<compile_context>
chip_gen: v7x
topology: tpu7x:2x2x1
jax: 0.10.0
libtpu: 0.0.40
codegen_flags: <defaults>
</compile_context>

<pallas_src>
import functools

import jax
import jax.numpy as jnp
from jax.experimental import pallas as pl
from jax.experimental.pallas import tpu as pltpu


def _round_up(v, m):
    return ((v + m - 1) // m) * m


# ----------------------------------------------------------------------------
# Kernel 1: fused (im2col-matmul + folded BN/bias shift + LeakyReLU)
# ----------------------------------------------------------------------------
def _conv_kernel(x_ref, w_ref, shift_ref, o_ref):
    z = jnp.dot(x_ref[...], w_ref[...], preferred_element_type=jnp.float32)
    z = z + shift_ref[...]
    # nn.LeakyReLU default negative_slope = 0.01
    o_ref[...] = jnp.where(z >= 0.0, z, 0.01 * z).astype(o_ref.dtype)


def conv_block(cols, w, shift, tm):
    """cols: (M, K) bf16, w: (K, N) bf16 (BN scale pre-folded), shift: (1, N) f32."""
    M, K = cols.shape
    N = w.shape[1]
    if M % tm != 0:
        tm = M
    return pl.pallas_call(
        _conv_kernel,
        out_shape=jax.ShapeDtypeStruct((M, N), jnp.bfloat16),
        grid_spec=pltpu.PrefetchScalarGridSpec(
            num_scalar_prefetch=0,
            grid=(M // tm,),
            in_specs=[
                pl.BlockSpec((tm, K), lambda i: (i, 0)),   # activation tile
                pl.BlockSpec((K, N), lambda i: (0, 0)),    # full weight (bf16)
                pl.BlockSpec((1, N), lambda i: (0, 0)),    # BN shift (+bias), f32
            ],
            out_specs=pl.BlockSpec((tm, N), lambda i: (i, 0)),
        ),
        compiler_params=pltpu.CompilerParams(
            dimension_semantics=("parallel",)),
    )(cols, w, shift)


# ----------------------------------------------------------------------------
# Kernel 2: conv4 (5x5 + BN + LeakyReLU) fused with the 1x1 conv (+ LeakyReLU,
#           Dropout = identity in eval mode).  The (B,8,8,128) activation stays
#           entirely in VMEM.
# ----------------------------------------------------------------------------
def _conv45_kernel(x_ref, w4_ref, shift4_ref, w16_ref, b16_ref, o_ref):
    z = jnp.dot(x_ref[...], w4_ref[...], preferred_element_type=jnp.float32)
    z = z + shift4_ref[...]
    z = jnp.where(z >= 0.0, z, 0.01 * z)                       # LeakyReLU (conv4)
    z = jnp.dot(z.astype(jnp.bfloat16), w16_ref[...],
                preferred_element_type=jnp.float32) + b16_ref[...]
    # LeakyReLU after the 1x1 conv; Dropout is the identity in eval mode.
    o_ref[...] = jnp.where(z >= 0.0, z, 0.01 * z).astype(o_ref.dtype)


def conv45_block(cols, w4, shift4, w16, b16, tm):
    M, K = cols.shape
    N4 = w4.shape[1]
    N5 = w16.shape[1]
    if M % tm != 0:
        tm = M
    return pl.pallas_call(
        _conv45_kernel,
        out_shape=jax.ShapeDtypeStruct((M, N5), jnp.bfloat16),
        grid_spec=pltpu.PrefetchScalarGridSpec(
            num_scalar_prefetch=0,
            grid=(M // tm,),
            in_specs=[
                pl.BlockSpec((tm, K), lambda i: (i, 0)),
                pl.BlockSpec((K, N4), lambda i: (0, 0)),
                pl.BlockSpec((1, N4), lambda i: (0, 0)),
                pl.BlockSpec((N4, N5), lambda i: (0, 0)),
                pl.BlockSpec((1, N5), lambda i: (0, 0)),
            ],
            out_specs=pl.BlockSpec((tm, N5), lambda i: (i, 0)),
        ),
        compiler_params=pltpu.CompilerParams(
            dimension_semantics=("parallel",)),
    )(cols, w4, shift4, w16, b16)


# ----------------------------------------------------------------------------
# Kernel 3: VAE head.  final_layer (pure Linear) is already folded into the
# concatenated [fc_mu | fc_var] weight, so this is one small matmul + reparam.
# ----------------------------------------------------------------------------
def _head_kernel(h_ref, wmuv_ref, bmuv_ref, eps_ref,
                 z_ref, mu_ref, lv_ref, *, latent_dim, half):
    muv = jnp.dot(h_ref[...], wmuv_ref[...],
                  preferred_element_type=jnp.float32) + bmuv_ref[...]
    mu = muv[:, :latent_dim]                  # lanes [0, latent)
    log_var = muv[:, half:half + latent_dim]  # lanes [half, half+latent)
    mu_ref[...] = mu
    lv_ref[...] = log_var
    z_ref[...] = mu + jnp.exp(0.5 * log_var) * eps_ref[...]


def vae_head(h, wmuv, bmuv, eps):
    B, latent_dim = eps.shape
    half = wmuv.shape[1] // 2
    out_sds = jax.ShapeDtypeStruct((B, latent_dim), jnp.float32)
    vmem = pl.BlockSpec(memory_space=pltpu.MemorySpace.VMEM)
    # Kept gridless: the head is pure weight-DMA (~0.5 MiB); a per-batch grid for
    # v7x's 2 TCs would duplicate that DMA per core for no net gain.
    return pl.pallas_call(
        functools.partial(_head_kernel, latent_dim=latent_dim, half=half),
        out_shape=(out_sds, out_sds, out_sds),
        in_specs=[vmem] * 4,
        out_specs=(vmem, vmem, vmem),
    )(h, wmuv, bmuv, eps)


# ----------------------------------------------------------------------------
# Glue: im2col patch extraction (XLA-side layout plumbing, bf16, no hot compute)
# ----------------------------------------------------------------------------
def im2col(x, k, stride, pad, k_pad_to):
    """x: (B, H, W, C) -> ((B*Ho*Wo, K_pad), Ho, Wo); feature order (kh, kw, c)."""
    if pad > 0:
        x = jnp.pad(x, ((0, 0), (pad, pad), (pad, pad), (0, 0)))
    B, Hp, Wp, C = x.shape
    Ho = (Hp - k) // stride + 1
    Wo = (Wp - k) // stride + 1
    patches = []
    for i in range(k):
        for j in range(k):
            patches.append(x[:, i:i + stride * Ho:stride,
                              j:j + stride * Wo:stride, :])
    kk = k * k * C
    if k_pad_to > kk:
        patches.append(jnp.zeros((B, Ho, Wo, k_pad_to - kk), x.dtype))
        kk = k_pad_to
    cols = jnp.concatenate(patches, axis=-1)            # (B, Ho, Wo, K_pad)
    return cols.reshape(B * Ho * Wo, kk), Ho, Wo


# ----------------------------------------------------------------------------
# Deterministic parameter initialization (shapes follow Encoder.__init__)
# ----------------------------------------------------------------------------
_FILTERS = (32, 64, 128, 128)
_GROUPS = (4, 2, 1, 1)        # output pixels packed per matmul row (g*N == 128)


def init_params(key, in_channels, latent_dim):
    keys = iter(jax.random.split(key, 64))
    conv_w, conv_shift = [], []
    cin = in_channels
    for f, g in zip(_FILTERS, _GROUPS):
        fan_in = cin * 25
        bound = 1.0 / float(fan_in) ** 0.5
        w = jax.random.uniform(next(keys), (5, 5, cin, f),
                               minval=-bound, maxval=bound, dtype=jnp.float32)
        b = jax.random.uniform(next(keys), (f,),
                               minval=-bound, maxval=bound, dtype=jnp.float32)
        gamma = 1.0 + 0.1 * jax.random.normal(next(keys), (f,), jnp.float32)
        beta = 0.1 * jax.random.normal(next(keys), (f,), jnp.float32)
        r_mean = 0.1 * jax.random.normal(next(keys), (f,), jnp.float32)
        r_var = 1.0 + 0.1 * jnp.abs(jax.random.normal(next(keys), (f,),
                                                      jnp.float32))
        # Eval-mode BatchNorm: fold scale into the conv weight (f32), keep shift.
        s = gamma / jnp.sqrt(r_var + 1e-5)
        t = (b - r_mean) * s + beta
        w2 = (w * s).reshape(25 * cin, f)      # rows in (kh, kw, cin) order
        kp = _round_up(25 * cin, 128)
        if kp > w2.shape[0]:                   # zero rows match the padded cols
            w2 = jnp.pad(w2, ((0, kp - w2.shape[0]), (0, 0)))
        # Pack g output pixels per matmul row: block-diagonal weight so the
        # output tile is a lane-dense (tm, g*f == 128) slab.
        w_blk = jnp.kron(jnp.eye(g, dtype=jnp.float32), w2)     # (g*kp, g*f)
        conv_w.append(w_blk.astype(jnp.bfloat16))
        conv_shift.append(jnp.tile(t.reshape(1, f), (1, g)))     # (1, g*f) f32
        cin = f

    # final 1x1 conv -> 16 channels (+ LeakyReLU + Dropout = identity in eval)
    bound = 1.0 / float(cin) ** 0.5
    w16 = jax.random.uniform(next(keys), (cin, 16),
                             minval=-bound, maxval=bound, dtype=jnp.float32)
    b16 = jax.random.uniform(next(keys), (1, 16),
                             minval=-bound, maxval=bound, dtype=jnp.float32)

    def linear(kk, din, dout):
        bound = 1.0 / float(din) ** 0.5
        k1, k2 = jax.random.split(kk)
        w = jax.random.uniform(k1, (din, dout), minval=-bound, maxval=bound,
                               dtype=jnp.float32)
        b = jax.random.uniform(k2, (dout,), minval=-bound, maxval=bound,
                               dtype=jnp.float32)
        return w, b

    wf, bf = linear(next(keys), 1024, 1024)
    # torch.flatten on NCHW is channel-major; we flatten the NHWC conv output
    # instead and absorb the permutation into the rows of the Linear weight:
    # row (s*16 + c) of the permuted weight == row (c*64 + s) of the original.
    n_ch, n_sp = 16, 64
    wf = wf.reshape(n_ch, n_sp, 1024).transpose(1, 0, 2).reshape(1024, 1024)

    wmu, bmu = linear(next(keys), 1024, latent_dim)
    wv, bv = linear(next(keys), 1024, latent_dim)
    # final_layer is a bare Linear (no nonlinearity) -> fold it into fc_mu/fc_var
    # in f32:  mu = h @ (wf @ wmu) + (bf @ wmu + bmu), same for log_var.
    wmu_eff = wf @ wmu
    wv_eff = wf @ wv
    bmu_eff = bf @ wmu + bmu
    bv_eff = bf @ wv + bv
    # Concatenate into one lane-padded weight: mu occupies lanes [0, latent),
    # log_var occupies lanes [half, half + latent).
    half = _round_up(latent_dim, 128)
    wmuv = jnp.zeros((1024, 2 * half), jnp.float32)
    wmuv = wmuv.at[:, :latent_dim].set(wmu_eff)
    wmuv = wmuv.at[:, half:half + latent_dim].set(wv_eff)
    bmuv = jnp.zeros((1, 2 * half), jnp.float32)
    bmuv = bmuv.at[:, :latent_dim].set(bmu_eff)
    bmuv = bmuv.at[:, half:half + latent_dim].set(bv_eff)

    return dict(
        conv_w=conv_w, conv_shift=conv_shift,
        w16=w16.astype(jnp.bfloat16), b16=b16,
        wmuv=wmuv.astype(jnp.bfloat16), bmuv=bmuv,
    )


# ----------------------------------------------------------------------------
# Forward pass (equivalent to Encoder.forward, eval mode)
# ----------------------------------------------------------------------------
# Grouped row counts per conv layer: 2048 / 1024 / 512 / 128 -> 2 grid steps each
# (one per v7x TensorCore; only ~0.35us extra on single-TC v5e/v6e).
_CONV_TM = (1024, 512, 256, 64)


def encoder_forward(x_nchw, params, eps):
    x = jnp.transpose(x_nchw, (0, 2, 3, 1)).astype(jnp.bfloat16)  # NCHW -> NHWC
    B = x.shape[0]
    # conv blocks 1-3: Conv2d(5, stride=2, pad=2) + BN + LeakyReLU
    for li in range(3):
        cin = x.shape[-1]
        kp = _round_up(25 * cin, 128)
        cols, Ho, Wo = im2col(x, 5, 2, 2, kp)
        g = _GROUPS[li]
        cols_g = cols.reshape(cols.shape[0] // g, g * kp)   # pack g pixels / row
        y = conv_block(cols_g, params["conv_w"][li], params["conv_shift"][li],
                       _CONV_TM[li])
        # (M/g, g*N) row-major bytes == (M, N) row-major bytes -> free reshape.
        x = y.reshape(B, Ho, Wo, _FILTERS[li])
    # conv block 4 + final 1x1 conv fused into a single kernel
    kp = 25 * x.shape[-1]                                    # 3200, lane aligned
    cols, Ho, Wo = im2col(x, 5, 2, 2, kp)
    y16 = conv45_block(cols, params["conv_w"][3], params["conv_shift"][3],
                       params["w16"], params["b16"], _CONV_TM[3])
    # HWC-major flatten; the matching permutation is baked into the head weight.
    h = y16.reshape(B, Ho * Wo * y16.shape[-1])              # (B, 1024)
    z, mu, log_var = vae_head(h, params["wmuv"], params["bmuv"], eps)
    return [z, mu, log_var]


if __name__ == "__main__":
    key = jax.random.PRNGKey(0)
    # Linear(1024, ...) forces 16 channels * 8 * 8 after four stride-2 convs,
    # i.e. a 128x128 spatial input.  Keep batch / channels small.
    B, C, H, W = 2, 3, 128, 128
    latent_dim = 32
    dropout_rate = 0.1  # stored but identity in eval mode

    kx, kp_, keps = jax.random.split(key, 3)
    x = jax.random.normal(kx, (B, C, H, W), dtype=jnp.float32)
    params = init_params(kp_, C, latent_dim)
    eps = jax.random.normal(keps, (B, latent_dim), dtype=jnp.float32)

    fwd = jax.jit(encoder_forward)
    z, mu, log_var = fwd(x, params, eps)
    jax.block_until_ready((z, mu, log_var))
    assert z.shape == (B, latent_dim)
    assert mu.shape == (B, latent_dim)
    assert log_var.shape == (B, latent_dim)
    assert bool(jnp.all(jnp.isfinite(z)))
    assert bool(jnp.all(jnp.isfinite(mu)))
    assert bool(jnp.all(jnp.isfinite(log_var)))
    print("KERNEL_OK")
</pallas_src>

<mosaic_0001>
module attributes {stable_mosaic.version = 11 : i64} {
  func.func @_conv_kernel(%arg0: i32, %arg1: memref<1024x512xbf16, #tpu.memory_space<vmem>>, %arg2: memref<512x128xbf16, #tpu.memory_space<vmem>>, %arg3: memref<1x128xf32, #tpu.memory_space<vmem>>, %arg4: memref<1024x128xbf16, #tpu.memory_space<vmem>>) attributes {dimension_semantics = [#tpu.dimension_semantics<parallel>], iteration_bounds = array<i64: 2>, scalar_prefetch = 0 : i64, scratch_operands = 0 : i64, tpu.core_type = #tpu.core_type<tc>, window_params = [{transform_indices = @transform_0, window_bounds = array<i64: 1024, 512>}, {pipeline_mode = #tpu.pipeline_mode<synchronous>, transform_indices = @transform_1, window_bounds = array<i64: 512, 128>}, {pipeline_mode = #tpu.pipeline_mode<synchronous>, transform_indices = @transform_2, window_bounds = array<i64: 1, 128>}, {transform_indices = @transform_3, window_bounds = array<i64: 1024, 128>}]} {
    %c0 = arith.constant 0 : index
    %c0_0 = arith.constant 0 : index
    %0 = vector.load %arg1[%c0, %c0_0] : memref<1024x512xbf16, #tpu.memory_space<vmem>>, vector<1024x512xbf16>
    %c0_1 = arith.constant 0 : index
    %c0_2 = arith.constant 0 : index
    %1 = vector.load %arg2[%c0_1, %c0_2] : memref<512x128xbf16, #tpu.memory_space<vmem>>, vector<512x128xbf16>
    %cst = arith.constant dense<0.000000e+00> : vector<1024x128xf32>
    %2 = tpu.matmul %0, %1, %cst {dimension_numbers = #tpu.dot_dimension_numbers<[1], [0], [0], [1], [0, 0, 1, 1], [], []>} : vector<1024x512xbf16>, vector<512x128xbf16>, vector<1024x128xf32> -> vector<1024x128xf32>
    %c0_3 = arith.constant 0 : index
    %c0_4 = arith.constant 0 : index
    %3 = vector.load %arg3[%c0_3, %c0_4] : memref<1x128xf32, #tpu.memory_space<vmem>>, vector<1x128xf32>
    %4 = vector.broadcast %3 : vector<1x128xf32> to vector<1024x128xf32>
    %5 = arith.addf %2, %4 : vector<1024x128xf32>
    %cst_5 = arith.constant 0.000000e+00 : f32
    %6 = vector.broadcast %cst_5 : f32 to vector<1024x128xf32>
    %7 = arith.cmpf oge, %5, %6 : vector<1024x128xf32>
    %cst_6 = arith.constant 0.00999999977 : f32
    %8 = vector.broadcast %cst_6 : f32 to vector<1024x128xf32>
    %9 = arith.mulf %8, %5 : vector<1024x128xf32>
    %10 = arith.select %7, %5, %9 : vector<1024x128xi1>, vector<1024x128xf32>
    %11 = arith.truncf %10 : vector<1024x128xf32> to vector<1024x128xbf16>
    %c0_7 = arith.constant 0 : index
    %c0_8 = arith.constant 0 : index
    %12 = vector.load %arg4[%c0_7, %c0_8] : memref<1024x128xbf16, #tpu.memory_space<vmem>>, vector<1024x128xbf16>
    tpu.vector_store %arg4[%c0_7, %c0_8], %11 {strides = array<i32>} : memref<1024x128xbf16, #tpu.memory_space<vmem>>, vector<1024x128xbf16>,
    return
  }
  func.func @transform_0(%arg0: i32) -> (i32, i32) {
    %c0_i32 = arith.constant 0 : i32
    %c0_i32_0 = arith.constant 0 : i32
    return %arg0, %c0_i32 : i32, i32
  }
  func.func @transform_1(%arg0: i32) -> (i32, i32) {
    %c0_i32 = arith.constant 0 : i32
    %c0_i32_0 = arith.constant 0 : i32
    %c0_i32_1 = arith.constant 0 : i32
    return %c0_i32, %c0_i32_0 : i32, i32
  }
  func.func @transform_2(%arg0: i32) -> (i32, i32) {
    %c0_i32 = arith.constant 0 : i32
    %c0_i32_0 = arith.constant 0 : i32
    %c0_i32_1 = arith.constant 0 : i32
    return %c0_i32, %c0_i32_0 : i32, i32
  }
  func.func @transform_3(%arg0: i32) -> (i32, i32) {
    %c0_i32 = arith.constant 0 : i32
    %c0_i32_0 = arith.constant 0 : i32
    return %arg0, %c0_i32 : i32, i32
  }
}

module attributes {stable_mosaic.version = 11 : i64} {
  func.func @_conv_kernel(%arg0: i32, %arg1: memref<512x1792xbf16, #tpu.memory_space<vmem>>, %arg2: memref<1792x128xbf16, #tpu.memory_space<vmem>>, %arg3: memref<1x128xf32, #tpu.memory_space<vmem>>, %arg4: memref<512x128xbf16, #tpu.memory_space<vmem>>) attributes {dimension_semantics = [#tpu.dimension_semantics<parallel>], iteration_bounds = array<i64: 2>, scalar_prefetch = 0 : i64, scratch_operands = 0 : i64, tpu.core_type = #tpu.core_type<tc>, window_params = [{transform_indices = @transform_0, window_bounds = array<i64: 512, 1792>}, {pipeline_mode = #tpu.pipeline_mode<synchronous>, transform_indices = @transform_1, window_bounds = array<i64: 1792, 128>}, {pipeline_mode = #tpu.pipeline_mode<synchronous>, transform_indices = @transform_2, window_bounds = array<i64: 1, 128>}, {transform_indices = @transform_3, window_bounds = array<i64: 512, 128>}]} {
    %c0 = arith.constant 0 : index
    %c0_0 = arith.constant 0 : index
    %0 = vector.load %arg1[%c0, %c0_0] : memref<512x1792xbf16, #tpu.memory_space<vmem>>, vector<512x1792xbf16>
    %c0_1 = arith.constant 0 : index
    %c0_2 = arith.constant 0 : index
    %1 = vector.load %arg2[%c0_1, %c0_2] : memref<1792x128xbf16, #tpu.memory_space<vmem>>, vector<1792x128xbf16>
    %cst = arith.constant dense<0.000000e+00> : vector<512x128xf32>
    %2 = tpu.matmul %0, %1, %cst {dimension_numbers = #tpu.dot_dimension_numbers<[1], [0], [0], [1], [0, 0, 1, 1], [], []>} : vector<512x1792xbf16>, vector<1792x128xbf16>, vector<512x128xf32> -> vector<512x128xf32>
    %c0_3 = arith.constant 0 : index
    %c0_4 = arith.constant 0 : index
    %3 = vector.load %arg3[%c0_3, %c0_4] : memref<1x128xf32, #tpu.memory_space<vmem>>, vector<1x128xf32>
    %4 = vector.broadcast %3 : vector<1x128xf32> to vector<512x128xf32>
    %5 = arith.addf %2, %4 : vector<512x128xf32>
    %cst_5 = arith.constant 0.000000e+00 : f32
    %6 = vector.broadcast %cst_5 : f32 to vector<512x128xf32>
    %7 = arith.cmpf oge, %5, %6 : vector<512x128xf32>
    %cst_6 = arith.constant 0.00999999977 : f32
    %8 = vector.broadcast %cst_6 : f32 to vector<512x128xf32>
    %9 = arith.mulf %8, %5 : vector<512x128xf32>
    %10 = arith.select %7, %5, %9 : vector<512x128xi1>, vector<512x128xf32>
    %11 = arith.truncf %10 : vector<512x128xf32> to vector<512x128xbf16>
    %c0_7 = arith.constant 0 : index
    %c0_8 = arith.constant 0 : index
    %12 = vector.load %arg4[%c0_7, %c0_8] : memref<512x128xbf16, #tpu.memory_space<vmem>>, vector<512x128xbf16>
    tpu.vector_store %arg4[%c0_7, %c0_8], %11 {strides = array<i32>} : memref<512x128xbf16, #tpu.memory_space<vmem>>, vector<512x128xbf16>,
    return
  }
  func.func @transform_0(%arg0: i32) -> (i32, i32) {
    %c0_i32 = arith.constant 0 : i32
    %c0_i32_0 = arith.constant 0 : i32
    return %arg0, %c0_i32 : i32, i32
  }
  func.func @transform_1(%arg0: i32) -> (i32, i32) {
    %c0_i32 = arith.constant 0 : i32
    %c0_i32_0 = arith.constant 0 : i32
    %c0_i32_1 = arith.constant 0 : i32
    return %c0_i32, %c0_i32_0 : i32, i32
  }
  func.func @transform_2(%arg0: i32) -> (i32, i32) {
    %c0_i32 = arith.constant 0 : i32
    %c0_i32_0 = arith.constant 0 : i32
    %c0_i32_1 = arith.constant 0 : i32
    return %c0_i32, %c0_i32_0 : i32, i32
  }
  func.func @transform_3(%arg0: i32) -> (i32, i32) {
    %c0_i32 = arith.constant 0 : i32
    %c0_i32_0 = arith.constant 0 : i32
    return %arg0, %c0_i32 : i32, i32
  }
}

module attributes {stable_mosaic.version = 11 : i64} {
  func.func @_conv_kernel(%arg0: i32, %arg1: memref<256x1664xbf16, #tpu.memory_space<vmem>>, %arg2: memref<1664x128xbf16, #tpu.memory_space<vmem>>, %arg3: memref<1x128xf32, #tpu.memory_space<vmem>>, %arg4: memref<256x128xbf16, #tpu.memory_space<vmem>>) attributes {dimension_semantics = [#tpu.dimension_semantics<parallel>], iteration_bounds = array<i64: 2>, scalar_prefetch = 0 : i64, scratch_operands = 0 : i64, tpu.core_type = #tpu.core_type<tc>, window_params = [{transform_indices = @transform_0, window_bounds = array<i64: 256, 1664>}, {pipeline_mode = #tpu.pipeline_mode<synchronous>, transform_indices = @transform_1, window_bounds = array<i64: 1664, 128>}, {pipeline_mode = #tpu.pipeline_mode<synchronous>, transform_indices = @transform_2, window_bounds = array<i64: 1, 128>}, {transform_indices = @transform_3, window_bounds = array<i64: 256, 128>}]} {
    %c0 = arith.constant 0 : index
    %c0_0 = arith.constant 0 : index
    %0 = vector.load %arg1[%c0, %c0_0] : memref<256x1664xbf16, #tpu.memory_space<vmem>>, vector<256x1664xbf16>
    %c0_1 = arith.constant 0 : index
    %c0_2 = arith.constant 0 : index
    %1 = vector.load %arg2[%c0_1, %c0_2] : memref<1664x128xbf16, #tpu.memory_space<vmem>>, vector<1664x128xbf16>
    %cst = arith.constant dense<0.000000e+00> : vector<256x128xf32>
    %2 = tpu.matmul %0, %1, %cst {dimension_numbers = #tpu.dot_dimension_numbers<[1], [0], [0], [1], [0, 0, 1, 1], [], []>} : vector<256x1664xbf16>, vector<1664x128xbf16>, vector<256x128xf32> -> vector<256x128xf32>
    %c0_3 = arith.constant 0 : index
    %c0_4 = arith.constant 0 : index
    %3 = vector.load %arg3[%c0_3, %c0_4] : memref<1x128xf32, #tpu.memory_space<vmem>>, vector<1x128xf32>
    %4 = vector.broadcast %3 : vector<1x128xf32> to vector<256x128xf32>
    %5 = arith.addf %2, %4 : vector<256x128xf32>
    %cst_5 = arith.constant 0.000000e+00 : f32
    %6 = vector.broadcast %cst_5 : f32 to vector<256x128xf32>
    %7 = arith.cmpf oge, %5, %6 : vector<256x128xf32>
    %cst_6 = arith.constant 0.00999999977 : f32
    %8 = vector.broadcast %cst_6 : f32 to vector<256x128xf32>
    %9 = arith.mulf %8, %5 : vector<256x128xf32>
    %10 = arith.select %7, %5, %9 : vector<256x128xi1>, vector<256x128xf32>
    %11 = arith.truncf %10 : vector<256x128xf32> to vector<256x128xbf16>
    %c0_7 = arith.constant 0 : index
    %c0_8 = arith.constant 0 : index
    %12 = vector.load %arg4[%c0_7, %c0_8] : memref<256x128xbf16, #tpu.memory_space<vmem>>, vector<256x128xbf16>
    tpu.vector_store %arg4[%c0_7, %c0_8], %11 {strides = array<i32>} : memref<256x128xbf16, #tpu.memory_space<vmem>>, vector<256x128xbf16>,
    return
  }
  func.func @transform_0(%arg0: i32) -> (i32, i32) {
    %c0_i32 = arith.constant 0 : i32
    %c0_i32_0 = arith.constant 0 : i32
    return %arg0, %c0_i32 : i32, i32
  }
  func.func @transform_1(%arg0: i32) -> (i32, i32) {
    %c0_i32 = arith.constant 0 : i32
    %c0_i32_0 = arith.constant 0 : i32
    %c0_i32_1 = arith.constant 0 : i32
    return %c0_i32, %c0_i32_0 : i32, i32
  }
  func.func @transform_2(%arg0: i32) -> (i32, i32) {
    %c0_i32 = arith.constant 0 : i32
    %c0_i32_0 = arith.constant 0 : i32
    %c0_i32_1 = arith.constant 0 : i32
    return %c0_i32, %c0_i32_0 : i32, i32
  }
  func.func @transform_3(%arg0: i32) -> (i32, i32) {
    %c0_i32 = arith.constant 0 : i32
    %c0_i32_0 = arith.constant 0 : i32
    return %arg0, %c0_i32 : i32, i32
  }
}

module attributes {stable_mosaic.version = 11 : i64} {
  func.func @_conv45_kernel(%arg0: i32, %arg1: memref<64x3200xbf16, #tpu.memory_space<vmem>>, %arg2: memref<3200x128xbf16, #tpu.memory_space<vmem>>, %arg3: memref<1x128xf32, #tpu.memory_space<vmem>>, %arg4: memref<128x16xbf16, #tpu.memory_space<vmem>>, %arg5: memref<1x16xf32, #tpu.memory_space<vmem>>, %arg6: memref<64x16xbf16, #tpu.memory_space<vmem>>) attributes {dimension_semantics = [#tpu.dimension_semantics<parallel>], iteration_bounds = array<i64: 2>, scalar_prefetch = 0 : i64, scratch_operands = 0 : i64, tpu.core_type = #tpu.core_type<tc>, window_params = [{transform_indices = @transform_0, window_bounds = array<i64: 64, 3200>}, {pipeline_mode = #tpu.pipeline_mode<synchronous>, transform_indices = @transform_1, window_bounds = array<i64: 3200, 128>}, {pipeline_mode = #tpu.pipeline_mode<synchronous>, transform_indices = @transform_2, window_bounds = array<i64: 1, 128>}, {pipeline_mode = #tpu.pipeline_mode<synchronous>, transform_indices = @transform_3, window_bounds = array<i64: 128, 16>}, {pipeline_mode = #tpu.pipeline_mode<synchronous>, transform_indices = @transform_4, window_bounds = array<i64: 1, 16>}, {transform_indices = @transform_5, window_bounds = array<i64: 64, 16>}]} {
    %c0 = arith.constant 0 : index
    %c0_0 = arith.constant 0 : index
    %0 = vector.load %arg1[%c0, %c0_0] : memref<64x3200xbf16, #tpu.memory_space<vmem>>, vector<64x3200xbf16>
    %c0_1 = arith.constant 0 : index
    %c0_2 = arith.constant 0 : index
    %1 = vector.load %arg2[%c0_1, %c0_2] : memref<3200x128xbf16, #tpu.memory_space<vmem>>, vector<3200x128xbf16>
    %cst = arith.constant dense<0.000000e+00> : vector<64x128xf32>
    %2 = tpu.matmul %0, %1, %cst {dimension_numbers = #tpu.dot_dimension_numbers<[1], [0], [0], [1], [0, 0, 1, 1], [], []>} : vector<64x3200xbf16>, vector<3200x128xbf16>, vector<64x128xf32> -> vector<64x128xf32>
    %c0_3 = arith.constant 0 : index
    %c0_4 = arith.constant 0 : index
    %3 = vector.load %arg3[%c0_3, %c0_4] : memref<1x128xf32, #tpu.memory_space<vmem>>, vector<1x128xf32>
    %4 = vector.broadcast %3 : vector<1x128xf32> to vector<64x128xf32>
    %5 = arith.addf %2, %4 : vector<64x128xf32>
    %cst_5 = arith.constant 0.000000e+00 : f32
    %6 = vector.broadcast %cst_5 : f32 to vector<64x128xf32>
    %7 = arith.cmpf oge, %5, %6 : vector<64x128xf32>
    %cst_6 = arith.constant 0.00999999977 : f32
    %8 = vector.broadcast %cst_6 : f32 to vector<64x128xf32>
    %9 = arith.mulf %8, %5 : vector<64x128xf32>
    %10 = arith.select %7, %5, %9 : vector<64x128xi1>, vector<64x128xf32>
    %11 = arith.truncf %10 : vector<64x128xf32> to vector<64x128xbf16>
    %c0_7 = arith.constant 0 : index
    %c0_8 = arith.constant 0 : index
    %12 = vector.load %arg4[%c0_7, %c0_8] : memref<128x16xbf16, #tpu.memory_space<vmem>>, vector<128x16xbf16>
    %cst_9 = arith.constant dense<0.000000e+00> : vector<64x16xf32>
    %13 = tpu.matmul %11, %12, %cst_9 {dimension_numbers = #tpu.dot_dimension_numbers<[1], [0], [0], [1], [0, 0, 1, 1], [], []>} : vector<64x128xbf16>, vector<128x16xbf16>, vector<64x16xf32> -> vector<64x16xf32>
    %c0_10 = arith.constant 0 : index
    %c0_11 = arith.constant 0 : index
    %14 = vector.load %arg5[%c0_10, %c0_11] : memref<1x16xf32, #tpu.memory_space<vmem>>, vector<1x16xf32>
    %15 = vector.broadcast %14 : vector<1x16xf32> to vector<64x16xf32>
    %16 = arith.addf %13, %15 : vector<64x16xf32>
    %cst_12 = arith.constant 0.000000e+00 : f32
    %17 = vector.broadcast %cst_12 : f32 to vector<64x16xf32>
    %18 = arith.cmpf oge, %16, %17 : vector<64x16xf32>
    %cst_13 = arith.constant 0.00999999977 : f32
    %19 = vector.broadcast %cst_13 : f32 to vector<64x16xf32>
    %20 = arith.mulf %19, %16 : vector<64x16xf32>
    %21 = arith.select %18, %16, %20 : vector<64x16xi1>, vector<64x16xf32>
    %22 = arith.truncf %21 : vector<64x16xf32> to vector<64x16xbf16>
    %c0_14 = arith.constant 0 : index
    %c0_15 = arith.constant 0 : index
    %23 = vector.load %arg6[%c0_14, %c0_15] : memref<64x16xbf16, #tpu.memory_space<vmem>>, vector<64x16xbf16>
    tpu.vector_store %arg6[%c0_14, %c0_15], %22 {strides = array<i32>} : memref<64x16xbf16, #tpu.memory_space<vmem>>, vector<64x16xbf16>,
    return
  }
  func.func @transform_0(%arg0: i32) -> (i32, i32) {
    %c0_i32 = arith.constant 0 : i32
    %c0_i32_0 = arith.constant 0 : i32
    return %arg0, %c0_i32 : i32, i32
  }
  func.func @transform_1(%arg0: i32) -> (i32, i32) {
    %c0_i32 = arith.constant 0 : i32
    %c0_i32_0 = arith.constant 0 : i32
    %c0_i32_1 = arith.constant 0 : i32
    return %c0_i32, %c0_i32_0 : i32, i32
  }
  func.func @transform_2(%arg0: i32) -> (i32, i32) {
    %c0_i32 = arith.constant 0 : i32
    %c0_i32_0 = arith.constant 0 : i32
    %c0_i32_1 = arith.constant 0 : i32
    return %c0_i32, %c0_i32_0 : i32, i32
  }
  func.func @transform_3(%arg0: i32) -> (i32, i32) {
    %c0_i32 = arith.constant 0 : i32
    %c0_i32_0 = arith.constant 0 : i32
    %c0_i32_1 = arith.constant 0 : i32
    return %c0_i32, %c0_i32_0 : i32, i32
  }
  func.func @transform_4(%arg0: i32) -> (i32, i32) {
    %c0_i32 = arith.constant 0 : i32
    %c0_i32_0 = arith.constant 0 : i32
    %c0_i32_1 = arith.constant 0 : i32
    return %c0_i32, %c0_i32_0 : i32, i32
  }
  func.func @transform_5(%arg0: i32) -> (i32, i32) {
    %c0_i32 = arith.constant 0 : i32
    %c0_i32_0 = arith.constant 0 : i32
    return %arg0, %c0_i32 : i32, i32
  }
}

module attributes {stable_mosaic.version = 11 : i64} {
  func.func @_head_kernel(%arg0: memref<2x1024xbf16, #tpu.memory_space<vmem>>, %arg1: memref<1024x256xbf16, #tpu.memory_space<vmem>>, %arg2: memref<1x256xf32, #tpu.memory_space<vmem>>, %arg3: memref<2x32xf32, #tpu.memory_space<vmem>>, %arg4: memref<2x32xf32, #tpu.memory_space<vmem>>, %arg5: memref<2x32xf32, #tpu.memory_space<vmem>>, %arg6: memref<2x32xf32, #tpu.memory_space<vmem>>) attributes {dimension_semantics = [], scalar_prefetch = 0 : i64, scratch_operands = 0 : i64, tpu.core_type = #tpu.core_type<tc>} {
    %c0 = arith.constant 0 : index
    %c0_0 = arith.constant 0 : index
    %0 = vector.load %arg0[%c0, %c0_0] : memref<2x1024xbf16, #tpu.memory_space<vmem>>, vector<2x1024xbf16>
    %c0_1 = arith.constant 0 : index
    %c0_2 = arith.constant 0 : index
    %1 = vector.load %arg1[%c0_1, %c0_2] : memref<1024x256xbf16, #tpu.memory_space<vmem>>, vector<1024x256xbf16>
    %cst = arith.constant dense<0.000000e+00> : vector<2x256xf32>
    %2 = tpu.matmul %0, %1, %cst {dimension_numbers = #tpu.dot_dimension_numbers<[1], [0], [0], [1], [0, 0, 1, 1], [], []>} : vector<2x1024xbf16>, vector<1024x256xbf16>, vector<2x256xf32> -> vector<2x256xf32>
    %c0_3 = arith.constant 0 : index
    %c0_4 = arith.constant 0 : index
    %3 = vector.load %arg2[%c0_3, %c0_4] : memref<1x256xf32, #tpu.memory_space<vmem>>, vector<1x256xf32>
    %4 = vector.broadcast %3 : vector<1x256xf32> to vector<2x256xf32>
    %5 = arith.addf %2, %4 : vector<2x256xf32>
    %6 = vector.extract_strided_slice %5 {offsets = [0, 0], sizes = [2, 32], strides = [1, 1]} : vector<2x256xf32> to vector<2x32xf32>
    %7 = vector.extract_strided_slice %5 {offsets = [0, 128], sizes = [2, 32], strides = [1, 1]} : vector<2x256xf32> to vector<2x32xf32>
    %c0_5 = arith.constant 0 : index
    %c0_6 = arith.constant 0 : index
    %8 = vector.load %arg5[%c0_5, %c0_6] : memref<2x32xf32, #tpu.memory_space<vmem>>, vector<2x32xf32>
    tpu.vector_store %arg5[%c0_5, %c0_6], %6 {strides = array<i32>} : memref<2x32xf32, #tpu.memory_space<vmem>>, vector<2x32xf32>,
    %c0_7 = arith.constant 0 : index
    %c0_8 = arith.constant 0 : index
    %9 = vector.load %arg6[%c0_7, %c0_8] : memref<2x32xf32, #tpu.memory_space<vmem>>, vector<2x32xf32>
    tpu.vector_store %arg6[%c0_7, %c0_8], %7 {strides = array<i32>} : memref<2x32xf32, #tpu.memory_space<vmem>>, vector<2x32xf32>,
    %cst_9 = arith.constant 5.000000e-01 : f32
    %10 = vector.broadcast %cst_9 : f32 to vector<2x32xf32>
    %11 = arith.mulf %10, %7 : vector<2x32xf32>
    %12 = math.exp %11 : vector<2x32xf32>
    %c0_10 = arith.constant 0 : index
    %c0_11 = arith.constant 0 : index
    %13 = vector.load %arg3[%c0_10, %c0_11] : memref<2x32xf32, #tpu.memory_space<vmem>>, vector<2x32xf32>
    %14 = arith.mulf %12, %13 : vector<2x32xf32>
    %15 = arith.addf %6, %14 : vector<2x32xf32>
    %c0_12 = arith.constant 0 : index
    %c0_13 = arith.constant 0 : index
    %16 = vector.load %arg4[%c0_12, %c0_13] : memref<2x32xf32, #tpu.memory_space<vmem>>, vector<2x32xf32>
    tpu.vector_store %arg4[%c0_12, %c0_13], %15 {strides = array<i32>} : memref<2x32xf32, #tpu.memory_space<vmem>>, vector<2x32xf32>,
    return
  }
}

</mosaic_0001>

<bundles_post_ra>
// kernel: encoder_forward.5
= control target key start
LH: loop header
LB: loop body
LE: loop exit
PB: predicated region body
PF: predicated region fallthrough
CT: control target
= control target key end

     0   :  { %s5801_s12 = smov 0   ;;  %s6420_s0 = inlined_call_operand.vmem [shape: bf16[2048,512], index: 0, kind: input, shape index: {}]   ;;  %s6421_s1 = inlined_call_operand.vmem [shape: bf16[512,128], index: 1, kind: input, shape index: {}]   ;;  %s6422_s2 = inlined_call_operand.vmem [shape: f32[1,128], index: 2, kind: input, shape index: {}]   ;;  %s6423_s3 = inlined_call_operand.vmem [shape: bf16[2048,128], index: 3, kind: output, shape index: {}]  }
   0x1 LB: > { %s4147_s13 = sadd.s32 4294967295, %s5778_s12   ;;  %p4151_p0 = scmp.ge.s32.totalorder %s5778_s12, 1  ;;  %s5778_s12 = sphi %s5801_s12, %s13_s12  }
   0x2   : > { %p139_p1 = scmp.lt.s32.totalorder %s5778_s12, 3 }
   0x4   : > { %p140_p2 = pnand %p4151_p0, %p139_p1 }
   0x5   : > { %v5353_v0 = vld [vmem:[%s6421_s1] sm:$0xff] (!%p140_p2)   ;;  %v5780_v1 = vmov (!%p140_p2), 0   ;;  %v5355_v3 = vld [vmem:[%s6421_s1 + $0x8] sm:$0xff] (!%p140_p2)   ;;  %v5357_v5 = vld [vmem:[%s6421_s1 + $0x10] sm:$0xff] (!%p140_p2)   ;;  %s4152_s7 = sshll.u32 (!%p140_p2), %s4147_s13, 7 }
   0x6   : > { %143 = sbr.rel (%p140_p2) target bundleno = 798 (0x31e), region = 32  ;;  %1977 = vmatprep.subr.bf16.mxu1 (!%p140_p2), %v5780_v1  ;;  %2522 = vmatprep.subr.bf16.mxu0 (!%p140_p2), %v5780_v1  ;;  %v5354_v2 = vld [vmem:[%s6421_s1 + $0x80] sm:$0xff] (!%p140_p2)   ;;  %v5356_v4 = vld [vmem:[%s6421_s1 + $0x88] sm:$0xff] (!%p140_p2)   ;;  %v5358_v6 = vld [vmem:[%s6421_s1 + $0x90] sm:$0xff] (!%p140_p2)   ;;  %p165_p3 = scmp.lt.s32.totalorder (!%p140_p2), %s4152_s7, 255 }
   0x7   : > { %1978 = vmatpush1.bf16.msra.mxu1 (!%p140_p2), %v5353_v0  ;;  %2523 = vmatpush1.bf16.msra.mxu0 (!%p140_p2), %v5354_v2  ;;  %v5359_v7 = vld [vmem:[%s6421_s1 + $0x18] sm:$0xff] (!%p140_p2)   ;;  %v5361_v9 = vld [vmem:[%s6421_s1 + $0x20] sm:$0xff] (!%p140_p2)   ;;  %v5363_v11 = vld [vmem:[%s6421_s1 + $0x28] sm:$0xff] (!%p140_p2)  }
   0x8   : > { %1979 = vmatprep.subr.bf16.mxu1 (!%p140_p2), %v5780_v1  ;;  %2524 = vmatprep.subr.bf16.mxu0 (!%p140_p2), %v5780_v1  ;;  %v5360_v8 = vld [vmem:[%s6421_s1 + $0x98] sm:$0xff] (!%p140_p2)   ;;  %v5362_v10 = vld [vmem:[%s6421_s1 + $0xa0] sm:$0xff] (!%p140_p2)   ;;  %v5364_v12 = vld [vmem:[%s6421_s1 + $0xa8] sm:$0xff] (!%p140_p2)  }
   0x9   : > { %v5365_v13 = vld [vmem:[%s6421_s1 + $0x30] sm:$0xff] (!%p140_p2)   ;;  %v5367_v15 = vld [vmem:[%s6421_s1 + $0x38] sm:$0xff] (!%p140_p2)   ;;  %v5369_v17 = vld [vmem:[%s6421_s1 + $0x40] sm:$0xff] (!%p140_p2)  }
   0xa   : > { %v5366_v14 = vld [vmem:[%s6421_s1 + $0xb0] sm:$0xff] (!%p140_p2)   ;;  %v5368_v16 = vld [vmem:[%s6421_s1 + $0xb8] sm:$0xff] (!%p140_p2)   ;;  %v5370_v18 = vld [vmem:[%s6421_s1 + $0xc0] sm:$0xff] (!%p140_p2)  }
   0xb   : > { %1980 = vmatpush1.bf16.msra.mxu1 (!%p140_p2), %v5355_v3  ;;  %2525 = vmatpush1.bf16.msra.mxu0 (!%p140_p2), %v5356_v4  ;;  %v5371_v20 = vld [vmem:[%s6421_s1 + $0x48] sm:$0xff] (!%p140_p2)   ;;  %v5373_v23 = vld [vmem:[%s6421_s1 + $0x50] sm:$0xff] (!%p140_p2)   ;;  %v5375_v25 = vld [vmem:[%s6421_s1 + $0x58] sm:$0xff] (!%p140_p2)  }
   0xc   : > { %1981 = vmatprep.subr.bf16.mxu1 (!%p140_p2), %v5780_v1  ;;  %2526 = vmatprep.subr.bf16.mxu0 (!%p140_p2), %v5780_v1  ;;  %v5372_v22 = vld [vmem:[%s6421_s1 + $0xc8] sm:$0xff] (!%p140_p2)   ;;  %v5374_v24 = vld [vmem:[%s6421_s1 + $0xd0] sm:$0xff] (!%p140_p2)   ;;  %v5376_v26 = vld [vmem:[%s6421_s1 + $0xd8] sm:$0xff] (!%p140_p2)  }
   0xd   : > { %s6425_s7 = smov (!%p165_p3, %s4152_s7), 255  ;;  %v5377_v27 = vld [vmem:[%s6421_s1 + $0x60] sm:$0xff]   ;;  %v5379_v29 = vld [vmem:[%s6421_s1 + $0x68] sm:$0xff]   ;;  %v5381_v31 = vld [vmem:[%s6421_s1 + $0x70] sm:$0xff]  }
   0xe   : > { %s4576_s21 = sshll.u32 %s6425_s7, 4  ;;  %v5378_v28 = vld [vmem:[%s6421_s1 + $0xe0] sm:$0xff]   ;;  %v5380_v30 = vld [vmem:[%s6421_s1 + $0xe8] sm:$0xff]   ;;  %v5382_v32 = vld [vmem:[%s6421_s1 + $0xf0] sm:$0xff]   ;;  %s4156_s9 = sshll.u32 %s6425_s7, 2 }
   0xf   : > { %1982 = vmatpush1.bf16.msra.mxu1 %v5357_v5  ;;  %2527 = vmatpush1.bf16.msra.mxu0 %v5358_v6  ;;  %s5884_s26 = scalar_lea.vmem %s6420_s0, %s4576_s21  ;;  %v5383_v33 = vld [vmem:[%s6421_s1 + $0x78] sm:$0xff]   ;;  %s6072_s14 = scalar_lea.vmem %s6423_s3, %s4156_s9 }
  0x10   : > { %1983 = vmatprep.subr.bf16.mxu1 %v5780_v1  ;;  %2528 = vmatprep.subr.bf16.mxu0 %v5780_v1  ;;  %v5387_v19 = vld [vmem:[%s5884_s26 + $0x4] ss:$16 sps:$4 sm:$0xff]   ;;  %v5390_v21 = vld [vmem:[%s5884_s26 + $0xc] ss:$16 sps:$4 sm:$0xff]   ;;  %v5385_v35 = vld [vmem:[%s5884_s26] ss:$16 sps:$4 sm:$0xff]  }
  0x11   : > { %2009 = vmatprep.mubr.bf16.mxu1 %v5387_v19  ;;  %2554 = vmatprep.mubr.bf16.mxu0 %v5390_v21  ;;  %v5384_v34 = vld [vmem:[%s6421_s1 + $0xf8] sm:$0xff]   ;;  %v5391_v37 = vld [vmem:[%s5884_s26 + $0x24] ss:$16 sps:$4 sm:$0xff]   ;;  %v5395_v39 = vld [vmem:[%s5884_s26 + $0x20] ss:$16 sps:$4 sm:$0xff]  }
  0x12   : > { %v5388_v36 = vld [vmem:[%s5884_s26 + $0x8] ss:$16 sps:$4 sm:$0xff]   ;;  %v5393_v38 = vld [vmem:[%s5884_s26 + $0x2c] ss:$16 sps:$4 sm:$0xff]   ;;  %v5397_v41 = vld [vmem:[%s5884_s26 + $0x44] ss:$16 sps:$4 sm:$0xff]  }
  0x13   : > { %1984 = vmatpush1.bf16.msra.mxu1 %v5359_v7  ;;  %2529 = vmatpush1.bf16.msra.mxu0 %v5360_v8  ;;  %v5396_v40 = vld [vmem:[%s5884_s26 + $0x28] ss:$16 sps:$4 sm:$0xff]   ;;  %v5399_v42 = vld [vmem:[%s5884_s26 + $0x4c] ss:$16 sps:$4 sm:$0xff]   ;;  %v5401_v43 = vld [vmem:[%s5884_s26 + $0x40] ss:$16 sps:$4 sm:$0xff]  }
  0x14   : > { %1985 = vmatprep.subr.bf16.mxu1 %v5780_v1  ;;  %2530 = vmatprep.subr.bf16.mxu0 %v5780_v1  ;;  %v5402_v44 = vld [vmem:[%s5884_s26 + $0x48] ss:$16 sps:$4 sm:$0xff]   ;;  %v5403_v45 = vld [vmem:[%s5884_s26 + $0x64] ss:$16 sps:$4 sm:$0xff]   ;;  %v5405_v46 = vld [vmem:[%s5884_s26 + $0x6c] ss:$16 sps:$4 sm:$0xff]  }
  0x15   : > { %v5407_v47 = vld [vmem:[%s5884_s26 + $0x60] ss:$16 sps:$4 sm:$0xff]   ;;  %v5408_v48 = vld [vmem:[%s5884_s26 + $0x68] ss:$16 sps:$4 sm:$0xff]   ;;  %v5409_v49 = vld [vmem:[%s5884_s26 + $0x84] ss:$16 sps:$4 sm:$0xff]  }
  0x16   : > { %v5411_v50 = vld [vmem:[%s5884_s26 + $0x8c] ss:$16 sps:$4 sm:$0xff]   ;;  %v5413_v51 = vld [vmem:[%s5884_s26 + $0x80] ss:$16 sps:$4 sm:$0xff]   ;;  %v5414_v52 = vld [vmem:[%s5884_s26 + $0x88] ss:$16 sps:$4 sm:$0xff]  }
  0x17   : > { %1986 = vmatpush1.bf16.msra.mxu1 %v5361_v9  ;;  %2531 = vmatpush1.bf16.msra.mxu0 %v5362_v10  ;;  %v5415_v53 = vld [vmem:[%s5884_s26 + $0xa4] ss:$16 sps:$4 sm:$0xff]   ;;  %v5417_v54 = vld [vmem:[%s5884_s26 + $0xac] ss:$16 sps:$4 sm:$0xff]   ;;  %v5419_v55 = vld [vmem:[%s5884_s26 + $0xa0] ss:$16 sps:$4 sm:$0xff]  }
  0x18   : > { %1987 = vmatprep.subr.bf16.mxu1 %v5780_v1  ;;  %2532 = vmatprep.subr.bf16.mxu0 %v5780_v1  ;;  %v5420_v56 = vld [vmem:[%s5884_s26 + $0xa8] ss:$16 sps:$4 sm:$0xff]   ;;  %v5421_v57 = vld [vmem:[%s5884_s26 + $0xc4] ss:$16 sps:$4 sm:$0xff]   ;;  %v5423_v58 = vld [vmem:[%s5884_s26 + $0xcc] ss:$16 sps:$4 sm:$0xff]  }
  0x19   : > { %v5425_v59 = vld [vmem:[%s5884_s26 + $0xc0] ss:$16 sps:$4 sm:$0xff]   ;;  %v5426_v60 = vld [vmem:[%s5884_s26 + $0xc8] ss:$16 sps:$4 sm:$0xff]   ;;  %v5427_v61 = vld [vmem:[%s5884_s26 + $0xe4] ss:$16 sps:$4 sm:$0xff]  }
  0x1a   : > { %v5429_v62 = vld [vmem:[%s5884_s26 + $0xec] ss:$16 sps:$4 sm:$0xff]   ;;  %v5431_v63 = vld [vmem:[%s5884_s26 + $0xe0] ss:$16 sps:$4 sm:$0xff]   ;;  %v5432_v0 = vld [vmem:[%s5884_s26 + $0xe8] ss:$16 sps:$4 sm:$0xff]  }
  0x1b   : > { %1988 = vmatpush1.bf16.msra.mxu1 %v5363_v11  ;;  %2533 = vmatpush1.bf16.msra.mxu0 %v5364_v12  ;;  %v5435_v2 = vld [vmem:[%s5884_s26 + $0x10c] ss:$16 sps:$4 sm:$0xff]   ;;  %v5437_v3 = vld [vmem:[%s5884_s26 + $0x100] ss:$16 sps:$4 sm:$0xff]   ;;  %v5438_v4 = vld [vmem:[%s5884_s26 + $0x108] ss:$16 sps:$4 sm:$0xff]  }
  0x1c   : > { %1989 = vmatprep.subr.bf16.mxu1 %v5780_v1  ;;  %2534 = vmatprep.subr.bf16.mxu0 %v5780_v1  ;;  %v5439_v5 = vld [vmem:[%s5884_s26 + $0x124] ss:$16 sps:$4 sm:$0xff]   ;;  %v5441_v6 = vld [vmem:[%s5884_s26 + $0x12c] ss:$16 sps:$4 sm:$0xff]   ;;  %v5443_v7 = vld [vmem:[%s5884_s26 + $0x120] ss:$16 sps:$4 sm:$0xff]  }
  0x1d   : > { %v5444_v8 = vld [vmem:[%s5884_s26 + $0x128] ss:$16 sps:$4 sm:$0xff]   ;;  %v5445_v9 = vld [vmem:[%s5884_s26 + $0x144] ss:$16 sps:$4 sm:$0xff]   ;;  %v5447_v10 = vld [vmem:[%s5884_s26 + $0x14c] ss:$16 sps:$4 sm:$0xff]  }
  0x1e   : > { %v5449_v11 = vld [vmem:[%s5884_s26 + $0x140] ss:$16 sps:$4 sm:$0xff]   ;;  %v5450_v12 = vld [vmem:[%s5884_s26 + $0x148] ss:$16 sps:$4 sm:$0xff]   ;;  %v5463_v21 = vld [vmem:[%s5884_s26 + $0x1a4] ss:$16 sps:$4 sm:$0xff]  }
  0x1f   : > { %1990 = vmatpush1.bf16.msra.mxu1 %v5365_v13  ;;  %2535 = vmatpush1.bf16.msra.mxu0 %v5366_v14  ;;  %v5451_v13 = vld [vmem:[%s5884_s26 + $0x164] ss:$16 sps:$4 sm:$0xff]   ;;  %v5453_v14 = vld [vmem:[%s5884_s26 + $0x16c] ss:$16 sps:$4 sm:$0xff]   ;;  %v5461_v19 = vld [vmem:[%s5884_s26 + $0x180] ss:$16 sps:$4 sm:$0xff]  }
  0x20   : > { %1991 = vmatprep.subr.bf16.mxu1 %v5780_v1  ;;  %2536 = vmatprep.subr.bf16.mxu0 %v5780_v1 }
  0x23   : > { %1992 = vmatpush1.bf16.msra.mxu1 %v5367_v15  ;;  %2537 = vmatpush1.bf16.msra.mxu0 %v5368_v16  ;;  %v5455_v15 = vld [vmem:[%s5884_s26 + $0x160] ss:$16 sps:$4 sm:$0xff]   ;;  %v5456_v16 = vld [vmem:[%s5884_s26 + $0x168] ss:$16 sps:$4 sm:$0xff]  }
  0x24   : > { %1993 = vmatprep.subr.bf16.mxu1 %v5780_v1  ;;  %2538 = vmatprep.subr.bf16.mxu0 %v5780_v1 }
  0x27   : > { %1994 = vmatpush1.bf16.msra.mxu1 %v5369_v17  ;;  %2539 = vmatpush1.bf16.msra.mxu0 %v5370_v18  ;;  %v5457_v17 = vld [vmem:[%s5884_s26 + $0x184] ss:$16 sps:$4 sm:$0xff]   ;;  %v5459_v18 = vld [vmem:[%s5884_s26 + $0x18c] ss:$16 sps:$4 sm:$0xff]  }
  0x28   : > { %1995 = vmatprep.subr.bf16.mxu1 %v5780_v1  ;;  %2540 = vmatprep.subr.bf16.mxu0 %v5780_v1 }
  0x2b   : > { %1996 = vmatpush1.bf16.msra.mxu1 %v5371_v20  ;;  %2541 = vmatpush1.bf16.msra.mxu0 %v5372_v22  ;;  %v5462_v20 = vld [vmem:[%s5884_s26 + $0x188] ss:$16 sps:$4 sm:$0xff]   ;;  %v5465_v22 = vld [vmem:[%s5884_s26 + $0x1ac] ss:$16 sps:$4 sm:$0xff]  }
  0x2c   : > { %1997 = vmatprep.subr.bf16.mxu1 %v5780_v1  ;;  %2542 = vmatprep.subr.bf16.mxu0 %v5780_v1 }
  0x2f   : > { %1998 = vmatpush1.bf16.msra.mxu1 %v5373_v23  ;;  %2543 = vmatpush1.bf16.msra.mxu0 %v5374_v24  ;;  %v5467_v23 = vld [vmem:[%s5884_s26 + $0x1a0] ss:$16 sps:$4 sm:$0xff]   ;;  %v5468_v24 = vld [vmem:[%s5884_s26 + $0x1a8] ss:$16 sps:$4 sm:$0xff]  }
  0x30   : > { %1999 = vmatprep.subr.bf16.mxu1 %v5780_v1  ;;  %2544 = vmatprep.subr.bf16.mxu0 %v5780_v1 }
  0x33   : > { %2000 = vmatpush1.bf16.msra.mxu1 %v5375_v25  ;;  %2545 = vmatpush1.bf16.msra.mxu0 %v5376_v26  ;;  %v5469_v25 = vld [vmem:[%s5884_s26 + $0x1c4] ss:$16 sps:$4 sm:$0xff]   ;;  %v5471_v26 = vld [vmem:[%s5884_s26 + $0x1cc] ss:$16 sps:$4 sm:$0xff]  }
  0x34   : > { %2001 = vmatprep.subr.bf16.mxu1 %v5780_v1  ;;  %2546 = vmatprep.subr.bf16.mxu0 %v5780_v1 }
  0x37   : > { %2002 = vmatpush1.bf16.msra.mxu1 %v5377_v27  ;;  %2547 = vmatpush1.bf16.msra.mxu0 %v5378_v28  ;;  %v5473_v27 = vld [vmem:[%s5884_s26 + $0x1c0] ss:$16 sps:$4 sm:$0xff]   ;;  %v5474_v28 = vld [vmem:[%s5884_s26 + $0x1c8] ss:$16 sps:$4 sm:$0xff]  }
  0x38   : > { %2003 = vmatprep.subr.bf16.mxu1 %v5780_v1  ;;  %2548 = vmatprep.subr.bf16.mxu0 %v5780_v1 }
  0x3b   : > { %2004 = vmatpush1.bf16.msra.mxu1 %v5379_v29  ;;  %2549 = vmatpush1.bf16.msra.mxu0 %v5380_v30  ;;  %v5475_v29 = vld [vmem:[%s5884_s26 + $0x1e4] ss:$16 sps:$4 sm:$0xff]   ;;  %v5477_v30 = vld [vmem:[%s5884_s26 + $0x1ec] ss:$16 sps:$4 sm:$0xff]  }
  0x3c   : > { %2005 = vmatprep.subr.bf16.mxu1 %v5780_v1  ;;  %2550 = vmatprep.subr.bf16.mxu0 %v5780_v1 }
  0x3f   : > { %2006 = vmatpush1.bf16.msra.mxu1 %v5381_v31  ;;  %2551 = vmatpush1.bf16.msra.mxu0 %v5382_v32  ;;  %v5479_v31 = vld [vmem:[%s5884_s26 + $0x1e0] ss:$16 sps:$4 sm:$0xff]   ;;  %v5480_v32 = vld [vmem:[%s5884_s26 + $0x1e8] ss:$16 sps:$4 sm:$0xff]  }
  0x40   : > { %2007 = vmatprep.subr.bf16.mxu1 %v5780_v1  ;;  %2552 = vmatprep.subr.bf16.mxu0 %v5780_v1  ;;  %v5433_v1 = vld [vmem:[%s5884_s26 + $0x104] ss:$16 sps:$4 sm:$0xff]  }
  0x43   : > { %2008 = vmatpush1.bf16.msra.mxu1 %v5383_v33  ;;  %2553 = vmatpush1.bf16.msra.mxu0 %v5384_v34  ;;  %v5481_v33 = vld [vmem:[%s5884_s26 + $0x204] ss:$16 sps:$4 sm:$0xff]   ;;  %v5483_v34 = vld [vmem:[%s5884_s26 + $0x20c] ss:$16 sps:$4 sm:$0xff]  }
  0x46   : > { %2010 = vmatmul.mubr.bf16.vlgmr.msra.gmra.mrb[0].mxu1 %v5385_v35  ;;  %2555 = vmatmul.mubr.bf16.vlgmr.msra.gmra.mrb[0].mxu0 %v5388_v36  ;;  %v5485_v35 = vld [vmem:[%s5884_s26 + $0x200] ss:$16 sps:$4 sm:$0xff]   ;;  %v5486_v36 = vld [vmem:[%s5884_s26 + $0x208] ss:$16 sps:$4 sm:$0xff]  }
  0x47   : > { %2017 = vmatprep.mubr.bf16.mxu1 %v5391_v37  ;;  %2562 = vmatprep.mubr.bf16.mxu0 %v5393_v38  ;;  %v5487_v37 = vld [vmem:[%s5884_s26 + $0x224] ss:$16 sps:$4 sm:$0xff]   ;;  %v5489_v38 = vld [vmem:[%s5884_s26 + $0x22c] ss:$16 sps:$4 sm:$0xff]  }
  0x4e   : > { %2018 = vmatmul.mubr.bf16.gmra.mrb[4].mxu1 %v5395_v39  ;;  %2563 = vmatmul.mubr.bf16.gmra.mrb[4].mxu0 %v5396_v40  ;;  %v5491_v39 = vld [vmem:[%s5884_s26 + $0x220] ss:$16 sps:$4 sm:$0xff]   ;;  %v5492_v40 = vld [vmem:[%s5884_s26 + $0x228] ss:$16 sps:$4 sm:$0xff]  }
  0x4f   : > { %2025 = vmatprep.mubr.bf16.mxu1 %v5397_v41  ;;  %2570 = vmatprep.mubr.bf16.mxu0 %v5399_v42  ;;  %v5493_v41 = vld [vmem:[%s5884_s26 + $0x244] ss:$16 sps:$4 sm:$0xff]   ;;  %v5495_v42 = vld [vmem:[%s5884_s26 + $0x24c] ss:$16 sps:$4 sm:$0xff]  }
  0x56   : > { %2026 = vmatmul.mubr.bf16.gmra.mrb[8].mxu1 %v5401_v43  ;;  %2571 = vmatmul.mubr.bf16.gmra.mrb[8].mxu0 %v5402_v44  ;;  %v5497_v43 = vld [vmem:[%s5884_s26 + $0x240] ss:$16 sps:$4 sm:$0xff]   ;;  %v5498_v44 = vld [vmem:[%s5884_s26 + $0x248] ss:$16 sps:$4 sm:$0xff]  }
  0x57   : > { %2033 = vmatprep.mubr.bf16.mxu1 %v5403_v45  ;;  %2578 = vmatprep.mubr.bf16.mxu0 %v5405_v46  ;;  %v5499_v45 = vld [vmem:[%s5884_s26 + $0x264] ss:$16 sps:$4 sm:$0xff]   ;;  %v5501_v46 = vld [vmem:[%s5884_s26 + $0x26c] ss:$16 sps:$4 sm:$0xff]  }
  0x5e   : > { %2034 = vmatmul.mubr.bf16.gmra.mrb[12].mxu1 %v5407_v47  ;;  %2579 = vmatmul.mubr.bf16.gmra.mrb[12].mxu0 %v5408_v48  ;;  %v5503_v47 = vld [vmem:[%s5884_s26 + $0x260] ss:$16 sps:$4 sm:$0xff]   ;;  %v5504_v48 = vld [vmem:[%s5884_s26 + $0x268] ss:$16 sps:$4 sm:$0xff]  }
  0x5f   : > { %2041 = vmatprep.mubr.bf16.mxu1 %v5409_v49  ;;  %2586 = vmatprep.mubr.bf16.mxu0 %v5411_v50  ;;  %v5505_v49 = vld [vmem:[%s5884_s26 + $0x284] ss:$16 sps:$4 sm:$0xff]   ;;  %v5507_v50 = vld [vmem:[%s5884_s26 + $0x28c] ss:$16 sps:$4 sm:$0xff]  }
  0x66   : > { %2042 = vmatmul.mubr.bf16.gmra.mrb[16].mxu1 %v5413_v51  ;;  %2587 = vmatmul.mubr.bf16.gmra.mrb[16].mxu0 %v5414_v52  ;;  %v5509_v51 = vld [vmem:[%s5884_s26 + $0x280] ss:$16 sps:$4 sm:$0xff]   ;;  %v5510_v52 = vld [vmem:[%s5884_s26 + $0x288] ss:$16 sps:$4 sm:$0xff]  }
  0x67   : > { %2049 = vmatprep.mubr.bf16.mxu1 %v5415_v53  ;;  %2594 = vmatprep.mubr.bf16.mxu0 %v5417_v54  ;;  %v5511_v53 = vld [vmem:[%s5884_s26 + $0x2a4] ss:$16 sps:$4 sm:$0xff]   ;;  %v5513_v54 = vld [vmem:[%s5884_s26 + $0x2ac] ss:$16 sps:$4 sm:$0xff]  }
  0x6e   : > { %2050 = vmatmul.mubr.bf16.gmra.mrb[20].mxu1 %v5419_v55  ;;  %2595 = vmatmul.mubr.bf16.gmra.mrb[20].mxu0 %v5420_v56  ;;  %v5515_v55 = vld [vmem:[%s5884_s26 + $0x2a0] ss:$16 sps:$4 sm:$0xff]   ;;  %v5516_v56 = vld [vmem:[%s5884_s26 + $0x2a8] ss:$16 sps:$4 sm:$0xff]  }
  0x6f   : > { %2057 = vmatprep.mubr.bf16.mxu1 %v5421_v57  ;;  %2602 = vmatprep.mubr.bf16.mxu0 %v5423_v58  ;;  %v5517_v57 = vld [vmem:[%s5884_s26 + $0x2c4] ss:$16 sps:$4 sm:$0xff]   ;;  %v5519_v58 = vld [vmem:[%s5884_s26 + $0x2cc] ss:$16 sps:$4 sm:$0xff]  }
  0x76   : > { %2058 = vmatmul.mubr.bf16.gmra.mrb[24].mxu1 %v5425_v59  ;;  %2603 = vmatmul.mubr.bf16.gmra.mrb[24].mxu0 %v5426_v60  ;;  %v5521_v59 = vld [vmem:[%s5884_s26 + $0x2c0] ss:$16 sps:$4 sm:$0xff]   ;;  %v5522_v60 = vld [vmem:[%s5884_s26 + $0x2c8] ss:$16 sps:$4 sm:$0xff]  }
  0x77   : > { %2065 = vmatprep.mubr.bf16.mxu1 %v5427_v61  ;;  %2610 = vmatprep.mubr.bf16.mxu0 %v5429_v62  ;;  %v5523_v61 = vld [vmem:[%s5884_s26 + $0x2e4] ss:$16 sps:$4 sm:$0xff]   ;;  %v5525_v62 = vld [vmem:[%s5884_s26 + $0x2ec] ss:$16 sps:$4 sm:$0xff]  }
  0x7e   : > { %2066 = vmatmul.mubr.bf16.gmra.mrb[28].mxu1 %v5431_v63  ;;  %2611 = vmatmul.mubr.bf16.gmra.mrb[28].mxu0 %v5432_v0  ;;  %v5527_v63 = vld [vmem:[%s5884_s26 + $0x2e0] ss:$16 sps:$4 sm:$0xff]   ;;  %v5528_v0 = vld [vmem:[%s5884_s26 + $0x2e8] ss:$16 sps:$4 sm:$0xff]  }
  0x7f   : > { %2073 = vmatprep.mubr.bf16.mxu1 %v5433_v1  ;;  %2618 = vmatprep.mubr.bf16.mxu0 %v5435_v2  ;;  %v5529_v1 = vld [vmem:[%s5884_s26 + $0x304] ss:$16 sps:$4 sm:$0xff]   ;;  %v5531_v2 = vld [vmem:[%s5884_s26 + $0x30c] ss:$16 sps:$4 sm:$0xff]  }
  0x86   : > { %2074 = vmatmul.mubr.bf16.gmra.mrb[32].mxu1 %v5437_v3  ;;  %2619 = vmatmul.mubr.bf16.gmra.mrb[32].mxu0 %v5438_v4  ;;  %v5533_v3 = vld [vmem:[%s5884_s26 + $0x300] ss:$16 sps:$4 sm:$0xff]   ;;  %v5534_v4 = vld [vmem:[%s5884_s26 + $0x308] ss:$16 sps:$4 sm:$0xff]  }
  0x87   : > { %2081 = vmatprep.mubr.bf16.mxu1 %v5439_v5  ;;  %2626 = vmatprep.mubr.bf16.mxu0 %v5441_v6  ;;  %v5535_v5 = vld [vmem:[%s5884_s26 + $0x324] ss:$16 sps:$4 sm:$0xff]   ;;  %v5537_v6 = vld [vmem:[%s5884_s26 + $0x32c] ss:$16 sps:$4 sm:$0xff]  }
  0x8e   : > { %2082 = vmatmul.mubr.bf16.gmra.mrb[36].mxu1 %v5443_v7  ;;  %2627 = vmatmul.mubr.bf16.gmra.mrb[36].mxu0 %v5444_v8  ;;  %v5539_v7 = vld [vmem:[%s5884_s26 + $0x320] ss:$16 sps:$4 sm:$0xff]   ;;  %v5540_v8 = vld [vmem:[%s5884_s26 + $0x328] ss:$16 sps:$4 sm:$0xff]  }
  0x8f   : > { %2089 = vmatprep.mubr.bf16.mxu1 %v5445_v9  ;;  %2634 = vmatprep.mubr.bf16.mxu0 %v5447_v10  ;;  %v5541_v9 = vld [vmem:[%s5884_s26 + $0x344] ss:$16 sps:$4 sm:$0xff]   ;;  %v5543_v10 = vld [vmem:[%s5884_s26 + $0x34c] ss:$16 sps:$4 sm:$0xff]  }
  0x96   : > { %2090 = vmatmul.mubr.bf16.gmra.mrb[40].mxu1 %v5449_v11  ;;  %2635 = vmatmul.mubr.bf16.gmra.mrb[40].mxu0 %v5450_v12  ;;  %v5545_v11 = vld [vmem:[%s5884_s26 + $0x340] ss:$16 sps:$4 sm:$0xff]   ;;  %v5546_v12 = vld [vmem:[%s5884_s26 + $0x348] ss:$16 sps:$4 sm:$0xff]  }
  0x97   : > { %2097 = vmatprep.mubr.bf16.mxu1 %v5451_v13  ;;  %2642 = vmatprep.mubr.bf16.mxu0 %v5453_v14  ;;  %v5547_v13 = vld [vmem:[%s5884_s26 + $0x364] ss:$16 sps:$4 sm:$0xff]   ;;  %v5549_v14 = vld [vmem:[%s5884_s26 + $0x36c] ss:$16 sps:$4 sm:$0xff]  }
  0x9e   : > { %2098 = vmatmul.mubr.bf16.gmra.mrb[44].mxu1 %v5455_v15  ;;  %2643 = vmatmul.mubr.bf16.gmra.mrb[44].mxu0 %v5456_v16  ;;  %v6060_v15 = vld [vmem:[%s6422_s2] ss:$0 sm:$0xff] }
  0x9f   : > { %2105 = vmatprep.mubr.bf16.mxu1 %v5457_v17  ;;  %2650 = vmatprep.mubr.bf16.mxu0 %v5459_v18 }
  0xa6   : > { %2106 = vmatmul.mubr.bf16.gmra.mrb[48].mxu1 %v5461_v19  ;;  %2651 = vmatmul.mubr.bf16.gmra.mrb[48].mxu0 %v5462_v20  ;;  %v5551_v20 = vld [vmem:[%s5884_s26 + $0x360] ss:$16 sps:$4 sm:$0xff]  }
  0xa7   : > { %2113 = vmatprep.mubr.bf16.mxu1 %v5463_v21  ;;  %2658 = vmatprep.mubr.bf16.mxu0 %v5465_v22 }
  0xae   : > { %2114 = vmatmul.mubr.bf16.gmra.mrb[52].mxu1 %v5467_v23  ;;  %2659 = vmatmul.mubr.bf16.gmra.mrb[52].mxu0 %v5468_v24  ;;  %v5552_v23 = vld [vmem:[%s5884_s26 + $0x368] ss:$16 sps:$4 sm:$0xff]   ;;  %v5553_v24 = vld [vmem:[%s5884_s26 + $0x384] ss:$16 sps:$4 sm:$0xff]  }
  0xaf   : > { %2121 = vmatprep.mubr.bf16.mxu1 %v5469_v25  ;;  %2666 = vmatprep.mubr.bf16.mxu0 %v5471_v26 }
  0xb6   : > { %2122 = vmatmul.mubr.bf16.gmra.mrb[56].mxu1 %v5473_v27  ;;  %2667 = vmatmul.mubr.bf16.gmra.mrb[56].mxu0 %v5474_v28 }
  0xb7   : > { %2129 = vmatprep.mubr.bf16.mxu1 %v5475_v29  ;;  %2674 = vmatprep.mubr.bf16.mxu0 %v5477_v30  ;;  %v5555_v29 = vld [vmem:[%s5884_s26 + $0x38c] ss:$16 sps:$4 sm:$0xff]  }
  0xbe   : > { %2130 = vmatmul.mubr.bf16.gmra.mrb[60].mxu1 %v5479_v31  ;;  %2675 = vmatmul.mubr.bf16.gmra.mrb[60].mxu0 %v5480_v32 }
  0xbf   : > { %2137 = vmatprep.mubr.bf16.mxu1 %v5481_v33  ;;  %2682 = vmatprep.mubr.bf16.mxu0 %v5483_v34 }
  0xc6   : > { %2138 = vmatmul.mubr.bf16.gmra.mrb[64].mxu1 %v5485_v35  ;;  %2683 = vmatmul.mubr.bf16.gmra.mrb[64].mxu0 %v5486_v36 }
  0xc7   : > { %2145 = vmatprep.mubr.bf16.mxu1 %v5487_v37  ;;  %2690 = vmatprep.mubr.bf16.mxu0 %v5489_v38 }
  0xce   : > { %2146 = vmatmul.mubr.bf16.gmra.mrb[68].mxu1 %v5491_v39  ;;  %2691 = vmatmul.mubr.bf16.gmra.mrb[68].mxu0 %v5492_v40  ;;  %v5557_v40 = vld [vmem:[%s5884_s26 + $0x380] ss:$16 sps:$4 sm:$0xff]  }
  0xcf   : > { %2153 = vmatprep.mubr.bf16.mxu1 %v5493_v41  ;;  %2698 = vmatprep.mubr.bf16.mxu0 %v5495_v42 }
  0xd6   : > { %2154 = vmatmul.mubr.bf16.gmra.mrb[72].mxu1 %v5497_v43  ;;  %2699 = vmatmul.mubr.bf16.gmra.mrb[72].mxu0 %v5498_v44  ;;  %v5558_v44 = vld [vmem:[%s5884_s26 + $0x388] ss:$16 sps:$4 sm:$0xff]  }
  0xd7   : > { %2161 = vmatprep.mubr.bf16.mxu1 %v5499_v45  ;;  %2706 = vmatprep.mubr.bf16.mxu0 %v5501_v46  ;;  %v5559_v45 = vld [vmem:[%s5884_s26 + $0x3a4] ss:$16 sps:$4 sm:$0xff]  }
  0xde   : > { %2162 = vmatmul.mubr.bf16.gmra.mrb[76].mxu1 %v5503_v47  ;;  %2707 = vmatmul.mubr.bf16.gmra.mrb[76].mxu0 %v5504_v48 }
  0xdf   : > { %2169 = vmatprep.mubr.bf16.mxu1 %v5505_v49  ;;  %2714 = vmatprep.mubr.bf16.mxu0 %v5507_v50  ;;  %v5561_v50 = vld [vmem:[%s5884_s26 + $0x3ac] ss:$16 sps:$4 sm:$0xff]  }
  0xe6   : > { %2170 = vmatmul.mubr.bf16.gmra.mrb[80].mxu1 %v5509_v51  ;;  %2715 = vmatmul.mubr.bf16.gmra.mrb[80].mxu0 %v5510_v52 }
  0xe7   : > { %2177 = vmatprep.mubr.bf16.mxu1 %v5511_v53  ;;  %2722 = vmatprep.mubr.bf16.mxu0 %v5513_v54 }
  0xee   : > { %2178 = vmatmul.mubr.bf16.gmra.mrb[84].mxu1 %v5515_v55  ;;  %2723 = vmatmul.mubr.bf16.gmra.mrb[84].mxu0 %v5516_v56 }
  0xef   : > { %2185 = vmatprep.mubr.bf16.mxu1 %v5517_v57  ;;  %2730 = vmatprep.mubr.bf16.mxu0 %v5519_v58 }
  0xf6   : > { %2186 = vmatmul.mubr.bf16.gmra.mrb[88].mxu1 %v5521_v59  ;;  %2731 = vmatmul.mubr.bf16.gmra.mrb[88].mxu0 %v5522_v60 }
  0xf7   : > { %2193 = vmatprep.mubr.bf16.mxu1 %v5523_v61  ;;  %2738 = vmatprep.mubr.bf16.mxu0 %v5525_v62  ;;  %v5563_v61 = vld [vmem:[%s5884_s26 + $0x3a0] ss:$16 sps:$4 sm:$0xff]  }
  0xfe   : > { %2194 = vmatmul.mubr.bf16.gmra.mrb[92].mxu1 %v5527_v63  ;;  %2739 = vmatmul.mubr.bf16.gmra.mrb[92].mxu0 %v5528_v0 }
  0xff   : > { %2201 = vmatprep.mubr.bf16.mxu1 %v5529_v1  ;;  %2746 = vmatprep.mubr.bf16.mxu0 %v5531_v2  ;;  %v5564_v1 = vld [vmem:[%s5884_s26 + $0x3a8] ss:$16 sps:$4 sm:$0xff]   ;;  %v5565_v2 = vld [vmem:[%s5884_s26 + $0x3c4] ss:$16 sps:$4 sm:$0xff]  }
 0x106   : > { %2202 = vmatmul.mubr.bf16.gmra.mrb[96].mxu1 %v5533_v3  ;;  %2747 = vmatmul.mubr.bf16.gmra.mrb[96].mxu0 %v5534_v4 }
 0x107   : > { %2209 = vmatprep.mubr.bf16.mxu1 %v5535_v5  ;;  %2754 = vmatprep.mubr.bf16.mxu0 %v5537_v6 }
 0x10e   : > { %2210 = vmatmul.mubr.bf16.gmra.mrb[100].mxu1 %v5539_v7  ;;  %2755 = vmatmul.mubr.bf16.gmra.mrb[100].mxu0 %v5540_v8  ;;  %v5567_v7 = vld [vmem:[%s5884_s26 + $0x3cc] ss:$16 sps:$4 sm:$0xff]  }
 0x10f   : > { %2217 = vmatprep.mubr.bf16.mxu1 %v5541_v9  ;;  %2762 = vmatprep.mubr.bf16.mxu0 %v5543_v10 }
 0x116   : > { %2218 = vmatmul.mubr.bf16.gmra.mrb[104].mxu1 %v5545_v11  ;;  %2763 = vmatmul.mubr.bf16.gmra.mrb[104].mxu0 %v5546_v12 }
 0x117   : > { %2225 = vmatprep.mubr.bf16.mxu1 %v5547_v13  ;;  %2770 = vmatprep.mubr.bf16.mxu0 %v5549_v14 }
 0x119   : > { %v2011_v16 = vpop.f32.mrb[0].mxu1  ;;  %v2556_v18 = vpop.f32.mrb[0].mxu0 }
 0x11a   : > { %v2012_v17 = vadd.f32 %v6060_v15, %v2011_v16  ;;  %v2013_v19 = vpop.f32.mrb[1].mxu1  ;;  %v2558_v21 = vpop.f32.mrb[1].mxu0 }
 0x11b   : > { %v2014_v22 = vpop.f32.mrb[2].mxu1  ;;  %v2559_v27 = vpop.f32.mrb[2].mxu0  ;;  %v5569_v19 = vld [vmem:[%s5884_s26 + $0x3c0] ss:$16 sps:$4 sm:$0xff]  }
 0x11c   : > { %v2557_v25 = vadd.f32 %v2556_v18, %v2012_v17  ;;  %v2015_v26 = vadd.f32 %v6060_v15, %v2014_v22  ;;  %v2016_v28 = vpop.f32.mrb[3].mxu1  ;;  %v2561_v30 = vpop.f32.mrb[3].mxu0 }
 0x11e   : > { %v3195_v31 = vmul.f32 0.01, %v2557_v25  ;;  %v2560_v32 = vadd.f32 %v2559_v27, %v2015_v26  ;;  %2226 = vmatmul.mubr.bf16.gmra.mrb[108].mxu1 %v5551_v20  ;;  %vm3067_vm0 = vcmp.ge.f32.partialorder %v2557_v25, 0.0  ;;  %2771 = vmatmul.mubr.bf16.gmra.mrb[108].mxu0 %v5552_v23  ;;  %v5570_v23 = vld [vmem:[%s5884_s26 + $0x3c8] ss:$16 sps:$4 sm:$0xff]  }
 0x11f   : > { %2233 = vmatprep.mubr.bf16.mxu1 %v5553_v24  ;;  %2778 = vmatprep.mubr.bf16.mxu0 %v5555_v29  ;;  %v5571_v24 = vld [vmem:[%s5884_s26 + $0x3e4] ss:$16 sps:$4 sm:$0xff]   ;;  %v5573_v29 = vld [vmem:[%s5884_s26 + $0x3ec] ss:$16 sps:$4 sm:$0xff]  }
 0x120   : > { %vm3068_vm1 = vcmp.ge.f32.partialorder %v2560_v32, 0.0  ;;  %v3196_v33 = vmul.f32 0.01, %v2560_v32  ;;  %v3323_v35 = vsel %vm3067_vm0, %v2557_v25, %v3195_v31 }
 0x121   : > { %v2019_v34 = vpop.f32.mrb[4].mxu1  ;;  %v2564_v38 = vpop.f32.mrb[4].mxu0 }
 0x122   : > { %v3324_v36 = vsel %vm3068_vm1, %v2560_v32, %v3196_v33  ;;  %v2020_v37 = vadd.f32 %v6060_v15, %v2019_v34  ;;  %v2021_v39 = vpop.f32.mrb[5].mxu1  ;;  %v2566_v42 = vpop.f32.mrb[5].mxu0 }
 0x123   : > { %v4708_v41 = vpack.c.bf16 %v3324_v36, %v3323_v35  ;;  %v2022_v43 = vpop.f32.mrb[6].mxu1  ;;  %v2567_v48 = vpop.f32.mrb[6].mxu0 }
 0x124   : > { %v2565_v46 = vadd.f32 %v2564_v38, %v2020_v37  ;;  %v2023_v47 = vadd.f32 %v6060_v15, %v2022_v43  ;;  %v2024_v49 = vpop.f32.mrb[7].mxu1  ;;  %v2569_v51 = vpop.f32.mrb[7].mxu0 }
 0x125   : > { %4709 = vst [vmem:[%s6072_s14] sm:$0xff] %v4708_v41  }
 0x126   : > { %v3197_v52 = vmul.f32 0.01, %v2565_v46  ;;  %v2568_v53 = vadd.f32 %v2567_v48, %v2023_v47  ;;  %2234 = vmatmul.mubr.bf16.gmra.mrb[112].mxu1 %v5557_v40  ;;  %vm3069_vm2 = vcmp.ge.f32.partialorder %v2565_v46, 0.0  ;;  %2779 = vmatmul.mubr.bf16.gmra.mrb[112].mxu0 %v5558_v44  ;;  %v5575_v40 = vld [vmem:[%s5884_s26 + $0x3e0] ss:$16 sps:$4 sm:$0xff]  }
 0x127   : > { %2241 = vmatprep.mubr.bf16.mxu1 %v5559_v45  ;;  %2786 = vmatprep.mubr.bf16.mxu0 %v5561_v50  ;;  %v5576_v44 = vld [vmem:[%s5884_s26 + $0x3e8] ss:$16 sps:$4 sm:$0xff]   ;;  %v5577_v45 = vld [vmem:[%s5884_s26 + $0x404] ss:$16 sps:$4 sm:$0xff]   ;;  %v5579_v50 = vld [vmem:[%s5884_s26 + $0x40c] ss:$16 sps:$4 sm:$0xff]  }
 0x128   : > { %vm3070_vm3 = vcmp.ge.f32.partialorder %v2568_v53, 0.0  ;;  %v3198_v54 = vmul.f32 0.01, %v2568_v53  ;;  %v3325_v56 = vsel %vm3069_vm2, %v2565_v46, %v3197_v52 }
 0x129   : > { %v2027_v55 = vpop.f32.mrb[8].mxu1  ;;  %v2572_v59 = vpop.f32.mrb[8].mxu0 }
 0x12a   : > { %v3326_v57 = vsel %vm3070_vm3, %v2568_v53, %v3198_v54  ;;  %v2028_v58 = vadd.f32 %v6060_v15, %v2027_v55  ;;  %v2029_v60 = vpop.f32.mrb[9].mxu1  ;;  %v2574_v63 = vpop.f32.mrb[9].mxu0 }
 0x12b   : > { %v4713_v62 = vpack.c.bf16 %v3326_v57, %v3325_v56  ;;  %v2030_v0 = vpop.f32.mrb[10].mxu1  ;;  %v2575_v5 = vpop.f32.mrb[10].mxu0 }
 0x12c   : > { %v2573_v3 = vadd.f32 %v2572_v59, %v2028_v58  ;;  %v2031_v4 = vadd.f32 %v6060_v15, %v2030_v0  ;;  %v2032_v6 = vpop.f32.mrb[11].mxu1  ;;  %v2577_v8 = vpop.f32.mrb[11].mxu0 }
 0x12d   : > { %5025 = vst [vmem:[%s6072_s14 + $0x8] sm:$0xff] %v4713_v62  }
 0x12e   : > { %v3199_v9 = vmul.f32 0.01, %v2573_v3  ;;  %v2576_v10 = vadd.f32 %v2575_v5, %v2031_v4  ;;  %2242 = vmatmul.mubr.bf16.gmra.mrb[116].mxu1 %v5563_v61  ;;  %vm3071_vm4 = vcmp.ge.f32.partialorder %v2573_v3, 0.0  ;;  %2787 = vmatmul.mubr.bf16.gmra.mrb[116].mxu0 %v5564_v1  ;;  %v5581_v61 = vld [vmem:[%s5884_s26 + $0x400] ss:$16 sps:$4 sm:$0xff]  }
 0x12f   : > { %2249 = vmatprep.mubr.bf16.mxu1 %v5565_v2  ;;  %2794 = vmatprep.mubr.bf16.mxu0 %v5567_v7  ;;  %v5582_v1 = vld [vmem:[%s5884_s26 + $0x408] ss:$16 sps:$4 sm:$0xff]   ;;  %v5583_v2 = vld [vmem:[%s5884_s26 + $0x424] ss:$16 sps:$4 sm:$0xff]   ;;  %v5585_v7 = vld [vmem:[%s5884_s26 + $0x42c] ss:$16 sps:$4 sm:$0xff]  }
 0x130   : > { %vm3072_vm5 = vcmp.ge.f32.partialorder %v2576_v10, 0.0  ;;  %v3200_v11 = vmul.f32 0.01, %v2576_v10  ;;  %v3327_v13 = vsel %vm3071_vm4, %v2573_v3, %v3199_v9 }
 0x131   : > { %v2035_v12 = vpop.f32.mrb[12].mxu1  ;;  %v2580_v17 = vpop.f32.mrb[12].mxu0 }
 0x132   : > { %v3328_v14 = vsel %vm3072_vm5, %v2576_v10, %v3200_v11  ;;  %v2036_v16 = vadd.f32 %v6060_v15, %v2035_v12  ;;  %v2037_v18 = vpop.f32.mrb[13].mxu1  ;;  %v2582_v21 = vpop.f32.mrb[13].mxu0 }
 0x133   : > { %v4718_v20 = vpack.c.bf16 %v3328_v14, %v3327_v13  ;;  %v2038_v22 = vpop.f32.mrb[14].mxu1  ;;  %v2583_v27 = vpop.f32.mrb[14].mxu0 }
 0x134   : > { %v2581_v25 = vadd.f32 %v2580_v17, %v2036_v16  ;;  %v2039_v26 = vadd.f32 %v6060_v15, %v2038_v22  ;;  %v2040_v28 = vpop.f32.mrb[15].mxu1  ;;  %v2585_v30 = vpop.f32.mrb[15].mxu0 }
 0x135   : > { %5026 = vst [vmem:[%s6072_s14 + $0x10] sm:$0xff] %v4718_v20  }
 0x136   : > { %v3201_v31 = vmul.f32 0.01, %v2581_v25  ;;  %v2584_v32 = vadd.f32 %v2583_v27, %v2039_v26  ;;  %2250 = vmatmul.mubr.bf16.gmra.mrb[120].mxu1 %v5569_v19  ;;  %vm3073_vm6 = vcmp.ge.f32.partialorder %v2581_v25, 0.0  ;;  %2795 = vmatmul.mubr.bf16.gmra.mrb[120].mxu0 %v5570_v23  ;;  %v5587_v19 = vld [vmem:[%s5884_s26 + $0x420] ss:$16 sps:$4 sm:$0xff]  }
 0x137   : > { %2257 = vmatprep.mubr.bf16.mxu1 %v5571_v24  ;;  %2802 = vmatprep.mubr.bf16.mxu0 %v5573_v29  ;;  %v5588_v23 = vld [vmem:[%s5884_s26 + $0x428] ss:$16 sps:$4 sm:$0xff]   ;;  %v5589_v24 = vld [vmem:[%s5884_s26 + $0x444] ss:$16 sps:$4 sm:$0xff]   ;;  %v5591_v29 = vld [vmem:[%s5884_s26 + $0x44c] ss:$16 sps:$4 sm:$0xff]  }
 0x138   : > { %vm3074_vm7 = vcmp.ge.f32.partialorder %v2584_v32, 0.0  ;;  %v3202_v33 = vmul.f32 0.01, %v2584_v32  ;;  %v3329_v35 = vsel %vm3073_vm6, %v2581_v25, %v3201_v31 }
 0x139   : > { %v2043_v34 = vpop.f32.mrb[16].mxu1  ;;  %v2588_v38 = vpop.f32.mrb[16].mxu0 }
 0x13a   : > { %v3330_v36 = vsel %vm3074_vm7, %v2584_v32, %v3202_v33  ;;  %v2044_v37 = vadd.f32 %v6060_v15, %v2043_v34  ;;  %v2045_v39 = vpop.f32.mrb[17].mxu1  ;;  %v2590_v42 = vpop.f32.mrb[17].mxu0 }
 0x13b   : > { %v4723_v41 = vpack.c.bf16 %v3330_v36, %v3329_v35  ;;  %v2046_v43 = vpop.f32.mrb[18].mxu1  ;;  %v2591_v48 = vpop.f32.mrb[18].mxu0 }
 0x13c   : > { %v2589_v46 = vadd.f32 %v2588_v38, %v2044_v37  ;;  %v2047_v47 = vadd.f32 %v6060_v15, %v2046_v43  ;;  %v2048_v49 = vpop.f32.mrb[19].mxu1  ;;  %v2593_v51 = vpop.f32.mrb[19].mxu0 }
 0x13d   : > { %5027 = vst [vmem:[%s6072_s14 + $0x18] sm:$0xff] %v4723_v41  }
 0x13e   : > { %v3203_v52 = vmul.f32 0.01, %v2589_v46  ;;  %v2592_v53 = vadd.f32 %v2591_v48, %v2047_v47  ;;  %2258 = vmatmul.mubr.bf16.gmra.mrb[124].mxu1 %v5575_v40  ;;  %vm3075_vm8 = vcmp.ge.f32.partialorder %v2589_v46, 0.0  ;;  %2803 = vmatmul.mubr.bf16.gmra.mrb[124].mxu0 %v5576_v44  ;;  %v5593_v40 = vld [vmem:[%s5884_s26 + $0x440] ss:$16 sps:$4 sm:$0xff]  }
 0x13f   : > { %2265 = vmatprep.mubr.bf16.mxu1 %v5577_v45  ;;  %2810 = vmatprep.mubr.bf16.mxu0 %v5579_v50  ;;  %v5594_v44 = vld [vmem:[%s5884_s26 + $0x448] ss:$16 sps:$4 sm:$0xff]   ;;  %v5595_v45 = vld [vmem:[%s5884_s26 + $0x464] ss:$16 sps:$4 sm:$0xff]   ;;  %v5597_v50 = vld [vmem:[%s5884_s26 + $0x46c] ss:$16 sps:$4 sm:$0xff]  }
 0x140   : > { %vm3076_vm9 = vcmp.ge.f32.partialorder %v2592_v53, 0.0  ;;  %v3204_v54 = vmul.f32 0.01, %v2592_v53  ;;  %v3331_v56 = vsel %vm3075_vm8, %v2589_v46, %v3203_v52 }
 0x141   : > { %v2051_v55 = vpop.f32.mrb[20].mxu1  ;;  %v2596_v59 = vpop.f32.mrb[20].mxu0 }
 0x142   : > { %v3332_v57 = vsel %vm3076_vm9, %v2592_v53, %v3204_v54  ;;  %v2052_v58 = vadd.f32 %v6060_v15, %v2051_v55  ;;  %v2053_v60 = vpop.f32.mrb[21].mxu1  ;;  %v2598_v63 = vpop.f32.mrb[21].mxu0 }
 0x143   : > { %v4728_v62 = vpack.c.bf16 %v3332_v57, %v3331_v56  ;;  %v2054_v0 = vpop.f32.mrb[22].mxu1  ;;  %v2599_v5 = vpop.f32.mrb[22].mxu0 }
 0x144   : > { %v2597_v3 = vadd.f32 %v2596_v59, %v2052_v58  ;;  %v2055_v4 = vadd.f32 %v6060_v15, %v2054_v0  ;;  %v2056_v6 = vpop.f32.mrb[23].mxu1  ;;  %v2601_v8 = vpop.f32.mrb[23].mxu0 }
 0x145   : > { %5028 = vst [vmem:[%s6072_s14 + $0x20] sm:$0xff] %v4728_v62  }
 0x146   : > { %v3205_v9 = vmul.f32 0.01, %v2597_v3  ;;  %v2600_v10 = vadd.f32 %v2599_v5, %v2055_v4  ;;  %2266 = vmatmul.mubr.bf16.gmra.mrb[128].mxu1 %v5581_v61  ;;  %vm3077_vm10 = vcmp.ge.f32.partialorder %v2597_v3, 0.0  ;;  %2811 = vmatmul.mubr.bf16.gmra.mrb[128].mxu0 %v5582_v1  ;;  %v5599_v61 = vld [vmem:[%s5884_s26 + $0x460] ss:$16 sps:$4 sm:$0xff]  }
 0x147   : > { %2273 = vmatprep.mubr.bf16.mxu1 %v5583_v2  ;;  %2818 = vmatprep.mubr.bf16.mxu0 %v5585_v7  ;;  %v5600_v1 = vld [vmem:[%s5884_s26 + $0x468] ss:$16 sps:$4 sm:$0xff]   ;;  %v5601_v2 = vld [vmem:[%s5884_s26 + $0x484] ss:$16 sps:$4 sm:$0xff]   ;;  %v5603_v7 = vld [vmem:[%s5884_s26 + $0x48c] ss:$16 sps:$4 sm:$0xff]  }
 0x148   : > { %vm3078_vm11 = vcmp.ge.f32.partialorder %v2600_v10, 0.0  ;;  %v3206_v11 = vmul.f32 0.01, %v2600_v10  ;;  %v3333_v13 = vsel %vm3077_vm10, %v2597_v3, %v3205_v9 }
 0x149   : > { %v2059_v12 = vpop.f32.mrb[24].mxu1  ;;  %v2604_v17 = vpop.f32.mrb[24].mxu0 }
 0x14a   : > { %v3334_v14 = vsel %vm3078_vm11, %v2600_v10, %v3206_v11  ;;  %v2060_v16 = vadd.f32 %v6060_v15, %v2059_v12  ;;  %v2061_v18 = vpop.f32.mrb[25].mxu1  ;;  %v2606_v21 = vpop.f32.mrb[25].mxu0 }
 0x14b   : > { %v4733_v20 = vpack.c.bf16 %v3334_v14, %v3333_v13  ;;  %v2062_v22 = vpop.f32.mrb[26].mxu1  ;;  %v2607_v27 = vpop.f32.mrb[26].mxu0 }
 0x14c   : > { %v2605_v25 = vadd.f32 %v2604_v17, %v2060_v16  ;;  %v2063_v26 = vadd.f32 %v6060_v15, %v2062_v22  ;;  %v2064_v28 = vpop.f32.mrb[27].mxu1  ;;  %v2609_v30 = vpop.f32.mrb[27].mxu0 }
 0x14d   : > { %5029 = vst [vmem:[%s6072_s14 + $0x28] sm:$0xff] %v4733_v20  }
 0x14e   : > { %v3207_v31 = vmul.f32 0.01, %v2605_v25  ;;  %v2608_v32 = vadd.f32 %v2607_v27, %v2063_v26  ;;  %2274 = vmatmul.mubr.bf16.gmra.mrb[132].mxu1 %v5587_v19  ;;  %vm3079_vm12 = vcmp.ge.f32.partialorder %v2605_v25, 0.0  ;;  %2819 = vmatmul.mubr.bf16.gmra.mrb[132].mxu0 %v5588_v23  ;;  %v5605_v19 = vld [vmem:[%s5884_s26 + $0x480] ss:$16 sps:$4 sm:$0xff]  }
 0x14f   : > { %2281 = vmatprep.mubr.bf16.mxu1 %v5589_v24  ;;  %2826 = vmatprep.mubr.bf16.mxu0 %v5591_v29  ;;  %v5606_v23 = vld [vmem:[%s5884_s26 + $0x488] ss:$16 sps:$4 sm:$0xff]   ;;  %v5607_v24 = vld [vmem:[%s5884_s26 + $0x4a4] ss:$16 sps:$4 sm:$0xff]   ;;  %v5609_v29 = vld [vmem:[%s5884_s26 + $0x4ac] ss:$16 sps:$4 sm:$0xff]  }
 0x150   : > { %vm3080_vm13 = vcmp.ge.f32.partialorder %v2608_v32, 0.0  ;;  %v3208_v33 = vmul.f32 0.01, %v2608_v32  ;;  %v3335_v35 = vsel %vm3079_vm12, %v2605_v25, %v3207_v31 }
 0x151   : > { %v2067_v34 = vpop.f32.mrb[28].mxu1  ;;  %v2612_v38 = vpop.f32.mrb[28].mxu0 }
 0x152   : > { %v3336_v36 = vsel %vm3080_vm13, %v2608_v32, %v3208_v33  ;;  %v2068_v37 = vadd.f32 %v6060_v15, %v2067_v34  ;;  %v2069_v39 = vpop.f32.mrb[29].mxu1  ;;  %v2614_v42 = vpop.f32.mrb[29].mxu0 }
 0x153   : > { %v4738_v41 = vpack.c.bf16 %v3336_v36, %v3335_v35  ;;  %v2070_v43 = vpop.f32.mrb[30].mxu1  ;;  %v2615_v48 = vpop.f32.mrb[30].mxu0 }
 0x154   : > { %v2613_v46 = vadd.f32 %v2612_v38, %v2068_v37  ;;  %v2071_v47 = vadd.f32 %v6060_v15, %v2070_v43  ;;  %v2072_v49 = vpop.f32.mrb[31].mxu1  ;;  %v2617_v51 = vpop.f32.mrb[31].mxu0 }
 0x155   : > { %5030 = vst [vmem:[%s6072_s14 + $0x30] sm:$0xff] %v4738_v41  }
 0x156   : > { %v3209_v52 = vmul.f32 0.01, %v2613_v46  ;;  %v2616_v53 = vadd.f32 %v2615_v48, %v2071_v47  ;;  %2282 = vmatmul.mubr.bf16.gmra.mrb[136].mxu1 %v5593_v40  ;;  %vm3081_vm14 = vcmp.ge.f32.partialorder %v2613_v46, 0.0  ;;  %2827 = vmatmul.mubr.bf16.gmra.mrb[136].mxu0 %v5594_v44  ;;  %v5611_v40 = vld [vmem:[%s5884_s26 + $0x4a0] ss:$16 sps:$4 sm:$0xff]  }
 0x157   : > { %2289 = vmatprep.mubr.bf16.mxu1 %v5595_v45  ;;  %2834 = vmatprep.mubr.bf16.mxu0 %v5597_v50  ;;  %v5612_v44 = vld [vmem:[%s5884_s26 + $0x4a8] ss:$16 sps:$4 sm:$0xff]   ;;  %v5613_v45 = vld [vmem:[%s5884_s26 + $0x4c4] ss:$16 sps:$4 sm:$0xff]   ;;  %v5615_v50 = vld [vmem:[%s5884_s26 + $0x4cc] ss:$16 sps:$4 sm:$0xff]  }
 0x158   : > { %vm3082_vm15 = vcmp.ge.f32.partialorder %v2616_v53, 0.0  ;;  %v3210_v54 = vmul.f32 0.01, %v2616_v53  ;;  %v3337_v56 = vsel %vm3081_vm14, %v2613_v46, %v3209_v52 }
 0x159   : > { %v2075_v55 = vpop.f32.mrb[32].mxu1  ;;  %v2620_v59 = vpop.f32.mrb[32].mxu0 }
 0x15a   : > { %v3338_v57 = vsel %vm3082_vm15, %v2616_v53, %v3210_v54  ;;  %v2076_v58 = vadd.f32 %v6060_v15, %v2075_v55  ;;  %v2077_v60 = vpop.f32.mrb[33].mxu1  ;;  %v2622_v63 = vpop.f32.mrb[33].mxu0 }
 0x15b   : > { %v4743_v62 = vpack.c.bf16 %v3338_v57, %v3337_v56  ;;  %v2078_v0 = vpop.f32.mrb[34].mxu1  ;;  %v2623_v5 = vpop.f32.mrb[34].mxu0 }
 0x15c   : > { %v2621_v3 = vadd.f32 %v2620_v59, %v2076_v58  ;;  %v2079_v4 = vadd.f32 %v6060_v15, %v2078_v0  ;;  %v2080_v6 = vpop.f32.mrb[35].mxu1  ;;  %v2625_v8 = vpop.f32.mrb[35].mxu0 }
 0x15d   : > { %5031 = vst [vmem:[%s6072_s14 + $0x38] sm:$0xff] %v4743_v62  }
 0x15e   : > { %v3211_v9 = vmul.f32 0.01, %v2621_v3  ;;  %v2624_v10 = vadd.f32 %v2623_v5, %v2079_v4  ;;  %2290 = vmatmul.mubr.bf16.gmra.mrb[140].mxu1 %v5599_v61  ;;  %vm3083_vm0 = vcmp.ge.f32.partialorder %v2621_v3, 0.0  ;;  %2835 = vmatmul.mubr.bf16.gmra.mrb[140].mxu0 %v5600_v1  ;;  %v5617_v61 = vld [vmem:[%s5884_s26 + $0x4c0] ss:$16 sps:$4 sm:$0xff]  }
 0x15f   : > { %2297 = vmatprep.mubr.bf16.mxu1 %v5601_v2  ;;  %2842 = vmatprep.mubr.bf16.mxu0 %v5603_v7  ;;  %v5618_v1 = vld [vmem:[%s5884_s26 + $0x4c8] ss:$16 sps:$4 sm:$0xff]   ;;  %v5619_v2 = vld [vmem:[%s5884_s26 + $0x4e4] ss:$16 sps:$4 sm:$0xff]   ;;  %v5621_v7 = vld [vmem:[%s5884_s26 + $0x4ec] ss:$16 sps:$4 sm:$0xff]  }
 0x160   : > { %vm3084_vm1 = vcmp.ge.f32.partialorder %v2624_v10, 0.0  ;;  %v3212_v11 = vmul.f32 0.01, %v2624_v10  ;;  %v3339_v13 = vsel %vm3083_vm0, %v2621_v3, %v3211_v9 }
 0x161   : > { %v2083_v12 = vpop.f32.mrb[36].mxu1  ;;  %v2628_v17 = vpop.f32.mrb[36].mxu0 }
 0x162   : > { %v3340_v14 = vsel %vm3084_vm1, %v2624_v10, %v3212_v11  ;;  %v2084_v16 = vadd.f32 %v6060_v15, %v2083_v12  ;;  %v2085_v18 = vpop.f32.mrb[37].mxu1  ;;  %v2630_v21 = vpop.f32.mrb[37].mxu0 }
 0x163   : > { %v4748_v20 = vpack.c.bf16 %v3340_v14, %v3339_v13  ;;  %v2086_v22 = vpop.f32.mrb[38].mxu1  ;;  %v2631_v27 = vpop.f32.mrb[38].mxu0 }
 0x164   : > { %v2629_v25 = vadd.f32 %v2628_v17, %v2084_v16  ;;  %v2087_v26 = vadd.f32 %v6060_v15, %v2086_v22  ;;  %v2088_v28 = vpop.f32.mrb[39].mxu1  ;;  %v2633_v30 = vpop.f32.mrb[39].mxu0 }
 0x165   : > { %5032 = vst [vmem:[%s6072_s14 + $0x40] sm:$0xff] %v4748_v20  }
 0x166   : > { %v3213_v31 = vmul.f32 0.01, %v2629_v25  ;;  %v2632_v32 = vadd.f32 %v2631_v27, %v2087_v26  ;;  %2298 = vmatmul.mubr.bf16.gmra.mrb[144].mxu1 %v5605_v19  ;;  %vm3085_vm2 = vcmp.ge.f32.partialorder %v2629_v25, 0.0  ;;  %2843 = vmatmul.mubr.bf16.gmra.mrb[144].mxu0 %v5606_v23  ;;  %v5623_v19 = vld [vmem:[%s5884_s26 + $0x4e0] ss:$16 sps:$4 sm:$0xff]  }
 0x167   : > { %2305 = vmatprep.mubr.bf16.mxu1 %v5607_v24  ;;  %2850 = vmatprep.mubr.bf16.mxu0 %v5609_v29  ;;  %v5624_v23 = vld [vmem:[%s5884_s26 + $0x4e8] ss:$16 sps:$4 sm:$0xff]   ;;  %v5625_v24 = vld [vmem:[%s5884_s26 + $0x504] ss:$16 sps:$4 sm:$0xff]   ;;  %v5627_v29 = vld [vmem:[%s5884_s26 + $0x50c] ss:$16 sps:$4 sm:$0xff]  }
 0x168   : > { %vm3086_vm3 = vcmp.ge.f32.partialorder %v2632_v32, 0.0  ;;  %v3214_v33 = vmul.f32 0.01, %v2632_v32  ;;  %v3341_v35 = vsel %vm3085_vm2, %v2629_v25, %v3213_v31 }
 0x169   : > { %v2091_v34 = vpop.f32.mrb[40].mxu1  ;;  %v2636_v38 = vpop.f32.mrb[40].mxu0 }
 0x16a   : > { %v3342_v36 = vsel %vm3086_vm3, %v2632_v32, %v3214_v33  ;;  %v2092_v37 = vadd.f32 %v6060_v15, %v2091_v34  ;;  %v2093_v39 = vpop.f32.mrb[41].mxu1  ;;  %v2638_v42 = vpop.f32.mrb[41].mxu0 }
 0x16b   : > { %v4753_v41 = vpack.c.bf16 %v3342_v36, %v3341_v35  ;;  %v2094_v43 = vpop.f32.mrb[42].mxu1  ;;  %v2639_v48 = vpop.f32.mrb[42].mxu0 }
 0x16c   : > { %v2637_v46 = vadd.f32 %v2636_v38, %v2092_v37  ;;  %v2095_v47 = vadd.f32 %v6060_v15, %v2094_v43  ;;  %v2096_v49 = vpop.f32.mrb[43].mxu1  ;;  %v2641_v51 = vpop.f32.mrb[43].mxu0 }
 0x16d   : > { %5033 = vst [vmem:[%s6072_s14 + $0x48] sm:$0xff] %v4753_v41  }
 0x16e   : > { %v3215_v52 = vmul.f32 0.01, %v2637_v46  ;;  %v2640_v53 = vadd.f32 %v2639_v48, %v2095_v47  ;;  %2306 = vmatmul.mubr.bf16.gmra.mrb[148].mxu1 %v5611_v40  ;;  %vm3087_vm4 = vcmp.ge.f32.partialorder %v2637_v46, 0.0  ;;  %2851 = vmatmul.mubr.bf16.gmra.mrb[148].mxu0 %v5612_v44  ;;  %v5629_v40 = vld [vmem:[%s5884_s26 + $0x500] ss:$16 sps:$4 sm:$0xff]  }
 0x16f   : > { %2313 = vmatprep.mubr.bf16.mxu1 %v5613_v45  ;;  %2858 = vmatprep.mubr.bf16.mxu0 %v5615_v50  ;;  %v5630_v44 = vld [vmem:[%s5884_s26 + $0x508] ss:$16 sps:$4 sm:$0xff]   ;;  %v5631_v45 = vld [vmem:[%s5884_s26 + $0x524] ss:$16 sps:$4 sm:$0xff]   ;;  %v5633_v50 = vld [vmem:[%s5884_s26 + $0x52c] ss:$16 sps:$4 sm:$0xff]  }
 0x170   : > { %vm3088_vm5 = vcmp.ge.f32.partialorder %v2640_v53, 0.0  ;;  %v3216_v54 = vmul.f32 0.01, %v2640_v53  ;;  %v3343_v56 = vsel %vm3087_vm4, %v2637_v46, %v3215_v52 }
 0x171   : > { %v2099_v55 = vpop.f32.mrb[44].mxu1  ;;  %v2644_v59 = vpop.f32.mrb[44].mxu0 }
 0x172   : > { %v3344_v57 = vsel %vm3088_vm5, %v2640_v53, %v3216_v54  ;;  %v2100_v58 = vadd.f32 %v6060_v15, %v2099_v55  ;;  %v2101_v60 = vpop.f32.mrb[45].mxu1  ;;  %v2646_v63 = vpop.f32.mrb[45].mxu0 }
 0x173   : > { %v4758_v62 = vpack.c.bf16 %v3344_v57, %v3343_v56  ;;  %v2102_v0 = vpop.f32.mrb[46].mxu1  ;;  %v2647_v5 = vpop.f32.mrb[46].mxu0 }
 0x174   : > { %v2645_v3 = vadd.f32 %v2644_v59, %v2100_v58  ;;  %v2103_v4 = vadd.f32 %v6060_v15, %v2102_v0  ;;  %v2104_v6 = vpop.f32.mrb[47].mxu1  ;;  %v2649_v8 = vpop.f32.mrb[47].mxu0 }
 0x175   : > { %5034 = vst [vmem:[%s6072_s14 + $0x50] sm:$0xff] %v4758_v62  }
 0x176   : > { %v3217_v9 = vmul.f32 0.01, %v2645_v3  ;;  %v2648_v10 = vadd.f32 %v2647_v5, %v2103_v4  ;;  %2314 = vmatmul.mubr.bf16.gmra.mrb[152].mxu1 %v5617_v61  ;;  %vm3089_vm6 = vcmp.ge.f32.partialorder %v2645_v3, 0.0  ;;  %2859 = vmatmul.mubr.bf16.gmra.mrb[152].mxu0 %v5618_v1  ;;  %v5635_v61 = vld [vmem:[%s5884_s26 + $0x520] ss:$16 sps:$4 sm:$0xff]  }
 0x177   : > { %2321 = vmatprep.mubr.bf16.mxu1 %v5619_v2  ;;  %2866 = vmatprep.mubr.bf16.mxu0 %v5621_v7  ;;  %v5636_v1 = vld [vmem:[%s5884_s26 + $0x528] ss:$16 sps:$4 sm:$0xff]   ;;  %v5637_v2 = vld [vmem:[%s5884_s26 + $0x544] ss:$16 sps:$4 sm:$0xff]   ;;  %v5639_v7 = vld [vmem:[%s5884_s26 + $0x54c] ss:$16 sps:$4 sm:$0xff]  }
 0x178   : > { %vm3090_vm7 = vcmp.ge.f32.partialorder %v2648_v10, 0.0  ;;  %v3218_v11 = vmul.f32 0.01, %v2648_v10  ;;  %v3345_v13 = vsel %vm3089_vm6, %v2645_v3, %v3217_v9 }
 0x179   : > { %v2107_v12 = vpop.f32.mrb[48].mxu1  ;;  %v2652_v17 = vpop.f32.mrb[48].mxu0 }
 0x17a   : > { %v3346_v14 = vsel %vm3090_vm7, %v2648_v10, %v3218_v11  ;;  %v2108_v16 = vadd.f32 %v6060_v15, %v2107_v12  ;;  %v2109_v18 = vpop.f32.mrb[49].mxu1  ;;  %v2654_v21 = vpop.f32.mrb[49].mxu0 }
 0x17b   : > { %v4763_v20 = vpack.c.bf16 %v3346_v14, %v3345_v13  ;;  %v2110_v22 = vpop.f32.mrb[50].mxu1  ;;  %v2655_v27 = vpop.f32.mrb[50].mxu0 }
 0x17c   : > { %v2653_v25 = vadd.f32 %v2652_v17, %v2108_v16  ;;  %v2111_v26 = vadd.f32 %v6060_v15, %v2110_v22  ;;  %v2112_v28 = vpop.f32.mrb[51].mxu1  ;;  %v2657_v30 = vpop.f32.mrb[51].mxu0 }
 0x17d   : > { %5035 = vst [vmem:[%s6072_s14 + $0x58] sm:$0xff] %v4763_v20  }
 0x17e   : > { %v3219_v31 = vmul.f32 0.01, %v2653_v25  ;;  %v2656_v32 = vadd.f32 %v2655_v27, %v2111_v26  ;;  %2322 = vmatmul.mubr.bf16.gmra.mrb[156].mxu1 %v5623_v19  ;;  %vm3091_vm8 = vcmp.ge.f32.partialorder %v2653_v25, 0.0  ;;  %2867 = vmatmul.mubr.bf16.gmra.mrb[156].mxu0 %v5624_v23  ;;  %v5641_v19 = vld [vmem:[%s5884_s26 + $0x540] ss:$16 sps:$4 sm:$0xff]  }
 0x17f   : > { %2329 = vmatprep.mubr.bf16.mxu1 %v5625_v24  ;;  %2874 = vmatprep.mubr.bf16.mxu0 %v5627_v29  ;;  %v5642_v23 = vld [vmem:[%s5884_s26 + $0x548] ss:$16 sps:$4 sm:$0xff]   ;;  %v5643_v24 = vld [vmem:[%s5884_s26 + $0x564] ss:$16 sps:$4 sm:$0xff]   ;;  %v5645_v29 = vld [vmem:[%s5884_s26 + $0x56c] ss:$16 sps:$4 sm:$0xff]  }
 0x180   : > { %vm3092_vm9 = vcmp.ge.f32.partialorder %v2656_v32, 0.0  ;;  %v3220_v33 = vmul.f32 0.01, %v2656_v32  ;;  %v3347_v35 = vsel %vm3091_vm8, %v2653_v25, %v3219_v31 }
 0x181   : > { %v2115_v34 = vpop.f32.mrb[52].mxu1  ;;  %v2660_v38 = vpop.f32.mrb[52].mxu0 }
 0x182   : > { %v3348_v36 = vsel %vm3092_vm9, %v2656_v32, %v3220_v33  ;;  %v2116_v37 = vadd.f32 %v6060_v15, %v2115_v34  ;;  %v2117_v39 = vpop.f32.mrb[53].mxu1  ;;  %v2662_v42 = vpop.f32.mrb[53].mxu0 }
 0x183   : > { %v4768_v41 = vpack.c.bf16 %v3348_v36, %v3347_v35  ;;  %v2118_v43 = vpop.f32.mrb[54].mxu1  ;;  %v2663_v48 = vpop.f32.mrb[54].mxu0 }
 0x184   : > { %v2661_v46 = vadd.f32 %v2660_v38, %v2116_v37  ;;  %v2119_v47 = vadd.f32 %v6060_v15, %v2118_v43  ;;  %v2120_v49 = vpop.f32.mrb[55].mxu1  ;;  %v2665_v51 = vpop.f32.mrb[55].mxu0 }
 0x185   : > { %5036 = vst [vmem:[%s6072_s14 + $0x60] sm:$0xff] %v4768_v41  }
 0x186   : > { %v3221_v52 = vmul.f32 0.01, %v2661_v46  ;;  %v2664_v53 = vadd.f32 %v2663_v48, %v2119_v47  ;;  %2330 = vmatmul.mubr.bf16.gmra.mrb[160].mxu1 %v5629_v40  ;;  %vm3093_vm10 = vcmp.ge.f32.partialorder %v2661_v46, 0.0  ;;  %2875 = vmatmul.mubr.bf16.gmra.mrb[160].mxu0 %v5630_v44  ;;  %v5647_v40 = vld [vmem:[%s5884_s26 + $0x560] ss:$16 sps:$4 sm:$0xff]  }
 0x187   : > { %2337 = vmatprep.mubr.bf16.mxu1 %v5631_v45  ;;  %2882 = vmatprep.mubr.bf16.mxu0 %v5633_v50  ;;  %v5648_v44 = vld [vmem:[%s5884_s26 + $0x568] ss:$16 sps:$4 sm:$0xff]   ;;  %v5649_v45 = vld [vmem:[%s5884_s26 + $0x584] ss:$16 sps:$4 sm:$0xff]   ;;  %v5651_v50 = vld [vmem:[%s5884_s26 + $0x58c] ss:$16 sps:$4 sm:$0xff]  }
 0x188   : > { %vm3094_vm11 = vcmp.ge.f32.partialorder %v2664_v53, 0.0  ;;  %v3222_v54 = vmul.f32 0.01, %v2664_v53  ;;  %v3349_v56 = vsel %vm3093_vm10, %v2661_v46, %v3221_v52 }
 0x189   : > { %v2123_v55 = vpop.f32.mrb[56].mxu1  ;;  %v2668_v59 = vpop.f32.mrb[56].mxu0 }
 0x18a   : > { %v3350_v57 = vsel %vm3094_vm11, %v2664_v53, %v3222_v54  ;;  %v2124_v58 = vadd.f32 %v6060_v15, %v2123_v55  ;;  %v2125_v60 = vpop.f32.mrb[57].mxu1  ;;  %v2670_v63 = vpop.f32.mrb[57].mxu0 }
 0x18b   : > { %v4773_v62 = vpack.c.bf16 %v3350_v57, %v3349_v56  ;;  %v2126_v0 = vpop.f32.mrb[58].mxu1  ;;  %v2671_v5 = vpop.f32.mrb[58].mxu0 }
 0x18c   : > { %v2669_v3 = vadd.f32 %v2668_v59, %v2124_v58  ;;  %v2127_v4 = vadd.f32 %v6060_v15, %v2126_v0  ;;  %v2128_v6 = vpop.f32.mrb[59].mxu1  ;;  %v2673_v8 = vpop.f32.mrb[59].mxu0 }
 0x18d   : > { %5037 = vst [vmem:[%s6072_s14 + $0x68] sm:$0xff] %v4773_v62  }
 0x18e   : > { %v3223_v9 = vmul.f32 0.01, %v2669_v3  ;;  %v2672_v10 = vadd.f32 %v2671_v5, %v2127_v4  ;;  %2338 = vmatmul.mubr.bf16.gmra.mrb[164].mxu1 %v5635_v61  ;;  %vm3095_vm12 = vcmp.ge.f32.partialorder %v2669_v3, 0.0  ;;  %2883 = vmatmul.mubr.bf16.gmra.mrb[164].mxu0 %v5636_v1  ;;  %v5653_v61 = vld [vmem:[%s5884_s26 + $0x580] ss:$16 sps:$4 sm:$0xff]  }
 0x18f   : > { %2345 = vmatprep.mubr.bf16.mxu1 %v5637_v2  ;;  %2890 = vmatprep.mubr.bf16.mxu0 %v5639_v7  ;;  %v5654_v1 = vld [vmem:[%s5884_s26 + $0x588] ss:$16 sps:$4 sm:$0xff]   ;;  %v5655_v2 = vld [vmem:[%s5884_s26 + $0x5a4] ss:$16 sps:$4 sm:$0xff]   ;;  %v5657_v7 = vld [vmem:[%s5884_s26 + $0x5ac] ss:$16 sps:$4 sm:$0xff]  }
 0x190   : > { %vm3096_vm13 = vcmp.ge.f32.partialorder %v2672_v10, 0.0  ;;  %v3224_v11 = vmul.f32 0.01, %v2672_v10  ;;  %v3351_v13 = vsel %vm3095_vm12, %v2669_v3, %v3223_v9 }
 0x191   : > { %v2131_v12 = vpop.f32.mrb[60].mxu1  ;;  %v2676_v17 = vpop.f32.mrb[60].mxu0 }
 0x192   : > { %v3352_v14 = vsel %vm3096_vm13, %v2672_v10, %v3224_v11  ;;  %v2132_v16 = vadd.f32 %v6060_v15, %v2131_v12  ;;  %v2133_v18 = vpop.f32.mrb[61].mxu1  ;;  %v2678_v21 = vpop.f32.mrb[61].mxu0 }
 0x193   : > { %v4778_v20 = vpack.c.bf16 %v3352_v14, %v3351_v13  ;;  %v2134_v22 = vpop.f32.mrb[62].mxu1  ;;  %v2679_v27 = vpop.f32.mrb[62].mxu0 }
 0x194   : > { %v2677_v25 = vadd.f32 %v2676_v17, %v2132_v16  ;;  %v2135_v26 = vadd.f32 %v6060_v15, %v2134_v22  ;;  %v2136_v28 = vpop.f32.mrb[63].mxu1  ;;  %v2681_v30 = vpop.f32.mrb[63].mxu0 }
 0x195   : > { %5038 = vst [vmem:[%s6072_s14 + $0x70] sm:$0xff] %v4778_v20   ;;  %v5663_v30 = vld [vmem:[%s5884_s26 + $0x5cc] ss:$16 sps:$4 sm:$0xff]  }
 0x196   : > { %v3225_v31 = vmul.f32 0.01, %v2677_v25  ;;  %v2680_v32 = vadd.f32 %v2679_v27, %v2135_v26  ;;  %2346 = vmatmul.mubr.bf16.gmra.mrb[168].mxu1 %v5641_v19  ;;  %vm3097_vm14 = vcmp.ge.f32.partialorder %v2677_v25, 0.0  ;;  %2891 = vmatmul.mubr.bf16.gmra.mrb[168].mxu0 %v5642_v23  ;;  %v5659_v19 = vld [vmem:[%s5884_s26 + $0x5a0] ss:$16 sps:$4 sm:$0xff]  }
 0x197   : > { %2353 = vmatprep.mubr.bf16.mxu1 %v5643_v24  ;;  %2898 = vmatprep.mubr.bf16.mxu0 %v5645_v29  ;;  %v5660_v23 = vld [vmem:[%s5884_s26 + $0x5a8] ss:$16 sps:$4 sm:$0xff]   ;;  %v5661_v24 = vld [vmem:[%s5884_s26 + $0x5c4] ss:$16 sps:$4 sm:$0xff]   ;;  %v6200_v26 = vld [vmem:[%s6422_s2] ss:$0 sm:$0xff] }
 0x198   : > { %vm3098_vm15 = vcmp.ge.f32.partialorder %v2680_v32, 0.0  ;;  %v3226_v33 = vmul.f32 0.01, %v2680_v32  ;;  %v3353_v35 = vsel %vm3097_vm14, %v2677_v25, %v3225_v31 }
 0x199   : > { %v2139_v34 = vpop.f32.mrb[64].mxu1  ;;  %v2684_v38 = vpop.f32.mrb[64].mxu0 }
 0x19a   : > { %v3354_v36 = vsel %vm3098_vm15, %v2680_v32, %v3226_v33  ;;  %v2140_v37 = vadd.f32 %v6060_v15, %v2139_v34  ;;  %v2141_v39 = vpop.f32.mrb[65].mxu1  ;;  %v2686_v42 = vpop.f32.mrb[65].mxu0 }
 0x19b   : > { %v4783_v41 = vpack.c.bf16 %v3354_v36, %v3353_v35  ;;  %v2142_v43 = vpop.f32.mrb[66].mxu1  ;;  %v2687_v48 = vpop.f32.mrb[66].mxu0 }
 0x19c   : > { %v2685_v46 = vadd.f32 %v2684_v38, %v2140_v37  ;;  %v2143_v47 = vadd.f32 %v6060_v15, %v2142_v43  ;;  %v2144_v49 = vpop.f32.mrb[67].mxu1  ;;  %v2689_v51 = vpop.f32.mrb[67].mxu0 }
 0x19d   : > { %5039 = vst [vmem:[%s6072_s14 + $0x78] sm:$0xff] %v4783_v41  }
 0x19e   : > { %v3227_v52 = vmul.f32 0.01, %v2685_v46  ;;  %v2688_v53 = vadd.f32 %v2687_v48, %v2143_v47  ;;  %2354 = vmatmul.mubr.bf16.gmra.mrb[172].mxu1 %v5647_v40  ;;  %vm3099_vm0 = vcmp.ge.f32.partialorder %v2685_v46, 0.0  ;;  %2899 = vmatmul.mubr.bf16.gmra.mrb[172].mxu0 %v5648_v44  ;;  %v5665_v40 = vld [vmem:[%s5884_s26 + $0x5c0] ss:$16 sps:$4 sm:$0xff]  }
 0x19f   : > { %2361 = vmatprep.mubr.bf16.mxu1 %v5649_v45  ;;  %2906 = vmatprep.mubr.bf16.mxu0 %v5651_v50  ;;  %v5666_v44 = vld [vmem:[%s5884_s26 + $0x5c8] ss:$16 sps:$4 sm:$0xff]   ;;  %v5667_v45 = vld [vmem:[%s5884_s26 + $0x5e4] ss:$16 sps:$4 sm:$0xff]   ;;  %v5669_v50 = vld [vmem:[%s5884_s26 + $0x5ec] ss:$16 sps:$4 sm:$0xff]  }
 0x1a0   : > { %vm3100_vm1 = vcmp.ge.f32.partialorder %v2688_v53, 0.0  ;;  %v3228_v54 = vmul.f32 0.01, %v2688_v53  ;;  %v3355_v56 = vsel %vm3099_vm0, %v2685_v46, %v3227_v52 }
 0x1a1   : > { %v2147_v55 = vpop.f32.mrb[68].mxu1  ;;  %v2692_v59 = vpop.f32.mrb[68].mxu0 }
 0x1a2   : > { %v3356_v57 = vsel %vm3100_vm1, %v2688_v53, %v3228_v54  ;;  %v2148_v58 = vadd.f32 %v6060_v15, %v2147_v55  ;;  %v2149_v60 = vpop.f32.mrb[69].mxu1  ;;  %v2694_v63 = vpop.f32.mrb[69].mxu0 }
 0x1a3   : > { %v4788_v62 = vpack.c.bf16 %v3356_v57, %v3355_v56  ;;  %v2150_v0 = vpop.f32.mrb[70].mxu1  ;;  %v2695_v5 = vpop.f32.mrb[70].mxu0 }
 0x1a4   : > { %v2693_v3 = vadd.f32 %v2692_v59, %v2148_v58  ;;  %v2151_v4 = vadd.f32 %v6060_v15, %v2150_v0  ;;  %v2152_v6 = vpop.f32.mrb[71].mxu1  ;;  %v2697_v8 = vpop.f32.mrb[71].mxu0 }
 0x1a5   : > { %5040 = vst [vmem:[%s6072_s14 + $0x80] sm:$0xff] %v4788_v62  }
 0x1a6   : > { %v3229_v9 = vmul.f32 0.01, %v2693_v3  ;;  %v2696_v10 = vadd.f32 %v2695_v5, %v2151_v4  ;;  %2362 = vmatmul.mubr.bf16.gmra.mrb[176].mxu1 %v5653_v61  ;;  %vm3101_vm2 = vcmp.ge.f32.partialorder %v2693_v3, 0.0  ;;  %2907 = vmatmul.mubr.bf16.gmra.mrb[176].mxu0 %v5654_v1  ;;  %v5671_v61 = vld [vmem:[%s5884_s26 + $0x5e0] ss:$16 sps:$4 sm:$0xff]  }
 0x1a7   : > { %2369 = vmatprep.mubr.bf16.mxu1 %v5655_v2  ;;  %2914 = vmatprep.mubr.bf16.mxu0 %v5657_v7  ;;  %v5672_v1 = vld [vmem:[%s5884_s26 + $0x5e8] ss:$16 sps:$4 sm:$0xff]   ;;  %v5673_v2 = vld [vmem:[%s5884_s26 + $0x604] ss:$16 sps:$4 sm:$0xff]   ;;  %v5675_v7 = vld [vmem:[%s5884_s26 + $0x60c] ss:$16 sps:$4 sm:$0xff]  }
 0x1a8   : > { %vm3102_vm3 = vcmp.ge.f32.partialorder %v2696_v10, 0.0  ;;  %v3230_v11 = vmul.f32 0.01, %v2696_v10  ;;  %v3357_v13 = vsel %vm3101_vm2, %v2693_v3, %v3229_v9 }
 0x1a9   : > { %v2155_v12 = vpop.f32.mrb[72].mxu1  ;;  %v2700_v17 = vpop.f32.mrb[72].mxu0 }
 0x1aa   : > { %v3358_v14 = vsel %vm3102_vm3, %v2696_v10, %v3230_v11  ;;  %v2156_v16 = vadd.f32 %v6060_v15, %v2155_v12  ;;  %v2157_v18 = vpop.f32.mrb[73].mxu1  ;;  %v2702_v21 = vpop.f32.mrb[73].mxu0 }
 0x1ab   : > { %v4793_v20 = vpack.c.bf16 %v3358_v14, %v3357_v13  ;;  %v2158_v22 = vpop.f32.mrb[74].mxu1  ;;  %v2703_v28 = vpop.f32.mrb[74].mxu0 }
 0x1ac   : > { %v2701_v25 = vadd.f32 %v2700_v17, %v2156_v16  ;;  %v2159_v27 = vadd.f32 %v6200_v26, %v2158_v22  ;;  %v2160_v29 = vpop.f32.mrb[75].mxu1  ;;  %v2705_v15 = vpop.f32.mrb[75].mxu0 }
 0x1ad   : > { %5041 = vst [vmem:[%s6072_s14 + $0x88] sm:$0xff] %v4793_v20  }
 0x1ae   : > { %v3231_v31 = vmul.f32 0.01, %v2701_v25  ;;  %v2704_v32 = vadd.f32 %v2703_v28, %v2159_v27  ;;  %2370 = vmatmul.mubr.bf16.gmra.mrb[180].mxu1 %v5659_v19  ;;  %vm3103_vm4 = vcmp.ge.f32.partialorder %v2701_v25, 0.0  ;;  %2915 = vmatmul.mubr.bf16.gmra.mrb[180].mxu0 %v5660_v23  ;;  %v5677_v19 = vld [vmem:[%s5884_s26 + $0x600] ss:$16 sps:$4 sm:$0xff]  }
 0x1af   : > { %2377 = vmatprep.mubr.bf16.mxu1 %v5661_v24  ;;  %2922 = vmatprep.mubr.bf16.mxu0 %v5663_v30  ;;  %v5678_v23 = vld [vmem:[%s5884_s26 + $0x608] ss:$16 sps:$4 sm:$0xff]   ;;  %v5679_v24 = vld [vmem:[%s5884_s26 + $0x624] ss:$16 sps:$4 sm:$0xff]   ;;  %v5681_v30 = vld [vmem:[%s5884_s26 + $0x62c] ss:$16 sps:$4 sm:$0xff]  }
 0x1b0   : > { %vm3104_vm5 = vcmp.ge.f32.partialorder %v2704_v32, 0.0  ;;  %v3232_v33 = vmul.f32 0.01, %v2704_v32  ;;  %v3359_v35 = vsel %vm3103_vm4, %v2701_v25, %v3231_v31 }
 0x1b1   : > { %v2163_v34 = vpop.f32.mrb[76].mxu1  ;;  %v2708_v38 = vpop.f32.mrb[76].mxu0 }
 0x1b2   : > { %v3360_v36 = vsel %vm3104_vm5, %v2704_v32, %v3232_v33  ;;  %v2164_v37 = vadd.f32 %v6200_v26, %v2163_v34  ;;  %v2165_v39 = vpop.f32.mrb[77].mxu1  ;;  %v2710_v42 = vpop.f32.mrb[77].mxu0 }
 0x1b3   : > { %v4798_v41 = vpack.c.bf16 %v3360_v36, %v3359_v35  ;;  %v2166_v43 = vpop.f32.mrb[78].mxu1  ;;  %v2711_v48 = vpop.f32.mrb[78].mxu0 }
 0x1b4   : > { %v2709_v46 = vadd.f32 %v2708_v38, %v2164_v37  ;;  %v2167_v47 = vadd.f32 %v6200_v26, %v2166_v43  ;;  %v2168_v49 = vpop.f32.mrb[79].mxu1  ;;  %v2713_v51 = vpop.f32.mrb[79].mxu0 }
 0x1b5   : > { %5042 = vst [vmem:[%s6072_s14 + $0x90] sm:$0xff] %v4798_v41  }
 0x1b6   : > { %v3233_v52 = vmul.f32 0.01, %v2709_v46  ;;  %v2712_v53 = vadd.f32 %v2711_v48, %v2167_v47  ;;  %2378 = vmatmul.mubr.bf16.gmra.mrb[184].mxu1 %v5665_v40  ;;  %vm3105_vm6 = vcmp.ge.f32.partialorder %v2709_v46, 0.0  ;;  %2923 = vmatmul.mubr.bf16.gmra.mrb[184].mxu0 %v5666_v44  ;;  %v5683_v40 = vld [vmem:[%s5884_s26 + $0x620] ss:$16 sps:$4 sm:$0xff]  }
 0x1b7   : > { %2385 = vmatprep.mubr.bf16.mxu1 %v5667_v45  ;;  %2930 = vmatprep.mubr.bf16.mxu0 %v5669_v50  ;;  %v5684_v44 = vld [vmem:[%s5884_s26 + $0x628] ss:$16 sps:$4 sm:$0xff]   ;;  %v5685_v45 = vld [vmem:[%s5884_s26 + $0x644] ss:$16 sps:$4 sm:$0xff]   ;;  %v5687_v50 = vld [vmem:[%s5884_s26 + $0x64c] ss:$16 sps:$4 sm:$0xff]  }
 0x1b8   : > { %vm3106_vm7 = vcmp.ge.f32.partialorder %v2712_v53, 0.0  ;;  %v3234_v54 = vmul.f32 0.01, %v2712_v53  ;;  %v3361_v56 = vsel %vm3105_vm6, %v2709_v46, %v3233_v52 }
 0x1b9   : > { %v2171_v55 = vpop.f32.mrb[80].mxu1  ;;  %v2716_v59 = vpop.f32.mrb[80].mxu0 }
 0x1ba   : > { %v3362_v57 = vsel %vm3106_vm7, %v2712_v53, %v3234_v54  ;;  %v2172_v58 = vadd.f32 %v6200_v26, %v2171_v55  ;;  %v2173_v60 = vpop.f32.mrb[81].mxu1  ;;  %v2718_v63 = vpop.f32.mrb[81].mxu0 }
 0x1bb   : > { %v4803_v62 = vpack.c.bf16 %v3362_v57, %v3361_v56  ;;  %v2174_v0 = vpop.f32.mrb[82].mxu1  ;;  %v2719_v5 = vpop.f32.mrb[82].mxu0 }
 0x1bc   : > { %v2717_v3 = vadd.f32 %v2716_v59, %v2172_v58  ;;  %v2175_v4 = vadd.f32 %v6200_v26, %v2174_v0  ;;  %v2176_v6 = vpop.f32.mrb[83].mxu1  ;;  %v2721_v8 = vpop.f32.mrb[83].mxu0 }
 0x1bd   : > { %5043 = vst [vmem:[%s6072_s14 + $0x98] sm:$0xff] %v4803_v62  }
 0x1be   : > { %v3235_v9 = vmul.f32 0.01, %v2717_v3  ;;  %v2720_v10 = vadd.f32 %v2719_v5, %v2175_v4  ;;  %2386 = vmatmul.mubr.bf16.gmra.mrb[188].mxu1 %v5671_v61  ;;  %vm3107_vm8 = vcmp.ge.f32.partialorder %v2717_v3, 0.0  ;;  %2931 = vmatmul.mubr.bf16.gmra.mrb[188].mxu0 %v5672_v1  ;;  %v5689_v61 = vld [vmem:[%s5884_s26 + $0x640] ss:$16 sps:$4 sm:$0xff]  }
 0x1bf   : > { %2393 = vmatprep.mubr.bf16.mxu1 %v5673_v2  ;;  %2938 = vmatprep.mubr.bf16.mxu0 %v5675_v7  ;;  %v5690_v1 = vld [vmem:[%s5884_s26 + $0x648] ss:$16 sps:$4 sm:$0xff]   ;;  %v5691_v2 = vld [vmem:[%s5884_s26 + $0x664] ss:$16 sps:$4 sm:$0xff]   ;;  %v5693_v7 = vld [vmem:[%s5884_s26 + $0x66c] ss:$16 sps:$4 sm:$0xff]  }
 0x1c0   : > { %vm3108_vm9 = vcmp.ge.f32.partialorder %v2720_v10, 0.0  ;;  %v3236_v11 = vmul.f32 0.01, %v2720_v10  ;;  %v3363_v13 = vsel %vm3107_vm8, %v2717_v3, %v3235_v9 }
 0x1c1   : > { %v2179_v12 = vpop.f32.mrb[84].mxu1  ;;  %v2724_v17 = vpop.f32.mrb[84].mxu0 }
 0x1c2   : > { %v3364_v14 = vsel %vm3108_vm9, %v2720_v10, %v3236_v11  ;;  %v2180_v16 = vadd.f32 %v6200_v26, %v2179_v12  ;;  %v2181_v18 = vpop.f32.mrb[85].mxu1  ;;  %v2726_v21 = vpop.f32.mrb[85].mxu0 }
 0x1c3   : > { %v4808_v20 = vpack.c.bf16 %v3364_v14, %v3363_v13  ;;  %v2182_v22 = vpop.f32.mrb[86].mxu1  ;;  %v2727_v28 = vpop.f32.mrb[86].mxu0 }
 0x1c4   : > { %v2725_v25 = vadd.f32 %v2724_v17, %v2180_v16  ;;  %v2183_v27 = vadd.f32 %v6200_v26, %v2182_v22  ;;  %v2184_v29 = vpop.f32.mrb[87].mxu1  ;;  %v2729_v15 = vpop.f32.mrb[87].mxu0 }
 0x1c5   : > { %5044 = vst [vmem:[%s6072_s14 + $0xa0] sm:$0xff] %v4808_v20  }
 0x1c6   : > { %v3237_v31 = vmul.f32 0.01, %v2725_v25  ;;  %v2728_v32 = vadd.f32 %v2727_v28, %v2183_v27  ;;  %2394 = vmatmul.mubr.bf16.gmra.mrb[192].mxu1 %v5677_v19  ;;  %vm3109_vm10 = vcmp.ge.f32.partialorder %v2725_v25, 0.0  ;;  %2939 = vmatmul.mubr.bf16.gmra.mrb[192].mxu0 %v5678_v23  ;;  %v5695_v19 = vld [vmem:[%s5884_s26 + $0x660] ss:$16 sps:$4 sm:$0xff]  }
 0x1c7   : > { %2401 = vmatprep.mubr.bf16.mxu1 %v5679_v24  ;;  %2946 = vmatprep.mubr.bf16.mxu0 %v5681_v30  ;;  %v5696_v23 = vld [vmem:[%s5884_s26 + $0x668] ss:$16 sps:$4 sm:$0xff]   ;;  %v5697_v24 = vld [vmem:[%s5884_s26 + $0x684] ss:$16 sps:$4 sm:$0xff]   ;;  %v5699_v30 = vld [vmem:[%s5884_s26 + $0x68c] ss:$16 sps:$4 sm:$0xff]  }
 0x1c8   : > { %vm3110_vm11 = vcmp.ge.f32.partialorder %v2728_v32, 0.0  ;;  %v3238_v33 = vmul.f32 0.01, %v2728_v32  ;;  %v3365_v35 = vsel %vm3109_vm10, %v2725_v25, %v3237_v31 }
 0x1c9   : > { %v2187_v34 = vpop.f32.mrb[88].mxu1  ;;  %v2732_v38 = vpop.f32.mrb[88].mxu0 }
 0x1ca   : > { %v3366_v36 = vsel %vm3110_vm11, %v2728_v32, %v3238_v33  ;;  %v2188_v37 = vadd.f32 %v6200_v26, %v2187_v34  ;;  %v2189_v39 = vpop.f32.mrb[89].mxu1  ;;  %v2734_v42 = vpop.f32.mrb[89].mxu0 }
 0x1cb   : > { %v4813_v41 = vpack.c.bf16 %v3366_v36, %v3365_v35  ;;  %v2190_v43 = vpop.f32.mrb[90].mxu1  ;;  %v2735_v48 = vpop.f32.mrb[90].mxu0 }
 0x1cc   : > { %v2733_v46 = vadd.f32 %v2732_v38, %v2188_v37  ;;  %v2191_v47 = vadd.f32 %v6200_v26, %v2190_v43  ;;  %v2192_v49 = vpop.f32.mrb[91].mxu1  ;;  %v2737_v51 = vpop.f32.mrb[91].mxu0 }
 0x1cd   : > { %5045 = vst [vmem:[%s6072_s14 + $0xa8] sm:$0xff] %v4813_v41  }
 0x1ce   : > { %v3239_v52 = vmul.f32 0.01, %v2733_v46  ;;  %v2736_v53 = vadd.f32 %v2735_v48, %v2191_v47  ;;  %2402 = vmatmul.mubr.bf16.gmra.mrb[196].mxu1 %v5683_v40  ;;  %vm3111_vm12 = vcmp.ge.f32.partialorder %v2733_v46, 0.0  ;;  %2947 = vmatmul.mubr.bf16.gmra.mrb[196].mxu0 %v5684_v44  ;;  %v5701_v40 = vld [vmem:[%s5884_s26 + $0x680] ss:$16 sps:$4 sm:$0xff]  }
 0x1cf   : > { %2409 = vmatprep.mubr.bf16.mxu1 %v5685_v45  ;;  %2954 = vmatprep.mubr.bf16.mxu0 %v5687_v50  ;;  %v5702_v44 = vld [vmem:[%s5884_s26 + $0x688] ss:$16 sps:$4 sm:$0xff]   ;;  %v5703_v45 = vld [vmem:[%s5884_s26 + $0x6a4] ss:$16 sps:$4 sm:$0xff]   ;;  %v5705_v50 = vld [vmem:[%s5884_s26 + $0x6ac] ss:$16 sps:$4 sm:$0xff]  }
 0x1d0   : > { %vm3112_vm13 = vcmp.ge.f32.partialorder %v2736_v53, 0.0  ;;  %v3240_v54 = vmul.f32 0.01, %v2736_v53  ;;  %v3367_v56 = vsel %vm3111_vm12, %v2733_v46, %v3239_v52 }
 0x1d1   : > { %v2195_v55 = vpop.f32.mrb[92].mxu1  ;;  %v2740_v59 = vpop.f32.mrb[92].mxu0 }
 0x1d2   : > { %v3368_v57 = vsel %vm3112_vm13, %v2736_v53, %v3240_v54  ;;  %v2196_v58 = vadd.f32 %v6200_v26, %v2195_v55  ;;  %v2197_v60 = vpop.f32.mrb[93].mxu1  ;;  %v2742_v63 = vpop.f32.mrb[93].mxu0 }
 0x1d3   : > { %v4818_v62 = vpack.c.bf16 %v3368_v57, %v3367_v56  ;;  %v2198_v0 = vpop.f32.mrb[94].mxu1  ;;  %v2743_v5 = vpop.f32.mrb[94].mxu0 }
 0x1d4   : > { %v2741_v3 = vadd.f32 %v2740_v59, %v2196_v58  ;;  %v2199_v4 = vadd.f32 %v6200_v26, %v2198_v0  ;;  %v2200_v6 = vpop.f32.mrb[95].mxu1  ;;  %v2745_v8 = vpop.f32.mrb[95].mxu0 }
 0x1d5   : > { %5046 = vst [vmem:[%s6072_s14 + $0xb0] sm:$0xff] %v4818_v62  }
 0x1d6   : > { %v3241_v9 = vmul.f32 0.01, %v2741_v3  ;;  %v2744_v10 = vadd.f32 %v2743_v5, %v2199_v4  ;;  %2410 = vmatmul.mubr.bf16.gmra.mrb[200].mxu1 %v5689_v61  ;;  %vm3113_vm14 = vcmp.ge.f32.partialorder %v2741_v3, 0.0  ;;  %2955 = vmatmul.mubr.bf16.gmra.mrb[200].mxu0 %v5690_v1  ;;  %v5707_v61 = vld [vmem:[%s5884_s26 + $0x6a0] ss:$16 sps:$4 sm:$0xff]  }
 0x1d7   : > { %2417 = vmatprep.mubr.bf16.mxu1 %v5691_v2  ;;  %2962 = vmatprep.mubr.bf16.mxu0 %v5693_v7  ;;  %v5708_v1 = vld [vmem:[%s5884_s26 + $0x6a8] ss:$16 sps:$4 sm:$0xff]   ;;  %v5709_v2 = vld [vmem:[%s5884_s26 + $0x6c4] ss:$16 sps:$4 sm:$0xff]   ;;  %v5711_v7 = vld [vmem:[%s5884_s26 + $0x6cc] ss:$16 sps:$4 sm:$0xff]  }
 0x1d8   : > { %vm3114_vm15 = vcmp.ge.f32.partialorder %v2744_v10, 0.0  ;;  %v3242_v11 = vmul.f32 0.01, %v2744_v10  ;;  %v3369_v13 = vsel %vm3113_vm14, %v2741_v3, %v3241_v9 }
 0x1d9   : > { %v2203_v12 = vpop.f32.mrb[96].mxu1  ;;  %v2748_v17 = vpop.f32.mrb[96].mxu0 }
 0x1da   : > { %v3370_v14 = vsel %vm3114_vm15, %v2744_v10, %v3242_v11  ;;  %v2204_v16 = vadd.f32 %v6200_v26, %v2203_v12  ;;  %v2205_v18 = vpop.f32.mrb[97].mxu1  ;;  %v2750_v21 = vpop.f32.mrb[97].mxu0 }
 0x1db   : > { %v4823_v20 = vpack.c.bf16 %v3370_v14, %v3369_v13  ;;  %v2206_v22 = vpop.f32.mrb[98].mxu1  ;;  %v2751_v28 = vpop.f32.mrb[98].mxu0 }
 0x1dc   : > { %v2749_v25 = vadd.f32 %v2748_v17, %v2204_v16  ;;  %v2207_v27 = vadd.f32 %v6200_v26, %v2206_v22  ;;  %v2208_v29 = vpop.f32.mrb[99].mxu1  ;;  %v2753_v15 = vpop.f32.mrb[99].mxu0 }
 0x1dd   : > { %5047 = vst [vmem:[%s6072_s14 + $0xb8] sm:$0xff] %v4823_v20  }
 0x1de   : > { %v3243_v31 = vmul.f32 0.01, %v2749_v25  ;;  %v2752_v32 = vadd.f32 %v2751_v28, %v2207_v27  ;;  %2418 = vmatmul.mubr.bf16.gmra.mrb[204].mxu1 %v5695_v19  ;;  %vm3115_vm0 = vcmp.ge.f32.partialorder %v2749_v25, 0.0  ;;  %2963 = vmatmul.mubr.bf16.gmra.mrb[204].mxu0 %v5696_v23  ;;  %v5713_v19 = vld [vmem:[%s5884_s26 + $0x6c0] ss:$16 sps:$4 sm:$0xff]  }
 0x1df   : > { %2425 = vmatprep.mubr.bf16.mxu1 %v5697_v24  ;;  %2970 = vmatprep.mubr.bf16.mxu0 %v5699_v30  ;;  %v5714_v23 = vld [vmem:[%s5884_s26 + $0x6c8] ss:$16 sps:$4 sm:$0xff]   ;;  %v5715_v24 = vld [vmem:[%s5884_s26 + $0x6e4] ss:$16 sps:$4 sm:$0xff]   ;;  %v5717_v30 = vld [vmem:[%s5884_s26 + $0x6ec] ss:$16 sps:$4 sm:$0xff]  }
 0x1e0   : > { %vm3116_vm1 = vcmp.ge.f32.partialorder %v2752_v32, 0.0  ;;  %v3244_v33 = vmul.f32 0.01, %v2752_v32  ;;  %v3371_v35 = vsel %vm3115_vm0, %v2749_v25, %v3243_v31 }
 0x1e1   : > { %v2211_v34 = vpop.f32.mrb[100].mxu1  ;;  %v2756_v38 = vpop.f32.mrb[100].mxu0 }
 0x1e2   : > { %v3372_v36 = vsel %vm3116_vm1, %v2752_v32, %v3244_v33  ;;  %v2212_v37 = vadd.f32 %v6200_v26, %v2211_v34  ;;  %v2213_v39 = vpop.f32.mrb[101].mxu1  ;;  %v2758_v42 = vpop.f32.mrb[101].mxu0 }
 0x1e3   : > { %v4828_v41 = vpack.c.bf16 %v3372_v36, %v3371_v35  ;;  %v2214_v43 = vpop.f32.mrb[102].mxu1  ;;  %v2759_v48 = vpop.f32.mrb[102].mxu0 }
 0x1e4   : > { %v2757_v46 = vadd.f32 %v2756_v38, %v2212_v37  ;;  %v2215_v47 = vadd.f32 %v6200_v26, %v2214_v43  ;;  %v2216_v49 = vpop.f32.mrb[103].mxu1  ;;  %v2761_v51 = vpop.f32.mrb[103].mxu0 }
 0x1e5   : > { %5048 = vst [vmem:[%s6072_s14 + $0xc0] sm:$0xff] %v4828_v41  }
 0x1e6   : > { %v3245_v52 = vmul.f32 0.01, %v2757_v46  ;;  %v2760_v53 = vadd.f32 %v2759_v48, %v2215_v47  ;;  %2426 = vmatmul.mubr.bf16.gmra.mrb[208].mxu1 %v5701_v40  ;;  %vm3117_vm2 = vcmp.ge.f32.partialorder %v2757_v46, 0.0  ;;  %2971 = vmatmul.mubr.bf16.gmra.mrb[208].mxu0 %v5702_v44  ;;  %v5719_v40 = vld [vmem:[%s5884_s26 + $0x6e0] ss:$16 sps:$4 sm:$0xff]  }
 0x1e7   : > { %2433 = vmatprep.mubr.bf16.mxu1 %v5703_v45  ;;  %2978 = vmatprep.mubr.bf16.mxu0 %v5705_v50  ;;  %v5720_v44 = vld [vmem:[%s5884_s26 + $0x6e8] ss:$16 sps:$4 sm:$0xff]   ;;  %v5721_v45 = vld [vmem:[%s5884_s26 + $0x704] ss:$16 sps:$4 sm:$0xff]   ;;  %v5723_v50 = vld [vmem:[%s5884_s26 + $0x70c] ss:$16 sps:$4 sm:$0xff]  }
 0x1e8   : > { %vm3118_vm3 = vcmp.ge.f32.partialorder %v2760_v53, 0.0  ;;  %v3246_v54 = vmul.f32 0.01, %v2760_v53  ;;  %v3373_v56 = vsel %vm3117_vm2, %v2757_v46, %v3245_v52 }
 0x1e9   : > { %v2219_v55 = vpop.f32.mrb[104].mxu1  ;;  %v2764_v59 = vpop.f32.mrb[104].mxu0 }
 0x1ea   : > { %v3374_v57 = vsel %vm3118_vm3, %v2760_v53, %v3246_v54  ;;  %v2220_v58 = vadd.f32 %v6200_v26, %v2219_v55  ;;  %v2221_v60 = vpop.f32.mrb[105].mxu1  ;;  %v2766_v63 = vpop.f32.mrb[105].mxu0 }
 0x1eb   : > { %v4833_v62 = vpack.c.bf16 %v3374_v57, %v3373_v56  ;;  %v2222_v0 = vpop.f32.mrb[106].mxu1  ;;  %v2767_v5 = vpop.f32.mrb[106].mxu0 }
 0x1ec   : > { %v2765_v3 = vadd.f32 %v2764_v59, %v2220_v58  ;;  %v2223_v4 = vadd.f32 %v6200_v26, %v2222_v0  ;;  %v2224_v6 = vpop.f32.mrb[107].mxu1  ;;  %v2769_v8 = vpop.f32.mrb[107].mxu0 }
 0x1ed   : > { %5049 = vst [vmem:[%s6072_s14 + $0xc8] sm:$0xff] %v4833_v62  }
 0x1ee   : > { %v3247_v9 = vmul.f32 0.01, %v2765_v3  ;;  %v2768_v10 = vadd.f32 %v2767_v5, %v2223_v4  ;;  %2434 = vmatmul.mubr.bf16.gmra.mrb[212].mxu1 %v5707_v61  ;;  %vm3119_vm4 = vcmp.ge.f32.partialorder %v2765_v3, 0.0  ;;  %2979 = vmatmul.mubr.bf16.gmra.mrb[212].mxu0 %v5708_v1  ;;  %v5725_v61 = vld [vmem:[%s5884_s26 + $0x700] ss:$16 sps:$4 sm:$0xff]  }
 0x1ef   : > { %2441 = vmatprep.mubr.bf16.mxu1 %v5709_v2  ;;  %2986 = vmatprep.mubr.bf16.mxu0 %v5711_v7  ;;  %v5726_v1 = vld [vmem:[%s5884_s26 + $0x708] ss:$16 sps:$4 sm:$0xff]   ;;  %v5727_v2 = vld [vmem:[%s5884_s26 + $0x724] ss:$16 sps:$4 sm:$0xff]   ;;  %v5729_v7 = vld [vmem:[%s5884_s26 + $0x72c] ss:$16 sps:$4 sm:$0xff]  }
 0x1f0   : > { %vm3120_vm5 = vcmp.ge.f32.partialorder %v2768_v10, 0.0  ;;  %v3248_v11 = vmul.f32 0.01, %v2768_v10  ;;  %v3375_v13 = vsel %vm3119_vm4, %v2765_v3, %v3247_v9 }
 0x1f1   : > { %v2227_v12 = vpop.f32.mrb[108].mxu1  ;;  %v2772_v17 = vpop.f32.mrb[108].mxu0 }
 0x1f2   : > { %v3376_v14 = vsel %vm3120_vm5, %v2768_v10, %v3248_v11  ;;  %v2228_v16 = vadd.f32 %v6200_v26, %v2227_v12  ;;  %v2229_v18 = vpop.f32.mrb[109].mxu1  ;;  %v2774_v21 = vpop.f32.mrb[109].mxu0 }
 0x1f3   : > { %v4838_v20 = vpack.c.bf16 %v3376_v14, %v3375_v13  ;;  %v2230_v22 = vpop.f32.mrb[110].mxu1  ;;  %v2775_v28 = vpop.f32.mrb[110].mxu0 }
 0x1f4   : > { %v2773_v25 = vadd.f32 %v2772_v17, %v2228_v16  ;;  %v2231_v27 = vadd.f32 %v6200_v26, %v2230_v22  ;;  %v2232_v29 = vpop.f32.mrb[111].mxu1  ;;  %v2777_v15 = vpop.f32.mrb[111].mxu0 }
 0x1f5   : > { %5050 = vst [vmem:[%s6072_s14 + $0xd0] sm:$0xff] %v4838_v20  }
 0x1f6   : > { %v3249_v31 = vmul.f32 0.01, %v2773_v25  ;;  %v2776_v32 = vadd.f32 %v2775_v28, %v2231_v27  ;;  %2442 = vmatmul.mubr.bf16.gmra.mrb[216].mxu1 %v5713_v19  ;;  %vm3121_vm6 = vcmp.ge.f32.partialorder %v2773_v25, 0.0  ;;  %2987 = vmatmul.mubr.bf16.gmra.mrb[216].mxu0 %v5714_v23  ;;  %v5731_v19 = vld [vmem:[%s5884_s26 + $0x720] ss:$16 sps:$4 sm:$0xff]  }
 0x1f7   : > { %2449 = vmatprep.mubr.bf16.mxu1 %v5715_v24  ;;  %2994 = vmatprep.mubr.bf16.mxu0 %v5717_v30  ;;  %v5732_v23 = vld [vmem:[%s5884_s26 + $0x728] ss:$16 sps:$4 sm:$0xff]   ;;  %v5733_v24 = vld [vmem:[%s5884_s26 + $0x744] ss:$16 sps:$4 sm:$0xff]   ;;  %v5735_v30 = vld [vmem:[%s5884_s26 + $0x74c] ss:$16 sps:$4 sm:$0xff]  }
 0x1f8   : > { %vm3122_vm7 = vcmp.ge.f32.partialorder %v2776_v32, 0.0  ;;  %v3250_v33 = vmul.f32 0.01, %v2776_v32  ;;  %v3377_v35 = vsel %vm3121_vm6, %v2773_v25, %v3249_v31 }
 0x1f9   : > { %v2235_v34 = vpop.f32.mrb[112].mxu1  ;;  %v2780_v38 = vpop.f32.mrb[112].mxu0 }
 0x1fa   : > { %v3378_v36 = vsel %vm3122_vm7, %v2776_v32, %v3250_v33  ;;  %v2236_v37 = vadd.f32 %v6200_v26, %v2235_v34  ;;  %v2237_v39 = vpop.f32.mrb[113].mxu1  ;;  %v2782_v42 = vpop.f32.mrb[113].mxu0 }
 0x1fb   : > { %v4843_v41 = vpack.c.bf16 %v3378_v36, %v3377_v35  ;;  %v2238_v43 = vpop.f32.mrb[114].mxu1  ;;  %v2783_v48 = vpop.f32.mrb[114].mxu0 }
 0x1fc   : > { %v2781_v46 = vadd.f32 %v2780_v38, %v2236_v37  ;;  %v2239_v47 = vadd.f32 %v6200_v26, %v2238_v43  ;;  %v2240_v49 = vpop.f32.mrb[115].mxu1  ;;  %v2785_v51 = vpop.f32.mrb[115].mxu0 }
 0x1fd   : > { %5051 = vst [vmem:[%s6072_s14 + $0xd8] sm:$0xff] %v4843_v41  }
 0x1fe   : > { %v3251_v52 = vmul.f32 0.01, %v2781_v46  ;;  %v2784_v53 = vadd.f32 %v2783_v48, %v2239_v47  ;;  %2450 = vmatmul.mubr.bf16.gmra.mrb[220].mxu1 %v5719_v40  ;;  %vm3123_vm8 = vcmp.ge.f32.partialorder %v2781_v46, 0.0  ;;  %2995 = vmatmul.mubr.bf16.gmra.mrb[220].mxu0 %v5720_v44  ;;  %v5737_v40 = vld [vmem:[%s5884_s26 + $0x740] ss:$16 sps:$4 sm:$0xff]  }
 0x1ff   : > { %2457 = vmatprep.mubr.bf16.mxu1 %v5721_v45  ;;  %3002 = vmatprep.mubr.bf16.mxu0 %v5723_v50  ;;  %v5738_v44 = vld [vmem:[%s5884_s26 + $0x748] ss:$16 sps:$4 sm:$0xff]   ;;  %v5739_v45 = vld [vmem:[%s5884_s26 + $0x764] ss:$16 sps:$4 sm:$0xff]   ;;  %v5741_v50 = vld [vmem:[%s5884_s26 + $0x76c] ss:$16 sps:$4 sm:$0xff]  }
 0x200   : > { %vm3124_vm9 = vcmp.ge.f32.partialorder %v2784_v53, 0.0  ;;  %v3252_v54 = vmul.f32 0.01, %v2784_v53  ;;  %v3379_v56 = vsel %vm3123_vm8, %v2781_v46, %v3251_v52 }
 0x201   : > { %v2243_v55 = vpop.f32.mrb[116].mxu1  ;;  %v2788_v59 = vpop.f32.mrb[116].mxu0 }
 0x202   : > { %v3380_v57 = vsel %vm3124_vm9, %v2784_v53, %v3252_v54  ;;  %v2244_v58 = vadd.f32 %v6200_v26, %v2243_v55  ;;  %v2245_v60 = vpop.f32.mrb[117].mxu1  ;;  %v2790_v63 = vpop.f32.mrb[117].mxu0 }
 0x203   : > { %v4848_v62 = vpack.c.bf16 %v3380_v57, %v3379_v56  ;;  %v2246_v0 = vpop.f32.mrb[118].mxu1  ;;  %v2791_v5 = vpop.f32.mrb[118].mxu0 }
 0x204   : > { %v2789_v3 = vadd.f32 %v2788_v59, %v2244_v58  ;;  %v2247_v4 = vadd.f32 %v6200_v26, %v2246_v0  ;;  %v2248_v6 = vpop.f32.mrb[119].mxu1  ;;  %v2793_v8 = vpop.f32.mrb[119].mxu0 }
 0x205   : > { %5052 = vst [vmem:[%s6072_s14 + $0xe0] sm:$0xff] %v4848_v62  }
 0x206   : > { %v3253_v9 = vmul.f32 0.01, %v2789_v3  ;;  %v2792_v10 = vadd.f32 %v2791_v5, %v2247_v4  ;;  %2458 = vmatmul.mubr.bf16.gmra.mrb[224].mxu1 %v5725_v61  ;;  %vm3125_vm10 = vcmp.ge.f32.partialorder %v2789_v3, 0.0  ;;  %3003 = vmatmul.mubr.bf16.gmra.mrb[224].mxu0 %v5726_v1  ;;  %v5743_v61 = vld [vmem:[%s5884_s26 + $0x760] ss:$16 sps:$4 sm:$0xff]  }
 0x207   : > { %2465 = vmatprep.mubr.bf16.mxu1 %v5727_v2  ;;  %3010 = vmatprep.mubr.bf16.mxu0 %v5729_v7  ;;  %v5744_v1 = vld [vmem:[%s5884_s26 + $0x768] ss:$16 sps:$4 sm:$0xff]   ;;  %v5745_v2 = vld [vmem:[%s5884_s26 + $0x784] ss:$16 sps:$4 sm:$0xff]   ;;  %v5747_v7 = vld [vmem:[%s5884_s26 + $0x78c] ss:$16 sps:$4 sm:$0xff]  }
 0x208   : > { %vm3126_vm11 = vcmp.ge.f32.partialorder %v2792_v10, 0.0  ;;  %v3254_v11 = vmul.f32 0.01, %v2792_v10  ;;  %v3381_v13 = vsel %vm3125_vm10, %v2789_v3, %v3253_v9 }
 0x209   : > { %v2251_v12 = vpop.f32.mrb[120].mxu1  ;;  %v2796_v17 = vpop.f32.mrb[120].mxu0 }
 0x20a   : > { %v3382_v14 = vsel %vm3126_vm11, %v2792_v10, %v3254_v11  ;;  %v2252_v16 = vadd.f32 %v6200_v26, %v2251_v12  ;;  %v2253_v18 = vpop.f32.mrb[121].mxu1  ;;  %v2798_v21 = vpop.f32.mrb[121].mxu0 }
 0x20b   : > { %v4853_v20 = vpack.c.bf16 %v3382_v14, %v3381_v13  ;;  %v2254_v22 = vpop.f32.mrb[122].mxu1  ;;  %v2799_v28 = vpop.f32.mrb[122].mxu0 }
 0x20c   : > { %v2797_v25 = vadd.f32 %v2796_v17, %v2252_v16  ;;  %v2255_v27 = vadd.f32 %v6200_v26, %v2254_v22  ;;  %v2256_v29 = vpop.f32.mrb[123].mxu1  ;;  %v2801_v15 = vpop.f32.mrb[123].mxu0 }
 0x20d   : > { %5053 = vst [vmem:[%s6072_s14 + $0xe8] sm:$0xff] %v4853_v20  }
 0x20e   : > { %v3255_v31 = vmul.f32 0.01, %v2797_v25  ;;  %v2800_v32 = vadd.f32 %v2799_v28, %v2255_v27  ;;  %2466 = vmatmul.mubr.bf16.gmra.mrb[228].mxu1 %v5731_v19  ;;  %vm3127_vm12 = vcmp.ge.f32.partialorder %v2797_v25, 0.0  ;;  %3011 = vmatmul.mubr.bf16.gmra.mrb[228].mxu0 %v5732_v23  ;;  %v5749_v19 = vld [vmem:[%s5884_s26 + $0x780] ss:$16 sps:$4 sm:$0xff]  }
 0x20f   : > { %2473 = vmatprep.mubr.bf16.mxu1 %v5733_v24  ;;  %3018 = vmatprep.mubr.bf16.mxu0 %v5735_v30  ;;  %v5750_v23 = vld [vmem:[%s5884_s26 + $0x788] ss:$16 sps:$4 sm:$0xff]   ;;  %v5751_v24 = vld [vmem:[%s5884_s26 + $0x7a4] ss:$16 sps:$4 sm:$0xff]   ;;  %v5753_v30 = vld [vmem:[%s5884_s26 + $0x7ac] ss:$16 sps:$4 sm:$0xff]  }
 0x210   : > { %vm3128_vm13 = vcmp.ge.f32.partialorder %v2800_v32, 0.0  ;;  %v3256_v33 = vmul.f32 0.01, %v2800_v32  ;;  %v3383_v35 = vsel %vm3127_vm12, %v2797_v25, %v3255_v31 }
 0x211   : > { %v2259_v34 = vpop.f32.mrb[124].mxu1  ;;  %v2804_v38 = vpop.f32.mrb[124].mxu0 }
 0x212   : > { %v3384_v36 = vsel %vm3128_vm13, %v2800_v32, %v3256_v33  ;;  %v2260_v37 = vadd.f32 %v6200_v26, %v2259_v34  ;;  %v2261_v39 = vpop.f32.mrb[125].mxu1  ;;  %v2806_v42 = vpop.f32.mrb[125].mxu0 }
 0x213   : > { %v4858_v41 = vpack.c.bf16 %v3384_v36, %v3383_v35  ;;  %v2262_v43 = vpop.f32.mrb[126].mxu1  ;;  %v2807_v48 = vpop.f32.mrb[126].mxu0 }
 0x214   : > { %v2805_v46 = vadd.f32 %v2804_v38, %v2260_v37  ;;  %v2263_v47 = vadd.f32 %v6200_v26, %v2262_v43  ;;  %v2264_v49 = vpop.f32.mrb[127].mxu1  ;;  %v2809_v51 = vpop.f32.mrb[127].mxu0 }
 0x215   : > { %5054 = vst [vmem:[%s6072_s14 + $0xf0] sm:$0xff] %v4858_v41  }
 0x216   : > { %v3257_v52 = vmul.f32 0.01, %v2805_v46  ;;  %v2808_v53 = vadd.f32 %v2807_v48, %v2263_v47  ;;  %2474 = vmatmul.mubr.bf16.gmra.mrb[232].mxu1 %v5737_v40  ;;  %vm3129_vm14 = vcmp.ge.f32.partialorder %v2805_v46, 0.0  ;;  %3019 = vmatmul.mubr.bf16.gmra.mrb[232].mxu0 %v5738_v44  ;;  %v5755_v40 = vld [vmem:[%s5884_s26 + $0x7a0] ss:$16 sps:$4 sm:$0xff]  }
 0x217   : > { %2481 = vmatprep.mubr.bf16.mxu1 %v5739_v45  ;;  %3026 = vmatprep.mubr.bf16.mxu0 %v5741_v50  ;;  %v5756_v44 = vld [vmem:[%s5884_s26 + $0x7a8] ss:$16 sps:$4 sm:$0xff]   ;;  %v5757_v45 = vld [vmem:[%s5884_s26 + $0x7c4] ss:$16 sps:$4 sm:$0xff]   ;;  %v5759_v50 = vld [vmem:[%s5884_s26 + $0x7cc] ss:$16 sps:$4 sm:$0xff]  }
 0x218   : > { %vm3130_vm15 = vcmp.ge.f32.partialorder %v2808_v53, 0.0  ;;  %v3258_v54 = vmul.f32 0.01, %v2808_v53  ;;  %v3385_v56 = vsel %vm3129_vm14, %v2805_v46, %v3257_v52 }
 0x219   : > { %v2267_v55 = vpop.f32.mrb[128].mxu1  ;;  %v2812_v59 = vpop.f32.mrb[128].mxu0 }
 0x21a   : > { %v3386_v57 = vsel %vm3130_vm15, %v2808_v53, %v3258_v54  ;;  %v2268_v58 = vadd.f32 %v6200_v26, %v2267_v55  ;;  %v2269_v60 = vpop.f32.mrb[129].mxu1  ;;  %v2814_v63 = vpop.f32.mrb[129].mxu0 }
 0x21b   : > { %v4863_v62 = vpack.c.bf16 %v3386_v57, %v3385_v56  ;;  %v2270_v0 = vpop.f32.mrb[130].mxu1  ;;  %v2815_v5 = vpop.f32.mrb[130].mxu0 }
 0x21c   : > { %v2813_v3 = vadd.f32 %v2812_v59, %v2268_v58  ;;  %v2271_v4 = vadd.f32 %v6200_v26, %v2270_v0  ;;  %v2272_v6 = vpop.f32.mrb[131].mxu1  ;;  %v2817_v8 = vpop.f32.mrb[131].mxu0 }
 0x21d   : > { %5055 = vst [vmem:[%s6072_s14 + $0xf8] sm:$0xff] %v4863_v62  }
 0x21e   : > { %v3259_v9 = vmul.f32 0.01, %v2813_v3  ;;  %v2816_v10 = vadd.f32 %v2815_v5, %v2271_v4  ;;  %2482 = vmatmul.mubr.bf16.gmra.mrb[236].mxu1 %v5743_v61  ;;  %vm3131_vm0 = vcmp.ge.f32.partialorder %v2813_v3, 0.0  ;;  %3027 = vmatmul.mubr.bf16.gmra.mrb[236].mxu0 %v5744_v1  ;;  %v5761_v61 = vld [vmem:[%s5884_s26 + $0x7c0] ss:$16 sps:$4 sm:$0xff]  }
 0x21f   : > { %2489 = vmatprep.mubr.bf16.mxu1 %v5745_v2  ;;  %3034 = vmatprep.mubr.bf16.mxu0 %v5747_v7  ;;  %v5762_v1 = vld [vmem:[%s5884_s26 + $0x7c8] ss:$16 sps:$4 sm:$0xff]   ;;  %v5763_v2 = vld [vmem:[%s5884_s26 + $0x7e4] ss:$16 sps:$4 sm:$0xff]   ;;  %v5765_v7 = vld [vmem:[%s5884_s26 + $0x7ec] ss:$16 sps:$4 sm:$0xff]  }
 0x220   : > { %vm3132_vm1 = vcmp.ge.f32.partialorder %v2816_v10, 0.0  ;;  %v3260_v11 = vmul.f32 0.01, %v2816_v10  ;;  %v3387_v13 = vsel %vm3131_vm0, %v2813_v3, %v3259_v9 }
 0x221   : > { %v2275_v12 = vpop.f32.mrb[132].mxu1  ;;  %v2820_v17 = vpop.f32.mrb[132].mxu0 }
 0x222   : > { %v3388_v14 = vsel %vm3132_vm1, %v2816_v10, %v3260_v11  ;;  %v2276_v16 = vadd.f32 %v6200_v26, %v2275_v12  ;;  %v2277_v18 = vpop.f32.mrb[133].mxu1  ;;  %v2822_v21 = vpop.f32.mrb[133].mxu0 }
 0x223   : > { %v4868_v20 = vpack.c.bf16 %v3388_v14, %v3387_v13  ;;  %v2278_v22 = vpop.f32.mrb[134].mxu1  ;;  %v2823_v28 = vpop.f32.mrb[134].mxu0 }
 0x224   : > { %v2821_v25 = vadd.f32 %v2820_v17, %v2276_v16  ;;  %v2279_v27 = vadd.f32 %v6200_v26, %v2278_v22  ;;  %v2280_v29 = vpop.f32.mrb[135].mxu1  ;;  %v2825_v15 = vpop.f32.mrb[135].mxu0 }
 0x225   : > { %5056 = vst [vmem:[%s6072_s14 + $0x100] sm:$0xff] %v4868_v20  }
 0x226   : > { %v3261_v31 = vmul.f32 0.01, %v2821_v25  ;;  %v2824_v32 = vadd.f32 %v2823_v28, %v2279_v27  ;;  %2490 = vmatmul.mubr.bf16.gmra.mrb[240].mxu1 %v5749_v19  ;;  %vm3133_vm2 = vcmp.ge.f32.partialorder %v2821_v25, 0.0  ;;  %3035 = vmatmul.mubr.bf16.gmra.mrb[240].mxu0 %v5750_v23  ;;  %v5767_v19 = vld [vmem:[%s5884_s26 + $0x7e0] ss:$16 sps:$4 sm:$0xff]  }
 0x227   : > { %2497 = vmatprep.mubr.bf16.mxu1 %v5751_v24  ;;  %3042 = vmatprep.mubr.bf16.mxu0 %v5753_v30  ;;  %v5768_v23 = vld [vmem:[%s5884_s26 + $0x7e8] ss:$16 sps:$4 sm:$0xff]  }
 0x228   : > { %vm3134_vm3 = vcmp.ge.f32.partialorder %v2824_v32, 0.0  ;;  %v3262_v33 = vmul.f32 0.01, %v2824_v32  ;;  %v3389_v35 = vsel %vm3133_vm2, %v2821_v25, %v3261_v31 }
 0x229   : > { %v2283_v34 = vpop.f32.mrb[136].mxu1  ;;  %v2828_v38 = vpop.f32.mrb[136].mxu0 }
 0x22a   : > { %v3390_v36 = vsel %vm3134_vm3, %v2824_v32, %v3262_v33  ;;  %v2284_v37 = vadd.f32 %v6200_v26, %v2283_v34  ;;  %v2285_v39 = vpop.f32.mrb[137].mxu1  ;;  %v2830_v42 = vpop.f32.mrb[137].mxu0 }
 0x22b   : > { %v4873_v41 = vpack.c.bf16 %v3390_v36, %v3389_v35  ;;  %v2286_v43 = vpop.f32.mrb[138].mxu1  ;;  %v2831_v48 = vpop.f32.mrb[138].mxu0  ;;  %v6332_v35 = vld [vmem:[%s6422_s2] ss:$0 sm:$0xff] }
 0x22c   : > { %v2829_v46 = vadd.f32 %v2828_v38, %v2284_v37  ;;  %v2287_v47 = vadd.f32 %v6200_v26, %v2286_v43  ;;  %v2288_v49 = vpop.f32.mrb[139].mxu1  ;;  %v2833_v51 = vpop.f32.mrb[139].mxu0 }
 0x22d   : > { %5057 = vst [vmem:[%s6072_s14 + $0x108] sm:$0xff] %v4873_v41  }
 0x22e   : > { %v3263_v52 = vmul.f32 0.01, %v2829_v46  ;;  %v2832_v53 = vadd.f32 %v2831_v48, %v2287_v47  ;;  %2498 = vmatmul.mubr.bf16.gmra.mrb[244].mxu1 %v5755_v40  ;;  %vm3135_vm4 = vcmp.ge.f32.partialorder %v2829_v46, 0.0  ;;  %3043 = vmatmul.mubr.bf16.gmra.mrb[244].mxu0 %v5756_v44 }
 0x22f   : > { %2505 = vmatprep.mubr.bf16.mxu1 %v5757_v45  ;;  %3050 = vmatprep.mubr.bf16.mxu0 %v5759_v50 }
 0x230   : > { %vm3136_vm5 = vcmp.ge.f32.partialorder %v2832_v53, 0.0  ;;  %v3264_v54 = vmul.f32 0.01, %v2832_v53  ;;  %v3391_v56 = vsel %vm3135_vm4, %v2829_v46, %v3263_v52 }
 0x231   : > { %v2291_v55 = vpop.f32.mrb[140].mxu1  ;;  %v2836_v59 = vpop.f32.mrb[140].mxu0 }
 0x232   : > { %v3392_v57 = vsel %vm3136_vm5, %v2832_v53, %v3264_v54  ;;  %v2292_v58 = vadd.f32 %v6200_v26, %v2291_v55  ;;  %v2293_v60 = vpop.f32.mrb[141].mxu1  ;;  %v2838_v63 = vpop.f32.mrb[141].mxu0 }
 0x233   : > { %v4878_v62 = vpack.c.bf16 %v3392_v57, %v3391_v56  ;;  %v2294_v0 = vpop.f32.mrb[142].mxu1  ;;  %v2839_v5 = vpop.f32.mrb[142].mxu0 }
 0x234   : > { %v2837_v3 = vadd.f32 %v2836_v59, %v2292_v58  ;;  %v2295_v4 = vadd.f32 %v6200_v26, %v2294_v0  ;;  %v2296_v6 = vpop.f32.mrb[143].mxu1  ;;  %v2841_v8 = vpop.f32.mrb[143].mxu0 }
 0x235   : > { %5058 = vst [vmem:[%s6072_s14 + $0x110] sm:$0xff] %v4878_v62  }
 0x236   : > { %v3265_v9 = vmul.f32 0.01, %v2837_v3  ;;  %v2840_v10 = vadd.f32 %v2839_v5, %v2295_v4  ;;  %2506 = vmatmul.mubr.bf16.gmra.mrb[248].mxu1 %v5761_v61  ;;  %vm3137_vm6 = vcmp.ge.f32.partialorder %v2837_v3, 0.0  ;;  %3051 = vmatmul.mubr.bf16.gmra.mrb[248].mxu0 %v5762_v1 }
 0x237   : > { %2513 = vmatprep.mubr.bf16.mxu1 %v5763_v2  ;;  %3058 = vmatprep.mubr.bf16.mxu0 %v5765_v7 }
 0x238   : > { %vm3138_vm7 = vcmp.ge.f32.partialorder %v2840_v10, 0.0  ;;  %v3266_v11 = vmul.f32 0.01, %v2840_v10  ;;  %v3393_v13 = vsel %vm3137_vm6, %v2837_v3, %v3265_v9 }
 0x239   : > { %v2299_v12 = vpop.f32.mrb[144].mxu1  ;;  %v2844_v17 = vpop.f32.mrb[144].mxu0 }
 0x23a   : > { %v3394_v14 = vsel %vm3138_vm7, %v2840_v10, %v3266_v11  ;;  %v2300_v16 = vadd.f32 %v6200_v26, %v2299_v12  ;;  %v2301_v18 = vpop.f32.mrb[145].mxu1  ;;  %v2846_v21 = vpop.f32.mrb[145].mxu0 }
 0x23b   : > { %v4883_v20 = vpack.c.bf16 %v3394_v14, %v3393_v13  ;;  %v2302_v22 = vpop.f32.mrb[146].mxu1  ;;  %v2847_v27 = vpop.f32.mrb[146].mxu0 }
 0x23c   : > { %v2845_v24 = vadd.f32 %v2844_v17, %v2300_v16  ;;  %v2303_v25 = vadd.f32 %v6200_v26, %v2302_v22  ;;  %v2304_v28 = vpop.f32.mrb[147].mxu1  ;;  %v2849_v29 = vpop.f32.mrb[147].mxu0 }
 0x23d   : > { %5059 = vst [vmem:[%s6072_s14 + $0x118] sm:$0xff] %v4883_v20  }
 0x23e   : > { %v3267_v30 = vmul.f32 0.01, %v2845_v24  ;;  %v2848_v15 = vadd.f32 %v2847_v27, %v2303_v25  ;;  %2514 = vmatmul.mubr.bf16.gmra.mrb[252].mxu1 %v5767_v19  ;;  %vm3139_vm8 = vcmp.ge.f32.partialorder %v2845_v24, 0.0  ;;  %3059 = vmatmul.mubr.bf16.gmra.mrb[252].mxu0 %v5768_v23 }
 0x240   : > { %vm3140_vm9 = vcmp.ge.f32.partialorder %v2848_v15, 0.0  ;;  %v3268_v31 = vmul.f32 0.01, %v2848_v15  ;;  %v3395_v33 = vsel %vm3139_vm8, %v2845_v24, %v3267_v30 }
 0x241   : > { %v2307_v32 = vpop.f32.mrb[148].mxu1  ;;  %v2852_v36 = vpop.f32.mrb[148].mxu0 }
 0x242   : > { %v3396_v34 = vsel %vm3140_vm9, %v2848_v15, %v3268_v31  ;;  %v2308_v26 = vadd.f32 %v6332_v35, %v2307_v32  ;;  %v2309_v37 = vpop.f32.mrb[149].mxu1  ;;  %v2854_v39 = vpop.f32.mrb[149].mxu0 }
 0x243   : > { %v4888_v38 = vpack.c.bf16 %v3396_v34, %v3395_v33  ;;  %v2310_v40 = vpop.f32.mrb[150].mxu1  ;;  %v2855_v43 = vpop.f32.mrb[150].mxu0 }
 0x244   : > { %v2853_v41 = vadd.f32 %v2852_v36, %v2308_v26  ;;  %v2311_v42 = vadd.f32 %v6332_v35, %v2310_v40  ;;  %v2312_v44 = vpop.f32.mrb[151].mxu1  ;;  %v2857_v45 = vpop.f32.mrb[151].mxu0 }
 0x245   : > { %5060 = vst [vmem:[%s6072_s14 + $0x120] sm:$0xff] %v4888_v38  }
 0x246   : > { %v3269_v46 = vmul.f32 0.01, %v2853_v41  ;;  %v2856_v47 = vadd.f32 %v2855_v43, %v2311_v42  ;;  %vm3141_vm10 = vcmp.ge.f32.partialorder %v2853_v41, 0.0 }
 0x248   : > { %vm3142_vm11 = vcmp.ge.f32.partialorder %v2856_v47, 0.0  ;;  %v3270_v48 = vmul.f32 0.01, %v2856_v47  ;;  %v3397_v50 = vsel %vm3141_vm10, %v2853_v41, %v3269_v46 }
 0x249   : > { %v2315_v49 = vpop.f32.mrb[152].mxu1  ;;  %v2860_v53 = vpop.f32.mrb[152].mxu0 }
 0x24a   : > { %v3398_v51 = vsel %vm3142_vm11, %v2856_v47, %v3270_v48  ;;  %v2316_v52 = vadd.f32 %v6332_v35, %v2315_v49  ;;  %v2317_v54 = vpop.f32.mrb[153].mxu1  ;;  %v2862_v56 = vpop.f32.mrb[153].mxu0 }
 0x24b   : > { %v4893_v55 = vpack.c.bf16 %v3398_v51, %v3397_v50  ;;  %v2318_v57 = vpop.f32.mrb[154].mxu1  ;;  %v2863_v60 = vpop.f32.mrb[154].mxu0 }
 0x24c   : > { %v2861_v58 = vadd.f32 %v2860_v53, %v2316_v52  ;;  %v2319_v59 = vadd.f32 %v6332_v35, %v2318_v57  ;;  %v2320_v61 = vpop.f32.mrb[155].mxu1  ;;  %v2865_v62 = vpop.f32.mrb[155].mxu0 }
 0x24d   : > { %5061 = vst [vmem:[%s6072_s14 + $0x128] sm:$0xff] %v4893_v55  }
 0x24e   : > { %v3271_v63 = vmul.f32 0.01, %v2861_v58  ;;  %v2864_v0 = vadd.f32 %v2863_v60, %v2319_v59  ;;  %vm3143_vm12 = vcmp.ge.f32.partialorder %v2861_v58, 0.0 }
 0x250   : > { %vm3144_vm13 = vcmp.ge.f32.partialorder %v2864_v0, 0.0  ;;  %v3272_v1 = vmul.f32 0.01, %v2864_v0  ;;  %v3399_v3 = vsel %vm3143_vm12, %v2861_v58, %v3271_v63 }
 0x251   : > { %v2323_v2 = vpop.f32.mrb[156].mxu1  ;;  %v2868_v6 = vpop.f32.mrb[156].mxu0 }
 0x252   : > { %v3400_v4 = vsel %vm3144_vm13, %v2864_v0, %v3272_v1  ;;  %v2324_v5 = vadd.f32 %v6332_v35, %v2323_v2  ;;  %v2325_v7 = vpop.f32.mrb[157].mxu1  ;;  %v2870_v9 = vpop.f32.mrb[157].mxu0 }
 0x253   : > { %v4898_v8 = vpack.c.bf16 %v3400_v4, %v3399_v3  ;;  %v2326_v10 = vpop.f32.mrb[158].mxu1  ;;  %v2871_v13 = vpop.f32.mrb[158].mxu0 }
 0x254   : > { %v2869_v11 = vadd.f32 %v2868_v6, %v2324_v5  ;;  %v2327_v12 = vadd.f32 %v6332_v35, %v2326_v10  ;;  %v2328_v14 = vpop.f32.mrb[159].mxu1  ;;  %v2873_v16 = vpop.f32.mrb[159].mxu0 }
 0x255   : > { %5062 = vst [vmem:[%s6072_s14 + $0x130] sm:$0xff] %v4898_v8  }
 0x256   : > { %v3273_v17 = vmul.f32 0.01, %v2869_v11  ;;  %v2872_v18 = vadd.f32 %v2871_v13, %v2327_v12  ;;  %vm3145_vm14 = vcmp.ge.f32.partialorder %v2869_v11, 0.0 }
 0x258   : > { %vm3146_vm15 = vcmp.ge.f32.partialorder %v2872_v18, 0.0  ;;  %v3274_v19 = vmul.f32 0.01, %v2872_v18  ;;  %v3401_v21 = vsel %vm3145_vm14, %v2869_v11, %v3273_v17 }
 0x259   : > { %v2331_v20 = vpop.f32.mrb[160].mxu1  ;;  %v2876_v24 = vpop.f32.mrb[160].mxu0 }
 0x25a   : > { %v3402_v22 = vsel %vm3146_vm15, %v2872_v18, %v3274_v19  ;;  %v2332_v23 = vadd.f32 %v6332_v35, %v2331_v20  ;;  %v2333_v25 = vpop.f32.mrb[161].mxu1  ;;  %v2878_v28 = vpop.f32.mrb[161].mxu0 }
 0x25b   : > { %v4903_v27 = vpack.c.bf16 %v3402_v22, %v3401_v21  ;;  %v2334_v29 = vpop.f32.mrb[162].mxu1  ;;  %v2879_v31 = vpop.f32.mrb[162].mxu0 }
 0x25c   : > { %v2877_v30 = vadd.f32 %v2876_v24, %v2332_v23  ;;  %v2335_v15 = vadd.f32 %v6332_v35, %v2334_v29  ;;  %v2336_v32 = vpop.f32.mrb[163].mxu1  ;;  %v2881_v33 = vpop.f32.mrb[163].mxu0 }
 0x25d   : > { %5063 = vst [vmem:[%s6072_s14 + $0x138] sm:$0xff] %v4903_v27  }
 0x25e   : > { %v3275_v34 = vmul.f32 0.01, %v2877_v30  ;;  %v2880_v26 = vadd.f32 %v2879_v31, %v2335_v15  ;;  %vm3147_vm0 = vcmp.ge.f32.partialorder %v2877_v30, 0.0 }
 0x260   : > { %vm3148_vm1 = vcmp.ge.f32.partialorder %v2880_v26, 0.0  ;;  %v3276_v36 = vmul.f32 0.01, %v2880_v26  ;;  %v3403_v38 = vsel %vm3147_vm0, %v2877_v30, %v3275_v34 }
 0x261   : > { %v2339_v37 = vpop.f32.mrb[164].mxu1  ;;  %v2884_v41 = vpop.f32.mrb[164].mxu0 }
 0x262   : > { %v3404_v39 = vsel %vm3148_vm1, %v2880_v26, %v3276_v36  ;;  %v2340_v40 = vadd.f32 %v6332_v35, %v2339_v37  ;;  %v2341_v42 = vpop.f32.mrb[165].mxu1  ;;  %v2886_v44 = vpop.f32.mrb[165].mxu0 }
 0x263   : > { %v4908_v43 = vpack.c.bf16 %v3404_v39, %v3403_v38  ;;  %v2342_v45 = vpop.f32.mrb[166].mxu1  ;;  %v2887_v48 = vpop.f32.mrb[166].mxu0 }
 0x264   : > { %v2885_v46 = vadd.f32 %v2884_v41, %v2340_v40  ;;  %v2343_v47 = vadd.f32 %v6332_v35, %v2342_v45  ;;  %v2344_v49 = vpop.f32.mrb[167].mxu1  ;;  %v2889_v50 = vpop.f32.mrb[167].mxu0 }
 0x265   : > { %5064 = vst [vmem:[%s6072_s14 + $0x140] sm:$0xff] %v4908_v43  }
 0x266   : > { %v3277_v51 = vmul.f32 0.01, %v2885_v46  ;;  %v2888_v52 = vadd.f32 %v2887_v48, %v2343_v47  ;;  %vm3149_vm2 = vcmp.ge.f32.partialorder %v2885_v46, 0.0 }
 0x268   : > { %vm3150_vm3 = vcmp.ge.f32.partialorder %v2888_v52, 0.0  ;;  %v3278_v53 = vmul.f32 0.01, %v2888_v52  ;;  %v3405_v55 = vsel %vm3149_vm2, %v2885_v46, %v3277_v51 }
 0x269   : > { %v2347_v54 = vpop.f32.mrb[168].mxu1  ;;  %v2892_v58 = vpop.f32.mrb[168].mxu0 }
 0x26a   : > { %v3406_v56 = vsel %vm3150_vm3, %v2888_v52, %v3278_v53  ;;  %v2348_v57 = vadd.f32 %v6332_v35, %v2347_v54  ;;  %v2349_v59 = vpop.f32.mrb[169].mxu1  ;;  %v2894_v61 = vpop.f32.mrb[169].mxu0 }
 0x26b   : > { %v4913_v60 = vpack.c.bf16 %v3406_v56, %v3405_v55  ;;  %v2350_v62 = vpop.f32.mrb[170].mxu1  ;;  %v2895_v1 = vpop.f32.mrb[170].mxu0 }
 0x26c   : > { %v2893_v63 = vadd.f32 %v2892_v58, %v2348_v57  ;;  %v2351_v0 = vadd.f32 %v6332_v35, %v2350_v62  ;;  %v2352_v2 = vpop.f32.mrb[171].mxu1  ;;  %v2897_v3 = vpop.f32.mrb[171].mxu0 }
 0x26d   : > { %5065 = vst [vmem:[%s6072_s14 + $0x148] sm:$0xff] %v4913_v60  }
 0x26e   : > { %v3279_v4 = vmul.f32 0.01, %v2893_v63  ;;  %v2896_v5 = vadd.f32 %v2895_v1, %v2351_v0  ;;  %vm3151_vm4 = vcmp.ge.f32.partialorder %v2893_v63, 0.0 }
 0x270   : > { %vm3152_vm5 = vcmp.ge.f32.partialorder %v2896_v5, 0.0  ;;  %v3280_v6 = vmul.f32 0.01, %v2896_v5  ;;  %v3407_v8 = vsel %vm3151_vm4, %v2893_v63, %v3279_v4 }
 0x271   : > { %v2355_v7 = vpop.f32.mrb[172].mxu1  ;;  %v2900_v11 = vpop.f32.mrb[172].mxu0 }
 0x272   : > { %v3408_v9 = vsel %vm3152_vm5, %v2896_v5, %v3280_v6  ;;  %v2356_v10 = vadd.f32 %v6332_v35, %v2355_v7  ;;  %v2357_v12 = vpop.f32.mrb[173].mxu1  ;;  %v2902_v14 = vpop.f32.mrb[173].mxu0 }
 0x273   : > { %v4918_v13 = vpack.c.bf16 %v3408_v9, %v3407_v8  ;;  %v2358_v16 = vpop.f32.mrb[174].mxu1  ;;  %v2903_v19 = vpop.f32.mrb[174].mxu0 }
 0x274   : > { %v2901_v17 = vadd.f32 %v2900_v11, %v2356_v10  ;;  %v2359_v18 = vadd.f32 %v6332_v35, %v2358_v16  ;;  %v2360_v20 = vpop.f32.mrb[175].mxu1  ;;  %v2905_v21 = vpop.f32.mrb[175].mxu0 }
 0x275   : > { %5066 = vst [vmem:[%s6072_s14 + $0x150] sm:$0xff] %v4918_v13  }
 0x276   : > { %v3281_v22 = vmul.f32 0.01, %v2901_v17  ;;  %v2904_v23 = vadd.f32 %v2903_v19, %v2359_v18  ;;  %vm3153_vm6 = vcmp.ge.f32.partialorder %v2901_v17, 0.0 }
 0x278   : > { %vm3154_vm7 = vcmp.ge.f32.partialorder %v2904_v23, 0.0  ;;  %v3282_v24 = vmul.f32 0.01, %v2904_v23  ;;  %v3409_v27 = vsel %vm3153_vm6, %v2901_v17, %v3281_v22 }
 0x279   : > { %v2363_v25 = vpop.f32.mrb[176].mxu1  ;;  %v2908_v30 = vpop.f32.mrb[176].mxu0 }
 0x27a   : > { %v3410_v28 = vsel %vm3154_vm7, %v2904_v23, %v3282_v24  ;;  %v2364_v29 = vadd.f32 %v6332_v35, %v2363_v25  ;;  %v2365_v15 = vpop.f32.mrb[177].mxu1  ;;  %v2910_v32 = vpop.f32.mrb[177].mxu0 }
 0x27b   : > { %v4923_v31 = vpack.c.bf16 %v3410_v28, %v3409_v27  ;;  %v2366_v33 = vpop.f32.mrb[178].mxu1  ;;  %v2911_v36 = vpop.f32.mrb[178].mxu0 }
 0x27c   : > { %v2909_v34 = vadd.f32 %v2908_v30, %v2364_v29  ;;  %v2367_v26 = vadd.f32 %v6332_v35, %v2366_v33  ;;  %v2368_v37 = vpop.f32.mrb[179].mxu1  ;;  %v2913_v38 = vpop.f32.mrb[179].mxu0 }
 0x27d   : > { %5067 = vst [vmem:[%s6072_s14 + $0x158] sm:$0xff] %v4923_v31  }
 0x27e   : > { %v3283_v39 = vmul.f32 0.01, %v2909_v34  ;;  %v2912_v40 = vadd.f32 %v2911_v36, %v2367_v26  ;;  %vm3155_vm8 = vcmp.ge.f32.partialorder %v2909_v34, 0.0 }
 0x280   : > { %vm3156_vm9 = vcmp.ge.f32.partialorder %v2912_v40, 0.0  ;;  %v3284_v41 = vmul.f32 0.01, %v2912_v40  ;;  %v3411_v43 = vsel %vm3155_vm8, %v2909_v34, %v3283_v39 }
 0x281   : > { %v2371_v42 = vpop.f32.mrb[180].mxu1  ;;  %v2916_v46 = vpop.f32.mrb[180].mxu0 }
 0x282   : > { %v3412_v44 = vsel %vm3156_vm9, %v2912_v40, %v3284_v41  ;;  %v2372_v45 = vadd.f32 %v6332_v35, %v2371_v42  ;;  %v2373_v47 = vpop.f32.mrb[181].mxu1  ;;  %v2918_v49 = vpop.f32.mrb[181].mxu0 }
 0x283   : > { %v4928_v48 = vpack.c.bf16 %v3412_v44, %v3411_v43  ;;  %v2374_v50 = vpop.f32.mrb[182].mxu1  ;;  %v2919_v53 = vpop.f32.mrb[182].mxu0 }
 0x284   : > { %v2917_v51 = vadd.f32 %v2916_v46, %v2372_v45  ;;  %v2375_v52 = vadd.f32 %v6332_v35, %v2374_v50  ;;  %v2376_v54 = vpop.f32.mrb[183].mxu1  ;;  %v2921_v55 = vpop.f32.mrb[183].mxu0 }
 0x285   : > { %5068 = vst [vmem:[%s6072_s14 + $0x160] sm:$0xff] %v4928_v48  }
 0x286   : > { %v3285_v56 = vmul.f32 0.01, %v2917_v51  ;;  %v2920_v57 = vadd.f32 %v2919_v53, %v2375_v52  ;;  %vm3157_vm10 = vcmp.ge.f32.partialorder %v2917_v51, 0.0 }
 0x288   : > { %vm3158_vm11 = vcmp.ge.f32.partialorder %v2920_v57, 0.0  ;;  %v3286_v58 = vmul.f32 0.01, %v2920_v57  ;;  %v3413_v60 = vsel %vm3157_vm10, %v2917_v51, %v3285_v56 }
 0x289   : > { %v2379_v59 = vpop.f32.mrb[184].mxu1  ;;  %v2924_v63 = vpop.f32.mrb[184].mxu0 }
 0x28a   : > { %v3414_v61 = vsel %vm3158_vm11, %v2920_v57, %v3286_v58  ;;  %v2380_v62 = vadd.f32 %v6332_v35, %v2379_v59  ;;  %v2381_v0 = vpop.f32.mrb[185].mxu1  ;;  %v2926_v2 = vpop.f32.mrb[185].mxu0 }
 0x28b   : > { %v4933_v1 = vpack.c.bf16 %v3414_v61, %v3413_v60  ;;  %v2382_v3 = vpop.f32.mrb[186].mxu1  ;;  %v2927_v6 = vpop.f32.mrb[186].mxu0 }
 0x28c   : > { %v2925_v4 = vadd.f32 %v2924_v63, %v2380_v62  ;;  %v2383_v5 = vadd.f32 %v6332_v35, %v2382_v3  ;;  %v2384_v7 = vpop.f32.mrb[187].mxu1  ;;  %v2929_v8 = vpop.f32.mrb[187].mxu0 }
 0x28d   : > { %5069 = vst [vmem:[%s6072_s14 + $0x168] sm:$0xff] %v4933_v1  }
 0x28e   : > { %v3287_v9 = vmul.f32 0.01, %v2925_v4  ;;  %v2928_v10 = vadd.f32 %v2927_v6, %v2383_v5  ;;  %vm3159_vm12 = vcmp.ge.f32.partialorder %v2925_v4, 0.0 }
 0x290   : > { %vm3160_vm13 = vcmp.ge.f32.partialorder %v2928_v10, 0.0  ;;  %v3288_v11 = vmul.f32 0.01, %v2928_v10  ;;  %v3415_v13 = vsel %vm3159_vm12, %v2925_v4, %v3287_v9 }
 0x291   : > { %v2387_v12 = vpop.f32.mrb[188].mxu1  ;;  %v2932_v17 = vpop.f32.mrb[188].mxu0 }
 0x292   : > { %v3416_v14 = vsel %vm3160_vm13, %v2928_v10, %v3288_v11  ;;  %v2388_v16 = vadd.f32 %v6332_v35, %v2387_v12  ;;  %v2389_v18 = vpop.f32.mrb[189].mxu1  ;;  %v2934_v20 = vpop.f32.mrb[189].mxu0 }
 0x293   : > { %v4938_v19 = vpack.c.bf16 %v3416_v14, %v3415_v13  ;;  %v2390_v21 = vpop.f32.mrb[190].mxu1  ;;  %v2935_v24 = vpop.f32.mrb[190].mxu0 }
 0x294   : > { %v2933_v22 = vadd.f32 %v2932_v17, %v2388_v16  ;;  %v2391_v23 = vadd.f32 %v6332_v35, %v2390_v21  ;;  %v2392_v25 = vpop.f32.mrb[191].mxu1  ;;  %v2937_v27 = vpop.f32.mrb[191].mxu0 }
 0x295   : > { %5070 = vst [vmem:[%s6072_s14 + $0x170] sm:$0xff] %v4938_v19  }
 0x296   : > { %v3289_v28 = vmul.f32 0.01, %v2933_v22  ;;  %v2936_v29 = vadd.f32 %v2935_v24, %v2391_v23  ;;  %vm3161_vm14 = vcmp.ge.f32.partialorder %v2933_v22, 0.0 }
 0x298   : > { %vm3162_vm15 = vcmp.ge.f32.partialorder %v2936_v29, 0.0  ;;  %v3290_v30 = vmul.f32 0.01, %v2936_v29  ;;  %v3417_v31 = vsel %vm3161_vm14, %v2933_v22, %v3289_v28 }
 0x299   : > { %v2395_v15 = vpop.f32.mrb[192].mxu1  ;;  %v2940_v34 = vpop.f32.mrb[192].mxu0 }
 0x29a   : > { %v3418_v32 = vsel %vm3162_vm15, %v2936_v29, %v3290_v30  ;;  %v2396_v33 = vadd.f32 %v6332_v35, %v2395_v15  ;;  %v2397_v26 = vpop.f32.mrb[193].mxu1  ;;  %v2942_v37 = vpop.f32.mrb[193].mxu0 }
 0x29b   : > { %v4943_v36 = vpack.c.bf16 %v3418_v32, %v3417_v31  ;;  %v2398_v38 = vpop.f32.mrb[194].mxu1  ;;  %v2943_v41 = vpop.f32.mrb[194].mxu0 }
 0x29c   : > { %v2941_v39 = vadd.f32 %v2940_v34, %v2396_v33  ;;  %v2399_v40 = vadd.f32 %v6332_v35, %v2398_v38  ;;  %v2400_v42 = vpop.f32.mrb[195].mxu1  ;;  %v2945_v43 = vpop.f32.mrb[195].mxu0 }
 0x29d   : > { %5071 = vst [vmem:[%s6072_s14 + $0x178] sm:$0xff] %v4943_v36  }
 0x29e   : > { %v3291_v44 = vmul.f32 0.01, %v2941_v39  ;;  %v2944_v45 = vadd.f32 %v2943_v41, %v2399_v40  ;;  %vm3163_vm0 = vcmp.ge.f32.partialorder %v2941_v39, 0.0 }
 0x2a0   : > { %vm3164_vm1 = vcmp.ge.f32.partialorder %v2944_v45, 0.0  ;;  %v3292_v46 = vmul.f32 0.01, %v2944_v45  ;;  %v3419_v48 = vsel %vm3163_vm0, %v2941_v39, %v3291_v44 }
 0x2a1   : > { %v2403_v47 = vpop.f32.mrb[196].mxu1  ;;  %v2948_v51 = vpop.f32.mrb[196].mxu0 }
 0x2a2   : > { %v3420_v49 = vsel %vm3164_vm1, %v2944_v45, %v3292_v46  ;;  %v2404_v50 = vadd.f32 %v6332_v35, %v2403_v47  ;;  %v2405_v52 = vpop.f32.mrb[197].mxu1  ;;  %v2950_v54 = vpop.f32.mrb[197].mxu0 }
 0x2a3   : > { %v4948_v53 = vpack.c.bf16 %v3420_v49, %v3419_v48  ;;  %v2406_v55 = vpop.f32.mrb[198].mxu1  ;;  %v2951_v58 = vpop.f32.mrb[198].mxu0 }
 0x2a4   : > { %v2949_v56 = vadd.f32 %v2948_v51, %v2404_v50  ;;  %v2407_v57 = vadd.f32 %v6332_v35, %v2406_v55  ;;  %v2408_v59 = vpop.f32.mrb[199].mxu1  ;;  %v2953_v60 = vpop.f32.mrb[199].mxu0 }
 0x2a5   : > { %5072 = vst [vmem:[%s6072_s14 + $0x180] sm:$0xff] %v4948_v53  }
 0x2a6   : > { %v3293_v61 = vmul.f32 0.01, %v2949_v56  ;;  %v2952_v62 = vadd.f32 %v2951_v58, %v2407_v57  ;;  %vm3165_vm2 = vcmp.ge.f32.partialorder %v2949_v56, 0.0 }
 0x2a8   : > { %vm3166_vm3 = vcmp.ge.f32.partialorder %v2952_v62, 0.0  ;;  %v3294_v63 = vmul.f32 0.01, %v2952_v62  ;;  %v3421_v1 = vsel %vm3165_vm2, %v2949_v56, %v3293_v61 }
 0x2a9   : > { %v2411_v0 = vpop.f32.mrb[200].mxu1  ;;  %v2956_v4 = vpop.f32.mrb[200].mxu0 }
 0x2aa   : > { %v3422_v2 = vsel %vm3166_vm3, %v2952_v62, %v3294_v63  ;;  %v2412_v3 = vadd.f32 %v6332_v35, %v2411_v0  ;;  %v2413_v5 = vpop.f32.mrb[201].mxu1  ;;  %v2958_v7 = vpop.f32.mrb[201].mxu0 }
 0x2ab   : > { %v4953_v6 = vpack.c.bf16 %v3422_v2, %v3421_v1  ;;  %v2414_v8 = vpop.f32.mrb[202].mxu1  ;;  %v2959_v11 = vpop.f32.mrb[202].mxu0 }
 0x2ac   : > { %v2957_v9 = vadd.f32 %v2956_v4, %v2412_v3  ;;  %v2415_v10 = vadd.f32 %v6332_v35, %v2414_v8  ;;  %v2416_v12 = vpop.f32.mrb[203].mxu1  ;;  %v2961_v13 = vpop.f32.mrb[203].mxu0 }
 0x2ad   : > { %5073 = vst [vmem:[%s6072_s14 + $0x188] sm:$0xff] %v4953_v6  }
 0x2ae   : > { %v3295_v14 = vmul.f32 0.01, %v2957_v9  ;;  %v2960_v16 = vadd.f32 %v2959_v11, %v2415_v10  ;;  %vm3167_vm4 = vcmp.ge.f32.partialorder %v2957_v9, 0.0 }
 0x2b0   : > { %vm3168_vm5 = vcmp.ge.f32.partialorder %v2960_v16, 0.0  ;;  %v3296_v17 = vmul.f32 0.01, %v2960_v16  ;;  %v3423_v19 = vsel %vm3167_vm4, %v2957_v9, %v3295_v14 }
 0x2b1   : > { %v2419_v18 = vpop.f32.mrb[204].mxu1  ;;  %v2964_v22 = vpop.f32.mrb[204].mxu0 }
 0x2b2   : > { %v3424_v20 = vsel %vm3168_vm5, %v2960_v16, %v3296_v17  ;;  %v2420_v21 = vadd.f32 %v6332_v35, %v2419_v18  ;;  %v2421_v23 = vpop.f32.mrb[205].mxu1  ;;  %v2966_v25 = vpop.f32.mrb[205].mxu0 }
 0x2b3   : > { %v4958_v24 = vpack.c.bf16 %v3424_v20, %v3423_v19  ;;  %v2422_v27 = vpop.f32.mrb[206].mxu1  ;;  %v2967_v30 = vpop.f32.mrb[206].mxu0 }
 0x2b4   : > { %v2965_v28 = vadd.f32 %v2964_v22, %v2420_v21  ;;  %v2423_v29 = vadd.f32 %v6332_v35, %v2422_v27  ;;  %v2424_v15 = vpop.f32.mrb[207].mxu1  ;;  %v2969_v31 = vpop.f32.mrb[207].mxu0 }
 0x2b5   : > { %5074 = vst [vmem:[%s6072_s14 + $0x190] sm:$0xff] %v4958_v24  }
 0x2b6   : > { %v3297_v32 = vmul.f32 0.01, %v2965_v28  ;;  %v2968_v33 = vadd.f32 %v2967_v30, %v2423_v29  ;;  %vm3169_vm6 = vcmp.ge.f32.partialorder %v2965_v28, 0.0 }
 0x2b8   : > { %vm3170_vm7 = vcmp.ge.f32.partialorder %v2968_v33, 0.0  ;;  %v3298_v34 = vmul.f32 0.01, %v2968_v33  ;;  %v3425_v36 = vsel %vm3169_vm6, %v2965_v28, %v3297_v32 }
 0x2b9   : > { %v2427_v26 = vpop.f32.mrb[208].mxu1  ;;  %v2972_v39 = vpop.f32.mrb[208].mxu0 }
 0x2ba   : > { %v3426_v37 = vsel %vm3170_vm7, %v2968_v33, %v3298_v34  ;;  %v2428_v38 = vadd.f32 %v6332_v35, %v2427_v26  ;;  %v2429_v40 = vpop.f32.mrb[209].mxu1  ;;  %v2974_v42 = vpop.f32.mrb[209].mxu0 }
 0x2bb   : > { %v4963_v41 = vpack.c.bf16 %v3426_v37, %v3425_v36  ;;  %v2430_v43 = vpop.f32.mrb[210].mxu1  ;;  %v2975_v46 = vpop.f32.mrb[210].mxu0 }
 0x2bc   : > { %v2973_v44 = vadd.f32 %v2972_v39, %v2428_v38  ;;  %v2431_v45 = vadd.f32 %v6332_v35, %v2430_v43  ;;  %v2432_v47 = vpop.f32.mrb[211].mxu1  ;;  %v2977_v48 = vpop.f32.mrb[211].mxu0 }
 0x2bd   : > { %5075 = vst [vmem:[%s6072_s14 + $0x198] sm:$0xff] %v4963_v41  }
 0x2be   : > { %v3299_v49 = vmul.f32 0.01, %v2973_v44  ;;  %v2976_v50 = vadd.f32 %v2975_v46, %v2431_v45  ;;  %vm3171_vm8 = vcmp.ge.f32.partialorder %v2973_v44, 0.0 }
 0x2c0   : > { %vm3172_vm9 = vcmp.ge.f32.partialorder %v2976_v50, 0.0  ;;  %v3300_v51 = vmul.f32 0.01, %v2976_v50  ;;  %v3427_v53 = vsel %vm3171_vm8, %v2973_v44, %v3299_v49 }
 0x2c1   : > { %v2435_v52 = vpop.f32.mrb[212].mxu1  ;;  %v2980_v56 = vpop.f32.mrb[212].mxu0 }
 0x2c2   : > { %v3428_v54 = vsel %vm3172_vm9, %v2976_v50, %v3300_v51  ;;  %v2436_v55 = vadd.f32 %v6332_v35, %v2435_v52  ;;  %v2437_v57 = vpop.f32.mrb[213].mxu1  ;;  %v2982_v59 = vpop.f32.mrb[213].mxu0 }
 0x2c3   : > { %v4968_v58 = vpack.c.bf16 %v3428_v54, %v3427_v53  ;;  %v2438_v60 = vpop.f32.mrb[214].mxu1  ;;  %v2983_v63 = vpop.f32.mrb[214].mxu0 }
 0x2c4   : > { %v2981_v61 = vadd.f32 %v2980_v56, %v2436_v55  ;;  %v2439_v62 = vadd.f32 %v6332_v35, %v2438_v60  ;;  %v2440_v0 = vpop.f32.mrb[215].mxu1  ;;  %v2985_v1 = vpop.f32.mrb[215].mxu0 }
 0x2c5   : > { %5076 = vst [vmem:[%s6072_s14 + $0x1a0] sm:$0xff] %v4968_v58  }
 0x2c6   : > { %v3301_v2 = vmul.f32 0.01, %v2981_v61  ;;  %v2984_v3 = vadd.f32 %v2983_v63, %v2439_v62  ;;  %vm3173_vm10 = vcmp.ge.f32.partialorder %v2981_v61, 0.0 }
 0x2c8   : > { %vm3174_vm11 = vcmp.ge.f32.partialorder %v2984_v3, 0.0  ;;  %v3302_v4 = vmul.f32 0.01, %v2984_v3  ;;  %v3429_v6 = vsel %vm3173_vm10, %v2981_v61, %v3301_v2 }
 0x2c9   : > { %v2443_v5 = vpop.f32.mrb[216].mxu1  ;;  %v2988_v9 = vpop.f32.mrb[216].mxu0 }
 0x2ca   : > { %v3430_v7 = vsel %vm3174_vm11, %v2984_v3, %v3302_v4  ;;  %v2444_v8 = vadd.f32 %v6332_v35, %v2443_v5  ;;  %v2445_v10 = vpop.f32.mrb[217].mxu1  ;;  %v2990_v12 = vpop.f32.mrb[217].mxu0 }
 0x2cb   : > { %v4973_v11 = vpack.c.bf16 %v3430_v7, %v3429_v6  ;;  %v2446_v13 = vpop.f32.mrb[218].mxu1  ;;  %v2991_v17 = vpop.f32.mrb[218].mxu0 }
 0x2cc   : > { %v2989_v14 = vadd.f32 %v2988_v9, %v2444_v8  ;;  %v2447_v16 = vadd.f32 %v6332_v35, %v2446_v13  ;;  %v2448_v18 = vpop.f32.mrb[219].mxu1  ;;  %v2993_v19 = vpop.f32.mrb[219].mxu0 }
 0x2cd   : > { %5077 = vst [vmem:[%s6072_s14 + $0x1a8] sm:$0xff] %v4973_v11  }
 0x2ce   : > { %v3303_v20 = vmul.f32 0.01, %v2989_v14  ;;  %v2992_v21 = vadd.f32 %v2991_v17, %v2447_v16  ;;  %vm3175_vm12 = vcmp.ge.f32.partialorder %v2989_v14, 0.0 }
 0x2d0   : > { %vm3176_vm13 = vcmp.ge.f32.partialorder %v2992_v21, 0.0  ;;  %v3304_v22 = vmul.f32 0.01, %v2992_v21  ;;  %v3431_v24 = vsel %vm3175_vm12, %v2989_v14, %v3303_v20 }
 0x2d1   : > { %v2451_v23 = vpop.f32.mrb[220].mxu1  ;;  %v2996_v28 = vpop.f32.mrb[220].mxu0 }
 0x2d2   : > { %v3432_v25 = vsel %vm3176_vm13, %v2992_v21, %v3304_v22  ;;  %v2452_v27 = vadd.f32 %v6332_v35, %v2451_v23  ;;  %v2453_v29 = vpop.f32.mrb[221].mxu1  ;;  %v2998_v15 = vpop.f32.mrb[221].mxu0 }
 0x2d3   : > { %v4978_v30 = vpack.c.bf16 %v3432_v25, %v3431_v24  ;;  %v2454_v31 = vpop.f32.mrb[222].mxu1  ;;  %v2999_v34 = vpop.f32.mrb[222].mxu0 }
 0x2d4   : > { %v2997_v32 = vadd.f32 %v2996_v28, %v2452_v27  ;;  %v2455_v33 = vadd.f32 %v6332_v35, %v2454_v31  ;;  %v2456_v26 = vpop.f32.mrb[223].mxu1  ;;  %v3001_v36 = vpop.f32.mrb[223].mxu0 }
 0x2d5   : > { %5078 = vst [vmem:[%s6072_s14 + $0x1b0] sm:$0xff] %v4978_v30  }
 0x2d6   : > { %v3305_v37 = vmul.f32 0.01, %v2997_v32  ;;  %v3000_v38 = vadd.f32 %v2999_v34, %v2455_v33  ;;  %vm3177_vm14 = vcmp.ge.f32.partialorder %v2997_v32, 0.0 }
 0x2d8   : > { %vm3178_vm15 = vcmp.ge.f32.partialorder %v3000_v38, 0.0  ;;  %v3306_v39 = vmul.f32 0.01, %v3000_v38  ;;  %v3433_v41 = vsel %vm3177_vm14, %v2997_v32, %v3305_v37 }
 0x2d9   : > { %v2459_v40 = vpop.f32.mrb[224].mxu1  ;;  %v3004_v44 = vpop.f32.mrb[224].mxu0 }
 0x2da   : > { %v3434_v42 = vsel %vm3178_vm15, %v3000_v38, %v3306_v39  ;;  %v2460_v43 = vadd.f32 %v6332_v35, %v2459_v40  ;;  %v2461_v45 = vpop.f32.mrb[225].mxu1  ;;  %v3006_v47 = vpop.f32.mrb[225].mxu0 }
 0x2db   : > { %v4983_v46 = vpack.c.bf16 %v3434_v42, %v3433_v41  ;;  %v2462_v48 = vpop.f32.mrb[226].mxu1  ;;  %v3007_v51 = vpop.f32.mrb[226].mxu0 }
 0x2dc   : > { %v3005_v49 = vadd.f32 %v3004_v44, %v2460_v43  ;;  %v2463_v50 = vadd.f32 %v6332_v35, %v2462_v48  ;;  %v2464_v52 = vpop.f32.mrb[227].mxu1  ;;  %v3009_v53 = vpop.f32.mrb[227].mxu0 }
 0x2dd   : > { %5079 = vst [vmem:[%s6072_s14 + $0x1b8] sm:$0xff] %v4983_v46  }
 0x2de   : > { %v3307_v54 = vmul.f32 0.01, %v3005_v49  ;;  %v3008_v55 = vadd.f32 %v3007_v51, %v2463_v50  ;;  %vm3179_vm0 = vcmp.ge.f32.partialorder %v3005_v49, 0.0 }
 0x2e0   : > { %vm3180_vm1 = vcmp.ge.f32.partialorder %v3008_v55, 0.0  ;;  %v3308_v56 = vmul.f32 0.01, %v3008_v55  ;;  %v3435_v58 = vsel %vm3179_vm0, %v3005_v49, %v3307_v54 }
 0x2e1   : > { %v2467_v57 = vpop.f32.mrb[228].mxu1  ;;  %v3012_v61 = vpop.f32.mrb[228].mxu0 }
 0x2e2   : > { %v3436_v59 = vsel %vm3180_vm1, %v3008_v55, %v3308_v56  ;;  %v2468_v60 = vadd.f32 %v6332_v35, %v2467_v57  ;;  %v2469_v62 = vpop.f32.mrb[229].mxu1  ;;  %v3014_v0 = vpop.f32.mrb[229].mxu0 }
 0x2e3   : > { %v4988_v63 = vpack.c.bf16 %v3436_v59, %v3435_v58  ;;  %v2470_v1 = vpop.f32.mrb[230].mxu1  ;;  %v3015_v4 = vpop.f32.mrb[230].mxu0 }
 0x2e4   : > { %v3013_v2 = vadd.f32 %v3012_v61, %v2468_v60  ;;  %v2471_v3 = vadd.f32 %v6332_v35, %v2470_v1  ;;  %v2472_v5 = vpop.f32.mrb[231].mxu1  ;;  %v3017_v6 = vpop.f32.mrb[231].mxu0 }
 0x2e5   : > { %5080 = vst [vmem:[%s6072_s14 + $0x1c0] sm:$0xff] %v4988_v63  }
 0x2e6   : > { %v3309_v7 = vmul.f32 0.01, %v3013_v2  ;;  %v3016_v8 = vadd.f32 %v3015_v4, %v2471_v3  ;;  %vm3181_vm2 = vcmp.ge.f32.partialorder %v3013_v2, 0.0 }
 0x2e8   : > { %vm3182_vm3 = vcmp.ge.f32.partialorder %v3016_v8, 0.0  ;;  %v3310_v9 = vmul.f32 0.01, %v3016_v8  ;;  %v3437_v11 = vsel %vm3181_vm2, %v3013_v2, %v3309_v7 }
 0x2e9   : > { %v2475_v10 = vpop.f32.mrb[232].mxu1  ;;  %v3020_v14 = vpop.f32.mrb[232].mxu0 }
 0x2ea   : > { %v3438_v12 = vsel %vm3182_vm3, %v3016_v8, %v3310_v9  ;;  %v2476_v13 = vadd.f32 %v6332_v35, %v2475_v10  ;;  %v2477_v16 = vpop.f32.mrb[233].mxu1  ;;  %v3022_v18 = vpop.f32.mrb[233].mxu0 }
 0x2eb   : > { %v4993_v17 = vpack.c.bf16 %v3438_v12, %v3437_v11  ;;  %v2478_v19 = vpop.f32.mrb[234].mxu1  ;;  %v3023_v22 = vpop.f32.mrb[234].mxu0 }
 0x2ec   : > { %v3021_v20 = vadd.f32 %v3020_v14, %v2476_v13  ;;  %v2479_v21 = vadd.f32 %v6332_v35, %v2478_v19  ;;  %v2480_v23 = vpop.f32.mrb[235].mxu1  ;;  %v3025_v24 = vpop.f32.mrb[235].mxu0 }
 0x2ed   : > { %5081 = vst [vmem:[%s6072_s14 + $0x1c8] sm:$0xff] %v4993_v17  }
 0x2ee   : > { %v3311_v25 = vmul.f32 0.01, %v3021_v20  ;;  %v3024_v27 = vadd.f32 %v3023_v22, %v2479_v21  ;;  %vm3183_vm4 = vcmp.ge.f32.partialorder %v3021_v20, 0.0 }
 0x2f0   : > { %vm3184_vm5 = vcmp.ge.f32.partialorder %v3024_v27, 0.0  ;;  %v3312_v28 = vmul.f32 0.01, %v3024_v27  ;;  %v3439_v30 = vsel %vm3183_vm4, %v3021_v20, %v3311_v25 }
 0x2f1   : > { %v2483_v29 = vpop.f32.mrb[236].mxu1  ;;  %v3028_v32 = vpop.f32.mrb[236].mxu0 }
 0x2f2   : > { %v3440_v15 = vsel %vm3184_vm5, %v3024_v27, %v3312_v28  ;;  %v2484_v31 = vadd.f32 %v6332_v35, %v2483_v29  ;;  %v2485_v33 = vpop.f32.mrb[237].mxu1  ;;  %v3030_v26 = vpop.f32.mrb[237].mxu0 }
 0x2f3   : > { %v4998_v34 = vpack.c.bf16 %v3440_v15, %v3439_v30  ;;  %v2486_v36 = vpop.f32.mrb[238].mxu1  ;;  %v3031_v39 = vpop.f32.mrb[238].mxu0 }
 0x2f4   : > { %v3029_v37 = vadd.f32 %v3028_v32, %v2484_v31  ;;  %v2487_v38 = vadd.f32 %v6332_v35, %v2486_v36  ;;  %v2488_v40 = vpop.f32.mrb[239].mxu1  ;;  %v3033_v41 = vpop.f32.mrb[239].mxu0  ;;  %v5771_v36 = vld [vmem:[%s6422_s2] ss:$0 sm:$0xff] }
 0x2f5   : > { %5082 = vst [vmem:[%s6072_s14 + $0x1d0] sm:$0xff] %v4998_v34  }
 0x2f6   : > { %v3313_v42 = vmul.f32 0.01, %v3029_v37  ;;  %v3032_v43 = vadd.f32 %v3031_v39, %v2487_v38  ;;  %vm3185_vm6 = vcmp.ge.f32.partialorder %v3029_v37, 0.0 }
 0x2f8   : > { %vm3186_vm7 = vcmp.ge.f32.partialorder %v3032_v43, 0.0  ;;  %v3314_v44 = vmul.f32 0.01, %v3032_v43  ;;  %v3441_v46 = vsel %vm3185_vm6, %v3029_v37, %v3313_v42 }
 0x2f9   : > { %v2491_v45 = vpop.f32.mrb[240].mxu1  ;;  %v3036_v49 = vpop.f32.mrb[240].mxu0 }
 0x2fa   : > { %v3442_v47 = vsel %vm3186_vm7, %v3032_v43, %v3314_v44  ;;  %v2492_v48 = vadd.f32 %v6332_v35, %v2491_v45  ;;  %v2493_v50 = vpop.f32.mrb[241].mxu1  ;;  %v3038_v52 = vpop.f32.mrb[241].mxu0 }
 0x2fb   : > { %v5003_v51 = vpack.c.bf16 %v3442_v47, %v3441_v46  ;;  %v2494_v53 = vpop.f32.mrb[242].mxu1  ;;  %v3039_v56 = vpop.f32.mrb[242].mxu0 }
 0x2fc   : > { %v3037_v54 = vadd.f32 %v3036_v49, %v2492_v48  ;;  %v2495_v55 = vadd.f32 %v6332_v35, %v2494_v53  ;;  %v2496_v57 = vpop.f32.mrb[243].mxu1  ;;  %v3041_v58 = vpop.f32.mrb[243].mxu0 }
 0x2fd   : > { %5083 = vst [vmem:[%s6072_s14 + $0x1d8] sm:$0xff] %v5003_v51  }
 0x2fe   : > { %v3315_v59 = vmul.f32 0.01, %v3037_v54  ;;  %v3040_v60 = vadd.f32 %v3039_v56, %v2495_v55  ;;  %vm3187_vm8 = vcmp.ge.f32.partialorder %v3037_v54, 0.0 }
 0x300   : > { %vm3188_vm9 = vcmp.ge.f32.partialorder %v3040_v60, 0.0  ;;  %v3316_v61 = vmul.f32 0.01, %v3040_v60  ;;  %v3443_v63 = vsel %vm3187_vm8, %v3037_v54, %v3315_v59 }
 0x301   : > { %v2499_v62 = vpop.f32.mrb[244].mxu1  ;;  %v3044_v2 = vpop.f32.mrb[244].mxu0 }
 0x302   : > { %v3444_v0 = vsel %vm3188_vm9, %v3040_v60, %v3316_v61  ;;  %v2500_v1 = vadd.f32 %v6332_v35, %v2499_v62  ;;  %v2501_v3 = vpop.f32.mrb[245].mxu1  ;;  %v3046_v5 = vpop.f32.mrb[245].mxu0 }
 0x303   : > { %v5008_v4 = vpack.c.bf16 %v3444_v0, %v3443_v63  ;;  %v2502_v6 = vpop.f32.mrb[246].mxu1  ;;  %v3047_v9 = vpop.f32.mrb[246].mxu0 }
 0x304   : > { %v3045_v7 = vadd.f32 %v3044_v2, %v2500_v1  ;;  %v2503_v8 = vadd.f32 %v6332_v35, %v2502_v6  ;;  %v2504_v10 = vpop.f32.mrb[247].mxu1  ;;  %v3049_v11 = vpop.f32.mrb[247].mxu0 }
 0x305   : > { %5084 = vst [vmem:[%s6072_s14 + $0x1e0] sm:$0xff] %v5008_v4  }
 0x306   : > { %v3317_v12 = vmul.f32 0.01, %v3045_v7  ;;  %v3048_v13 = vadd.f32 %v3047_v9, %v2503_v8  ;;  %vm3189_vm10 = vcmp.ge.f32.partialorder %v3045_v7, 0.0 }
 0x308   : > { %vm3190_vm11 = vcmp.ge.f32.partialorder %v3048_v13, 0.0  ;;  %v3318_v14 = vmul.f32 0.01, %v3048_v13  ;;  %v3445_v17 = vsel %vm3189_vm10, %v3045_v7, %v3317_v12 }
 0x309   : > { %v2507_v16 = vpop.f32.mrb[248].mxu1  ;;  %v3052_v20 = vpop.f32.mrb[248].mxu0 }
 0x30a   : > { %v3446_v18 = vsel %vm3190_vm11, %v3048_v13, %v3318_v14  ;;  %v2508_v19 = vadd.f32 %v6332_v35, %v2507_v16  ;;  %v2509_v21 = vpop.f32.mrb[249].mxu1  ;;  %v3054_v23 = vpop.f32.mrb[249].mxu0 }
 0x30b   : > { %v5013_v22 = vpack.c.bf16 %v3446_v18, %v3445_v17  ;;  %v2510_v24 = vpop.f32.mrb[250].mxu1  ;;  %v3055_v28 = vpop.f32.mrb[250].mxu0 }
 0x30c   : > { %v3053_v25 = vadd.f32 %v3052_v20, %v2508_v19  ;;  %v2511_v27 = vadd.f32 %v6332_v35, %v2510_v24  ;;  %v2512_v29 = vpop.f32.mrb[251].mxu1  ;;  %v3057_v30 = vpop.f32.mrb[251].mxu0 }
 0x30d   : > { %5085 = vst [vmem:[%s6072_s14 + $0x1e8] sm:$0xff] %v5013_v22  }
 0x30e   : > { %v3319_v15 = vmul.f32 0.01, %v3053_v25  ;;  %v3056_v31 = vadd.f32 %v3055_v28, %v2511_v27  ;;  %vm3191_vm12 = vcmp.ge.f32.partialorder %v3053_v25, 0.0 }
 0x310   : > { %vm3192_vm13 = vcmp.ge.f32.partialorder %v3056_v31, 0.0  ;;  %v3320_v32 = vmul.f32 0.01, %v3056_v31  ;;  %v3447_v34 = vsel %vm3191_vm12, %v3053_v25, %v3319_v15 }
 0x311   : > { %v2515_v33 = vpop.f32.mrb[252].mxu1  ;;  %v3060_v38 = vpop.f32.mrb[252].mxu0 }
 0x312   : > { %v3448_v26 = vsel %vm3192_vm13, %v3056_v31, %v3320_v32  ;;  %v2516_v37 = vadd.f32 %v5771_v36, %v2515_v33  ;;  %v2517_v35 = vpop.f32.mrb[253].mxu1  ;;  %v3062_v40 = vpop.f32.mrb[253].mxu0 }
 0x313   : > { %v5018_v39 = vpack.c.bf16 %v3448_v26, %v3447_v34  ;;  %v2518_v41 = vpop.f32.mrb[254].mxu1  ;;  %v3063_v44 = vpop.f32.mrb[254].mxu0 }
 0x314   : > { %v3061_v42 = vadd.f32 %v3060_v38, %v2516_v37  ;;  %v2519_v43 = vadd.f32 %v5771_v36, %v2518_v41  ;;  %v2520_v45 = vpop.f32.mrb[255].mxu1  ;;  %v3065_v46 = vpop.f32.mrb[255].mxu0 }
 0x315   : > { %5086 = vst [vmem:[%s6072_s14 + $0x1f0] sm:$0xff] %v5018_v39  }
 0x316   : > { %v3321_v47 = vmul.f32 0.01, %v3061_v42  ;;  %v3064_v48 = vadd.f32 %v3063_v44, %v2519_v43  ;;  %vm3193_vm14 = vcmp.ge.f32.partialorder %v3061_v42, 0.0 }
 0x318   : > { %vm3194_vm15 = vcmp.ge.f32.partialorder %v3064_v48, 0.0  ;;  %v3322_v49 = vmul.f32 0.01, %v3064_v48  ;;  %v3449_v50 = vsel %vm3193_vm14, %v3061_v42, %v3321_v47 }
 0x31a   : > { %v3450_v51 = vsel %vm3194_vm15, %v3064_v48, %v3322_v49 }
 0x31b   : > { %v5023_v52 = vpack.c.bf16 %v3450_v51, %v3449_v50 }
 0x31d   : > { %5087 = vst [vmem:[%s6072_s14 + $0x1f8] sm:$0xff] %v5023_v52  }
 0x31e PF: > { %s13_s12 = sadd.s32 1, %s5778_s12  }
 0x31f   : > { %p10_p4 = scmp.ge.s32.totalorder %s13_s12, 4  }
 0x321   :  { %12 = sbr.rel (!%p10_p4) target bundleno = 1 (0x1), region = 62 }

// kernel: encoder_forward.6
= control target key start
LH: loop header
LB: loop body
LE: loop exit
PB: predicated region body
PF: predicated region fallthrough
CT: control target
= control target key end

     0   :  { %s8891_s12 = smov 0   ;;  %s10080_s0 = inlined_call_operand.vmem [shape: bf16[1024,1792], index: 0, kind: input, shape index: {}]   ;;  %s10081_s1 = inlined_call_operand.vmem [shape: bf16[1792,128], index: 1, kind: input, shape index: {}]   ;;  %s10082_s2 = inlined_call_operand.vmem [shape: f32[1,128], index: 2, kind: input, shape index: {}]   ;;  %s10083_s3 = inlined_call_operand.vmem [shape: bf16[1024,128], index: 3, kind: output, shape index: {}]  }
   0x1 LB: > { %s6360_s13 = sadd.s32 4294967295, %s8868_s12   ;;  %p6364_p0 = scmp.ge.s32.totalorder %s8868_s12, 1  ;;  %s8868_s12 = sphi %s8891_s12, %s13_s12  }
   0x2   : > { %p139_p1 = scmp.lt.s32.totalorder %s8868_s12, 3 }
   0x4   : > { %p140_p2 = pnand %p6364_p0, %p139_p1 }
   0x5   : > { %v8061_v0 = vld [vmem:[%s10081_s1] sm:$0xff] (!%p140_p2)   ;;  %v8870_v1 = vmov (!%p140_p2), 0   ;;  %v8063_v3 = vld [vmem:[%s10081_s1 + $0x8] sm:$0xff] (!%p140_p2)   ;;  %v8065_v5 = vld [vmem:[%s10081_s1 + $0x10] sm:$0xff] (!%p140_p2)   ;;  %s6365_s7 = sshll.u32 (!%p140_p2), %s6360_s13, 6 }
   0x6   : > { %143 = sbr.rel (%p140_p2) target bundleno = 1182 (0x49e), region = 32  ;;  %3769 = vmatprep.subr.bf16.mxu1 (!%p140_p2), %v8870_v1  ;;  %4636 = vmatprep.subr.bf16.mxu0 (!%p140_p2), %v8870_v1  ;;  %v8062_v2 = vld [vmem:[%s10081_s1 + $0x180] sm:$0xff] (!%p140_p2)   ;;  %v8064_v4 = vld [vmem:[%s10081_s1 + $0x188] sm:$0xff] (!%p140_p2)   ;;  %v8066_v6 = vld [vmem:[%s10081_s1 + $0x190] sm:$0xff] (!%p140_p2)   ;;  %p165_p3 = scmp.lt.s32.totalorder (!%p140_p2), %s6365_s7, 127 }
   0x7   : > { %3770 = vmatpush1.bf16.msra.mxu1 (!%p140_p2), %v8061_v0  ;;  %4637 = vmatpush1.bf16.msra.mxu0 (!%p140_p2), %v8062_v2  ;;  %v8067_v7 = vld [vmem:[%s10081_s1 + $0x18] sm:$0xff] (!%p140_p2)   ;;  %v8069_v9 = vld [vmem:[%s10081_s1 + $0x20] sm:$0xff] (!%p140_p2)   ;;  %v8071_v11 = vld [vmem:[%s10081_s1 + $0x28] sm:$0xff] (!%p140_p2)  }
   0x8   : > { %3771 = vmatprep.subr.bf16.mxu1 (!%p140_p2), %v8870_v1  ;;  %4638 = vmatprep.subr.bf16.mxu0 (!%p140_p2), %v8870_v1  ;;  %v8068_v8 = vld [vmem:[%s10081_s1 + $0x198] sm:$0xff] (!%p140_p2)   ;;  %v8070_v10 = vld [vmem:[%s10081_s1 + $0x1a0] sm:$0xff] (!%p140_p2)   ;;  %v8072_v12 = vld [vmem:[%s10081_s1 + $0x1a8] sm:$0xff] (!%p140_p2)  }
   0x9   : > { %v8073_v13 = vld [vmem:[%s10081_s1 + $0x30] sm:$0xff] (!%p140_p2)   ;;  %v8075_v15 = vld [vmem:[%s10081_s1 + $0x38] sm:$0xff] (!%p140_p2)   ;;  %v8077_v17 = vld [vmem:[%s10081_s1 + $0x40] sm:$0xff] (!%p140_p2)  }
   0xa   : > { %v8074_v14 = vld [vmem:[%s10081_s1 + $0x1b0] sm:$0xff] (!%p140_p2)   ;;  %v8076_v16 = vld [vmem:[%s10081_s1 + $0x1b8] sm:$0xff] (!%p140_p2)   ;;  %v8078_v18 = vld [vmem:[%s10081_s1 + $0x1c0] sm:$0xff] (!%p140_p2)  }
   0xb   : > { %3772 = vmatpush1.bf16.msra.mxu1 (!%p140_p2), %v8063_v3  ;;  %4639 = vmatpush1.bf16.msra.mxu0 (!%p140_p2), %v8064_v4  ;;  %v8079_v20 = vld [vmem:[%s10081_s1 + $0x48] sm:$0xff] (!%p140_p2)   ;;  %v8081_v23 = vld [vmem:[%s10081_s1 + $0x50] sm:$0xff] (!%p140_p2)   ;;  %v8083_v25 = vld [vmem:[%s10081_s1 + $0x58] sm:$0xff] (!%p140_p2)  }
   0xc   : > { %3773 = vmatprep.subr.bf16.mxu1 (!%p140_p2), %v8870_v1  ;;  %4640 = vmatprep.subr.bf16.mxu0 (!%p140_p2), %v8870_v1  ;;  %v8080_v22 = vld [vmem:[%s10081_s1 + $0x1c8] sm:$0xff] (!%p140_p2)   ;;  %v8082_v24 = vld [vmem:[%s10081_s1 + $0x1d0] sm:$0xff] (!%p140_p2)   ;;  %v8084_v26 = vld [vmem:[%s10081_s1 + $0x1d8] sm:$0xff] (!%p140_p2)  }
   0xd   : > { %s10085_s7 = smov (!%p165_p3, %s6365_s7), 127  ;;  %v8085_v27 = vld [vmem:[%s10081_s1 + $0x60] sm:$0xff]   ;;  %v8087_v29 = vld [vmem:[%s10081_s1 + $0x68] sm:$0xff]   ;;  %v8089_v31 = vld [vmem:[%s10081_s1 + $0x70] sm:$0xff]  }
   0xe   : > { %s8051_s19 = smul.u32 56, %s10085_s7  ;;  %v8086_v28 = vld [vmem:[%s10081_s1 + $0x1e0] sm:$0xff]   ;;  %v8088_v30 = vld [vmem:[%s10081_s1 + $0x1e8] sm:$0xff]   ;;  %v8090_v32 = vld [vmem:[%s10081_s1 + $0x1f0] sm:$0xff]   ;;  %s6368_s9 = sshll.u32 %s10085_s7, 2 }
   0xf   : > { %3774 = vmatpush1.bf16.msra.mxu1 %v8065_v5  ;;  %4641 = vmatpush1.bf16.msra.mxu0 %v8066_v6  ;;  %v8091_v33 = vld [vmem:[%s10081_s1 + $0x78] sm:$0xff]   ;;  %v8099_v37 = vld [vmem:[%s10081_s1 + $0x80] sm:$0xff]   ;;  %v8114_v41 = vld [vmem:[%s10081_s1 + $0x88] sm:$0xff]   ;;  %s9934_s14 = scalar_lea.vmem %s10083_s3, %s6368_s9 }
  0x10   : > { %3775 = vmatprep.subr.bf16.mxu1 %v8870_v1  ;;  %4642 = vmatprep.subr.bf16.mxu0 %v8870_v1  ;;  %s8974_s26 = scalar_lea.vmem %s10080_s0, %s8051_s19  ;;  %v8092_v34 = vld [vmem:[%s10081_s1 + $0x1f8] sm:$0xff]   ;;  %v8100_v38 = vld [vmem:[%s10081_s1 + $0x200] sm:$0xff]   ;;  %v8107_v43 = vld [vmem:[%s10081_s1 + $0x208] sm:$0xff]  }
  0x11   : > { %v8095_v19 = vld [vmem:[%s8974_s26 + $0x4] ss:$56 sps:$4 sm:$0xff]   ;;  %v8093_v35 = vld [vmem:[%s8974_s26] ss:$56 sps:$4 sm:$0xff]   ;;  %v8101_v39 = vld [vmem:[%s8974_s26 + $0x74] ss:$56 sps:$4 sm:$0xff]  }
  0x12   : > { %v8098_v21 = vld [vmem:[%s8974_s26 + $0x1c] ss:$56 sps:$4 sm:$0xff]   ;;  %3801 = vmatprep.mubr.bf16.mxu1 %v8095_v19  ;;  %v8096_v36 = vld [vmem:[%s8974_s26 + $0x18] ss:$56 sps:$4 sm:$0xff]   ;;  %v8103_v40 = vld [vmem:[%s8974_s26 + $0x8c] ss:$56 sps:$4 sm:$0xff]  }
  0x13   : > { %3776 = vmatpush1.bf16.msra.mxu1 %v8067_v7  ;;  %4643 = vmatpush1.bf16.msra.mxu0 %v8068_v8  ;;  %v8105_v42 = vld [vmem:[%s8974_s26 + $0x70] ss:$56 sps:$4 sm:$0xff]   ;;  %v8108_v45 = vld [vmem:[%s8974_s26 + $0xe4] ss:$56 sps:$4 sm:$0xff]   ;;  %v8112_v49 = vld [vmem:[%s8974_s26 + $0xe0] ss:$56 sps:$4 sm:$0xff]  }
  0x14   : > { %3777 = vmatprep.subr.bf16.mxu1 %v8870_v1  ;;  %4644 = vmatprep.subr.bf16.mxu0 %v8870_v1  ;;  %v8106_v44 = vld [vmem:[%s8974_s26 + $0x88] ss:$56 sps:$4 sm:$0xff]   ;;  %v8110_v46 = vld [vmem:[%s8974_s26 + $0xfc] ss:$56 sps:$4 sm:$0xff]   ;;  %v8113_v51 = vld [vmem:[%s8974_s26 + $0xf8] ss:$56 sps:$4 sm:$0xff]  }
  0x15   : > { %4668 = vmatprep.mubr.bf16.mxu0 %v8098_v21  ;;  %v8115_v47 = vld [vmem:[%s10081_s1 + $0x210] sm:$0xff]   ;;  %v8122_v50 = vld [vmem:[%s10081_s1 + $0x218] sm:$0xff]   ;;  %v8118_v54 = vld [vmem:[%s8974_s26 + $0x16c] ss:$56 sps:$4 sm:$0xff]  }
  0x16   : > { %v8129_v48 = vld [vmem:[%s10081_s1 + $0x90] sm:$0xff]   ;;  %v8144_v52 = vld [vmem:[%s10081_s1 + $0x98] sm:$0xff]   ;;  %v8130_v55 = vld [vmem:[%s10081_s1 + $0x220] sm:$0xff]  }
  0x17   : > { %3778 = vmatpush1.bf16.msra.mxu1 %v8069_v9  ;;  %4645 = vmatpush1.bf16.msra.mxu0 %v8070_v10  ;;  %v8116_v53 = vld [vmem:[%s8974_s26 + $0x154] ss:$56 sps:$4 sm:$0xff]   ;;  %v8159_v56 = vld [vmem:[%s10081_s1 + $0xa0] sm:$0xff]   ;;  %v8120_v57 = vld [vmem:[%s8974_s26 + $0x150] ss:$56 sps:$4 sm:$0xff]  }
  0x18   : > { %3779 = vmatprep.subr.bf16.mxu1 %v8870_v1  ;;  %4646 = vmatprep.subr.bf16.mxu0 %v8870_v1  ;;  %v8137_v58 = vld [vmem:[%s10081_s1 + $0x228] sm:$0xff]   ;;  %v8123_v61 = vld [vmem:[%s8974_s26 + $0x1c4] ss:$56 sps:$4 sm:$0xff]   ;;  %v8145_v63 = vld [vmem:[%s10081_s1 + $0x230] sm:$0xff]  }
  0x19   : > { %v8121_v59 = vld [vmem:[%s8974_s26 + $0x168] ss:$56 sps:$4 sm:$0xff]   ;;  %v8125_v62 = vld [vmem:[%s8974_s26 + $0x1dc] ss:$56 sps:$4 sm:$0xff]   ;;  %v8128_v4 = vld [vmem:[%s8974_s26 + $0x1d8] ss:$56 sps:$4 sm:$0xff]  }
  0x1a   : > { %v8174_v60 = vld [vmem:[%s10081_s1 + $0xa8] sm:$0xff]   ;;  %v8189_v0 = vld [vmem:[%s10081_s1 + $0xb0] sm:$0xff]   ;;  %v8152_v2 = vld [vmem:[%s10081_s1 + $0x238] sm:$0xff]  }
  0x1b   : > { %3780 = vmatpush1.bf16.msra.mxu1 %v8071_v11  ;;  %4647 = vmatpush1.bf16.msra.mxu0 %v8072_v12  ;;  %v8127_v3 = vld [vmem:[%s8974_s26 + $0x1c0] ss:$56 sps:$4 sm:$0xff]   ;;  %v8131_v5 = vld [vmem:[%s8974_s26 + $0x234] ss:$56 sps:$4 sm:$0xff]   ;;  %v8135_v9 = vld [vmem:[%s8974_s26 + $0x230] ss:$56 sps:$4 sm:$0xff]  }
  0x1c   : > { %3781 = vmatprep.subr.bf16.mxu1 %v8870_v1  ;;  %4648 = vmatprep.subr.bf16.mxu0 %v8870_v1  ;;  %v8204_v6 = vld [vmem:[%s10081_s1 + $0xb8] sm:$0xff]   ;;  %v8133_v7 = vld [vmem:[%s8974_s26 + $0x24c] ss:$56 sps:$4 sm:$0xff]   ;;  %v8136_v11 = vld [vmem:[%s8974_s26 + $0x248] ss:$56 sps:$4 sm:$0xff]  }
  0x1d   : > { %v8160_v8 = vld [vmem:[%s10081_s1 + $0x240] sm:$0xff]   ;;  %v8167_v10 = vld [vmem:[%s10081_s1 + $0x248] sm:$0xff]  }
  0x1e   : > { %v8138_v12 = vld [vmem:[%s8974_s26 + $0x2a4] ss:$56 sps:$4 sm:$0xff]   ;;  %v8146_v19 = vld [vmem:[%s8974_s26 + $0x314] ss:$56 sps:$4 sm:$0xff]  }
  0x1f   : > { %3782 = vmatpush1.bf16.msra.mxu1 %v8073_v13  ;;  %4649 = vmatpush1.bf16.msra.mxu0 %v8074_v14  ;;  %v8140_v13 = vld [vmem:[%s8974_s26 + $0x2bc] ss:$56 sps:$4 sm:$0xff]   ;;  %v8219_v14 = vld [vmem:[%s10081_s1 + $0xc0] sm:$0xff]  }
  0x20   : > { %3783 = vmatprep.subr.bf16.mxu1 %v8870_v1  ;;  %4650 = vmatprep.subr.bf16.mxu0 %v8870_v1  ;;  %v8148_v21 = vld [vmem:[%s8974_s26 + $0x32c] ss:$56 sps:$4 sm:$0xff]  }
  0x23   : > { %3784 = vmatpush1.bf16.msra.mxu1 %v8075_v15  ;;  %4651 = vmatpush1.bf16.msra.mxu0 %v8076_v16  ;;  %v8175_v15 = vld [vmem:[%s10081_s1 + $0x250] sm:$0xff]   ;;  %v8142_v16 = vld [vmem:[%s8974_s26 + $0x2a0] ss:$56 sps:$4 sm:$0xff]  }
  0x24   : > { %3785 = vmatprep.subr.bf16.mxu1 %v8870_v1  ;;  %4652 = vmatprep.subr.bf16.mxu0 %v8870_v1 }
  0x27   : > { %3786 = vmatpush1.bf16.msra.mxu1 %v8077_v17  ;;  %4653 = vmatpush1.bf16.msra.mxu0 %v8078_v18  ;;  %v8182_v17 = vld [vmem:[%s10081_s1 + $0x258] sm:$0xff]  }
  0x28   : > { %3787 = vmatprep.subr.bf16.mxu1 %v8870_v1  ;;  %4654 = vmatprep.subr.bf16.mxu0 %v8870_v1  ;;  %v8143_v18 = vld [vmem:[%s8974_s26 + $0x2b8] ss:$56 sps:$4 sm:$0xff]  }
  0x2b   : > { %3788 = vmatpush1.bf16.msra.mxu1 %v8079_v20  ;;  %4655 = vmatpush1.bf16.msra.mxu0 %v8080_v22  ;;  %v8233_v20 = vld [vmem:[%s10081_s1 + $0xc8] sm:$0xff]   ;;  %v8190_v22 = vld [vmem:[%s10081_s1 + $0x260] sm:$0xff]  }
  0x2c   : > { %3789 = vmatprep.subr.bf16.mxu1 %v8870_v1  ;;  %4656 = vmatprep.subr.bf16.mxu0 %v8870_v1 }
  0x2f   : > { %3790 = vmatpush1.bf16.msra.mxu1 %v8081_v23  ;;  %4657 = vmatpush1.bf16.msra.mxu0 %v8082_v24  ;;  %v8150_v23 = vld [vmem:[%s8974_s26 + $0x310] ss:$56 sps:$4 sm:$0xff]  }
  0x30   : > { %3791 = vmatprep.subr.bf16.mxu1 %v8870_v1  ;;  %4658 = vmatprep.subr.bf16.mxu0 %v8870_v1  ;;  %v8197_v24 = vld [vmem:[%s10081_s1 + $0x268] sm:$0xff]  }
  0x33   : > { %3792 = vmatpush1.bf16.msra.mxu1 %v8083_v25  ;;  %4659 = vmatpush1.bf16.msra.mxu0 %v8084_v26  ;;  %v8151_v25 = vld [vmem:[%s8974_s26 + $0x328] ss:$56 sps:$4 sm:$0xff]   ;;  %v8247_v26 = vld [vmem:[%s10081_s1 + $0xd0] sm:$0xff]  }
  0x34   : > { %3793 = vmatprep.subr.bf16.mxu1 %v8870_v1  ;;  %4660 = vmatprep.subr.bf16.mxu0 %v8870_v1 }
  0x37   : > { %3794 = vmatpush1.bf16.msra.mxu1 %v8085_v27  ;;  %4661 = vmatpush1.bf16.msra.mxu0 %v8086_v28  ;;  %v8153_v27 = vld [vmem:[%s8974_s26 + $0x384] ss:$56 sps:$4 sm:$0xff]  }
  0x38   : > { %3795 = vmatprep.subr.bf16.mxu1 %v8870_v1  ;;  %4662 = vmatprep.subr.bf16.mxu0 %v8870_v1  ;;  %v8155_v28 = vld [vmem:[%s8974_s26 + $0x39c] ss:$56 sps:$4 sm:$0xff]  }
  0x3b   : > { %3796 = vmatpush1.bf16.msra.mxu1 %v8087_v29  ;;  %4663 = vmatpush1.bf16.msra.mxu0 %v8088_v30  ;;  %v8205_v29 = vld [vmem:[%s10081_s1 + $0x270] sm:$0xff]   ;;  %v8157_v30 = vld [vmem:[%s8974_s26 + $0x380] ss:$56 sps:$4 sm:$0xff]  }
  0x3c   : > { %3797 = vmatprep.subr.bf16.mxu1 %v8870_v1  ;;  %4664 = vmatprep.subr.bf16.mxu0 %v8870_v1 }
  0x3f   : > { %3798 = vmatpush1.bf16.msra.mxu1 %v8089_v31  ;;  %4665 = vmatpush1.bf16.msra.mxu0 %v8090_v32  ;;  %v8212_v31 = vld [vmem:[%s10081_s1 + $0x278] sm:$0xff]  }
  0x40   : > { %3799 = vmatprep.subr.bf16.mxu1 %v8870_v1  ;;  %4666 = vmatprep.subr.bf16.mxu0 %v8870_v1  ;;  %v8261_v32 = vld [vmem:[%s10081_s1 + $0xd8] sm:$0xff]  }
  0x43   : > { %3800 = vmatpush1.bf16.msra.mxu1 %v8091_v33  ;;  %4667 = vmatpush1.bf16.msra.mxu0 %v8092_v34  ;;  %v8158_v33 = vld [vmem:[%s8974_s26 + $0x398] ss:$56 sps:$4 sm:$0xff]   ;;  %v8161_v34 = vld [vmem:[%s8974_s26 + $0x3f4] ss:$56 sps:$4 sm:$0xff]  }
  0x44   : > { %4058 = vmatprep.subr.bf16.mxu1 %v8870_v1  ;;  %4925 = vmatprep.subr.bf16.mxu0 %v8870_v1 }
  0x46   : > { %3802 = vmatmul.mubr.bf16.vlgmr.msra.gmra.mrb[0].mxu1 %v8093_v35  ;;  %4669 = vmatmul.mubr.bf16.vlgmr.msra.gmra.mrb[0].mxu0 %v8096_v36  ;;  %v8163_v35 = vld [vmem:[%s8974_s26 + $0x40c] ss:$56 sps:$4 sm:$0xff]  }
  0x47   : > { %4059 = vmatpush1.bf16.msra.mxu1 %v8099_v37  ;;  %4926 = vmatpush1.bf16.msra.mxu0 %v8100_v38  ;;  %v8275_v36 = vld [vmem:[%s10081_s1 + $0xe0] sm:$0xff]   ;;  %v8165_v37 = vld [vmem:[%s8974_s26 + $0x3f0] ss:$56 sps:$4 sm:$0xff]  }
  0x48   : > { %3809 = vmatprep.mubr.bf16.mxu1 %v8101_v39  ;;  %4676 = vmatprep.mubr.bf16.mxu0 %v8103_v40  ;;  %v8166_v38 = vld [vmem:[%s8974_s26 + $0x408] ss:$56 sps:$4 sm:$0xff]   ;;  %v8168_v39 = vld [vmem:[%s8974_s26 + $0x464] ss:$56 sps:$4 sm:$0xff]  }
  0x49   : > { %4927 = vmatprep.subr.bf16.mxu0 %v8870_v1  ;;  %4060 = vmatprep.subr.bf16.mxu1 %v8870_v1  ;;  %v8170_v40 = vld [vmem:[%s8974_s26 + $0x47c] ss:$56 sps:$4 sm:$0xff]  }
  0x4b   : > { %4061 = vmatpush1.bf16.msra.mxu1 %v8114_v41  ;;  %4928 = vmatpush1.bf16.msra.mxu0 %v8107_v43  ;;  %v8172_v41 = vld [vmem:[%s8974_s26 + $0x460] ss:$56 sps:$4 sm:$0xff]   ;;  %v8176_v43 = vld [vmem:[%s8974_s26 + $0x4d4] ss:$56 sps:$4 sm:$0xff]  }
  0x4c   : > { %4062 = vmatprep.subr.bf16.mxu1 %v8870_v1  ;;  %4929 = vmatprep.subr.bf16.mxu0 %v8870_v1 }
  0x4e   : > { %3810 = vmatmul.mubr.bf16.gmra.mrb[4].mxu1 %v8105_v42  ;;  %4677 = vmatmul.mubr.bf16.gmra.mrb[4].mxu0 %v8106_v44  ;;  %v8173_v42 = vld [vmem:[%s8974_s26 + $0x478] ss:$56 sps:$4 sm:$0xff]   ;;  %v8178_v44 = vld [vmem:[%s8974_s26 + $0x4ec] ss:$56 sps:$4 sm:$0xff]  }
  0x4f   : > { %3817 = vmatprep.mubr.bf16.mxu1 %v8108_v45  ;;  %4684 = vmatprep.mubr.bf16.mxu0 %v8110_v46  ;;  %v8289_v45 = vld [vmem:[%s10081_s1 + $0xe8] sm:$0xff]  }
  0x50   : > { %4930 = vmatpush1.bf16.msra.mxu0 %v8115_v47  ;;  %4063 = vmatpush1.bf16.msra.mxu1 %v8129_v48  ;;  %v8180_v46 = vld [vmem:[%s8974_s26 + $0x4d0] ss:$56 sps:$4 sm:$0xff]   ;;  %v8183_v48 = vld [vmem:[%s8974_s26 + $0x544] ss:$56 sps:$4 sm:$0xff]  }
  0x51   : > { %4931 = vmatprep.subr.bf16.mxu0 %v8870_v1  ;;  %4064 = vmatprep.subr.bf16.mxu1 %v8870_v1  ;;  %v8181_v47 = vld [vmem:[%s8974_s26 + $0x4e8] ss:$56 sps:$4 sm:$0xff]  }
  0x54   : > { %4932 = vmatpush1.bf16.msra.mxu0 %v8122_v50  ;;  %4065 = vmatpush1.bf16.msra.mxu1 %v8144_v52  ;;  %v8187_v50 = vld [vmem:[%s8974_s26 + $0x540] ss:$56 sps:$4 sm:$0xff]   ;;  %v8191_v52 = vld [vmem:[%s8974_s26 + $0x5b4] ss:$56 sps:$4 sm:$0xff]  }
  0x55   : > { %4933 = vmatprep.subr.bf16.mxu0 %v8870_v1  ;;  %4066 = vmatprep.subr.bf16.mxu1 %v8870_v1 }
  0x56   : > { %3818 = vmatmul.mubr.bf16.gmra.mrb[8].mxu1 %v8112_v49  ;;  %4685 = vmatmul.mubr.bf16.gmra.mrb[8].mxu0 %v8113_v51  ;;  %v8185_v49 = vld [vmem:[%s8974_s26 + $0x55c] ss:$56 sps:$4 sm:$0xff]   ;;  %v8188_v51 = vld [vmem:[%s8974_s26 + $0x558] ss:$56 sps:$4 sm:$0xff]  }
  0x57   : > { %3825 = vmatprep.mubr.bf16.mxu1 %v8116_v53  ;;  %4692 = vmatprep.mubr.bf16.mxu0 %v8118_v54  ;;  %v8193_v53 = vld [vmem:[%s8974_s26 + $0x5cc] ss:$56 sps:$4 sm:$0xff]   ;;  %v8303_v54 = vld [vmem:[%s10081_s1 + $0xf0] sm:$0xff]  }
  0x58   : > { %4934 = vmatpush1.bf16.msra.mxu0 %v8130_v55  ;;  %4067 = vmatpush1.bf16.msra.mxu1 %v8159_v56  ;;  %v8195_v55 = vld [vmem:[%s8974_s26 + $0x5b0] ss:$56 sps:$4 sm:$0xff]  }
  0x59   : > { %4935 = vmatprep.subr.bf16.mxu0 %v8870_v1  ;;  %4068 = vmatprep.subr.bf16.mxu1 %v8870_v1  ;;  %v8196_v56 = vld [vmem:[%s8974_s26 + $0x5c8] ss:$56 sps:$4 sm:$0xff]  }
  0x5c   : > { %4936 = vmatpush1.bf16.msra.mxu0 %v8137_v58  ;;  %4069 = vmatpush1.bf16.msra.mxu1 %v8174_v60  ;;  %v8200_v58 = vld [vmem:[%s8974_s26 + $0x63c] ss:$56 sps:$4 sm:$0xff]   ;;  %v8203_v60 = vld [vmem:[%s8974_s26 + $0x638] ss:$56 sps:$4 sm:$0xff]  }
  0x5d   : > { %4937 = vmatprep.subr.bf16.mxu0 %v8870_v1  ;;  %4070 = vmatprep.subr.bf16.mxu1 %v8870_v1 }
  0x5e   : > { %3826 = vmatmul.mubr.bf16.gmra.mrb[12].mxu1 %v8120_v57  ;;  %4693 = vmatmul.mubr.bf16.gmra.mrb[12].mxu0 %v8121_v59  ;;  %v8198_v57 = vld [vmem:[%s8974_s26 + $0x624] ss:$56 sps:$4 sm:$0xff]   ;;  %v8202_v59 = vld [vmem:[%s8974_s26 + $0x620] ss:$56 sps:$4 sm:$0xff]  }
  0x5f   : > { %3833 = vmatprep.mubr.bf16.mxu1 %v8123_v61  ;;  %4700 = vmatprep.mubr.bf16.mxu0 %v8125_v62  ;;  %v8206_v61 = vld [vmem:[%s8974_s26 + $0x694] ss:$56 sps:$4 sm:$0xff]  }
  0x60   : > { %4938 = vmatpush1.bf16.msra.mxu0 %v8145_v63  ;;  %4071 = vmatpush1.bf16.msra.mxu1 %v8189_v0  ;;  %v8208_v62 = vld [vmem:[%s8974_s26 + $0x6ac] ss:$56 sps:$4 sm:$0xff]   ;;  %v8317_v63 = vld [vmem:[%s10081_s1 + $0xf8] sm:$0xff]   ;;  %v8210_v0 = vld [vmem:[%s8974_s26 + $0x690] ss:$56 sps:$4 sm:$0xff]  }
  0x61   : > { %4939 = vmatprep.subr.bf16.mxu0 %v8870_v1  ;;  %4072 = vmatprep.subr.bf16.mxu1 %v8870_v1 }
  0x64   : > { %4940 = vmatpush1.bf16.msra.mxu0 %v8152_v2  ;;  %4073 = vmatpush1.bf16.msra.mxu1 %v8204_v6  ;;  %v8211_v2 = vld [vmem:[%s8974_s26 + $0x6a8] ss:$56 sps:$4 sm:$0xff]  }
  0x65   : > { %4941 = vmatprep.subr.bf16.mxu0 %v8870_v1  ;;  %4074 = vmatprep.subr.bf16.mxu1 %v8870_v1  ;;  %v8215_v6 = vld [vmem:[%s8974_s26 + $0x20] ss:$56 sps:$4 sm:$0xff]  }
  0x66   : > { %3834 = vmatmul.mubr.bf16.gmra.mrb[16].mxu1 %v8127_v3  ;;  %4701 = vmatmul.mubr.bf16.gmra.mrb[16].mxu0 %v8128_v4  ;;  %v8213_v3 = vld [vmem:[%s8974_s26 + $0x704] ss:$56 sps:$4 sm:$0xff]  }
  0x67   : > { %3841 = vmatprep.mubr.bf16.mxu1 %v8131_v5  ;;  %4708 = vmatprep.mubr.bf16.mxu0 %v8133_v7  ;;  %v8217_v4 = vld [vmem:[%s8974_s26 + $0x24] ss:$56 sps:$4 sm:$0xff]   ;;  %v8218_v5 = vld [vmem:[%s8974_s26 + $0x700] ss:$56 sps:$4 sm:$0xff]   ;;  %v8221_v7 = vld [vmem:[%s8974_s26 + $0x774] ss:$56 sps:$4 sm:$0xff]  }
  0x68   : > { %4942 = vmatpush1.bf16.msra.mxu0 %v8160_v8  ;;  %4075 = vmatpush1.bf16.msra.mxu1 %v8219_v14  ;;  %v8220_v8 = vld [vmem:[%s10081_s1 + $0x280] sm:$0xff]  }
  0x69   : > { %4943 = vmatprep.subr.bf16.mxu0 %v8870_v1  ;;  %4076 = vmatprep.subr.bf16.mxu1 %v8870_v1  ;;  %v8229_v14 = vld [vmem:[%s8974_s26 + $0x104] ss:$56 sps:$4 sm:$0xff]  }
  0x6c   : > { %4944 = vmatpush1.bf16.msra.mxu0 %v8167_v10  ;;  %4077 = vmatpush1.bf16.msra.mxu1 %v8233_v20  ;;  %v8225_v10 = vld [vmem:[%s8974_s26 + $0x770] ss:$56 sps:$4 sm:$0xff]   ;;  %v8237_v20 = vld [vmem:[%s8974_s26 + $0x174] ss:$56 sps:$4 sm:$0xff]  }
  0x6d   : > { %4945 = vmatprep.subr.bf16.mxu0 %v8870_v1  ;;  %4078 = vmatprep.subr.bf16.mxu1 %v8870_v1 }
  0x6e   : > { %3842 = vmatmul.mubr.bf16.gmra.mrb[20].mxu1 %v8135_v9  ;;  %4709 = vmatmul.mubr.bf16.gmra.mrb[20].mxu0 %v8136_v11  ;;  %v8223_v9 = vld [vmem:[%s8974_s26 + $0x94] ss:$56 sps:$4 sm:$0xff]  }
  0x6f   : > { %3849 = vmatprep.mubr.bf16.mxu1 %v8138_v12  ;;  %4716 = vmatprep.mubr.bf16.mxu0 %v8140_v13  ;;  %v8234_v11 = vld [vmem:[%s10081_s1 + $0x288] sm:$0xff]   ;;  %v8227_v13 = vld [vmem:[%s8974_s26 + $0x7e4] ss:$56 sps:$4 sm:$0xff]  }
  0x70   : > { %4946 = vmatpush1.bf16.msra.mxu0 %v8175_v15  ;;  %4079 = vmatpush1.bf16.msra.mxu1 %v8247_v26  ;;  %v8226_v12 = vld [vmem:[%s8974_s26 + $0x90] ss:$56 sps:$4 sm:$0xff]   ;;  %v8243_v26 = vld [vmem:[%s8974_s26 + $0x1e4] ss:$56 sps:$4 sm:$0xff]  }
  0x71   : > { %4947 = vmatprep.subr.bf16.mxu0 %v8870_v1  ;;  %4080 = vmatprep.subr.bf16.mxu1 %v8870_v1  ;;  %v8248_v15 = vld [vmem:[%s10081_s1 + $0x290] sm:$0xff]  }
  0x74   : > { %4948 = vmatpush1.bf16.msra.mxu0 %v8182_v17  ;;  %4081 = vmatpush1.bf16.msra.mxu1 %v8261_v32  ;;  %v8262_v17 = vld [vmem:[%s10081_s1 + $0x298] sm:$0xff]   ;;  %v8251_v32 = vld [vmem:[%s8974_s26 + $0x254] ss:$56 sps:$4 sm:$0xff]  }
  0x75   : > { %4949 = vmatprep.subr.bf16.mxu0 %v8870_v1  ;;  %4082 = vmatprep.subr.bf16.mxu1 %v8870_v1 }
  0x76   : > { %3850 = vmatmul.mubr.bf16.gmra.mrb[24].mxu1 %v8142_v16  ;;  %4717 = vmatmul.mubr.bf16.gmra.mrb[24].mxu0 %v8143_v18  ;;  %v8231_v16 = vld [vmem:[%s8974_s26 + $0x7e0] ss:$56 sps:$4 sm:$0xff]  }
  0x77   : > { %3857 = vmatprep.mubr.bf16.mxu1 %v8146_v19  ;;  %4724 = vmatprep.mubr.bf16.mxu0 %v8148_v21  ;;  %v8232_v18 = vld [vmem:[%s8974_s26 + $0x100] ss:$56 sps:$4 sm:$0xff]   ;;  %v8235_v19 = vld [vmem:[%s8974_s26 + $0x854] ss:$56 sps:$4 sm:$0xff]  }
  0x78   : > { %4950 = vmatpush1.bf16.msra.mxu0 %v8190_v22  ;;  %4083 = vmatpush1.bf16.msra.mxu1 %v8275_v36  ;;  %v8276_v21 = vld [vmem:[%s10081_s1 + $0x2a0] sm:$0xff]   ;;  %v8239_v22 = vld [vmem:[%s8974_s26 + $0x850] ss:$56 sps:$4 sm:$0xff]  }
  0x79   : > { %4951 = vmatprep.subr.bf16.mxu0 %v8870_v1  ;;  %4084 = vmatprep.subr.bf16.mxu1 %v8870_v1  ;;  %v8254_v36 = vld [vmem:[%s8974_s26 + $0x250] ss:$56 sps:$4 sm:$0xff]  }
  0x7c   : > { %4952 = vmatpush1.bf16.msra.mxu0 %v8197_v24  ;;  %4085 = vmatpush1.bf16.msra.mxu1 %v8289_v45  ;;  %v8240_v24 = vld [vmem:[%s8974_s26 + $0x170] ss:$56 sps:$4 sm:$0xff]  }
  0x7d   : > { %4953 = vmatprep.subr.bf16.mxu0 %v8870_v1  ;;  %4086 = vmatprep.subr.bf16.mxu1 %v8870_v1  ;;  %v8267_v45 = vld [vmem:[%s8974_s26 + $0xa10] ss:$56 sps:$4 sm:$0xff]  }
  0x7e   : > { %3858 = vmatmul.mubr.bf16.gmra.mrb[28].mxu1 %v8150_v23  ;;  %4725 = vmatmul.mubr.bf16.gmra.mrb[28].mxu0 %v8151_v25  ;;  %v8290_v23 = vld [vmem:[%s10081_s1 + $0x2a8] sm:$0xff]   ;;  %v8241_v25 = vld [vmem:[%s8974_s26 + $0x8c4] ss:$56 sps:$4 sm:$0xff]  }
  0x7f   : > { %3865 = vmatprep.mubr.bf16.mxu1 %v8153_v27  ;;  %4732 = vmatprep.mubr.bf16.mxu0 %v8155_v28  ;;  %v8304_v27 = vld [vmem:[%s10081_s1 + $0x2b0] sm:$0xff]   ;;  %v8245_v28 = vld [vmem:[%s8974_s26 + $0x8c0] ss:$56 sps:$4 sm:$0xff]  }
  0x80   : > { %4954 = vmatpush1.bf16.msra.mxu0 %v8205_v29  ;;  %4087 = vmatpush1.bf16.msra.mxu1 %v8303_v54  ;;  %v8318_v29 = vld [vmem:[%s10081_s1 + $0x2b8] sm:$0xff]   ;;  %v8281_v54 = vld [vmem:[%s8974_s26 + $0xaf0] ss:$56 sps:$4 sm:$0xff]  }
  0x81   : > { %4955 = vmatprep.subr.bf16.mxu0 %v8870_v1  ;;  %4088 = vmatprep.subr.bf16.mxu1 %v8870_v1 }
  0x84   : > { %4956 = vmatpush1.bf16.msra.mxu0 %v8212_v31  ;;  %4089 = vmatpush1.bf16.msra.mxu1 %v8317_v63  ;;  %v8249_v31 = vld [vmem:[%s8974_s26 + $0x934] ss:$56 sps:$4 sm:$0xff]   ;;  %v8295_v63 = vld [vmem:[%s8974_s26 + $0xbd0] ss:$56 sps:$4 sm:$0xff]  }
  0x85   : > { %5214 = vmatprep.subr.bf16.mxu0 %v8870_v1  ;;  %4347 = vmatprep.subr.bf16.mxu1 %v8870_v1 }
  0x86   : > { %3866 = vmatmul.mubr.bf16.gmra.mrb[32].mxu1 %v8157_v30  ;;  %4733 = vmatmul.mubr.bf16.gmra.mrb[32].mxu0 %v8158_v33  ;;  %v8246_v30 = vld [vmem:[%s8974_s26 + $0x1e0] ss:$56 sps:$4 sm:$0xff]  }
  0x87   : > { %3873 = vmatprep.mubr.bf16.mxu1 %v8161_v34  ;;  %4740 = vmatprep.mubr.bf16.mxu0 %v8163_v35  ;;  %v8332_v33 = vld [vmem:[%s10081_s1 + $0x2c0] sm:$0xff]   ;;  %v8253_v34 = vld [vmem:[%s8974_s26 + $0x930] ss:$56 sps:$4 sm:$0xff]  }
  0x88   : > { %v8346_v35 = vld [vmem:[%s10081_s1 + $0x2c8] sm:$0xff]  }
  0x8e   : > { %3874 = vmatmul.mubr.bf16.gmra.mrb[36].mxu1 %v8165_v37  ;;  %4741 = vmatmul.mubr.bf16.gmra.mrb[36].mxu0 %v8166_v38  ;;  %v8255_v37 = vld [vmem:[%s8974_s26 + $0x9a4] ss:$56 sps:$4 sm:$0xff]  }
  0x8f   : > { %3881 = vmatprep.mubr.bf16.mxu1 %v8168_v39  ;;  %4748 = vmatprep.mubr.bf16.mxu0 %v8170_v40  ;;  %v8257_v38 = vld [vmem:[%s8974_s26 + $0x2c4] ss:$56 sps:$4 sm:$0xff]   ;;  %v8360_v39 = vld [vmem:[%s10081_s1 + $0x2d0] sm:$0xff]   ;;  %v8259_v40 = vld [vmem:[%s8974_s26 + $0x9a0] ss:$56 sps:$4 sm:$0xff]  }
  0x96   : > { %3882 = vmatmul.mubr.bf16.gmra.mrb[40].mxu1 %v8172_v41  ;;  %4749 = vmatmul.mubr.bf16.gmra.mrb[40].mxu0 %v8173_v42  ;;  %v8260_v41 = vld [vmem:[%s8974_s26 + $0x2c0] ss:$56 sps:$4 sm:$0xff]   ;;  %v8263_v42 = vld [vmem:[%s8974_s26 + $0xa14] ss:$56 sps:$4 sm:$0xff]  }
  0x97   : > { %3889 = vmatprep.mubr.bf16.mxu1 %v8176_v43  ;;  %4756 = vmatprep.mubr.bf16.mxu0 %v8178_v44  ;;  %v8265_v43 = vld [vmem:[%s8974_s26 + $0x334] ss:$56 sps:$4 sm:$0xff]   ;;  %v8374_v44 = vld [vmem:[%s10081_s1 + $0x2d8] sm:$0xff]  }
  0x9e   : > { %3890 = vmatmul.mubr.bf16.gmra.mrb[44].mxu1 %v8180_v46  ;;  %4757 = vmatmul.mubr.bf16.gmra.mrb[44].mxu0 %v8181_v47  ;;  %v8268_v46 = vld [vmem:[%s8974_s26 + $0x330] ss:$56 sps:$4 sm:$0xff]   ;;  %v8269_v47 = vld [vmem:[%s8974_s26 + $0xa84] ss:$56 sps:$4 sm:$0xff]  }
  0x9f   : > { %3897 = vmatprep.mubr.bf16.mxu1 %v8183_v48  ;;  %4764 = vmatprep.mubr.bf16.mxu0 %v8185_v49  ;;  %v8271_v48 = vld [vmem:[%s8974_s26 + $0x3a4] ss:$56 sps:$4 sm:$0xff]   ;;  %v8273_v49 = vld [vmem:[%s8974_s26 + $0xa80] ss:$56 sps:$4 sm:$0xff]  }
  0xa6   : > { %3898 = vmatmul.mubr.bf16.gmra.mrb[48].mxu1 %v8187_v50  ;;  %4765 = vmatmul.mubr.bf16.gmra.mrb[48].mxu0 %v8188_v51  ;;  %v8274_v50 = vld [vmem:[%s8974_s26 + $0x3a0] ss:$56 sps:$4 sm:$0xff]   ;;  %v8277_v51 = vld [vmem:[%s8974_s26 + $0xaf4] ss:$56 sps:$4 sm:$0xff]  }
  0xa7   : > { %3905 = vmatprep.mubr.bf16.mxu1 %v8191_v52  ;;  %4772 = vmatprep.mubr.bf16.mxu0 %v8193_v53  ;;  %v8279_v52 = vld [vmem:[%s8974_s26 + $0x414] ss:$56 sps:$4 sm:$0xff]   ;;  %v8388_v53 = vld [vmem:[%s10081_s1 + $0x2e0] sm:$0xff]  }
  0xae   : > { %3906 = vmatmul.mubr.bf16.gmra.mrb[52].mxu1 %v8195_v55  ;;  %4773 = vmatmul.mubr.bf16.gmra.mrb[52].mxu0 %v8196_v56  ;;  %v8282_v55 = vld [vmem:[%s8974_s26 + $0x410] ss:$56 sps:$4 sm:$0xff]   ;;  %v8283_v56 = vld [vmem:[%s8974_s26 + $0xb64] ss:$56 sps:$4 sm:$0xff]  }
  0xaf   : > { %3913 = vmatprep.mubr.bf16.mxu1 %v8198_v57  ;;  %4780 = vmatprep.mubr.bf16.mxu0 %v8200_v58  ;;  %v8285_v57 = vld [vmem:[%s8974_s26 + $0x484] ss:$56 sps:$4 sm:$0xff]   ;;  %v8287_v58 = vld [vmem:[%s8974_s26 + $0xb60] ss:$56 sps:$4 sm:$0xff]  }
  0xb6   : > { %3914 = vmatmul.mubr.bf16.gmra.mrb[56].mxu1 %v8202_v59  ;;  %4781 = vmatmul.mubr.bf16.gmra.mrb[56].mxu0 %v8203_v60  ;;  %v8288_v59 = vld [vmem:[%s8974_s26 + $0x480] ss:$56 sps:$4 sm:$0xff]   ;;  %v8291_v60 = vld [vmem:[%s8974_s26 + $0xbd4] ss:$56 sps:$4 sm:$0xff]  }
  0xb7   : > { %3921 = vmatprep.mubr.bf16.mxu1 %v8206_v61  ;;  %4788 = vmatprep.mubr.bf16.mxu0 %v8208_v62  ;;  %v8293_v61 = vld [vmem:[%s8974_s26 + $0x4f4] ss:$56 sps:$4 sm:$0xff]  }
  0xb8   : > { %v8402_v62 = vld [vmem:[%s10081_s1 + $0x2e8] sm:$0xff]  }
  0xbe   : > { %3922 = vmatmul.mubr.bf16.gmra.mrb[60].mxu1 %v8210_v0  ;;  %4789 = vmatmul.mubr.bf16.gmra.mrb[60].mxu0 %v8211_v2  ;;  %v8296_v0 = vld [vmem:[%s8974_s26 + $0x4f0] ss:$56 sps:$4 sm:$0xff]   ;;  %v8297_v2 = vld [vmem:[%s8974_s26 + $0xc44] ss:$56 sps:$4 sm:$0xff]  }
  0xbf   : > { %3929 = vmatprep.mubr.bf16.mxu1 %v8213_v3  ;;  %4957 = vmatprep.mubr.bf16.mxu0 %v8217_v4  ;;  %v8299_v3 = vld [vmem:[%s8974_s26 + $0x564] ss:$56 sps:$4 sm:$0xff]   ;;  %v8301_v4 = vld [vmem:[%s8974_s26 + $0xc40] ss:$56 sps:$4 sm:$0xff]  }
  0xc6   : > { %3930 = vmatmul.mubr.bf16.gmra.mrb[64].mxu1 %v8218_v5  ;;  %4958 = vmatmul.mubr.bf16.vlgmr.msra.gmra.mrb[0].mxu0 %v8215_v6  ;;  %v8302_v5 = vld [vmem:[%s8974_s26 + $0x560] ss:$56 sps:$4 sm:$0xff]   ;;  %v8305_v6 = vld [vmem:[%s8974_s26 + $0xcb4] ss:$56 sps:$4 sm:$0xff]  }
  0xc7   : > { %3937 = vmatprep.mubr.bf16.mxu1 %v8221_v7  ;;  %5215 = vmatpush1.bf16.msra.mxu0 %v8220_v8  ;;  %v8307_v7 = vld [vmem:[%s8974_s26 + $0x5d4] ss:$56 sps:$4 sm:$0xff]  }
  0xc8   : > { %4965 = vmatprep.mubr.bf16.mxu0 %v8223_v9  ;;  %5216 = vmatprep.subr.bf16.mxu0 %v8870_v1  ;;  %v8416_v8 = vld [vmem:[%s10081_s1 + $0x2f0] sm:$0xff]  }
  0xc9   : > { %v8309_v9 = vld [vmem:[%s8974_s26 + $0xcb0] ss:$56 sps:$4 sm:$0xff]  }
  0xcb   : > { %5217 = vmatpush1.bf16.msra.mxu0 %v8234_v11  ;;  %v8311_v11 = vld [vmem:[%s8974_s26 + $0xd24] ss:$56 sps:$4 sm:$0xff]  }
  0xcc   : > { %5218 = vmatprep.subr.bf16.mxu0 %v8870_v1 }
  0xce   : > { %3938 = vmatmul.mubr.bf16.gmra.mrb[68].mxu1 %v8225_v10  ;;  %4966 = vmatmul.mubr.bf16.gmra.mrb[4].mxu0 %v8226_v12  ;;  %v8310_v10 = vld [vmem:[%s8974_s26 + $0x5d0] ss:$56 sps:$4 sm:$0xff]   ;;  %v8313_v12 = vld [vmem:[%s8974_s26 + $0x644] ss:$56 sps:$4 sm:$0xff]  }
  0xcf   : > { %3945 = vmatprep.mubr.bf16.mxu1 %v8227_v13  ;;  %4973 = vmatprep.mubr.bf16.mxu0 %v8229_v14  ;;  %v8315_v13 = vld [vmem:[%s8974_s26 + $0xd20] ss:$56 sps:$4 sm:$0xff]  }
  0xd0   : > { %5219 = vmatpush1.bf16.msra.mxu0 %v8248_v15  ;;  %v8316_v14 = vld [vmem:[%s8974_s26 + $0x640] ss:$56 sps:$4 sm:$0xff]   ;;  %v8319_v15 = vld [vmem:[%s8974_s26 + $0xd94] ss:$56 sps:$4 sm:$0xff]  }
  0xd1   : > { %5220 = vmatprep.subr.bf16.mxu0 %v8870_v1 }
  0xd4   : > { %5221 = vmatpush1.bf16.msra.mxu0 %v8262_v17  ;;  %v8430_v17 = vld [vmem:[%s10081_s1 + $0x2f8] sm:$0xff]  }
  0xd5   : > { %5222 = vmatprep.subr.bf16.mxu0 %v8870_v1 }
  0xd6   : > { %3946 = vmatmul.mubr.bf16.gmra.mrb[72].mxu1 %v8231_v16  ;;  %4974 = vmatmul.mubr.bf16.gmra.mrb[8].mxu0 %v8232_v18  ;;  %v8321_v16 = vld [vmem:[%s8974_s26 + $0x6b4] ss:$56 sps:$4 sm:$0xff]   ;;  %v8323_v18 = vld [vmem:[%s8974_s26 + $0xd90] ss:$56 sps:$4 sm:$0xff]  }
  0xd7   : > { %3953 = vmatprep.mubr.bf16.mxu1 %v8235_v19  ;;  %4981 = vmatprep.mubr.bf16.mxu0 %v8237_v20  ;;  %v8324_v19 = vld [vmem:[%s8974_s26 + $0x6b0] ss:$56 sps:$4 sm:$0xff]   ;;  %v8327_v20 = vld [vmem:[%s8974_s26 + $0xc] ss:$56 sps:$4 sm:$0xff]  }
  0xd8   : > { %5223 = vmatpush1.bf16.msra.mxu0 %v8276_v21  ;;  %v8328_v21 = vld [vmem:[%s8974_s26 + $0x724] ss:$56 sps:$4 sm:$0xff]  }
  0xd9   : > { %5224 = vmatprep.subr.bf16.mxu0 %v8870_v1 }
  0xdc   : > { %5225 = vmatpush1.bf16.msra.mxu0 %v8290_v23  ;;  %v8330_v23 = vld [vmem:[%s8974_s26 + $0x720] ss:$56 sps:$4 sm:$0xff]  }
  0xdd   : > { %5226 = vmatprep.subr.bf16.mxu0 %v8870_v1 }
  0xde   : > { %3954 = vmatmul.mubr.bf16.gmra.mrb[76].mxu1 %v8239_v22  ;;  %4982 = vmatmul.mubr.bf16.gmra.mrb[12].mxu0 %v8240_v24  ;;  %v8325_v22 = vld [vmem:[%s8974_s26 + $0x8] ss:$56 sps:$4 sm:$0xff]  }
  0xdf   : > { %3961 = vmatprep.mubr.bf16.mxu1 %v8241_v25  ;;  %4989 = vmatprep.mubr.bf16.mxu0 %v8243_v26  ;;  %v8331_v24 = vld [vmem:[%s10081_s1 + $0x100] sm:$0xff]   ;;  %v8333_v25 = vld [vmem:[%s8974_s26 + $0x7c] ss:$56 sps:$4 sm:$0xff]  }
  0xe0   : > { %5227 = vmatpush1.bf16.msra.mxu0 %v8304_v27  ;;  %v8335_v26 = vld [vmem:[%s8974_s26 + $0x794] ss:$56 sps:$4 sm:$0xff]  }
  0xe1   : > { %5228 = vmatprep.subr.bf16.mxu0 %v8870_v1  ;;  %v8345_v27 = vld [vmem:[%s10081_s1 + $0x108] sm:$0xff]  }
  0xe4   : > { %5229 = vmatpush1.bf16.msra.mxu0 %v8318_v29  ;;  %v8338_v29 = vld [vmem:[%s8974_s26 + $0x790] ss:$56 sps:$4 sm:$0xff]  }
  0xe5   : > { %5230 = vmatprep.subr.bf16.mxu0 %v8870_v1 }
  0xe6   : > { %3962 = vmatmul.mubr.bf16.gmra.mrb[80].mxu1 %v8245_v28  ;;  %4990 = vmatmul.mubr.bf16.gmra.mrb[16].mxu0 %v8246_v30  ;;  %v8337_v28 = vld [vmem:[%s8974_s26 + $0x78] ss:$56 sps:$4 sm:$0xff]   ;;  %v8339_v30 = vld [vmem:[%s8974_s26 + $0xec] ss:$56 sps:$4 sm:$0xff]  }
  0xe7   : > { %3969 = vmatprep.mubr.bf16.mxu1 %v8249_v31  ;;  %4997 = vmatprep.mubr.bf16.mxu0 %v8251_v32  ;;  %v8341_v31 = vld [vmem:[%s8974_s26 + $0x804] ss:$56 sps:$4 sm:$0xff]   ;;  %v8359_v32 = vld [vmem:[%s10081_s1 + $0x110] sm:$0xff]  }
  0xe8   : > { %5231 = vmatpush1.bf16.msra.mxu0 %v8332_v33  ;;  %v8373_v33 = vld [vmem:[%s10081_s1 + $0x118] sm:$0xff]  }
  0xe9   : > { %5232 = vmatprep.subr.bf16.mxu0 %v8870_v1 }
  0xec   : > { %5233 = vmatpush1.bf16.msra.mxu0 %v8346_v35  ;;  %v8344_v35 = vld [vmem:[%s8974_s26 + $0x800] ss:$56 sps:$4 sm:$0xff]  }
  0xed   : > { %5234 = vmatprep.subr.bf16.mxu0 %v8870_v1 }
  0xee   : > { %3970 = vmatmul.mubr.bf16.gmra.mrb[84].mxu1 %v8253_v34  ;;  %4998 = vmatmul.mubr.bf16.gmra.mrb[20].mxu0 %v8254_v36  ;;  %v8343_v34 = vld [vmem:[%s8974_s26 + $0xe8] ss:$56 sps:$4 sm:$0xff]   ;;  %v8347_v36 = vld [vmem:[%s8974_s26 + $0x15c] ss:$56 sps:$4 sm:$0xff]  }
  0xef   : > { %3977 = vmatprep.mubr.bf16.mxu1 %v8255_v37  ;;  %5005 = vmatprep.mubr.bf16.mxu0 %v8257_v38  ;;  %v8349_v37 = vld [vmem:[%s8974_s26 + $0x874] ss:$56 sps:$4 sm:$0xff]   ;;  %v8387_v38 = vld [vmem:[%s10081_s1 + $0x120] sm:$0xff]  }
  0xf0   : > { %5235 = vmatpush1.bf16.msra.mxu0 %v8360_v39  ;;  %v8401_v39 = vld [vmem:[%s10081_s1 + $0x128] sm:$0xff]  }
  0xf1   : > { %5236 = vmatprep.subr.bf16.mxu0 %v8870_v1 }
  0xf4   : > { %5237 = vmatpush1.bf16.msra.mxu0 %v8374_v44  ;;  %v8415_v44 = vld [vmem:[%s10081_s1 + $0x130] sm:$0xff]  }
  0xf5   : > { %5238 = vmatprep.subr.bf16.mxu0 %v8870_v1 }
  0xf6   : > { %3978 = vmatmul.mubr.bf16.gmra.mrb[88].mxu1 %v8259_v40  ;;  %5006 = vmatmul.mubr.bf16.gmra.mrb[24].mxu0 %v8260_v41  ;;  %v8351_v40 = vld [vmem:[%s8974_s26 + $0x158] ss:$56 sps:$4 sm:$0xff]  }
  0xf7   : > { %3985 = vmatprep.mubr.bf16.mxu1 %v8263_v42  ;;  %5013 = vmatprep.mubr.bf16.mxu0 %v8265_v43  ;;  %v8352_v41 = vld [vmem:[%s8974_s26 + $0x870] ss:$56 sps:$4 sm:$0xff]   ;;  %v8353_v42 = vld [vmem:[%s8974_s26 + $0x1cc] ss:$56 sps:$4 sm:$0xff]  }
  0xf8   : > { %5239 = vmatpush1.bf16.msra.mxu0 %v8388_v53  ;;  %v8355_v43 = vld [vmem:[%s8974_s26 + $0x8e4] ss:$56 sps:$4 sm:$0xff]   ;;  %v8366_v53 = vld [vmem:[%s8974_s26 + $0x950] ss:$56 sps:$4 sm:$0xff]  }
  0xf9   : > { %5240 = vmatprep.subr.bf16.mxu0 %v8870_v1 }
  0xfc   : > { %5241 = vmatpush1.bf16.msra.mxu0 %v8402_v62  ;;  %v8379_v62 = vld [vmem:[%s8974_s26 + $0x318] ss:$56 sps:$4 sm:$0xff]  }
  0xfd   : > { %5242 = vmatprep.subr.bf16.mxu0 %v8870_v1 }
  0xfe   : > { %3986 = vmatmul.mubr.bf16.gmra.mrb[92].mxu1 %v8267_v45  ;;  %5014 = vmatmul.mubr.bf16.gmra.mrb[28].mxu0 %v8268_v46  ;;  %v8429_v45 = vld [vmem:[%s10081_s1 + $0x138] sm:$0xff]   ;;  %v8357_v46 = vld [vmem:[%s8974_s26 + $0x1c8] ss:$56 sps:$4 sm:$0xff]  }
  0xff   : > { %3993 = vmatprep.mubr.bf16.mxu1 %v8269_v47  ;;  %5021 = vmatprep.mubr.bf16.mxu0 %v8271_v48  ;;  %v8358_v47 = vld [vmem:[%s8974_s26 + $0x8e0] ss:$56 sps:$4 sm:$0xff]   ;;  %v8361_v48 = vld [vmem:[%s8974_s26 + $0x23c] ss:$56 sps:$4 sm:$0xff]  }
 0x100   : > { %5243 = vmatpush1.bf16.msra.mxu0 %v8416_v8  ;;  %v8393_v8 = vld [vmem:[%s8974_s26 + $0x3f8] ss:$56 sps:$4 sm:$0xff]  }
 0x101   : > { %5244 = vmatprep.subr.bf16.mxu0 %v8870_v1 }
 0x104   : > { %5245 = vmatpush1.bf16.msra.mxu0 %v8430_v17  ;;  %v8407_v17 = vld [vmem:[%s8974_s26 + $0x4d8] ss:$56 sps:$4 sm:$0xff]  }
 0x105   : > { %5503 = vmatprep.subr.bf16.mxu0 %v8870_v1 }
 0x106   : > { %3994 = vmatmul.mubr.bf16.gmra.mrb[96].mxu1 %v8273_v49  ;;  %5022 = vmatmul.mubr.bf16.gmra.mrb[32].mxu0 %v8274_v50  ;;  %v8363_v49 = vld [vmem:[%s8974_s26 + $0x954] ss:$56 sps:$4 sm:$0xff]   ;;  %v8443_v50 = vld [vmem:[%s10081_s1 + $0x140] sm:$0xff]  }
 0x107   : > { %4001 = vmatprep.mubr.bf16.mxu1 %v8277_v51  ;;  %5029 = vmatprep.mubr.bf16.mxu0 %v8279_v52  ;;  %v8457_v51 = vld [vmem:[%s10081_s1 + $0x148] sm:$0xff]   ;;  %v8365_v52 = vld [vmem:[%s8974_s26 + $0x238] ss:$56 sps:$4 sm:$0xff]  }
 0x10e   : > { %4002 = vmatmul.mubr.bf16.gmra.mrb[100].mxu1 %v8281_v54  ;;  %5030 = vmatmul.mubr.bf16.gmra.mrb[36].mxu0 %v8282_v55  ;;  %v8367_v54 = vld [vmem:[%s8974_s26 + $0x2ac] ss:$56 sps:$4 sm:$0xff]  }
 0x10f   : > { %4009 = vmatprep.mubr.bf16.mxu1 %v8283_v56  ;;  %5037 = vmatprep.mubr.bf16.mxu0 %v8285_v57  ;;  %v8369_v55 = vld [vmem:[%s8974_s26 + $0x9c4] ss:$56 sps:$4 sm:$0xff]   ;;  %v8471_v56 = vld [vmem:[%s10081_s1 + $0x150] sm:$0xff]   ;;  %v8371_v57 = vld [vmem:[%s8974_s26 + $0x2a8] ss:$56 sps:$4 sm:$0xff]  }
 0x116   : > { %4010 = vmatmul.mubr.bf16.gmra.mrb[104].mxu1 %v8287_v58  ;;  %5038 = vmatmul.mubr.bf16.gmra.mrb[40].mxu0 %v8288_v59  ;;  %v8372_v58 = vld [vmem:[%s8974_s26 + $0x9c0] ss:$56 sps:$4 sm:$0xff]   ;;  %v8375_v59 = vld [vmem:[%s8974_s26 + $0x31c] ss:$56 sps:$4 sm:$0xff]  }
 0x117   : > { %4017 = vmatprep.mubr.bf16.mxu1 %v8291_v60  ;;  %5045 = vmatprep.mubr.bf16.mxu0 %v8293_v61  ;;  %v8377_v60 = vld [vmem:[%s8974_s26 + $0xa34] ss:$56 sps:$4 sm:$0xff]   ;;  %v8485_v61 = vld [vmem:[%s10081_s1 + $0x158] sm:$0xff]  }
 0x11e   : > { %4018 = vmatmul.mubr.bf16.gmra.mrb[108].mxu1 %v8295_v63  ;;  %5046 = vmatmul.mubr.bf16.gmra.mrb[44].mxu0 %v8296_v0  ;;  %v8380_v63 = vld [vmem:[%s8974_s26 + $0xa30] ss:$56 sps:$4 sm:$0xff]   ;;  %v8381_v0 = vld [vmem:[%s8974_s26 + $0x38c] ss:$56 sps:$4 sm:$0xff]  }
 0x11f   : > { %4025 = vmatprep.mubr.bf16.mxu1 %v8297_v2  ;;  %5053 = vmatprep.mubr.bf16.mxu0 %v8299_v3  ;;  %v8383_v2 = vld [vmem:[%s8974_s26 + $0xaa4] ss:$56 sps:$4 sm:$0xff]   ;;  %v8385_v3 = vld [vmem:[%s8974_s26 + $0x388] ss:$56 sps:$4 sm:$0xff]  }
 0x126   : > { %4026 = vmatmul.mubr.bf16.gmra.mrb[112].mxu1 %v8301_v4  ;;  %5054 = vmatmul.mubr.bf16.gmra.mrb[48].mxu0 %v8302_v5  ;;  %v8386_v4 = vld [vmem:[%s8974_s26 + $0xaa0] ss:$56 sps:$4 sm:$0xff]   ;;  %v8389_v5 = vld [vmem:[%s8974_s26 + $0x3fc] ss:$56 sps:$4 sm:$0xff]  }
 0x127   : > { %4033 = vmatprep.mubr.bf16.mxu1 %v8305_v6  ;;  %5061 = vmatprep.mubr.bf16.mxu0 %v8307_v7  ;;  %v8391_v6 = vld [vmem:[%s8974_s26 + $0xb14] ss:$56 sps:$4 sm:$0xff]   ;;  %v8499_v7 = vld [vmem:[%s10081_s1 + $0x160] sm:$0xff]  }
 0x12e   : > { %4034 = vmatmul.mubr.bf16.gmra.mrb[116].mxu1 %v8309_v9  ;;  %5062 = vmatmul.mubr.bf16.gmra.mrb[52].mxu0 %v8310_v10  ;;  %v8394_v9 = vld [vmem:[%s8974_s26 + $0xb10] ss:$56 sps:$4 sm:$0xff]   ;;  %v8395_v10 = vld [vmem:[%s8974_s26 + $0x46c] ss:$56 sps:$4 sm:$0xff]  }
 0x12f   : > { %4041 = vmatprep.mubr.bf16.mxu1 %v8311_v11  ;;  %5069 = vmatprep.mubr.bf16.mxu0 %v8313_v12  ;;  %v8397_v11 = vld [vmem:[%s8974_s26 + $0xb84] ss:$56 sps:$4 sm:$0xff]   ;;  %v8399_v12 = vld [vmem:[%s8974_s26 + $0x468] ss:$56 sps:$4 sm:$0xff]  }
 0x136   : > { %4042 = vmatmul.mubr.bf16.gmra.mrb[120].mxu1 %v8315_v13  ;;  %5070 = vmatmul.mubr.bf16.gmra.mrb[56].mxu0 %v8316_v14  ;;  %v8400_v13 = vld [vmem:[%s8974_s26 + $0xb80] ss:$56 sps:$4 sm:$0xff]   ;;  %v8403_v14 = vld [vmem:[%s8974_s26 + $0x4dc] ss:$56 sps:$4 sm:$0xff]  }
 0x137   : > { %4049 = vmatprep.mubr.bf16.mxu1 %v8319_v15  ;;  %5077 = vmatprep.mubr.bf16.mxu0 %v8321_v16  ;;  %v8405_v15 = vld [vmem:[%s8974_s26 + $0xbf4] ss:$56 sps:$4 sm:$0xff]  }
 0x138   : > { %v8513_v16 = vld [vmem:[%s10081_s1 + $0x168] sm:$0xff]  }
 0x13e   : > { %4050 = vmatmul.mubr.bf16.gmra.mrb[124].mxu1 %v8323_v18  ;;  %5078 = vmatmul.mubr.bf16.gmra.mrb[60].mxu0 %v8324_v19  ;;  %v8408_v18 = vld [vmem:[%s8974_s26 + $0xbf0] ss:$56 sps:$4 sm:$0xff]   ;;  %v8409_v19 = vld [vmem:[%s8974_s26 + $0x54c] ss:$56 sps:$4 sm:$0xff]  }
 0x13f   : > { %4090 = vmatprep.mubr.bf16.mxu1 %v8327_v20  ;;  %5085 = vmatprep.mubr.bf16.mxu0 %v8328_v21  ;;  %v8411_v20 = vld [vmem:[%s8974_s26 + $0xc64] ss:$56 sps:$4 sm:$0xff]   ;;  %v8413_v21 = vld [vmem:[%s8974_s26 + $0x548] ss:$56 sps:$4 sm:$0xff]  }
 0x146   : > { %4091 = vmatmul.mubr.bf16.vlgmr.msra.gmra.mrb[0].mxu1 %v8325_v22  ;;  %5086 = vmatmul.mubr.bf16.gmra.mrb[64].mxu0 %v8330_v23  ;;  %v8414_v22 = vld [vmem:[%s8974_s26 + $0xc60] ss:$56 sps:$4 sm:$0xff]   ;;  %v8417_v23 = vld [vmem:[%s8974_s26 + $0x5bc] ss:$56 sps:$4 sm:$0xff]  }
 0x147   : > { %4348 = vmatpush1.bf16.msra.mxu1 %v8331_v24  ;;  %4098 = vmatprep.mubr.bf16.mxu1 %v8333_v25  ;;  %v8419_v24 = vld [vmem:[%s8974_s26 + $0xcd4] ss:$56 sps:$4 sm:$0xff]  }
 0x148   : > { %5093 = vmatprep.mubr.bf16.mxu0 %v8335_v26  ;;  %4349 = vmatprep.subr.bf16.mxu1 %v8870_v1  ;;  %v8527_v25 = vld [vmem:[%s10081_s1 + $0x170] sm:$0xff]  }
 0x149   : > { %v8421_v26 = vld [vmem:[%s8974_s26 + $0x5b8] ss:$56 sps:$4 sm:$0xff]  }
 0x14b   : > { %4350 = vmatpush1.bf16.msra.mxu1 %v8345_v27  ;;  %v8422_v27 = vld [vmem:[%s8974_s26 + $0xcd0] ss:$56 sps:$4 sm:$0xff]  }
 0x14c   : > { %4351 = vmatprep.subr.bf16.mxu1 %v8870_v1 }
 0x14e   : > { %4099 = vmatmul.mubr.bf16.gmra.mrb[4].mxu1 %v8337_v28  ;;  %5094 = vmatmul.mubr.bf16.gmra.mrb[68].mxu0 %v8338_v29  ;;  %v8423_v28 = vld [vmem:[%s8974_s26 + $0x62c] ss:$56 sps:$4 sm:$0xff]  }
 0x14f   : > { %4106 = vmatprep.mubr.bf16.mxu1 %v8339_v30  ;;  %5101 = vmatprep.mubr.bf16.mxu0 %v8341_v31  ;;  %v8425_v29 = vld [vmem:[%s8974_s26 + $0xd44] ss:$56 sps:$4 sm:$0xff]   ;;  %v8427_v30 = vld [vmem:[%s8974_s26 + $0x628] ss:$56 sps:$4 sm:$0xff]  }
 0x150   : > { %4352 = vmatpush1.bf16.msra.mxu1 %v8359_v32  ;;  %v8428_v31 = vld [vmem:[%s8974_s26 + $0xd40] ss:$56 sps:$4 sm:$0xff]   ;;  %v8431_v32 = vld [vmem:[%s8974_s26 + $0x69c] ss:$56 sps:$4 sm:$0xff]  }
 0x151   : > { %4353 = vmatprep.subr.bf16.mxu1 %v8870_v1 }
 0x154   : > { %4354 = vmatpush1.bf16.msra.mxu1 %v8373_v33  ;;  %v8433_v33 = vld [vmem:[%s8974_s26 + $0xdb4] ss:$56 sps:$4 sm:$0xff]  }
 0x155   : > { %4355 = vmatprep.subr.bf16.mxu1 %v8870_v1 }
 0x156   : > { %4107 = vmatmul.mubr.bf16.gmra.mrb[8].mxu1 %v8343_v34  ;;  %5102 = vmatmul.mubr.bf16.gmra.mrb[72].mxu0 %v8344_v35  ;;  %v8541_v34 = vld [vmem:[%s10081_s1 + $0x178] sm:$0xff]  }
 0x157   : > { %4114 = vmatprep.mubr.bf16.mxu1 %v8347_v36  ;;  %5109 = vmatprep.mubr.bf16.mxu0 %v8349_v37  ;;  %v8435_v35 = vld [vmem:[%s8974_s26 + $0x698] ss:$56 sps:$4 sm:$0xff]   ;;  %v8437_v37 = vld [vmem:[%s8974_s26 + $0x70c] ss:$56 sps:$4 sm:$0xff]  }
 0x158   : > { %4356 = vmatpush1.bf16.msra.mxu1 %v8387_v38  ;;  %v8436_v36 = vld [vmem:[%s8974_s26 + $0xdb0] ss:$56 sps:$4 sm:$0xff]   ;;  %v8441_v38 = vld [vmem:[%s8974_s26 + $0x2c] ss:$56 sps:$4 sm:$0xff]  }
 0x159   : > { %4357 = vmatprep.subr.bf16.mxu1 %v8870_v1 }
 0x15c   : > { %4358 = vmatpush1.bf16.msra.mxu1 %v8401_v39  ;;  %v8442_v39 = vld [vmem:[%s8974_s26 + $0x708] ss:$56 sps:$4 sm:$0xff]  }
 0x15d   : > { %4359 = vmatprep.subr.bf16.mxu1 %v8870_v1 }
 0x15e   : > { %4115 = vmatmul.mubr.bf16.gmra.mrb[12].mxu1 %v8351_v40  ;;  %5110 = vmatmul.mubr.bf16.gmra.mrb[76].mxu0 %v8352_v41  ;;  %v8439_v40 = vld [vmem:[%s8974_s26 + $0x28] ss:$56 sps:$4 sm:$0xff]   ;;  %v8445_v41 = vld [vmem:[%s8974_s26 + $0x77c] ss:$56 sps:$4 sm:$0xff]  }
 0x15f   : > { %4122 = vmatprep.mubr.bf16.mxu1 %v8353_v42  ;;  %5117 = vmatprep.mubr.bf16.mxu0 %v8355_v43  ;;  %v8444_v42 = vld [vmem:[%s10081_s1 + $0x300] sm:$0xff]   ;;  %v8447_v43 = vld [vmem:[%s8974_s26 + $0x9c] ss:$56 sps:$4 sm:$0xff]  }
 0x160   : > { %4360 = vmatpush1.bf16.msra.mxu1 %v8415_v44  ;;  %v8458_v44 = vld [vmem:[%s10081_s1 + $0x308] sm:$0xff]  }
 0x161   : > { %4361 = vmatprep.subr.bf16.mxu1 %v8870_v1 }
 0x164   : > { %4362 = vmatpush1.bf16.msra.mxu1 %v8429_v45  ;;  %v8449_v45 = vld [vmem:[%s8974_s26 + $0x778] ss:$56 sps:$4 sm:$0xff]  }
 0x165   : > { %4363 = vmatprep.subr.bf16.mxu1 %v8870_v1 }
 0x166   : > { %4123 = vmatmul.mubr.bf16.gmra.mrb[16].mxu1 %v8357_v46  ;;  %5118 = vmatmul.mubr.bf16.gmra.mrb[80].mxu0 %v8358_v47  ;;  %v8450_v46 = vld [vmem:[%s8974_s26 + $0x98] ss:$56 sps:$4 sm:$0xff]   ;;  %v8451_v47 = vld [vmem:[%s8974_s26 + $0x7ec] ss:$56 sps:$4 sm:$0xff]  }
 0x167   : > { %4130 = vmatprep.mubr.bf16.mxu1 %v8361_v48  ;;  %5125 = vmatprep.mubr.bf16.mxu0 %v8363_v49  ;;  %v8453_v48 = vld [vmem:[%s8974_s26 + $0x10c] ss:$56 sps:$4 sm:$0xff]   ;;  %v8472_v49 = vld [vmem:[%s10081_s1 + $0x310] sm:$0xff]  }
 0x168   : > { %4364 = vmatpush1.bf16.msra.mxu1 %v8443_v50  ;;  %v8486_v50 = vld [vmem:[%s10081_s1 + $0x318] sm:$0xff]  }
 0x169   : > { %4365 = vmatprep.subr.bf16.mxu1 %v8870_v1 }
 0x16c   : > { %4366 = vmatpush1.bf16.msra.mxu1 %v8457_v51  ;;  %v8455_v51 = vld [vmem:[%s8974_s26 + $0x7e8] ss:$56 sps:$4 sm:$0xff]  }
 0x16d   : > { %4367 = vmatprep.subr.bf16.mxu1 %v8870_v1 }
 0x16e   : > { %4131 = vmatmul.mubr.bf16.gmra.mrb[20].mxu1 %v8365_v52  ;;  %5126 = vmatmul.mubr.bf16.gmra.mrb[84].mxu0 %v8366_v53  ;;  %v8456_v52 = vld [vmem:[%s8974_s26 + $0x108] ss:$56 sps:$4 sm:$0xff]   ;;  %v8459_v53 = vld [vmem:[%s8974_s26 + $0x85c] ss:$56 sps:$4 sm:$0xff]  }
 0x16f   : > { %4138 = vmatprep.mubr.bf16.mxu1 %v8367_v54  ;;  %5133 = vmatprep.mubr.bf16.mxu0 %v8369_v55  ;;  %v8461_v54 = vld [vmem:[%s8974_s26 + $0x17c] ss:$56 sps:$4 sm:$0xff]   ;;  %v8500_v55 = vld [vmem:[%s10081_s1 + $0x320] sm:$0xff]  }
 0x170   : > { %4368 = vmatpush1.bf16.msra.mxu1 %v8471_v56  ;;  %v8514_v56 = vld [vmem:[%s10081_s1 + $0x328] sm:$0xff]  }
 0x171   : > { %4369 = vmatprep.subr.bf16.mxu1 %v8870_v1 }
 0x174   : > { %4370 = vmatpush1.bf16.msra.mxu1 %v8485_v61  ;;  %v8528_v61 = vld [vmem:[%s10081_s1 + $0x330] sm:$0xff]  }
 0x175   : > { %4371 = vmatprep.subr.bf16.mxu1 %v8870_v1 }
 0x176   : > { %4139 = vmatmul.mubr.bf16.gmra.mrb[24].mxu1 %v8371_v57  ;;  %5134 = vmatmul.mubr.bf16.gmra.mrb[88].mxu0 %v8372_v58  ;;  %v8463_v57 = vld [vmem:[%s8974_s26 + $0x858] ss:$56 sps:$4 sm:$0xff]  }
 0x177   : > { %4146 = vmatprep.mubr.bf16.mxu1 %v8375_v59  ;;  %5141 = vmatprep.mubr.bf16.mxu0 %v8377_v60  ;;  %v8464_v58 = vld [vmem:[%s8974_s26 + $0x178] ss:$56 sps:$4 sm:$0xff]   ;;  %v8465_v59 = vld [vmem:[%s8974_s26 + $0x8cc] ss:$56 sps:$4 sm:$0xff]  }
 0x178   : > { %4372 = vmatpush1.bf16.msra.mxu1 %v8499_v7  ;;  %v8467_v60 = vld [vmem:[%s8974_s26 + $0x1ec] ss:$56 sps:$4 sm:$0xff]   ;;  %v8478_v7 = vld [vmem:[%s8974_s26 + $0x258] ss:$56 sps:$4 sm:$0xff]  }
 0x179   : > { %4373 = vmatprep.subr.bf16.mxu1 %v8870_v1 }
 0x17c   : > { %4374 = vmatpush1.bf16.msra.mxu1 %v8513_v16  ;;  %v8491_v16 = vld [vmem:[%s8974_s26 + $0xa18] ss:$56 sps:$4 sm:$0xff]  }
 0x17d   : > { %4375 = vmatprep.subr.bf16.mxu1 %v8870_v1 }
 0x17e   : > { %4147 = vmatmul.mubr.bf16.gmra.mrb[28].mxu1 %v8379_v62  ;;  %5142 = vmatmul.mubr.bf16.gmra.mrb[92].mxu0 %v8380_v63  ;;  %v8542_v62 = vld [vmem:[%s10081_s1 + $0x338] sm:$0xff]   ;;  %v8469_v63 = vld [vmem:[%s8974_s26 + $0x8c8] ss:$56 sps:$4 sm:$0xff]  }
 0x17f   : > { %4154 = vmatprep.mubr.bf16.mxu1 %v8381_v0  ;;  %5149 = vmatprep.mubr.bf16.mxu0 %v8383_v2  ;;  %v8470_v0 = vld [vmem:[%s8974_s26 + $0x1e8] ss:$56 sps:$4 sm:$0xff]   ;;  %v8473_v2 = vld [vmem:[%s8974_s26 + $0x93c] ss:$56 sps:$4 sm:$0xff]  }
 0x180   : > { %4376 = vmatpush1.bf16.msra.mxu1 %v8527_v25  ;;  %v8505_v25 = vld [vmem:[%s8974_s26 + $0xaf8] ss:$56 sps:$4 sm:$0xff]  }
 0x181   : > { %4377 = vmatprep.subr.bf16.mxu1 %v8870_v1 }
 0x184   : > { %4378 = vmatpush1.bf16.msra.mxu1 %v8541_v34  ;;  %v8519_v34 = vld [vmem:[%s8974_s26 + $0xbd8] ss:$56 sps:$4 sm:$0xff]  }
 0x185   : > { %7251 = vmatprep.subr.bf16.mxu1 %v8870_v1 }
 0x186   : > { %4155 = vmatmul.mubr.bf16.gmra.mrb[32].mxu1 %v8385_v3  ;;  %5150 = vmatmul.mubr.bf16.gmra.mrb[96].mxu0 %v8386_v4  ;;  %v8475_v3 = vld [vmem:[%s8974_s26 + $0x25c] ss:$56 sps:$4 sm:$0xff]   ;;  %v8555_v4 = vld [vmem:[%s10081_s1 + $0x340] sm:$0xff]  }
 0x187   : > { %4162 = vmatprep.mubr.bf16.mxu1 %v8389_v5  ;;  %5157 = vmatprep.mubr.bf16.mxu0 %v8391_v6  ;;  %v8568_v5 = vld [vmem:[%s10081_s1 + $0x348] sm:$0xff]   ;;  %v8477_v6 = vld [vmem:[%s8974_s26 + $0x938] ss:$56 sps:$4 sm:$0xff]  }
 0x18e   : > { %4163 = vmatmul.mubr.bf16.gmra.mrb[36].mxu1 %v8393_v8  ;;  %5158 = vmatmul.mubr.bf16.gmra.mrb[100].mxu0 %v8394_v9  ;;  %v8479_v8 = vld [vmem:[%s8974_s26 + $0x9ac] ss:$56 sps:$4 sm:$0xff]  }
 0x18f   : > { %4170 = vmatprep.mubr.bf16.mxu1 %v8395_v10  ;;  %5165 = vmatprep.mubr.bf16.mxu0 %v8397_v11  ;;  %v8481_v9 = vld [vmem:[%s8974_s26 + $0x2cc] ss:$56 sps:$4 sm:$0xff]   ;;  %v8581_v10 = vld [vmem:[%s10081_s1 + $0x350] sm:$0xff]   ;;  %v8483_v11 = vld [vmem:[%s8974_s26 + $0x9a8] ss:$56 sps:$4 sm:$0xff]  }
 0x196   : > { %4171 = vmatmul.mubr.bf16.gmra.mrb[40].mxu1 %v8399_v12  ;;  %5166 = vmatmul.mubr.bf16.gmra.mrb[104].mxu0 %v8400_v13  ;;  %v8484_v12 = vld [vmem:[%s8974_s26 + $0x2c8] ss:$56 sps:$4 sm:$0xff]   ;;  %v8487_v13 = vld [vmem:[%s8974_s26 + $0xa1c] ss:$56 sps:$4 sm:$0xff]  }
 0x197   : > { %4178 = vmatprep.mubr.bf16.mxu1 %v8403_v14  ;;  %5173 = vmatprep.mubr.bf16.mxu0 %v8405_v15  ;;  %v8489_v14 = vld [vmem:[%s8974_s26 + $0x33c] ss:$56 sps:$4 sm:$0xff]  }
 0x198   : > { %v8594_v15 = vld [vmem:[%s10081_s1 + $0x358] sm:$0xff]  }
 0x19e   : > { %4179 = vmatmul.mubr.bf16.gmra.mrb[44].mxu1 %v8407_v17  ;;  %5174 = vmatmul.mubr.bf16.gmra.mrb[108].mxu0 %v8408_v18  ;;  %v8492_v17 = vld [vmem:[%s8974_s26 + $0x338] ss:$56 sps:$4 sm:$0xff]   ;;  %v8493_v18 = vld [vmem:[%s8974_s26 + $0xa8c] ss:$56 sps:$4 sm:$0xff]  }
 0x19f   : > { %4186 = vmatprep.mubr.bf16.mxu1 %v8409_v19  ;;  %5181 = vmatprep.mubr.bf16.mxu0 %v8411_v20  ;;  %v8495_v19 = vld [vmem:[%s8974_s26 + $0x3ac] ss:$56 sps:$4 sm:$0xff]   ;;  %v8497_v20 = vld [vmem:[%s8974_s26 + $0xa88] ss:$56 sps:$4 sm:$0xff]  }
 0x1a6   : > { %4187 = vmatmul.mubr.bf16.gmra.mrb[48].mxu1 %v8413_v21  ;;  %5182 = vmatmul.mubr.bf16.gmra.mrb[112].mxu0 %v8414_v22  ;;  %v8498_v21 = vld [vmem:[%s8974_s26 + $0x3a8] ss:$56 sps:$4 sm:$0xff]   ;;  %v8501_v22 = vld [vmem:[%s8974_s26 + $0xafc] ss:$56 sps:$4 sm:$0xff]  }
 0x1a7   : > { %4194 = vmatprep.mubr.bf16.mxu1 %v8417_v23  ;;  %5189 = vmatprep.mubr.bf16.mxu0 %v8419_v24  ;;  %v8503_v23 = vld [vmem:[%s8974_s26 + $0x41c] ss:$56 sps:$4 sm:$0xff]   ;;  %v8607_v24 = vld [vmem:[%s10081_s1 + $0x360] sm:$0xff]  }
 0x1ae   : > { %4195 = vmatmul.mubr.bf16.gmra.mrb[52].mxu1 %v8421_v26  ;;  %5190 = vmatmul.mubr.bf16.gmra.mrb[116].mxu0 %v8422_v27  ;;  %v8506_v26 = vld [vmem:[%s8974_s26 + $0x418] ss:$56 sps:$4 sm:$0xff]   ;;  %v8507_v27 = vld [vmem:[%s8974_s26 + $0xb6c] ss:$56 sps:$4 sm:$0xff]  }
 0x1af   : > { %4202 = vmatprep.mubr.bf16.mxu1 %v8423_v28  ;;  %5197 = vmatprep.mubr.bf16.mxu0 %v8425_v29  ;;  %v8509_v28 = vld [vmem:[%s8974_s26 + $0x48c] ss:$56 sps:$4 sm:$0xff]   ;;  %v8511_v29 = vld [vmem:[%s8974_s26 + $0xb68] ss:$56 sps:$4 sm:$0xff]  }
 0x1b6   : > { %4203 = vmatmul.mubr.bf16.gmra.mrb[56].mxu1 %v8427_v30  ;;  %5198 = vmatmul.mubr.bf16.gmra.mrb[120].mxu0 %v8428_v31  ;;  %v8512_v30 = vld [vmem:[%s8974_s26 + $0x488] ss:$56 sps:$4 sm:$0xff]   ;;  %v8515_v31 = vld [vmem:[%s8974_s26 + $0xbdc] ss:$56 sps:$4 sm:$0xff]  }
 0x1b7   : > { %4210 = vmatprep.mubr.bf16.mxu1 %v8431_v32  ;;  %5205 = vmatprep.mubr.bf16.mxu0 %v8433_v33  ;;  %v8517_v32 = vld [vmem:[%s8974_s26 + $0x4fc] ss:$56 sps:$4 sm:$0xff]   ;;  %v8620_v33 = vld [vmem:[%s10081_s1 + $0x368] sm:$0xff]  }
 0x1be   : > { %4211 = vmatmul.mubr.bf16.gmra.mrb[60].mxu1 %v8435_v35  ;;  %5206 = vmatmul.mubr.bf16.gmra.mrb[124].mxu0 %v8436_v36  ;;  %v8520_v35 = vld [vmem:[%s8974_s26 + $0x4f8] ss:$56 sps:$4 sm:$0xff]   ;;  %v8521_v36 = vld [vmem:[%s8974_s26 + $0xc4c] ss:$56 sps:$4 sm:$0xff]  }
 0x1bf   : > { %4218 = vmatprep.mubr.bf16.mxu1 %v8437_v37  ;;  %5246 = vmatprep.mubr.bf16.mxu0 %v8441_v38  ;;  %v8523_v37 = vld [vmem:[%s8974_s26 + $0x56c] ss:$56 sps:$4 sm:$0xff]   ;;  %v8525_v38 = vld [vmem:[%s8974_s26 + $0xc48] ss:$56 sps:$4 sm:$0xff]  }
 0x1c6   : > { %4219 = vmatmul.mubr.bf16.gmra.mrb[64].mxu1 %v8442_v39  ;;  %5247 = vmatmul.mubr.bf16.vlgmr.msra.gmra.mrb[0].mxu0 %v8439_v40  ;;  %v8526_v39 = vld [vmem:[%s8974_s26 + $0x568] ss:$56 sps:$4 sm:$0xff]   ;;  %v8529_v40 = vld [vmem:[%s8974_s26 + $0xcbc] ss:$56 sps:$4 sm:$0xff]  }
 0x1c7   : > { %4226 = vmatprep.mubr.bf16.mxu1 %v8445_v41  ;;  %5504 = vmatpush1.bf16.msra.mxu0 %v8444_v42  ;;  %v8531_v41 = vld [vmem:[%s8974_s26 + $0x5dc] ss:$56 sps:$4 sm:$0xff]  }
 0x1c8   : > { %5254 = vmatprep.mubr.bf16.mxu0 %v8447_v43  ;;  %5505 = vmatprep.subr.bf16.mxu0 %v8870_v1  ;;  %v8633_v42 = vld [vmem:[%s10081_s1 + $0x370] sm:$0xff]  }
 0x1c9   : > { %v8533_v43 = vld [vmem:[%s8974_s26 + $0xcb8] ss:$56 sps:$4 sm:$0xff]  }
 0x1cb   : > { %5506 = vmatpush1.bf16.msra.mxu0 %v8458_v44  ;;  %v8534_v44 = vld [vmem:[%s8974_s26 + $0x5d8] ss:$56 sps:$4 sm:$0xff]  }
 0x1cc   : > { %5507 = vmatprep.subr.bf16.mxu0 %v8870_v1 }
 0x1ce   : > { %4227 = vmatmul.mubr.bf16.gmra.mrb[68].mxu1 %v8449_v45  ;;  %5255 = vmatmul.mubr.bf16.gmra.mrb[4].mxu0 %v8450_v46  ;;  %v8535_v45 = vld [vmem:[%s8974_s26 + $0xd2c] ss:$56 sps:$4 sm:$0xff]  }
 0x1cf   : > { %4234 = vmatprep.mubr.bf16.mxu1 %v8451_v47  ;;  %5262 = vmatprep.mubr.bf16.mxu0 %v8453_v48  ;;  %v8537_v46 = vld [vmem:[%s8974_s26 + $0x64c] ss:$56 sps:$4 sm:$0xff]   ;;  %v8539_v47 = vld [vmem:[%s8974_s26 + $0xd28] ss:$56 sps:$4 sm:$0xff]  }
 0x1d0   : > { %5508 = vmatpush1.bf16.msra.mxu0 %v8472_v49  ;;  %v8540_v48 = vld [vmem:[%s8974_s26 + $0x648] ss:$56 sps:$4 sm:$0xff]   ;;  %v8543_v49 = vld [vmem:[%s8974_s26 + $0xd9c] ss:$56 sps:$4 sm:$0xff]  }
 0x1d1   : > { %5509 = vmatprep.subr.bf16.mxu0 %v8870_v1 }
 0x1d4   : > { %5510 = vmatpush1.bf16.msra.mxu0 %v8486_v50  ;;  %v8545_v50 = vld [vmem:[%s8974_s26 + $0x6bc] ss:$56 sps:$4 sm:$0xff]  }
 0x1d5   : > { %5511 = vmatprep.subr.bf16.mxu0 %v8870_v1 }
 0x1d6   : > { %4235 = vmatmul.mubr.bf16.gmra.mrb[72].mxu1 %v8455_v51  ;;  %5263 = vmatmul.mubr.bf16.gmra.mrb[8].mxu0 %v8456_v52  ;;  %v8646_v51 = vld [vmem:[%s10081_s1 + $0x378] sm:$0xff]  }
 0x1d7   : > { %4242 = vmatprep.mubr.bf16.mxu1 %v8459_v53  ;;  %5270 = vmatprep.mubr.bf16.mxu0 %v8461_v54  ;;  %v8547_v52 = vld [vmem:[%s8974_s26 + $0xd98] ss:$56 sps:$4 sm:$0xff]   ;;  %v8551_v54 = vld [vmem:[%s8974_s26 + $0x14] ss:$56 sps:$4 sm:$0xff]  }
 0x1d8   : > { %5512 = vmatpush1.bf16.msra.mxu0 %v8500_v55  ;;  %v8548_v53 = vld [vmem:[%s8974_s26 + $0x6b8] ss:$56 sps:$4 sm:$0xff]   ;;  %v8552_v55 = vld [vmem:[%s8974_s26 + $0x72c] ss:$56 sps:$4 sm:$0xff]  }
 0x1d9   : > { %5513 = vmatprep.subr.bf16.mxu0 %v8870_v1 }
 0x1dc   : > { %5514 = vmatpush1.bf16.msra.mxu0 %v8514_v56  ;;  %v8549_v56 = vld [vmem:[%s8974_s26 + $0x10] ss:$56 sps:$4 sm:$0xff]  }
 0x1dd   : > { %5515 = vmatprep.subr.bf16.mxu0 %v8870_v1 }
 0x1de   : > { %4243 = vmatmul.mubr.bf16.gmra.mrb[76].mxu1 %v8463_v57  ;;  %5271 = vmatmul.mubr.bf16.gmra.mrb[12].mxu0 %v8464_v58  ;;  %v8554_v57 = vld [vmem:[%s8974_s26 + $0x728] ss:$56 sps:$4 sm:$0xff]   ;;  %v8556_v58 = vld [vmem:[%s8974_s26 + $0x84] ss:$56 sps:$4 sm:$0xff]  }
 0x1df   : > { %4250 = vmatprep.mubr.bf16.mxu1 %v8465_v59  ;;  %5278 = vmatprep.mubr.bf16.mxu0 %v8467_v60  ;;  %v8558_v59 = vld [vmem:[%s8974_s26 + $0x79c] ss:$56 sps:$4 sm:$0xff]   ;;  %v8845_v60 = vld [vmem:[%s10081_s1 + $0x180] sm:$0xff]  }
 0x1e0   : > { %5516 = vmatpush1.bf16.msra.mxu0 %v8528_v61  ;;  %v8560_v61 = vld [vmem:[%s8974_s26 + $0x80] ss:$56 sps:$4 sm:$0xff]  }
 0x1e1   : > { %5517 = vmatprep.subr.bf16.mxu0 %v8870_v1 }
 0x1e4   : > { %5518 = vmatpush1.bf16.msra.mxu0 %v8542_v62  ;;  %v8561_v62 = vld [vmem:[%s8974_s26 + $0x798] ss:$56 sps:$4 sm:$0xff]  }
 0x1e5   : > { %5519 = vmatprep.subr.bf16.mxu0 %v8870_v1 }
 0x1e6   : > { %4251 = vmatmul.mubr.bf16.gmra.mrb[80].mxu1 %v8469_v63  ;;  %5279 = vmatmul.mubr.bf16.gmra.mrb[16].mxu0 %v8470_v0  ;;  %v8562_v63 = vld [vmem:[%s8974_s26 + $0xf4] ss:$56 sps:$4 sm:$0xff]  }
 0x1e7   : > { %4258 = vmatprep.mubr.bf16.mxu1 %v8473_v2  ;;  %5286 = vmatprep.mubr.bf16.mxu0 %v8475_v3  ;;  %v8846_v0 = vld [vmem:[%s10081_s1 + $0x188] sm:$0xff]   ;;  %v8847_v3 = vld [vmem:[%s10081_s1 + $0x190] sm:$0xff]  }
 0x1e8   : > { %5520 = vmatpush1.bf16.msra.mxu0 %v8555_v4  ;;  %v8564_v2 = vld [vmem:[%s8974_s26 + $0x80c] ss:$56 sps:$4 sm:$0xff]   ;;  %v8566_v4 = vld [vmem:[%s8974_s26 + $0xf0] ss:$56 sps:$4 sm:$0xff]  }
 0x1e9   : > { %5521 = vmatprep.subr.bf16.mxu0 %v8870_v1 }
 0x1ec   : > { %5522 = vmatpush1.bf16.msra.mxu0 %v8568_v5  ;;  %v8567_v5 = vld [vmem:[%s8974_s26 + $0x808] ss:$56 sps:$4 sm:$0xff]  }
 0x1ed   : > { %5523 = vmatprep.subr.bf16.mxu0 %v8870_v1 }
 0x1ee   : > { %4259 = vmatmul.mubr.bf16.gmra.mrb[84].mxu1 %v8477_v6  ;;  %5287 = vmatmul.mubr.bf16.gmra.mrb[20].mxu0 %v8478_v7  ;;  %v8569_v6 = vld [vmem:[%s8974_s26 + $0x164] ss:$56 sps:$4 sm:$0xff]  }
 0x1ef   : > { %4266 = vmatprep.mubr.bf16.mxu1 %v8479_v8  ;;  %5294 = vmatprep.mubr.bf16.mxu0 %v8481_v9  ;;  %v8571_v7 = vld [vmem:[%s8974_s26 + $0x87c] ss:$56 sps:$4 sm:$0xff]   ;;  %v8849_v9 = vld [vmem:[%s10081_s1 + $0x1a0] sm:$0xff]  }
 0x1f0   : > { %5524 = vmatpush1.bf16.msra.mxu0 %v8581_v10  ;;  %v8848_v8 = vld [vmem:[%s10081_s1 + $0x198] sm:$0xff]  }
 0x1f1   : > { %5525 = vmatprep.subr.bf16.mxu0 %v8870_v1  ;;  %v8573_v10 = vld [vmem:[%s8974_s26 + $0x160] ss:$56 sps:$4 sm:$0xff]  }
 0x1f4   : > { %5526 = vmatpush1.bf16.msra.mxu0 %v8594_v15  ;;  %v8851_v15 = vld [vmem:[%s10081_s1 + $0x1b0] sm:$0xff]  }
 0x1f5   : > { %5527 = vmatprep.subr.bf16.mxu0 %v8870_v1 }
 0x1f6   : > { %4267 = vmatmul.mubr.bf16.gmra.mrb[88].mxu1 %v8483_v11  ;;  %5295 = vmatmul.mubr.bf16.gmra.mrb[24].mxu0 %v8484_v12  ;;  %v8574_v11 = vld [vmem:[%s8974_s26 + $0x878] ss:$56 sps:$4 sm:$0xff]   ;;  %v8575_v12 = vld [vmem:[%s8974_s26 + $0x1d4] ss:$56 sps:$4 sm:$0xff]  }
 0x1f7   : > { %4274 = vmatprep.mubr.bf16.mxu1 %v8487_v13  ;;  %5302 = vmatprep.mubr.bf16.mxu0 %v8489_v14  ;;  %v8577_v13 = vld [vmem:[%s8974_s26 + $0x8ec] ss:$56 sps:$4 sm:$0xff]  }
 0x1f8   : > { %5528 = vmatpush1.bf16.msra.mxu0 %v8607_v24  ;;  %v8850_v14 = vld [vmem:[%s10081_s1 + $0x1a8] sm:$0xff]  }
 0x1f9   : > { %5529 = vmatprep.subr.bf16.mxu0 %v8870_v1  ;;  %v8588_v24 = vld [vmem:[%s8974_s26 + $0x2b4] ss:$56 sps:$4 sm:$0xff]  }
 0x1fc   : > { %5530 = vmatpush1.bf16.msra.mxu0 %v8620_v33  ;;  %v8857_v33 = vld [vmem:[%s10081_s1 + $0x1e0] sm:$0xff]  }
 0x1fd   : > { %5531 = vmatprep.subr.bf16.mxu0 %v8870_v1 }
 0x1fe   : > { %4275 = vmatmul.mubr.bf16.gmra.mrb[92].mxu1 %v8491_v16  ;;  %5303 = vmatmul.mubr.bf16.gmra.mrb[28].mxu0 %v8492_v17  ;;  %v8579_v16 = vld [vmem:[%s8974_s26 + $0x1d0] ss:$56 sps:$4 sm:$0xff]  }
 0x1ff   : > { %4282 = vmatprep.mubr.bf16.mxu1 %v8493_v18  ;;  %5310 = vmatprep.mubr.bf16.mxu0 %v8495_v19  ;;  %v8580_v17 = vld [vmem:[%s8974_s26 + $0x8e8] ss:$56 sps:$4 sm:$0xff]   ;;  %v8582_v18 = vld [vmem:[%s8974_s26 + $0x244] ss:$56 sps:$4 sm:$0xff]  }
 0x200   : > { %5532 = vmatpush1.bf16.msra.mxu0 %v8633_v42  ;;  %v8584_v19 = vld [vmem:[%s8974_s26 + $0x95c] ss:$56 sps:$4 sm:$0xff]  }
 0x201   : > { %5533 = vmatprep.subr.bf16.mxu0 %v8870_v1  ;;  %v8608_v42 = vld [vmem:[%s8974_s26 + $0x404] ss:$56 sps:$4 sm:$0xff]  }
 0x204   : > { %5534 = vmatpush1.bf16.msra.mxu0 %v8646_v51  ;;  %v8623_v51 = vld [vmem:[%s8974_s26 + $0xbfc] ss:$56 sps:$4 sm:$0xff]  }
 0x206   : > { %4283 = vmatmul.mubr.bf16.gmra.mrb[96].mxu1 %v8497_v20  ;;  %5311 = vmatmul.mubr.bf16.gmra.mrb[32].mxu0 %v8498_v21  ;;  %v8852_v20 = vld [vmem:[%s10081_s1 + $0x1b8] sm:$0xff]   ;;  %v8853_v21 = vld [vmem:[%s10081_s1 + $0x1c0] sm:$0xff]  }
 0x207   : > { %4290 = vmatprep.mubr.bf16.mxu1 %v8501_v22  ;;  %5318 = vmatprep.mubr.bf16.mxu0 %v8503_v23  ;;  %v8586_v22 = vld [vmem:[%s8974_s26 + $0x240] ss:$56 sps:$4 sm:$0xff]  }
 0x208   : > { %v8587_v23 = vld [vmem:[%s8974_s26 + $0x958] ss:$56 sps:$4 sm:$0xff]  }
 0x20e   : > { %4291 = vmatmul.mubr.bf16.gmra.mrb[100].mxu1 %v8505_v25  ;;  %5319 = vmatmul.mubr.bf16.gmra.mrb[36].mxu0 %v8506_v26  ;;  %v8590_v25 = vld [vmem:[%s8974_s26 + $0x9cc] ss:$56 sps:$4 sm:$0xff]  }
 0x20f   : > { %4298 = vmatprep.mubr.bf16.mxu1 %v8507_v27  ;;  %5326 = vmatprep.mubr.bf16.mxu0 %v8509_v28  ;;  %v8854_v26 = vld [vmem:[%s10081_s1 + $0x1c8] sm:$0xff]   ;;  %v8855_v27 = vld [vmem:[%s10081_s1 + $0x1d0] sm:$0xff]  }
 0x210   : > { %v8592_v28 = vld [vmem:[%s8974_s26 + $0x2b0] ss:$56 sps:$4 sm:$0xff]  }
 0x216   : > { %4299 = vmatmul.mubr.bf16.gmra.mrb[104].mxu1 %v8511_v29  ;;  %5327 = vmatmul.mubr.bf16.gmra.mrb[40].mxu0 %v8512_v30  ;;  %v8593_v29 = vld [vmem:[%s8974_s26 + $0x9c8] ss:$56 sps:$4 sm:$0xff]   ;;  %v8595_v30 = vld [vmem:[%s8974_s26 + $0x324] ss:$56 sps:$4 sm:$0xff]  }
 0x217   : > { %4306 = vmatprep.mubr.bf16.mxu1 %v8515_v31  ;;  %5334 = vmatprep.mubr.bf16.mxu0 %v8517_v32  ;;  %v8597_v31 = vld [vmem:[%s8974_s26 + $0xa3c] ss:$56 sps:$4 sm:$0xff]  }
 0x218   : > { %v8856_v32 = vld [vmem:[%s10081_s1 + $0x1d8] sm:$0xff]  }
 0x21e   : > { %4307 = vmatmul.mubr.bf16.gmra.mrb[108].mxu1 %v8519_v34  ;;  %5335 = vmatmul.mubr.bf16.gmra.mrb[44].mxu0 %v8520_v35  ;;  %v8599_v34 = vld [vmem:[%s8974_s26 + $0x320] ss:$56 sps:$4 sm:$0xff]  }
 0x21f   : > { %4314 = vmatprep.mubr.bf16.mxu1 %v8521_v36  ;;  %5342 = vmatprep.mubr.bf16.mxu0 %v8523_v37  ;;  %v8600_v35 = vld [vmem:[%s8974_s26 + $0xa38] ss:$56 sps:$4 sm:$0xff]   ;;  %v8601_v36 = vld [vmem:[%s8974_s26 + $0x394] ss:$56 sps:$4 sm:$0xff]  }
 0x220   : > { %v8603_v37 = vld [vmem:[%s8974_s26 + $0xaac] ss:$56 sps:$4 sm:$0xff]  }
 0x226   : > { %4315 = vmatmul.mubr.bf16.gmra.mrb[112].mxu1 %v8525_v38  ;;  %5343 = vmatmul.mubr.bf16.gmra.mrb[48].mxu0 %v8526_v39  ;;  %v8858_v38 = vld [vmem:[%s10081_s1 + $0x1e8] sm:$0xff]   ;;  %v8859_v39 = vld [vmem:[%s10081_s1 + $0x1f0] sm:$0xff]  }
 0x227   : > { %4322 = vmatprep.mubr.bf16.mxu1 %v8529_v40  ;;  %5350 = vmatprep.mubr.bf16.mxu0 %v8531_v41  ;;  %v8605_v40 = vld [vmem:[%s8974_s26 + $0x390] ss:$56 sps:$4 sm:$0xff]  }
 0x228   : > { %v8606_v41 = vld [vmem:[%s8974_s26 + $0xaa8] ss:$56 sps:$4 sm:$0xff]  }
 0x22e   : > { %4323 = vmatmul.mubr.bf16.gmra.mrb[116].mxu1 %v8533_v43  ;;  %5351 = vmatmul.mubr.bf16.gmra.mrb[52].mxu0 %v8534_v44  ;;  %v8610_v43 = vld [vmem:[%s8974_s26 + $0xb1c] ss:$56 sps:$4 sm:$0xff]  }
 0x22f   : > { %4330 = vmatprep.mubr.bf16.mxu1 %v8535_v45  ;;  %5358 = vmatprep.mubr.bf16.mxu0 %v8537_v46  ;;  %v8860_v44 = vld [vmem:[%s10081_s1 + $0x1f8] sm:$0xff]   ;;  %v8614_v46 = vld [vmem:[%s8974_s26 + $0x474] ss:$56 sps:$4 sm:$0xff]  }
 0x230   : > { %v8612_v45 = vld [vmem:[%s8974_s26 + $0x400] ss:$56 sps:$4 sm:$0xff]  }
 0x236   : > { %4331 = vmatmul.mubr.bf16.gmra.mrb[120].mxu1 %v8539_v47  ;;  %5359 = vmatmul.mubr.bf16.gmra.mrb[56].mxu0 %v8540_v48  ;;  %v8616_v47 = vld [vmem:[%s8974_s26 + $0xb8c] ss:$56 sps:$4 sm:$0xff]   ;;  %v8618_v48 = vld [vmem:[%s8974_s26 + $0x470] ss:$56 sps:$4 sm:$0xff]  }
 0x237   : > { %4338 = vmatprep.mubr.bf16.mxu1 %v8543_v49  ;;  %5366 = vmatprep.mubr.bf16.mxu0 %v8545_v50  ;;  %v8619_v49 = vld [vmem:[%s8974_s26 + $0xb88] ss:$56 sps:$4 sm:$0xff]   ;;  %v8621_v50 = vld [vmem:[%s8974_s26 + $0x4e4] ss:$56 sps:$4 sm:$0xff]  }
 0x23e   : > { %4339 = vmatmul.mubr.bf16.gmra.mrb[124].mxu1 %v8547_v52  ;;  %5367 = vmatmul.mubr.bf16.gmra.mrb[60].mxu0 %v8548_v53  ;;  %v8625_v52 = vld [vmem:[%s8974_s26 + $0x4e0] ss:$56 sps:$4 sm:$0xff]  }
 0x23f   : > { %4379 = vmatprep.mubr.bf16.mxu1 %v8551_v54  ;;  %5374 = vmatprep.mubr.bf16.mxu0 %v8552_v55  ;;  %v8626_v53 = vld [vmem:[%s8974_s26 + $0xbf8] ss:$56 sps:$4 sm:$0xff]   ;;  %v8627_v54 = vld [vmem:[%s8974_s26 + $0x554] ss:$56 sps:$4 sm:$0xff]  }
 0x240   : > { %v8629_v55 = vld [vmem:[%s8974_s26 + $0xc6c] ss:$56 sps:$4 sm:$0xff]  }
 0x246   : > { %4380 = vmatmul.mubr.bf16.vlgmr.msra.gmra.mrb[0].mxu1 %v8549_v56  ;;  %5375 = vmatmul.mubr.bf16.gmra.mrb[64].mxu0 %v8554_v57  ;;  %v8631_v56 = vld [vmem:[%s8974_s26 + $0x550] ss:$56 sps:$4 sm:$0xff]  }
 0x247   : > { %7267 = vmatpush1.bf16.msra.mxu1 %v8845_v60  ;;  %4387 = vmatprep.mubr.bf16.mxu1 %v8556_v58  ;;  %v8632_v57 = vld [vmem:[%s8974_s26 + $0xc68] ss:$56 sps:$4 sm:$0xff]   ;;  %v8634_v58 = vld [vmem:[%s8974_s26 + $0x5c4] ss:$56 sps:$4 sm:$0xff]  }
 0x248   : > { %5382 = vmatprep.mubr.bf16.mxu0 %v8558_v59  ;;  %7252 = vmatprep.subr.bf16.mxu1 %v8870_v1  ;;  %v8636_v59 = vld [vmem:[%s8974_s26 + $0xcdc] ss:$56 sps:$4 sm:$0xff]   ;;  %v8638_v60 = vld [vmem:[%s8974_s26 + $0x5c0] ss:$56 sps:$4 sm:$0xff]  }
 0x24b   : > { %7268 = vmatpush1.bf16.msra.mxu1 %v8846_v0  ;;  %v8644_v0 = vld [vmem:[%s8974_s26 + $0x630] ss:$56 sps:$4 sm:$0xff]  }
 0x24c   : > { %7253 = vmatprep.subr.bf16.mxu1 %v8870_v1 }
 0x24e   : > { %4388 = vmatmul.mubr.bf16.gmra.mrb[4].mxu1 %v8560_v61  ;;  %5383 = vmatmul.mubr.bf16.gmra.mrb[68].mxu0 %v8561_v62  ;;  %v8639_v61 = vld [vmem:[%s8974_s26 + $0xcd8] ss:$56 sps:$4 sm:$0xff]   ;;  %v8640_v62 = vld [vmem:[%s8974_s26 + $0x634] ss:$56 sps:$4 sm:$0xff]  }
 0x24f   : > { %4395 = vmatprep.mubr.bf16.mxu1 %v8562_v63  ;;  %5390 = vmatprep.mubr.bf16.mxu0 %v8564_v2  ;;  %v8642_v63 = vld [vmem:[%s8974_s26 + $0xd4c] ss:$56 sps:$4 sm:$0xff]   ;;  %v8645_v2 = vld [vmem:[%s8974_s26 + $0xd48] ss:$56 sps:$4 sm:$0xff]  }
 0x250   : > { %7269 = vmatpush1.bf16.msra.mxu1 %v8847_v3  ;;  %v8647_v3 = vld [vmem:[%s8974_s26 + $0x6a4] ss:$56 sps:$4 sm:$0xff]  }
 0x251   : > { %7254 = vmatprep.subr.bf16.mxu1 %v8870_v1 }
 0x254   : > { %7270 = vmatpush1.bf16.msra.mxu1 %v8848_v8  ;;  %v8657_v8 = vld [vmem:[%s8974_s26 + $0x34] ss:$56 sps:$4 sm:$0xff]  }
 0x255   : > { %7255 = vmatprep.subr.bf16.mxu1 %v8870_v1 }
 0x256   : > { %4396 = vmatmul.mubr.bf16.gmra.mrb[8].mxu1 %v8566_v4  ;;  %5391 = vmatmul.mubr.bf16.gmra.mrb[72].mxu0 %v8567_v5  ;;  %v8649_v4 = vld [vmem:[%s8974_s26 + $0xdbc] ss:$56 sps:$4 sm:$0xff]   ;;  %v8651_v5 = vld [vmem:[%s8974_s26 + $0x6a0] ss:$56 sps:$4 sm:$0xff]  }
 0x257   : > { %4403 = vmatprep.mubr.bf16.mxu1 %v8569_v6  ;;  %5398 = vmatprep.mubr.bf16.mxu0 %v8571_v7  ;;  %v8652_v6 = vld [vmem:[%s8974_s26 + $0xdb8] ss:$56 sps:$4 sm:$0xff]   ;;  %v8653_v7 = vld [vmem:[%s8974_s26 + $0x714] ss:$56 sps:$4 sm:$0xff]  }
 0x258   : > { %7271 = vmatpush1.bf16.msra.mxu1 %v8849_v9  ;;  %v8658_v9 = vld [vmem:[%s8974_s26 + $0x710] ss:$56 sps:$4 sm:$0xff]  }
 0x259   : > { %7256 = vmatprep.subr.bf16.mxu1 %v8870_v1 }
 0x25c   : > { %7272 = vmatpush1.bf16.msra.mxu1 %v8850_v14  ;;  %v8664_v14 = vld [vmem:[%s8974_s26 + $0xa0] ss:$56 sps:$4 sm:$0xff]  }
 0x25d   : > { %7257 = vmatprep.subr.bf16.mxu1 %v8870_v1 }
 0x25e   : > { %4404 = vmatmul.mubr.bf16.gmra.mrb[12].mxu1 %v8573_v10  ;;  %5399 = vmatmul.mubr.bf16.gmra.mrb[76].mxu0 %v8574_v11  ;;  %v8655_v10 = vld [vmem:[%s8974_s26 + $0x30] ss:$56 sps:$4 sm:$0xff]   ;;  %v8659_v11 = vld [vmem:[%s8974_s26 + $0x784] ss:$56 sps:$4 sm:$0xff]  }
 0x25f   : > { %4411 = vmatprep.mubr.bf16.mxu1 %v8575_v12  ;;  %5406 = vmatprep.mubr.bf16.mxu0 %v8577_v13  ;;  %v8661_v12 = vld [vmem:[%s8974_s26 + $0xa4] ss:$56 sps:$4 sm:$0xff]   ;;  %v8663_v13 = vld [vmem:[%s8974_s26 + $0x780] ss:$56 sps:$4 sm:$0xff]  }
 0x260   : > { %7273 = vmatpush1.bf16.msra.mxu1 %v8851_v15  ;;  %v8665_v15 = vld [vmem:[%s8974_s26 + $0x7f4] ss:$56 sps:$4 sm:$0xff]  }
 0x261   : > { %7258 = vmatprep.subr.bf16.mxu1 %v8870_v1 }
 0x264   : > { %7274 = vmatpush1.bf16.msra.mxu1 %v8852_v20  ;;  %v8673_v20 = vld [vmem:[%s8974_s26 + $0x184] ss:$56 sps:$4 sm:$0xff]  }
 0x265   : > { %7259 = vmatprep.subr.bf16.mxu1 %v8870_v1 }
 0x266   : > { %4412 = vmatmul.mubr.bf16.gmra.mrb[16].mxu1 %v8579_v16  ;;  %5407 = vmatmul.mubr.bf16.gmra.mrb[80].mxu0 %v8580_v17  ;;  %v8667_v16 = vld [vmem:[%s8974_s26 + $0x114] ss:$56 sps:$4 sm:$0xff]   ;;  %v8669_v17 = vld [vmem:[%s8974_s26 + $0x7f0] ss:$56 sps:$4 sm:$0xff]  }
 0x267   : > { %4419 = vmatprep.mubr.bf16.mxu1 %v8582_v18  ;;  %5414 = vmatprep.mubr.bf16.mxu0 %v8584_v19  ;;  %v8670_v18 = vld [vmem:[%s8974_s26 + $0x110] ss:$56 sps:$4 sm:$0xff]   ;;  %v8671_v19 = vld [vmem:[%s8974_s26 + $0x864] ss:$56 sps:$4 sm:$0xff]  }
 0x268   : > { %7275 = vmatpush1.bf16.msra.mxu1 %v8853_v21  ;;  %v8675_v21 = vld [vmem:[%s8974_s26 + $0x860] ss:$56 sps:$4 sm:$0xff]  }
 0x269   : > { %7260 = vmatprep.subr.bf16.mxu1 %v8870_v1 }
 0x26c   : > { %7276 = vmatpush1.bf16.msra.mxu1 %v8854_v26  ;;  %v8682_v26 = vld [vmem:[%s8974_s26 + $0x1f0] ss:$56 sps:$4 sm:$0xff]  }
 0x26d   : > { %7261 = vmatprep.subr.bf16.mxu1 %v8870_v1 }
 0x26e   : > { %4420 = vmatmul.mubr.bf16.gmra.mrb[20].mxu1 %v8586_v22  ;;  %5415 = vmatmul.mubr.bf16.gmra.mrb[84].mxu0 %v8587_v23  ;;  %v8676_v22 = vld [vmem:[%s8974_s26 + $0x180] ss:$56 sps:$4 sm:$0xff]   ;;  %v8677_v23 = vld [vmem:[%s8974_s26 + $0x8d4] ss:$56 sps:$4 sm:$0xff]  }
 0x26f   : > { %4427 = vmatprep.mubr.bf16.mxu1 %v8588_v24  ;;  %5422 = vmatprep.mubr.bf16.mxu0 %v8590_v25  ;;  %v8679_v24 = vld [vmem:[%s8974_s26 + $0x1f4] ss:$56 sps:$4 sm:$0xff]   ;;  %v8681_v25 = vld [vmem:[%s8974_s26 + $0x8d0] ss:$56 sps:$4 sm:$0xff]  }
 0x270   : > { %7277 = vmatpush1.bf16.msra.mxu1 %v8855_v27  ;;  %v8683_v27 = vld [vmem:[%s8974_s26 + $0x944] ss:$56 sps:$4 sm:$0xff]  }
 0x271   : > { %7262 = vmatprep.subr.bf16.mxu1 %v8870_v1 }
 0x274   : > { %7278 = vmatpush1.bf16.msra.mxu1 %v8856_v32  ;;  %v8691_v32 = vld [vmem:[%s8974_s26 + $0x2d4] ss:$56 sps:$4 sm:$0xff]  }
 0x275   : > { %7263 = vmatprep.subr.bf16.mxu1 %v8870_v1 }
 0x276   : > { %4428 = vmatmul.mubr.bf16.gmra.mrb[24].mxu1 %v8592_v28  ;;  %5423 = vmatmul.mubr.bf16.gmra.mrb[88].mxu0 %v8593_v29  ;;  %v8685_v28 = vld [vmem:[%s8974_s26 + $0x264] ss:$56 sps:$4 sm:$0xff]   ;;  %v8687_v29 = vld [vmem:[%s8974_s26 + $0x940] ss:$56 sps:$4 sm:$0xff]  }
 0x277   : > { %4435 = vmatprep.mubr.bf16.mxu1 %v8595_v30  ;;  %5430 = vmatprep.mubr.bf16.mxu0 %v8597_v31  ;;  %v8688_v30 = vld [vmem:[%s8974_s26 + $0x260] ss:$56 sps:$4 sm:$0xff]   ;;  %v8689_v31 = vld [vmem:[%s8974_s26 + $0x9b4] ss:$56 sps:$4 sm:$0xff]  }
 0x278   : > { %7279 = vmatpush1.bf16.msra.mxu1 %v8857_v33  ;;  %v8693_v33 = vld [vmem:[%s8974_s26 + $0x9b0] ss:$56 sps:$4 sm:$0xff]  }
 0x279   : > { %7264 = vmatprep.subr.bf16.mxu1 %v8870_v1 }
 0x27c   : > { %7280 = vmatpush1.bf16.msra.mxu1 %v8858_v38  ;;  %v8700_v38 = vld [vmem:[%s8974_s26 + $0x340] ss:$56 sps:$4 sm:$0xff]  }
 0x27d   : > { %7265 = vmatprep.subr.bf16.mxu1 %v8870_v1 }
 0x27e   : > { %4436 = vmatmul.mubr.bf16.gmra.mrb[28].mxu1 %v8599_v34  ;;  %5431 = vmatmul.mubr.bf16.gmra.mrb[92].mxu0 %v8600_v35  ;;  %v8694_v34 = vld [vmem:[%s8974_s26 + $0x2d0] ss:$56 sps:$4 sm:$0xff]   ;;  %v8695_v35 = vld [vmem:[%s8974_s26 + $0xa24] ss:$56 sps:$4 sm:$0xff]  }
 0x27f   : > { %4443 = vmatprep.mubr.bf16.mxu1 %v8601_v36  ;;  %5438 = vmatprep.mubr.bf16.mxu0 %v8603_v37  ;;  %v8697_v36 = vld [vmem:[%s8974_s26 + $0x344] ss:$56 sps:$4 sm:$0xff]   ;;  %v8699_v37 = vld [vmem:[%s8974_s26 + $0xa20] ss:$56 sps:$4 sm:$0xff]  }
 0x280   : > { %7281 = vmatpush1.bf16.msra.mxu1 %v8859_v39  ;;  %v8701_v39 = vld [vmem:[%s8974_s26 + $0xa94] ss:$56 sps:$4 sm:$0xff]  }
 0x281   : > { %7266 = vmatprep.subr.bf16.mxu1 %v8870_v1  ;;  %v8613_v1 = vld [vmem:[%s8974_s26 + $0xb18] ss:$56 sps:$4 sm:$0xff]  }
 0x284   : > { %7282 = vmatpush1.bf16.msra.mxu1 %v8860_v44  ;;  %v8709_v44 = vld [vmem:[%s8974_s26 + $0x424] ss:$56 sps:$4 sm:$0xff]  }
 0x286   : > { %4444 = vmatmul.mubr.bf16.gmra.mrb[32].mxu1 %v8605_v40  ;;  %5439 = vmatmul.mubr.bf16.gmra.mrb[96].mxu0 %v8606_v41  ;;  %v8703_v40 = vld [vmem:[%s8974_s26 + $0x3b4] ss:$56 sps:$4 sm:$0xff]   ;;  %v8705_v41 = vld [vmem:[%s8974_s26 + $0xa90] ss:$56 sps:$4 sm:$0xff]  }
 0x287   : > { %4451 = vmatprep.mubr.bf16.mxu1 %v8608_v42  ;;  %5446 = vmatprep.mubr.bf16.mxu0 %v8610_v43  ;;  %v8706_v42 = vld [vmem:[%s8974_s26 + $0x3b0] ss:$56 sps:$4 sm:$0xff]   ;;  %v8707_v43 = vld [vmem:[%s8974_s26 + $0xb04] ss:$56 sps:$4 sm:$0xff]  }
 0x28e   : > { %4452 = vmatmul.mubr.bf16.gmra.mrb[36].mxu1 %v8612_v45  ;;  %5447 = vmatmul.mubr.bf16.gmra.mrb[100].mxu0 %v8613_v1  ;;  %v8711_v45 = vld [vmem:[%s8974_s26 + $0xb00] ss:$56 sps:$4 sm:$0xff]  }
 0x28f   : > { %4459 = vmatprep.mubr.bf16.mxu1 %v8614_v46  ;;  %5454 = vmatprep.mubr.bf16.mxu0 %v8616_v47  ;;  %v8712_v1 = vld [vmem:[%s8974_s26 + $0x420] ss:$56 sps:$4 sm:$0xff]   ;;  %v8713_v46 = vld [vmem:[%s8974_s26 + $0xb74] ss:$56 sps:$4 sm:$0xff]  }
 0x290   : > { %v8715_v47 = vld [vmem:[%s8974_s26 + $0x494] ss:$56 sps:$4 sm:$0xff]  }
 0x296   : > { %4460 = vmatmul.mubr.bf16.gmra.mrb[40].mxu1 %v8618_v48  ;;  %5455 = vmatmul.mubr.bf16.gmra.mrb[104].mxu0 %v8619_v49  ;;  %v8717_v48 = vld [vmem:[%s8974_s26 + $0xb70] ss:$56 sps:$4 sm:$0xff]  }
 0x297   : > { %4467 = vmatprep.mubr.bf16.mxu1 %v8621_v50  ;;  %5462 = vmatprep.mubr.bf16.mxu0 %v8623_v51  ;;  %v8718_v49 = vld [vmem:[%s8974_s26 + $0x490] ss:$56 sps:$4 sm:$0xff]   ;;  %v8719_v50 = vld [vmem:[%s8974_s26 + $0xbe4] ss:$56 sps:$4 sm:$0xff]  }
 0x298   : > { %v8721_v51 = vld [vmem:[%s8974_s26 + $0x504] ss:$56 sps:$4 sm:$0xff]  }
 0x29e   : > { %4468 = vmatmul.mubr.bf16.gmra.mrb[44].mxu1 %v8625_v52  ;;  %5463 = vmatmul.mubr.bf16.gmra.mrb[108].mxu0 %v8626_v53 }
 0x29f   : > { %4475 = vmatprep.mubr.bf16.mxu1 %v8627_v54  ;;  %5470 = vmatprep.mubr.bf16.mxu0 %v8629_v55  ;;  %v8723_v54 = vld [vmem:[%s8974_s26 + $0xbe0] ss:$56 sps:$4 sm:$0xff]  }
 0x2a6   : > { %4476 = vmatmul.mubr.bf16.gmra.mrb[48].mxu1 %v8631_v56  ;;  %5471 = vmatmul.mubr.bf16.gmra.mrb[112].mxu0 %v8632_v57  ;;  %v8724_v56 = vld [vmem:[%s8974_s26 + $0x500] ss:$56 sps:$4 sm:$0xff]   ;;  %v8725_v57 = vld [vmem:[%s8974_s26 + $0xc54] ss:$56 sps:$4 sm:$0xff]  }
 0x2a7   : > { %4483 = vmatprep.mubr.bf16.mxu1 %v8634_v58  ;;  %5478 = vmatprep.mubr.bf16.mxu0 %v8636_v59  ;;  %v8727_v59 = vld [vmem:[%s8974_s26 + $0x574] ss:$56 sps:$4 sm:$0xff]  }
 0x2ae   : > { %4484 = vmatmul.mubr.bf16.gmra.mrb[52].mxu1 %v8638_v60  ;;  %5479 = vmatmul.mubr.bf16.gmra.mrb[116].mxu0 %v8639_v61 }
 0x2af   : > { %4491 = vmatprep.mubr.bf16.mxu1 %v8640_v62  ;;  %5486 = vmatprep.mubr.bf16.mxu0 %v8642_v63  ;;  %v8729_v62 = vld [vmem:[%s8974_s26 + $0xc50] ss:$56 sps:$4 sm:$0xff]  }
 0x2b6   : > { %4492 = vmatmul.mubr.bf16.gmra.mrb[56].mxu1 %v8644_v0  ;;  %5487 = vmatmul.mubr.bf16.gmra.mrb[120].mxu0 %v8645_v2  ;;  %v8730_v0 = vld [vmem:[%s8974_s26 + $0x570] ss:$56 sps:$4 sm:$0xff]   ;;  %v8731_v2 = vld [vmem:[%s8974_s26 + $0xcc4] ss:$56 sps:$4 sm:$0xff]  }
 0x2b7   : > { %4499 = vmatprep.mubr.bf16.mxu1 %v8647_v3  ;;  %5494 = vmatprep.mubr.bf16.mxu0 %v8649_v4  ;;  %v8733_v4 = vld [vmem:[%s8974_s26 + $0x5e4] ss:$56 sps:$4 sm:$0xff]  }
 0x2be   : > { %4500 = vmatmul.mubr.bf16.gmra.mrb[60].mxu1 %v8651_v5  ;;  %5495 = vmatmul.mubr.bf16.gmra.mrb[124].mxu0 %v8652_v6 }
 0x2bf   : > { %4507 = vmatprep.mubr.bf16.mxu1 %v8653_v7  ;;  %5535 = vmatprep.mubr.bf16.mxu0 %v8657_v8  ;;  %v8735_v7 = vld [vmem:[%s8974_s26 + $0xcc0] ss:$56 sps:$4 sm:$0xff]  }
 0x2c6   : > { %4508 = vmatmul.mubr.bf16.gmra.mrb[64].mxu1 %v8658_v9  ;;  %5536 = vmatmul.mubr.bf16.vlgmr.msra.gmra.mrb[0].mxu0 %v8655_v10  ;;  %v8736_v9 = vld [vmem:[%s8974_s26 + $0x5e0] ss:$56 sps:$4 sm:$0xff]   ;;  %v8737_v10 = vld [vmem:[%s8974_s26 + $0xd34] ss:$56 sps:$4 sm:$0xff]  }
 0x2c7   : > { %4515 = vmatprep.mubr.bf16.mxu1 %v8659_v11  ;;  %5543 = vmatprep.mubr.bf16.mxu0 %v8661_v12  ;;  %v8739_v12 = vld [vmem:[%s8974_s26 + $0x654] ss:$56 sps:$4 sm:$0xff]  }
 0x2ce   : > { %4516 = vmatmul.mubr.bf16.gmra.mrb[68].mxu1 %v8663_v13  ;;  %5544 = vmatmul.mubr.bf16.gmra.mrb[4].mxu0 %v8664_v14 }
 0x2cf   : > { %4523 = vmatprep.mubr.bf16.mxu1 %v8665_v15  ;;  %5551 = vmatprep.mubr.bf16.mxu0 %v8667_v16  ;;  %v8741_v15 = vld [vmem:[%s8974_s26 + $0xd30] ss:$56 sps:$4 sm:$0xff]  }
 0x2d6   : > { %4524 = vmatmul.mubr.bf16.gmra.mrb[72].mxu1 %v8669_v17  ;;  %5552 = vmatmul.mubr.bf16.gmra.mrb[8].mxu0 %v8670_v18  ;;  %v8742_v17 = vld [vmem:[%s8974_s26 + $0x650] ss:$56 sps:$4 sm:$0xff]   ;;  %v8743_v18 = vld [vmem:[%s8974_s26 + $0xda4] ss:$56 sps:$4 sm:$0xff]  }
 0x2d7   : > { %4531 = vmatprep.mubr.bf16.mxu1 %v8671_v19  ;;  %5559 = vmatprep.mubr.bf16.mxu0 %v8673_v20  ;;  %v8745_v20 = vld [vmem:[%s8974_s26 + $0x6c4] ss:$56 sps:$4 sm:$0xff]  }
 0x2de   : > { %4532 = vmatmul.mubr.bf16.gmra.mrb[76].mxu1 %v8675_v21  ;;  %5560 = vmatmul.mubr.bf16.gmra.mrb[12].mxu0 %v8676_v22 }
 0x2df   : > { %4539 = vmatprep.mubr.bf16.mxu1 %v8677_v23  ;;  %5567 = vmatprep.mubr.bf16.mxu0 %v8679_v24  ;;  %v8747_v23 = vld [vmem:[%s8974_s26 + $0xda0] ss:$56 sps:$4 sm:$0xff]  }
 0x2e6   : > { %4540 = vmatmul.mubr.bf16.gmra.mrb[80].mxu1 %v8681_v25  ;;  %5568 = vmatmul.mubr.bf16.gmra.mrb[16].mxu0 %v8682_v26  ;;  %v8748_v25 = vld [vmem:[%s8974_s26 + $0x6c0] ss:$56 sps:$4 sm:$0xff]   ;;  %v8751_v26 = vld [vmem:[%s8974_s26 + $0x71c] ss:$56 sps:$4 sm:$0xff]  }
 0x2e7   : > { %4547 = vmatprep.mubr.bf16.mxu1 %v8683_v27  ;;  %5575 = vmatprep.mubr.bf16.mxu0 %v8685_v28  ;;  %v8752_v28 = vld [vmem:[%s8974_s26 + $0x734] ss:$56 sps:$4 sm:$0xff]  }
 0x2ee   : > { %4548 = vmatmul.mubr.bf16.gmra.mrb[84].mxu1 %v8687_v29  ;;  %5576 = vmatmul.mubr.bf16.gmra.mrb[20].mxu0 %v8688_v30 }
 0x2ef   : > { %4555 = vmatprep.mubr.bf16.mxu1 %v8689_v31  ;;  %5583 = vmatprep.mubr.bf16.mxu0 %v8691_v32  ;;  %v8749_v31 = vld [vmem:[%s8974_s26 + $0x718] ss:$56 sps:$4 sm:$0xff]  }
 0x2f6   : > { %4556 = vmatmul.mubr.bf16.gmra.mrb[88].mxu1 %v8693_v33  ;;  %5584 = vmatmul.mubr.bf16.gmra.mrb[24].mxu0 %v8694_v34  ;;  %v8754_v33 = vld [vmem:[%s8974_s26 + $0x730] ss:$56 sps:$4 sm:$0xff]   ;;  %v8755_v34 = vld [vmem:[%s8974_s26 + $0x78c] ss:$56 sps:$4 sm:$0xff]  }
 0x2f7   : > { %4563 = vmatprep.mubr.bf16.mxu1 %v8695_v35  ;;  %5591 = vmatprep.mubr.bf16.mxu0 %v8697_v36  ;;  %v8757_v36 = vld [vmem:[%s8974_s26 + $0x7a4] ss:$56 sps:$4 sm:$0xff]  }
 0x2fe   : > { %4564 = vmatmul.mubr.bf16.gmra.mrb[92].mxu1 %v8699_v37  ;;  %5592 = vmatmul.mubr.bf16.gmra.mrb[28].mxu0 %v8700_v38 }
 0x2ff   : > { %4571 = vmatprep.mubr.bf16.mxu1 %v8701_v39  ;;  %5599 = vmatprep.mubr.bf16.mxu0 %v8703_v40  ;;  %v8759_v39 = vld [vmem:[%s8974_s26 + $0x788] ss:$56 sps:$4 sm:$0xff]  }
 0x306   : > { %4572 = vmatmul.mubr.bf16.gmra.mrb[96].mxu1 %v8705_v41  ;;  %5600 = vmatmul.mubr.bf16.gmra.mrb[32].mxu0 %v8706_v42  ;;  %v8760_v41 = vld [vmem:[%s8974_s26 + $0x7a0] ss:$56 sps:$4 sm:$0xff]   ;;  %v8761_v42 = vld [vmem:[%s8974_s26 + $0x7fc] ss:$56 sps:$4 sm:$0xff]  }
 0x307   : > { %4579 = vmatprep.mubr.bf16.mxu1 %v8707_v43  ;;  %5607 = vmatprep.mubr.bf16.mxu0 %v8709_v44  ;;  %v8763_v44 = vld [vmem:[%s8974_s26 + $0x814] ss:$56 sps:$4 sm:$0xff]  }
 0x30e   : > { %4580 = vmatmul.mubr.bf16.gmra.mrb[100].mxu1 %v8711_v45  ;;  %5608 = vmatmul.mubr.bf16.gmra.mrb[36].mxu0 %v8712_v1 }
 0x30f   : > { %4587 = vmatprep.mubr.bf16.mxu1 %v8713_v46  ;;  %5615 = vmatprep.mubr.bf16.mxu0 %v8715_v47  ;;  %v8765_v46 = vld [vmem:[%s8974_s26 + $0x7f8] ss:$56 sps:$4 sm:$0xff]  }
 0x316   : > { %4588 = vmatmul.mubr.bf16.gmra.mrb[104].mxu1 %v8717_v48  ;;  %5616 = vmatmul.mubr.bf16.gmra.mrb[40].mxu0 %v8718_v49  ;;  %v8766_v48 = vld [vmem:[%s8974_s26 + $0x810] ss:$56 sps:$4 sm:$0xff]   ;;  %v8767_v49 = vld [vmem:[%s8974_s26 + $0x86c] ss:$56 sps:$4 sm:$0xff]  }
 0x317   : > { %4595 = vmatprep.mubr.bf16.mxu1 %v8719_v50  ;;  %5623 = vmatprep.mubr.bf16.mxu0 %v8721_v51  ;;  %v8769_v51 = vld [vmem:[%s8974_s26 + $0x884] ss:$56 sps:$4 sm:$0xff]  }
 0x319   : > { %v9787_v52 = vpop.f32.mrb[0].mxu1 }
 0x31a   : > { %v4383_v53 = vpop.f32.mrb[1].mxu1 }
 0x31b   : > { %v9790_v55 = vpop.f32.mrb[2].mxu1 }
 0x31c   : > { %v4386_v58 = vpop.f32.mrb[3].mxu1 }
 0x31d   : > { %v8772_v58 = vld [vmem:[%s8974_s26 + $0x880] ss:$56 sps:$4 sm:$0xff]  }
 0x31e   : > { %4596 = vmatmul.mubr.bf16.gmra.mrb[108].mxu1 %v8723_v54  ;;  %5624 = vmatmul.mubr.bf16.gmra.mrb[44].mxu0 %v8724_v56  ;;  %v8771_v56 = vld [vmem:[%s8974_s26 + $0x868] ss:$56 sps:$4 sm:$0xff]  }
 0x31f   : > { %4603 = vmatprep.mubr.bf16.mxu1 %v8725_v57  ;;  %5631 = vmatprep.mubr.bf16.mxu0 %v8727_v59  ;;  %v8773_v59 = vld [vmem:[%s8974_s26 + $0x8dc] ss:$56 sps:$4 sm:$0xff]  }
 0x321   : > { %v9795_v60 = vpop.f32.mrb[4].mxu1 }
 0x322   : > { %v4391_v61 = vpop.f32.mrb[5].mxu1 }
 0x323   : > { %v9798_v63 = vpop.f32.mrb[6].mxu1 }
 0x324   : > { %v4394_v3 = vpop.f32.mrb[7].mxu1 }
 0x325   : > { %v8777_v3 = vld [vmem:[%s8974_s26 + $0x8d8] ss:$56 sps:$4 sm:$0xff]  }
 0x326   : > { %4604 = vmatmul.mubr.bf16.gmra.mrb[112].mxu1 %v8729_v62  ;;  %5632 = vmatmul.mubr.bf16.gmra.mrb[48].mxu0 %v8730_v0  ;;  %v8775_v62 = vld [vmem:[%s8974_s26 + $0x8f4] ss:$56 sps:$4 sm:$0xff]  }
 0x327   : > { %4611 = vmatprep.mubr.bf16.mxu1 %v8731_v2  ;;  %5639 = vmatprep.mubr.bf16.mxu0 %v8733_v4 }
 0x329   : > { %v9803_v5 = vpop.f32.mrb[8].mxu1 }
 0x32a   : > { %v4399_v6 = vpop.f32.mrb[9].mxu1 }
 0x32b   : > { %v9806_v8 = vpop.f32.mrb[10].mxu1  ;;  %v8778_v6 = vld [vmem:[%s8974_s26 + $0x8f0] ss:$56 sps:$4 sm:$0xff]  }
 0x32c   : > { %v4402_v11 = vpop.f32.mrb[11].mxu1 }
 0x32e   : > { %4612 = vmatmul.mubr.bf16.gmra.mrb[116].mxu1 %v8735_v7  ;;  %5640 = vmatmul.mubr.bf16.gmra.mrb[52].mxu0 %v8736_v9  ;;  %v8779_v7 = vld [vmem:[%s8974_s26 + $0x94c] ss:$56 sps:$4 sm:$0xff]  }
 0x32f   : > { %4619 = vmatprep.mubr.bf16.mxu1 %v8737_v10  ;;  %5647 = vmatprep.mubr.bf16.mxu0 %v8739_v12  ;;  %v8781_v10 = vld [vmem:[%s8974_s26 + $0x964] ss:$56 sps:$4 sm:$0xff]  }
 0x331   : > { %v9811_v13 = vpop.f32.mrb[12].mxu1 }
 0x332   : > { %v4407_v14 = vpop.f32.mrb[13].mxu1 }
 0x333   : > { %v9814_v16 = vpop.f32.mrb[14].mxu1  ;;  %v8783_v14 = vld [vmem:[%s8974_s26 + $0x948] ss:$56 sps:$4 sm:$0xff]  }
 0x334   : > { %v4410_v19 = vpop.f32.mrb[15].mxu1 }
 0x336   : > { %4620 = vmatmul.mubr.bf16.gmra.mrb[120].mxu1 %v8741_v15  ;;  %5648 = vmatmul.mubr.bf16.gmra.mrb[56].mxu0 %v8742_v17  ;;  %v8784_v17 = vld [vmem:[%s8974_s26 + $0x960] ss:$56 sps:$4 sm:$0xff]  }
 0x337   : > { %4627 = vmatprep.mubr.bf16.mxu1 %v8743_v18  ;;  %5655 = vmatprep.mubr.bf16.mxu0 %v8745_v20  ;;  %v8785_v18 = vld [vmem:[%s8974_s26 + $0x9bc] ss:$56 sps:$4 sm:$0xff]  }
 0x338   : > { %v8787_v20 = vld [vmem:[%s8974_s26 + $0x9d4] ss:$56 sps:$4 sm:$0xff]  }
 0x339   : > { %v9819_v21 = vpop.f32.mrb[16].mxu1 }
 0x33a   : > { %v4415_v22 = vpop.f32.mrb[17].mxu1 }
 0x33b   : > { %v9822_v24 = vpop.f32.mrb[18].mxu1 }
 0x33c   : > { %v4418_v27 = vpop.f32.mrb[19].mxu1 }
 0x33d   : > { %v8790_v27 = vld [vmem:[%s8974_s26 + $0x9d0] ss:$56 sps:$4 sm:$0xff]  }
 0x33e   : > { %4628 = vmatmul.mubr.bf16.gmra.mrb[124].mxu1 %v8747_v23  ;;  %5656 = vmatmul.mubr.bf16.gmra.mrb[60].mxu0 %v8748_v25  ;;  %v8789_v25 = vld [vmem:[%s8974_s26 + $0x9b8] ss:$56 sps:$4 sm:$0xff]  }
 0x33f   : > { %4796 = vmatprep.mubr.bf16.mxu1 %v8751_v26  ;;  %5663 = vmatprep.mubr.bf16.mxu0 %v8752_v28  ;;  %v8791_v28 = vld [vmem:[%s8974_s26 + $0xa2c] ss:$56 sps:$4 sm:$0xff]  }
 0x341   : > { %v9827_v29 = vpop.f32.mrb[20].mxu1 }
 0x342   : > { %v4423_v30 = vpop.f32.mrb[21].mxu1 }
 0x343   : > { %v9830_v32 = vpop.f32.mrb[22].mxu1 }
 0x344   : > { %v4426_v35 = vpop.f32.mrb[23].mxu1 }
 0x345   : > { %v8795_v35 = vld [vmem:[%s8974_s26 + $0xa28] ss:$56 sps:$4 sm:$0xff]  }
 0x346   : > { %4797 = vmatmul.mubr.bf16.vlgmr.msra.gmra.mrb[64].mxu1 %v8749_v31  ;;  %5664 = vmatmul.mubr.bf16.gmra.mrb[64].mxu0 %v8754_v33  ;;  %v8793_v31 = vld [vmem:[%s8974_s26 + $0xa44] ss:$56 sps:$4 sm:$0xff]  }
 0x347   : > { %4804 = vmatprep.mubr.bf16.mxu1 %v8755_v34  ;;  %5671 = vmatprep.mubr.bf16.mxu0 %v8757_v36 }
 0x349   : > { %v9835_v37 = vpop.f32.mrb[24].mxu1 }
 0x34a   : > { %v4431_v38 = vpop.f32.mrb[25].mxu1 }
 0x34b   : > { %v9838_v40 = vpop.f32.mrb[26].mxu1  ;;  %v8796_v38 = vld [vmem:[%s8974_s26 + $0xa40] ss:$56 sps:$4 sm:$0xff]  }
 0x34c   : > { %v4434_v43 = vpop.f32.mrb[27].mxu1 }
 0x34e   : > { %4805 = vmatmul.mubr.bf16.gmra.mrb[68].mxu1 %v8759_v39  ;;  %5672 = vmatmul.mubr.bf16.gmra.mrb[68].mxu0 %v8760_v41  ;;  %v8797_v39 = vld [vmem:[%s8974_s26 + $0xa9c] ss:$56 sps:$4 sm:$0xff]  }
 0x34f   : > { %4812 = vmatprep.mubr.bf16.mxu1 %v8761_v42  ;;  %5679 = vmatprep.mubr.bf16.mxu0 %v8763_v44  ;;  %v8799_v42 = vld [vmem:[%s8974_s26 + $0xab4] ss:$56 sps:$4 sm:$0xff]  }
 0x351   : > { %v9843_v45 = vpop.f32.mrb[28].mxu1 }
 0x352   : > { %v4439_v1 = vpop.f32.mrb[29].mxu1 }
 0x353   : > { %v9846_v47 = vpop.f32.mrb[30].mxu1  ;;  %v8801_v1 = vld [vmem:[%s8974_s26 + $0xa98] ss:$56 sps:$4 sm:$0xff]  }
 0x354   : > { %v4442_v50 = vpop.f32.mrb[31].mxu1 }
 0x356   : > { %4813 = vmatmul.mubr.bf16.gmra.mrb[72].mxu1 %v8765_v46  ;;  %5680 = vmatmul.mubr.bf16.gmra.mrb[72].mxu0 %v8766_v48  ;;  %v8802_v48 = vld [vmem:[%s8974_s26 + $0xab0] ss:$56 sps:$4 sm:$0xff]  }
 0x357   : > { %4820 = vmatprep.mubr.bf16.mxu1 %v8767_v49  ;;  %5687 = vmatprep.mubr.bf16.mxu0 %v8769_v51  ;;  %v8803_v49 = vld [vmem:[%s8974_s26 + $0xb0c] ss:$56 sps:$4 sm:$0xff]  }
 0x358   : > { %v8805_v51 = vld [vmem:[%s8974_s26 + $0xb24] ss:$56 sps:$4 sm:$0xff]  }
 0x359   : > { %v9851_v53 = vpop.f32.mrb[32].mxu1 }
 0x35a   : > { %v4447_v54 = vpop.f32.mrb[33].mxu1 }
 0x35b   : > { %v9854_v57 = vpop.f32.mrb[34].mxu1 }
 0x35c   : > { %v4450_v61 = vpop.f32.mrb[35].mxu1 }
 0x35d   : > { %v8808_v61 = vld [vmem:[%s8974_s26 + $0xb20] ss:$56 sps:$4 sm:$0xff]  }
 0x35e   : > { %4821 = vmatmul.mubr.bf16.gmra.mrb[76].mxu1 %v8771_v56  ;;  %5688 = vmatmul.mubr.bf16.gmra.mrb[76].mxu0 %v8772_v58  ;;  %v8807_v58 = vld [vmem:[%s8974_s26 + $0xb08] ss:$56 sps:$4 sm:$0xff]  }
 0x35f   : > { %4828 = vmatprep.mubr.bf16.mxu1 %v8773_v59  ;;  %5695 = vmatprep.mubr.bf16.mxu0 %v8775_v62  ;;  %v8809_v62 = vld [vmem:[%s8974_s26 + $0xb7c] ss:$56 sps:$4 sm:$0xff]  }
 0x361   : > { %v9859_v0 = vpop.f32.mrb[36].mxu1 }
 0x362   : > { %v4455_v2 = vpop.f32.mrb[37].mxu1 }
 0x363   : > { %v9862_v4 = vpop.f32.mrb[38].mxu1 }
 0x364   : > { %v4458_v9 = vpop.f32.mrb[39].mxu1 }
 0x365   : > { %v8813_v9 = vld [vmem:[%s8974_s26 + $0xb78] ss:$56 sps:$4 sm:$0xff]  }
 0x366   : > { %4829 = vmatmul.mubr.bf16.gmra.mrb[80].mxu1 %v8777_v3  ;;  %5696 = vmatmul.mubr.bf16.gmra.mrb[80].mxu0 %v8778_v6  ;;  %v8811_v3 = vld [vmem:[%s8974_s26 + $0xb94] ss:$56 sps:$4 sm:$0xff]  }
 0x367   : > { %4836 = vmatprep.mubr.bf16.mxu1 %v8779_v7  ;;  %5703 = vmatprep.mubr.bf16.mxu0 %v8781_v10 }
 0x369   : > { %v9867_v11 = vpop.f32.mrb[40].mxu1 }
 0x36a   : > { %v4463_v12 = vpop.f32.mrb[41].mxu1 }
 0x36b   : > { %v9870_v15 = vpop.f32.mrb[42].mxu1  ;;  %v8814_v12 = vld [vmem:[%s8974_s26 + $0xb90] ss:$56 sps:$4 sm:$0xff]  }
 0x36c   : > { %v4466_v19 = vpop.f32.mrb[43].mxu1 }
 0x36d   : > { %v9918_v19 = vld [vmem:[%s10082_s2] ss:$0 sm:$0xff] }
 0x36e   : > { %4837 = vmatmul.mubr.bf16.gmra.mrb[84].mxu1 %v8783_v14  ;;  %5704 = vmatmul.mubr.bf16.gmra.mrb[84].mxu0 %v8784_v17  ;;  %v8815_v14 = vld [vmem:[%s8974_s26 + $0xbec] ss:$56 sps:$4 sm:$0xff]  }
 0x36f   : > { %4844 = vmatprep.mubr.bf16.mxu1 %v8785_v18  ;;  %5711 = vmatprep.mubr.bf16.mxu0 %v8787_v20  ;;  %v8817_v18 = vld [vmem:[%s8974_s26 + $0xc04] ss:$56 sps:$4 sm:$0xff]   ;;  %v7283_v20 = vadd.f32 %v9918_v19, %v9787_v52 }
 0x371   : > { %v9875_v22 = vpop.f32.mrb[44].mxu1 }
 0x372   : > { %v4471_v23 = vpop.f32.mrb[45].mxu1 }
 0x373   : > { %v9878_v26 = vpop.f32.mrb[46].mxu1 }
 0x374   : > { %v4474_v30 = vpop.f32.mrb[47].mxu1 }
 0x376   : > { %4845 = vmatmul.mubr.bf16.gmra.mrb[88].mxu1 %v8789_v25  ;;  %5712 = vmatmul.mubr.bf16.gmra.mrb[88].mxu0 %v8790_v27  ;;  %v8819_v25 = vld [vmem:[%s8974_s26 + $0xbe8] ss:$56 sps:$4 sm:$0xff]   ;;  %v7285_v27 = vadd.f32 %v9918_v19, %v9790_v55  ;;  %v7287_v55 = vadd.f32 %v9918_v19, %v9795_v60 }
 0x377   : > { %4852 = vmatprep.mubr.bf16.mxu1 %v8791_v28  ;;  %5719 = vmatprep.mubr.bf16.mxu0 %v8793_v31  ;;  %v8820_v31 = vld [vmem:[%s8974_s26 + $0xc00] ss:$56 sps:$4 sm:$0xff]  }
 0x379   : > { %v9883_v33 = vpop.f32.mrb[48].mxu1 }
 0x37a   : > { %v4479_v34 = vpop.f32.mrb[49].mxu1 }
 0x37b   : > { %v9886_v36 = vpop.f32.mrb[50].mxu1  ;;  %v8821_v34 = vld [vmem:[%s8974_s26 + $0xc5c] ss:$56 sps:$4 sm:$0xff]  }
 0x37c   : > { %v4482_v41 = vpop.f32.mrb[51].mxu1 }
 0x37e   : > { %4853 = vmatmul.mubr.bf16.gmra.mrb[92].mxu1 %v8795_v35  ;;  %5720 = vmatmul.mubr.bf16.gmra.mrb[92].mxu0 %v8796_v38  ;;  %v8823_v38 = vld [vmem:[%s8974_s26 + $0xc74] ss:$56 sps:$4 sm:$0xff]  }
 0x37f   : > { %4860 = vmatprep.mubr.bf16.mxu1 %v8797_v39  ;;  %5727 = vmatprep.mubr.bf16.mxu0 %v8799_v42 }
 0x381   : > { %v9891_v43 = vpop.f32.mrb[52].mxu1 }
 0x382   : > { %v4487_v44 = vpop.f32.mrb[53].mxu1 }
 0x383   : > { %v9894_v46 = vpop.f32.mrb[54].mxu1 }
 0x384   : > { %v4490_v50 = vpop.f32.mrb[55].mxu1 }
 0x385   : > { %v8825_v50 = vld [vmem:[%s8974_s26 + $0xc58] ss:$56 sps:$4 sm:$0xff]  }
 0x386   : > { %4861 = vmatmul.mubr.bf16.gmra.mrb[96].mxu1 %v8801_v1  ;;  %5728 = vmatmul.mubr.bf16.gmra.mrb[96].mxu0 %v8802_v48 }
 0x387   : > { %4868 = vmatprep.mubr.bf16.mxu1 %v8803_v49  ;;  %5735 = vmatprep.mubr.bf16.mxu0 %v8805_v51  ;;  %v7289_v51 = vadd.f32 %v9918_v19, %v9798_v63  ;;  %v7291_v63 = vadd.f32 %v9918_v19, %v9803_v5 }
 0x389   : > { %v9899_v54 = vpop.f32.mrb[56].mxu1 }
 0x38a   : > { %v4495_v56 = vpop.f32.mrb[57].mxu1 }
 0x38b   : > { %v9902_v59 = vpop.f32.mrb[58].mxu1 }
 0x38c   : > { %v4498_v2 = vpop.f32.mrb[59].mxu1 }
 0x38d   : > { %v8829_v2 = vld [vmem:[%s8974_s26 + $0xce4] ss:$56 sps:$4 sm:$0xff]  }
 0x38e   : > { %4869 = vmatmul.mubr.bf16.gmra.mrb[100].mxu1 %v8807_v58  ;;  %5736 = vmatmul.mubr.bf16.gmra.mrb[100].mxu0 %v8808_v61  ;;  %v8826_v61 = vld [vmem:[%s8974_s26 + $0xc70] ss:$56 sps:$4 sm:$0xff]  }
 0x38f   : > { %4876 = vmatprep.mubr.bf16.mxu1 %v8809_v62  ;;  %5743 = vmatprep.mubr.bf16.mxu0 %v8811_v3  ;;  %v8827_v62 = vld [vmem:[%s8974_s26 + $0xccc] ss:$56 sps:$4 sm:$0xff]  }
 0x391   : > { %v9907_v6 = vpop.f32.mrb[60].mxu1 }
 0x392   : > { %v4503_v7 = vpop.f32.mrb[61].mxu1 }
 0x393   : > { %v9910_v10 = vpop.f32.mrb[62].mxu1 }
 0x394   : > { %v4506_v17 = vpop.f32.mrb[63].mxu1 }
 0x396   : > { %4877 = vmatmul.mubr.bf16.gmra.mrb[104].mxu1 %v8813_v9  ;;  %5744 = vmatmul.mubr.bf16.gmra.mrb[104].mxu0 %v8814_v12 }
 0x397   : > { %4884 = vmatprep.mubr.bf16.mxu1 %v8815_v14  ;;  %5751 = vmatprep.mubr.bf16.mxu0 %v8817_v18 }
 0x399   : > { %v5537_v23 = vpop.f32.mrb[0].mxu0 }
 0x39a   : > { %v7284_v28 = vadd.f32 %v7283_v20, %v5537_v23  ;;  %v5539_v30 = vpop.f32.mrb[1].mxu0  ;;  %v8831_v23 = vld [vmem:[%s8974_s26 + $0xcc8] ss:$56 sps:$4 sm:$0xff]  }
 0x39b   : > { %v5540_v35 = vpop.f32.mrb[2].mxu0  ;;  %v8832_v30 = vld [vmem:[%s8974_s26 + $0xce0] ss:$56 sps:$4 sm:$0xff]  }
 0x39c   : > { %v5856_v39 = vmul.f32 0.01, %v7284_v28  ;;  %v7286_v41 = vadd.f32 %v7285_v27, %v5540_v35  ;;  %v5542_v42 = vpop.f32.mrb[3].mxu0  ;;  %vm5792_vm0 = vcmp.ge.f32.partialorder %v7284_v28, 0.0  ;;  %v8835_v35 = vld [vmem:[%s8974_s26 + $0xd54] ss:$56 sps:$4 sm:$0xff]  }
 0x39e   : > { %4885 = vmatmul.mubr.bf16.gmra.mrb[108].mxu1 %v8819_v25  ;;  %vm5793_vm1 = vcmp.ge.f32.partialorder %v7286_v41, 0.0  ;;  %v5857_v52 = vmul.f32 0.01, %v7286_v41  ;;  %5752 = vmatmul.mubr.bf16.gmra.mrb[108].mxu0 %v8820_v31  ;;  %v5920_v44 = vsel %vm5792_vm0, %v7284_v28, %v5856_v39  ;;  %v7293_v25 = vadd.f32 %v9918_v19, %v9806_v8  ;;  %v8833_v31 = vld [vmem:[%s8974_s26 + $0xd3c] ss:$56 sps:$4 sm:$0xff]  }
 0x39f   : > { %4892 = vmatprep.mubr.bf16.mxu1 %v8821_v34  ;;  %5759 = vmatprep.mubr.bf16.mxu0 %v8823_v38  ;;  %v7295_v8 = vadd.f32 %v9918_v19, %v9811_v13 }
 0x3a0   : > { %v5921_v1 = vsel %vm5793_vm1, %v7286_v41, %v5857_v52 }
 0x3a1   : > { %v7063_v48 = vpack.c.bf16 %v5921_v1, %v5920_v44  ;;  %v5545_v49 = vpop.f32.mrb[4].mxu0  ;;  %v8837_v1 = vld [vmem:[%s8974_s26 + $0xd38] ss:$56 sps:$4 sm:$0xff]  }
 0x3a2   : > { %v7288_v56 = vadd.f32 %v7287_v55, %v5545_v49  ;;  %v5547_v58 = vpop.f32.mrb[5].mxu0 }
 0x3a3   : > { %7064 = vst [vmem:[%s9934_s14] sm:$0xff] %v7063_v48   ;;  %v5548_v60 = vpop.f32.mrb[6].mxu0  ;;  %v7297_v48 = vadd.f32 %v9918_v19, %v9814_v16  ;;  %v7299_v16 = vadd.f32 %v9918_v19, %v9819_v21 }
 0x3a4   : > { %v5858_v3 = vmul.f32 0.01, %v7288_v56  ;;  %v7290_v7 = vadd.f32 %v7289_v51, %v5548_v60  ;;  %v5550_v9 = vpop.f32.mrb[7].mxu0  ;;  %vm5794_vm2 = vcmp.ge.f32.partialorder %v7288_v56, 0.0  ;;  %v8838_v51 = vld [vmem:[%s8974_s26 + $0xd50] ss:$56 sps:$4 sm:$0xff]  }
 0x3a6   : > { %4893 = vmatmul.mubr.bf16.gmra.mrb[112].mxu1 %v8825_v50  ;;  %vm5795_vm3 = vcmp.ge.f32.partialorder %v7290_v7, 0.0  ;;  %v5859_v12 = vmul.f32 0.01, %v7290_v7  ;;  %5760 = vmatmul.mubr.bf16.gmra.mrb[112].mxu0 %v8826_v61  ;;  %v5922_v14 = vsel %vm5794_vm2, %v7288_v56, %v5858_v3  ;;  %v8839_v56 = vld [vmem:[%s8974_s26 + $0xdac] ss:$56 sps:$4 sm:$0xff]  }
 0x3a7   : > { %4900 = vmatprep.mubr.bf16.mxu1 %v8827_v62  ;;  %5767 = vmatprep.mubr.bf16.mxu0 %v8829_v2  ;;  %v8841_v61 = vld [vmem:[%s8974_s26 + $0xdc4] ss:$56 sps:$4 sm:$0xff]  }
 0x3a8   : > { %v5923_v17 = vsel %vm5795_vm3, %v7290_v7, %v5859_v12 }
 0x3a9   : > { %v7068_v18 = vpack.c.bf16 %v5923_v17, %v5922_v14  ;;  %v5553_v20 = vpop.f32.mrb[8].mxu0  ;;  %v7301_v14 = vadd.f32 %v9918_v19, %v9822_v24 }
 0x3aa   : > { %v7292_v27 = vadd.f32 %v7291_v63, %v5553_v20  ;;  %v5555_v28 = vpop.f32.mrb[9].mxu0  ;;  %v8843_v63 = vld [vmem:[%s8974_s26 + $0xda8] ss:$56 sps:$4 sm:$0xff]  }
 0x3ab   : > { %7220 = vst [vmem:[%s9934_s14 + $0x8] sm:$0xff] %v7068_v18   ;;  %v5556_v34 = vpop.f32.mrb[10].mxu0  ;;  %v8844_v20 = vld [vmem:[%s8974_s26 + $0xdc0] ss:$56 sps:$4 sm:$0xff]  }
 0x3ac   : > { %v5860_v38 = vmul.f32 0.01, %v7292_v27  ;;  %v7294_v39 = vadd.f32 %v7293_v25, %v5556_v34  ;;  %v5558_v41 = vpop.f32.mrb[11].mxu0  ;;  %vm5796_vm4 = vcmp.ge.f32.partialorder %v7292_v27, 0.0 }
 0x3ae   : > { %4901 = vmatmul.mubr.bf16.gmra.mrb[116].mxu1 %v8831_v23  ;;  %vm5797_vm5 = vcmp.ge.f32.partialorder %v7294_v39, 0.0  ;;  %v5861_v5 = vmul.f32 0.01, %v7294_v39  ;;  %5768 = vmatmul.mubr.bf16.gmra.mrb[116].mxu0 %v8832_v30  ;;  %v5924_v42 = vsel %vm5796_vm4, %v7292_v27, %v5860_v38  ;;  %v7303_v30 = vadd.f32 %v9918_v19, %v9827_v29 }
 0x3af   : > { %4908 = vmatprep.mubr.bf16.mxu1 %v8833_v31  ;;  %5775 = vmatprep.mubr.bf16.mxu0 %v8835_v35  ;;  %v7305_v38 = vadd.f32 %v9918_v19, %v9830_v32  ;;  %v7307_v29 = vadd.f32 %v9918_v19, %v9835_v37  ;;  %v7309_v32 = vadd.f32 %v9918_v19, %v9838_v40 }
 0x3b0   : > { %v5925_v52 = vsel %vm5797_vm5, %v7294_v39, %v5861_v5  ;;  %v7311_v37 = vadd.f32 %v9918_v19, %v9843_v45  ;;  %v7313_v40 = vadd.f32 %v9918_v19, %v9846_v47  ;;  %v7315_v45 = vadd.f32 %v9918_v19, %v9851_v53 }
 0x3b1   : > { %v7073_v55 = vpack.c.bf16 %v5925_v52, %v5924_v42  ;;  %v5561_v44 = vpop.f32.mrb[12].mxu0  ;;  %v7317_v47 = vadd.f32 %v9918_v19, %v9854_v57  ;;  %v7319_v53 = vadd.f32 %v9918_v19, %v9859_v0  ;;  %v7321_v57 = vadd.f32 %v9918_v19, %v9862_v4 }
 0x3b2   : > { %v7296_v49 = vadd.f32 %v7295_v8, %v5561_v44  ;;  %v5563_v50 = vpop.f32.mrb[13].mxu0  ;;  %v7323_v0 = vadd.f32 %v9918_v19, %v9867_v11  ;;  %v7325_v4 = vadd.f32 %v9918_v19, %v9870_v15  ;;  %v7327_v11 = vadd.f32 %v9918_v19, %v9875_v22 }
 0x3b3   : > { %7221 = vst [vmem:[%s9934_s14 + $0x10] sm:$0xff] %v7073_v55   ;;  %v5564_v58 = vpop.f32.mrb[14].mxu0  ;;  %v7329_v15 = vadd.f32 %v9918_v19, %v9878_v26  ;;  %v7331_v22 = vadd.f32 %v9918_v19, %v9883_v33  ;;  %v7333_v26 = vadd.f32 %v9918_v19, %v9886_v36  ;;  %v7335_v33 = vadd.f32 %v9918_v19, %v9891_v43 }
 0x3b4   : > { %v5862_v62 = vmul.f32 0.01, %v7296_v49  ;;  %v7298_v60 = vadd.f32 %v7297_v48, %v5564_v58  ;;  %v5566_v2 = vpop.f32.mrb[15].mxu0  ;;  %vm5798_vm6 = vcmp.ge.f32.partialorder %v7296_v49, 0.0  ;;  %v7337_v36 = vadd.f32 %v9918_v19, %v9894_v46 }
 0x3b5   : > { %v7339_v43 = vadd.f32 %v9918_v19, %v9899_v54  ;;  %v7341_v46 = vadd.f32 %v9918_v19, %v9902_v59  ;;  %v7343_v54 = vadd.f32 %v9918_v19, %v9907_v6  ;;  %v7345_v59 = vadd.f32 %v9918_v19, %v9910_v10 }
 0x3b6   : > { %4909 = vmatmul.mubr.bf16.gmra.mrb[120].mxu1 %v8837_v1  ;;  %vm5799_vm7 = vcmp.ge.f32.partialorder %v7298_v60, 0.0  ;;  %v5863_v13 = vmul.f32 0.01, %v7298_v60  ;;  %5776 = vmatmul.mubr.bf16.gmra.mrb[120].mxu0 %v8838_v51  ;;  %v5926_v3 = vsel %vm5798_vm6, %v7296_v49, %v5862_v62 }
 0x3b7   : > { %4916 = vmatprep.mubr.bf16.mxu1 %v8839_v56  ;;  %5783 = vmatprep.mubr.bf16.mxu0 %v8841_v61 }
 0x3b8   : > { %v5927_v7 = vsel %vm5799_vm7, %v7298_v60, %v5863_v13 }
 0x3b9   : > { %v7078_v9 = vpack.c.bf16 %v5927_v7, %v5926_v3  ;;  %v5569_v12 = vpop.f32.mrb[16].mxu0 }
 0x3ba   : > { %v7300_v17 = vadd.f32 %v7299_v16, %v5569_v12  ;;  %v5571_v18 = vpop.f32.mrb[17].mxu0 }
 0x3bb   : > { %7222 = vst [vmem:[%s9934_s14 + $0x18] sm:$0xff] %v7078_v9   ;;  %v5572_v23 = vpop.f32.mrb[18].mxu0 }
 0x3bc   : > { %v5864_v25 = vmul.f32 0.01, %v7300_v17  ;;  %v7302_v27 = vadd.f32 %v7301_v14, %v5572_v23  ;;  %v5574_v28 = vpop.f32.mrb[19].mxu0  ;;  %vm5800_vm8 = vcmp.ge.f32.partialorder %v7300_v17, 0.0 }
 0x3be   : > { %4917 = vmatmul.mubr.bf16.gmra.mrb[124].mxu1 %v8843_v63  ;;  %vm5801_vm9 = vcmp.ge.f32.partialorder %v7302_v27, 0.0  ;;  %v5865_v21 = vmul.f32 0.01, %v7302_v27  ;;  %5784 = vmatmul.mubr.bf16.gmra.mrb[124].mxu0 %v8844_v20  ;;  %v5928_v31 = vsel %vm5800_vm8, %v7300_v17, %v5864_v25 }
 0x3c0   : > { %v5929_v34 = vsel %vm5801_vm9, %v7302_v27, %v5865_v21 }
 0x3c1   : > { %v7083_v24 = vpack.c.bf16 %v5929_v34, %v5928_v31  ;;  %v5577_v35 = vpop.f32.mrb[20].mxu0 }
 0x3c2   : > { %v7304_v39 = vadd.f32 %v7303_v30, %v5577_v35  ;;  %v5579_v41 = vpop.f32.mrb[21].mxu0 }
 0x3c3   : > { %7223 = vst [vmem:[%s9934_s14 + $0x20] sm:$0xff] %v7083_v24   ;;  %v5580_v5 = vpop.f32.mrb[22].mxu0 }
 0x3c4   : > { %v5866_v8 = vmul.f32 0.01, %v7304_v39  ;;  %v7306_v42 = vadd.f32 %v7305_v38, %v5580_v5  ;;  %v5582_v52 = vpop.f32.mrb[23].mxu0  ;;  %vm5802_vm10 = vcmp.ge.f32.partialorder %v7304_v39, 0.0 }
 0x3c6   : > { %vm5803_vm11 = vcmp.ge.f32.partialorder %v7306_v42, 0.0  ;;  %v5867_v55 = vmul.f32 0.01, %v7306_v42  ;;  %v5930_v44 = vsel %vm5802_vm10, %v7304_v39, %v5866_v8 }
 0x3c8   : > { %v5931_v1 = vsel %vm5803_vm11, %v7306_v42, %v5867_v55 }
 0x3c9   : > { %v7088_v48 = vpack.c.bf16 %v5931_v1, %v5930_v44  ;;  %v5585_v49 = vpop.f32.mrb[24].mxu0 }
 0x3ca   : > { %v7308_v50 = vadd.f32 %v7307_v29, %v5585_v49  ;;  %v5587_v51 = vpop.f32.mrb[25].mxu0 }
 0x3cb   : > { %7224 = vst [vmem:[%s9934_s14 + $0x28] sm:$0xff] %v7088_v48   ;;  %v5588_v56 = vpop.f32.mrb[26].mxu0 }
 0x3cc   : > { %v5868_v58 = vmul.f32 0.01, %v7308_v50  ;;  %v7310_v61 = vadd.f32 %v7309_v32, %v5588_v56  ;;  %v5590_v62 = vpop.f32.mrb[27].mxu0  ;;  %vm5804_vm12 = vcmp.ge.f32.partialorder %v7308_v50, 0.0 }
 0x3ce   : > { %vm5805_vm13 = vcmp.ge.f32.partialorder %v7310_v61, 0.0  ;;  %v5869_v60 = vmul.f32 0.01, %v7310_v61  ;;  %v5932_v2 = vsel %vm5804_vm12, %v7308_v50, %v5868_v58 }
 0x3d0   : > { %v5933_v13 = vsel %vm5805_vm13, %v7310_v61, %v5869_v60 }
 0x3d1   : > { %v7093_v16 = vpack.c.bf16 %v5933_v13, %v5932_v2  ;;  %v5593_v3 = vpop.f32.mrb[28].mxu0 }
 0x3d2   : > { %v7312_v7 = vadd.f32 %v7311_v37, %v5593_v3  ;;  %v5595_v9 = vpop.f32.mrb[29].mxu0 }
 0x3d3   : > { %7225 = vst [vmem:[%s9934_s14 + $0x30] sm:$0xff] %v7093_v16   ;;  %v5596_v12 = vpop.f32.mrb[30].mxu0 }
 0x3d4   : > { %v5870_v63 = vmul.f32 0.01, %v7312_v7  ;;  %v7314_v14 = vadd.f32 %v7313_v40, %v5596_v12  ;;  %v5598_v17 = vpop.f32.mrb[31].mxu0  ;;  %vm5806_vm14 = vcmp.ge.f32.partialorder %v7312_v7, 0.0 }
 0x3d6   : > { %vm5807_vm15 = vcmp.ge.f32.partialorder %v7314_v14, 0.0  ;;  %v5871_v18 = vmul.f32 0.01, %v7314_v14  ;;  %v5934_v20 = vsel %vm5806_vm14, %v7312_v7, %v5870_v63 }
 0x3d8   : > { %v5935_v23 = vsel %vm5807_vm15, %v7314_v14, %v5871_v18 }
 0x3d9   : > { %v7098_v25 = vpack.c.bf16 %v5935_v23, %v5934_v20  ;;  %v5601_v27 = vpop.f32.mrb[32].mxu0 }
 0x3da   : > { %v7316_v28 = vadd.f32 %v7315_v45, %v5601_v27  ;;  %v5603_v21 = vpop.f32.mrb[33].mxu0 }
 0x3db   : > { %7226 = vst [vmem:[%s9934_s14 + $0x38] sm:$0xff] %v7098_v25   ;;  %v5604_v30 = vpop.f32.mrb[34].mxu0 }
 0x3dc   : > { %v5872_v31 = vmul.f32 0.01, %v7316_v28  ;;  %v7318_v34 = vadd.f32 %v7317_v47, %v5604_v30  ;;  %v5606_v24 = vpop.f32.mrb[35].mxu0  ;;  %vm5808_vm0 = vcmp.ge.f32.partialorder %v7316_v28, 0.0 }
 0x3de   : > { %vm5809_vm1 = vcmp.ge.f32.partialorder %v7318_v34, 0.0  ;;  %v5873_v35 = vmul.f32 0.01, %v7318_v34  ;;  %v5936_v38 = vsel %vm5808_vm0, %v7316_v28, %v5872_v31 }
 0x3e0   : > { %v5937_v39 = vsel %vm5809_vm1, %v7318_v34, %v5873_v35 }
 0x3e1   : > { %v7103_v41 = vpack.c.bf16 %v5937_v39, %v5936_v38  ;;  %v5609_v5 = vpop.f32.mrb[36].mxu0 }
 0x3e2   : > { %v7320_v8 = vadd.f32 %v7319_v53, %v5609_v5  ;;  %v5611_v42 = vpop.f32.mrb[37].mxu0 }
 0x3e3   : > { %7227 = vst [vmem:[%s9934_s14 + $0x40] sm:$0xff] %v7103_v41   ;;  %v5612_v52 = vpop.f32.mrb[38].mxu0 }
 0x3e4   : > { %v5874_v55 = vmul.f32 0.01, %v7320_v8  ;;  %v7322_v29 = vadd.f32 %v7321_v57, %v5612_v52  ;;  %v5614_v44 = vpop.f32.mrb[39].mxu0  ;;  %vm5810_vm2 = vcmp.ge.f32.partialorder %v7320_v8, 0.0 }
 0x3e6   : > { %vm5811_vm3 = vcmp.ge.f32.partialorder %v7322_v29, 0.0  ;;  %v5875_v1 = vmul.f32 0.01, %v7322_v29  ;;  %v5938_v48 = vsel %vm5810_vm2, %v7320_v8, %v5874_v55 }
 0x3e8   : > { %v5939_v49 = vsel %vm5811_vm3, %v7322_v29, %v5875_v1 }
 0x3e9   : > { %v7108_v32 = vpack.c.bf16 %v5939_v49, %v5938_v48  ;;  %v5617_v50 = vpop.f32.mrb[40].mxu0 }
 0x3ea   : > { %v7324_v51 = vadd.f32 %v7323_v0, %v5617_v50  ;;  %v5619_v56 = vpop.f32.mrb[41].mxu0 }
 0x3eb   : > { %7228 = vst [vmem:[%s9934_s14 + $0x48] sm:$0xff] %v7108_v32   ;;  %v5620_v58 = vpop.f32.mrb[42].mxu0 }
 0x3ec   : > { %v5876_v61 = vmul.f32 0.01, %v7324_v51  ;;  %v7326_v62 = vadd.f32 %v7325_v4, %v5620_v58  ;;  %v5622_v60 = vpop.f32.mrb[43].mxu0  ;;  %vm5812_vm4 = vcmp.ge.f32.partialorder %v7324_v51, 0.0 }
 0x3ee   : > { %vm5813_vm5 = vcmp.ge.f32.partialorder %v7326_v62, 0.0  ;;  %v5877_v37 = vmul.f32 0.01, %v7326_v62  ;;  %v5940_v2 = vsel %vm5812_vm4, %v7324_v51, %v5876_v61 }
 0x3f0   : > { %v5941_v13 = vsel %vm5813_vm5, %v7326_v62, %v5877_v37 }
 0x3f1   : > { %v7113_v16 = vpack.c.bf16 %v5941_v13, %v5940_v2  ;;  %v5625_v3 = vpop.f32.mrb[44].mxu0 }
 0x3f2   : > { %v7328_v40 = vadd.f32 %v7327_v11, %v5625_v3  ;;  %v5627_v7 = vpop.f32.mrb[45].mxu0 }
 0x3f3   : > { %7229 = vst [vmem:[%s9934_s14 + $0x50] sm:$0xff] %v7113_v16   ;;  %v5628_v9 = vpop.f32.mrb[46].mxu0 }
 0x3f4   : > { %v5878_v12 = vmul.f32 0.01, %v7328_v40  ;;  %v7330_v63 = vadd.f32 %v7329_v15, %v5628_v9  ;;  %v5630_v14 = vpop.f32.mrb[47].mxu0  ;;  %vm5814_vm6 = vcmp.ge.f32.partialorder %v7328_v40, 0.0 }
 0x3f6   : > { %vm5815_vm7 = vcmp.ge.f32.partialorder %v7330_v63, 0.0  ;;  %v5879_v17 = vmul.f32 0.01, %v7330_v63  ;;  %v5942_v18 = vsel %vm5814_vm6, %v7328_v40, %v5878_v12 }
 0x3f8   : > { %v5943_v45 = vsel %vm5815_vm7, %v7330_v63, %v5879_v17 }
 0x3f9   : > { %v7118_v20 = vpack.c.bf16 %v5943_v45, %v5942_v18  ;;  %v5633_v23 = vpop.f32.mrb[48].mxu0 }
 0x3fa   : > { %v7332_v25 = vadd.f32 %v7331_v22, %v5633_v23  ;;  %v5635_v27 = vpop.f32.mrb[49].mxu0 }
 0x3fb   : > { %7230 = vst [vmem:[%s9934_s14 + $0x58] sm:$0xff] %v7118_v20   ;;  %v5636_v47 = vpop.f32.mrb[50].mxu0 }
 0x3fc   : > { %v5880_v28 = vmul.f32 0.01, %v7332_v25  ;;  %v7334_v21 = vadd.f32 %v7333_v26, %v5636_v47  ;;  %v5638_v30 = vpop.f32.mrb[51].mxu0  ;;  %vm5816_vm8 = vcmp.ge.f32.partialorder %v7332_v25, 0.0 }
 0x3fe   : > { %vm5817_vm9 = vcmp.ge.f32.partialorder %v7334_v21, 0.0  ;;  %v5881_v31 = vmul.f32 0.01, %v7334_v21  ;;  %v5944_v34 = vsel %vm5816_vm8, %v7332_v25, %v5880_v28 }
 0x400   : > { %v5945_v24 = vsel %vm5817_vm9, %v7334_v21, %v5881_v31 }
 0x401   : > { %v7123_v35 = vpack.c.bf16 %v5945_v24, %v5944_v34  ;;  %v5641_v53 = vpop.f32.mrb[52].mxu0 }
 0x402   : > { %v7336_v38 = vadd.f32 %v7335_v33, %v5641_v53  ;;  %v5643_v39 = vpop.f32.mrb[53].mxu0 }
 0x403   : > { %7231 = vst [vmem:[%s9934_s14 + $0x60] sm:$0xff] %v7123_v35   ;;  %v5644_v41 = vpop.f32.mrb[54].mxu0 }
 0x404   : > { %v5882_v5 = vmul.f32 0.01, %v7336_v38  ;;  %v7338_v57 = vadd.f32 %v7337_v36, %v5644_v41  ;;  %v5646_v8 = vpop.f32.mrb[55].mxu0  ;;  %vm5818_vm10 = vcmp.ge.f32.partialorder %v7336_v38, 0.0 }
 0x406   : > { %vm5819_vm11 = vcmp.ge.f32.partialorder %v7338_v57, 0.0  ;;  %v5883_v42 = vmul.f32 0.01, %v7338_v57  ;;  %v5946_v52 = vsel %vm5818_vm10, %v7336_v38, %v5882_v5 }
 0x408   : > { %v5947_v55 = vsel %vm5819_vm11, %v7338_v57, %v5883_v42 }
 0x409   : > { %v7128_v29 = vpack.c.bf16 %v5947_v55, %v5946_v52  ;;  %v5649_v44 = vpop.f32.mrb[56].mxu0 }
 0x40a   : > { %v7340_v1 = vadd.f32 %v7339_v43, %v5649_v44  ;;  %v5651_v0 = vpop.f32.mrb[57].mxu0 }
 0x40b   : > { %7232 = vst [vmem:[%s9934_s14 + $0x68] sm:$0xff] %v7128_v29   ;;  %v5652_v48 = vpop.f32.mrb[58].mxu0 }
 0x40c   : > { %v5884_v49 = vmul.f32 0.01, %v7340_v1  ;;  %v7342_v32 = vadd.f32 %v7341_v46, %v5652_v48  ;;  %v5654_v50 = vpop.f32.mrb[59].mxu0  ;;  %vm5820_vm12 = vcmp.ge.f32.partialorder %v7340_v1, 0.0 }
 0x40e   : > { %vm5821_vm13 = vcmp.ge.f32.partialorder %v7342_v32, 0.0  ;;  %v5885_v4 = vmul.f32 0.01, %v7342_v32  ;;  %v5948_v51 = vsel %vm5820_vm12, %v7340_v1, %v5884_v49 }
 0x410   : > { %v5949_v56 = vsel %vm5821_vm13, %v7342_v32, %v5885_v4 }
 0x411   : > { %v7133_v58 = vpack.c.bf16 %v5949_v56, %v5948_v51  ;;  %v5657_v61 = vpop.f32.mrb[60].mxu0 }
 0x412   : > { %v7344_v62 = vadd.f32 %v7343_v54, %v5657_v61  ;;  %v5659_v60 = vpop.f32.mrb[61].mxu0 }
 0x413   : > { %7233 = vst [vmem:[%s9934_s14 + $0x70] sm:$0xff] %v7133_v58   ;;  %v5660_v37 = vpop.f32.mrb[62].mxu0 }
 0x414   : > { %v5886_v11 = vmul.f32 0.01, %v7344_v62  ;;  %v7346_v2 = vadd.f32 %v7345_v59, %v5660_v37  ;;  %v5662_v13 = vpop.f32.mrb[63].mxu0  ;;  %vm5822_vm14 = vcmp.ge.f32.partialorder %v7344_v62, 0.0 }
 0x416   : > { %vm5823_vm15 = vcmp.ge.f32.partialorder %v7346_v2, 0.0  ;;  %v5887_v16 = vmul.f32 0.01, %v7346_v2  ;;  %v5950_v3 = vsel %vm5822_vm14, %v7344_v62, %v5886_v11 }
 0x418   : > { %v5951_v6 = vsel %vm5823_vm15, %v7346_v2, %v5887_v16 }
 0x419   : > { %v4798_v15 = vpop.f32.mrb[64].mxu1  ;;  %v7138_v40 = vpack.c.bf16 %v5951_v6, %v5950_v3  ;;  %v5665_v9 = vpop.f32.mrb[64].mxu0 }
 0x41a   : > { %v7347_v7 = vadd.f32 %v9918_v19, %v4798_v15  ;;  %v4800_v12 = vpop.f32.mrb[65].mxu1  ;;  %v5667_v10 = vpop.f32.mrb[65].mxu0 }
 0x41b   : > { %v4801_v63 = vpop.f32.mrb[66].mxu1  ;;  %7234 = vst [vmem:[%s9934_s14 + $0x78] sm:$0xff] %v7138_v40   ;;  %v5668_v22 = vpop.f32.mrb[66].mxu0 }
 0x41c   : > { %v7348_v14 = vadd.f32 %v7347_v7, %v5665_v9  ;;  %v7349_v17 = vadd.f32 %v9918_v19, %v4801_v63  ;;  %v4803_v18 = vpop.f32.mrb[67].mxu1  ;;  %v5670_v45 = vpop.f32.mrb[67].mxu0 }
 0x41e   : > { %v5888_v20 = vmul.f32 0.01, %v7348_v14  ;;  %v7350_v23 = vadd.f32 %v7349_v17, %v5668_v22  ;;  %vm5824_vm0 = vcmp.ge.f32.partialorder %v7348_v14, 0.0 }
 0x420   : > { %vm5825_vm1 = vcmp.ge.f32.partialorder %v7350_v23, 0.0  ;;  %v5889_v26 = vmul.f32 0.01, %v7350_v23  ;;  %v5952_v27 = vsel %vm5824_vm0, %v7348_v14, %v5888_v20 }
 0x421   : > { %v4806_v25 = vpop.f32.mrb[68].mxu1  ;;  %v5673_v21 = vpop.f32.mrb[68].mxu0 }
 0x422   : > { %v5953_v47 = vsel %vm5825_vm1, %v7350_v23, %v5889_v26  ;;  %v7351_v28 = vadd.f32 %v9918_v19, %v4806_v25  ;;  %v4808_v30 = vpop.f32.mrb[69].mxu1  ;;  %v5675_v33 = vpop.f32.mrb[69].mxu0 }
 0x423   : > { %v7143_v31 = vpack.c.bf16 %v5953_v47, %v5952_v27  ;;  %v4809_v34 = vpop.f32.mrb[70].mxu1  ;;  %v5676_v53 = vpop.f32.mrb[70].mxu0 }
 0x424   : > { %v7352_v24 = vadd.f32 %v7351_v28, %v5673_v21  ;;  %v7353_v35 = vadd.f32 %v9918_v19, %v4809_v34  ;;  %v4811_v36 = vpop.f32.mrb[71].mxu1  ;;  %v5678_v38 = vpop.f32.mrb[71].mxu0 }
 0x425   : > { %7235 = vst [vmem:[%s9934_s14 + $0x80] sm:$0xff] %v7143_v31  }
 0x426   : > { %v5890_v39 = vmul.f32 0.01, %v7352_v24  ;;  %v7354_v41 = vadd.f32 %v7353_v35, %v5676_v53  ;;  %vm5826_vm2 = vcmp.ge.f32.partialorder %v7352_v24, 0.0 }
 0x428   : > { %vm5827_vm3 = vcmp.ge.f32.partialorder %v7354_v41, 0.0  ;;  %v5891_v5 = vmul.f32 0.01, %v7354_v41  ;;  %v5954_v8 = vsel %vm5826_vm2, %v7352_v24, %v5890_v39 }
 0x429   : > { %v4814_v57 = vpop.f32.mrb[72].mxu1  ;;  %v5681_v52 = vpop.f32.mrb[72].mxu0 }
 0x42a   : > { %v5955_v42 = vsel %vm5827_vm3, %v7354_v41, %v5891_v5  ;;  %v7355_v43 = vadd.f32 %v9918_v19, %v4814_v57  ;;  %v4816_v55 = vpop.f32.mrb[73].mxu1  ;;  %v5683_v44 = vpop.f32.mrb[73].mxu0 }
 0x42b   : > { %v7148_v29 = vpack.c.bf16 %v5955_v42, %v5954_v8  ;;  %v4817_v46 = vpop.f32.mrb[74].mxu1  ;;  %v5684_v48 = vpop.f32.mrb[74].mxu0 }
 0x42c   : > { %v7356_v1 = vadd.f32 %v7355_v43, %v5681_v52  ;;  %v7357_v0 = vadd.f32 %v9918_v19, %v4817_v46  ;;  %v4819_v49 = vpop.f32.mrb[75].mxu1  ;;  %v5686_v32 = vpop.f32.mrb[75].mxu0 }
 0x42d   : > { %7236 = vst [vmem:[%s9934_s14 + $0x88] sm:$0xff] %v7148_v29  }
 0x42e   : > { %v5892_v50 = vmul.f32 0.01, %v7356_v1  ;;  %v7358_v4 = vadd.f32 %v7357_v0, %v5684_v48  ;;  %vm5828_vm4 = vcmp.ge.f32.partialorder %v7356_v1, 0.0 }
 0x430   : > { %vm5829_vm5 = vcmp.ge.f32.partialorder %v7358_v4, 0.0  ;;  %v5893_v54 = vmul.f32 0.01, %v7358_v4  ;;  %v5956_v56 = vsel %vm5828_vm4, %v7356_v1, %v5892_v50 }
 0x431   : > { %v4822_v51 = vpop.f32.mrb[76].mxu1  ;;  %v5689_v59 = vpop.f32.mrb[76].mxu0 }
 0x432   : > { %v5957_v58 = vsel %vm5829_vm5, %v7358_v4, %v5893_v54  ;;  %v7359_v61 = vadd.f32 %v9918_v19, %v4822_v51  ;;  %v4824_v62 = vpop.f32.mrb[77].mxu1  ;;  %v5691_v37 = vpop.f32.mrb[77].mxu0 }
 0x433   : > { %v7153_v60 = vpack.c.bf16 %v5957_v58, %v5956_v56  ;;  %v4825_v11 = vpop.f32.mrb[78].mxu1  ;;  %v5692_v16 = vpop.f32.mrb[78].mxu0 }
 0x434   : > { %v7360_v2 = vadd.f32 %v7359_v61, %v5689_v59  ;;  %v7361_v13 = vadd.f32 %v9918_v19, %v4825_v11  ;;  %v4827_v3 = vpop.f32.mrb[79].mxu1  ;;  %v5694_v6 = vpop.f32.mrb[79].mxu0 }
 0x435   : > { %7237 = vst [vmem:[%s9934_s14 + $0x90] sm:$0xff] %v7153_v60  }
 0x436   : > { %v5894_v15 = vmul.f32 0.01, %v7360_v2  ;;  %v7362_v40 = vadd.f32 %v7361_v13, %v5692_v16  ;;  %vm5830_vm6 = vcmp.ge.f32.partialorder %v7360_v2, 0.0 }
 0x438   : > { %vm5831_vm7 = vcmp.ge.f32.partialorder %v7362_v40, 0.0  ;;  %v5895_v7 = vmul.f32 0.01, %v7362_v40  ;;  %v5958_v12 = vsel %vm5830_vm6, %v7360_v2, %v5894_v15 }
 0x439   : > { %v4830_v9 = vpop.f32.mrb[80].mxu1  ;;  %v5697_v14 = vpop.f32.mrb[80].mxu0 }
 0x43a   : > { %v5959_v10 = vsel %vm5831_vm7, %v7362_v40, %v5895_v7  ;;  %v7363_v63 = vadd.f32 %v9918_v19, %v4830_v9  ;;  %v4832_v17 = vpop.f32.mrb[81].mxu1  ;;  %v5699_v18 = vpop.f32.mrb[81].mxu0 }
 0x43b   : > { %v7158_v22 = vpack.c.bf16 %v5959_v10, %v5958_v12  ;;  %v4833_v45 = vpop.f32.mrb[82].mxu1  ;;  %v5700_v26 = vpop.f32.mrb[82].mxu0 }
 0x43c   : > { %v7364_v20 = vadd.f32 %v7363_v63, %v5697_v14  ;;  %v7365_v23 = vadd.f32 %v9918_v19, %v4833_v45  ;;  %v4835_v25 = vpop.f32.mrb[83].mxu1  ;;  %v5702_v27 = vpop.f32.mrb[83].mxu0 }
 0x43d   : > { %7238 = vst [vmem:[%s9934_s14 + $0x98] sm:$0xff] %v7158_v22  }
 0x43e   : > { %v5896_v47 = vmul.f32 0.01, %v7364_v20  ;;  %v7366_v28 = vadd.f32 %v7365_v23, %v5700_v26  ;;  %vm5832_vm8 = vcmp.ge.f32.partialorder %v7364_v20, 0.0 }
 0x440   : > { %vm5833_vm9 = vcmp.ge.f32.partialorder %v7366_v28, 0.0  ;;  %v5897_v21 = vmul.f32 0.01, %v7366_v28  ;;  %v5960_v31 = vsel %vm5832_vm8, %v7364_v20, %v5896_v47 }
 0x441   : > { %v4838_v30 = vpop.f32.mrb[84].mxu1  ;;  %v5705_v24 = vpop.f32.mrb[84].mxu0 }
 0x442   : > { %v5961_v33 = vsel %vm5833_vm9, %v7366_v28, %v5897_v21  ;;  %v7367_v34 = vadd.f32 %v9918_v19, %v4838_v30  ;;  %v4840_v35 = vpop.f32.mrb[85].mxu1  ;;  %v5707_v36 = vpop.f32.mrb[85].mxu0 }
 0x443   : > { %v7163_v53 = vpack.c.bf16 %v5961_v33, %v5960_v31  ;;  %v4841_v38 = vpop.f32.mrb[86].mxu1  ;;  %v5708_v5 = vpop.f32.mrb[86].mxu0 }
 0x444   : > { %v7368_v39 = vadd.f32 %v7367_v34, %v5705_v24  ;;  %v7369_v41 = vadd.f32 %v9918_v19, %v4841_v38  ;;  %v4843_v57 = vpop.f32.mrb[87].mxu1  ;;  %v5710_v8 = vpop.f32.mrb[87].mxu0 }
 0x445   : > { %7239 = vst [vmem:[%s9934_s14 + $0xa0] sm:$0xff] %v7163_v53  }
 0x446   : > { %v5898_v42 = vmul.f32 0.01, %v7368_v39  ;;  %v7370_v43 = vadd.f32 %v7369_v41, %v5708_v5  ;;  %vm5834_vm10 = vcmp.ge.f32.partialorder %v7368_v39, 0.0 }
 0x448   : > { %vm5835_vm11 = vcmp.ge.f32.partialorder %v7370_v43, 0.0  ;;  %v5899_v52 = vmul.f32 0.01, %v7370_v43  ;;  %v5962_v29 = vsel %vm5834_vm10, %v7368_v39, %v5898_v42 }
 0x449   : > { %v4846_v55 = vpop.f32.mrb[88].mxu1  ;;  %v5713_v1 = vpop.f32.mrb[88].mxu0 }
 0x44a   : > { %v5963_v44 = vsel %vm5835_vm11, %v7370_v43, %v5899_v52  ;;  %v7371_v46 = vadd.f32 %v9918_v19, %v4846_v55  ;;  %v4848_v0 = vpop.f32.mrb[89].mxu1  ;;  %v5715_v49 = vpop.f32.mrb[89].mxu0 }
 0x44b   : > { %v7168_v48 = vpack.c.bf16 %v5963_v44, %v5962_v29  ;;  %v4849_v32 = vpop.f32.mrb[90].mxu1  ;;  %v5716_v54 = vpop.f32.mrb[90].mxu0 }
 0x44c   : > { %v7372_v50 = vadd.f32 %v7371_v46, %v5713_v1  ;;  %v7373_v4 = vadd.f32 %v9918_v19, %v4849_v32  ;;  %v4851_v51 = vpop.f32.mrb[91].mxu1  ;;  %v5718_v56 = vpop.f32.mrb[91].mxu0 }
 0x44d   : > { %7240 = vst [vmem:[%s9934_s14 + $0xa8] sm:$0xff] %v7168_v48  }
 0x44e   : > { %v5900_v58 = vmul.f32 0.01, %v7372_v50  ;;  %v7374_v61 = vadd.f32 %v7373_v4, %v5716_v54  ;;  %vm5836_vm12 = vcmp.ge.f32.partialorder %v7372_v50, 0.0 }
 0x450   : > { %vm5837_vm13 = vcmp.ge.f32.partialorder %v7374_v61, 0.0  ;;  %v5901_v59 = vmul.f32 0.01, %v7374_v61  ;;  %v5964_v60 = vsel %vm5836_vm12, %v7372_v50, %v5900_v58 }
 0x451   : > { %v4854_v62 = vpop.f32.mrb[92].mxu1  ;;  %v5721_v2 = vpop.f32.mrb[92].mxu0 }
 0x452   : > { %v5965_v37 = vsel %vm5837_vm13, %v7374_v61, %v5901_v59  ;;  %v7375_v11 = vadd.f32 %v9918_v19, %v4854_v62  ;;  %v4856_v13 = vpop.f32.mrb[93].mxu1  ;;  %v5723_v3 = vpop.f32.mrb[93].mxu0 }
 0x453   : > { %v7173_v16 = vpack.c.bf16 %v5965_v37, %v5964_v60  ;;  %v4857_v6 = vpop.f32.mrb[94].mxu1  ;;  %v5724_v7 = vpop.f32.mrb[94].mxu0 }
 0x454   : > { %v7376_v15 = vadd.f32 %v7375_v11, %v5721_v2  ;;  %v7377_v40 = vadd.f32 %v9918_v19, %v4857_v6  ;;  %v4859_v9 = vpop.f32.mrb[95].mxu1  ;;  %v5726_v12 = vpop.f32.mrb[95].mxu0  ;;  %v10059_v6 = vld [vmem:[%s10082_s2] ss:$0 sm:$0xff] }
 0x455   : > { %7241 = vst [vmem:[%s9934_s14 + $0xb0] sm:$0xff] %v7173_v16  }
 0x456   : > { %v5902_v10 = vmul.f32 0.01, %v7376_v15  ;;  %v7378_v63 = vadd.f32 %v7377_v40, %v5724_v7  ;;  %vm5838_vm14 = vcmp.ge.f32.partialorder %v7376_v15, 0.0 }
 0x458   : > { %vm5839_vm15 = vcmp.ge.f32.partialorder %v7378_v63, 0.0  ;;  %v5903_v14 = vmul.f32 0.01, %v7378_v63  ;;  %v5966_v22 = vsel %vm5838_vm14, %v7376_v15, %v5902_v10 }
 0x459   : > { %v4862_v17 = vpop.f32.mrb[96].mxu1  ;;  %v5729_v20 = vpop.f32.mrb[96].mxu0 }
 0x45a   : > { %v5967_v18 = vsel %vm5839_vm15, %v7378_v63, %v5903_v14  ;;  %v7379_v45 = vadd.f32 %v9918_v19, %v4862_v17  ;;  %v4864_v23 = vpop.f32.mrb[97].mxu1  ;;  %v5731_v25 = vpop.f32.mrb[97].mxu0 }
 0x45b   : > { %v7178_v26 = vpack.c.bf16 %v5967_v18, %v5966_v22  ;;  %v4865_v27 = vpop.f32.mrb[98].mxu1  ;;  %v5732_v21 = vpop.f32.mrb[98].mxu0 }
 0x45c   : > { %v7380_v47 = vadd.f32 %v7379_v45, %v5729_v20  ;;  %v7381_v28 = vadd.f32 %v9918_v19, %v4865_v27  ;;  %v4867_v30 = vpop.f32.mrb[99].mxu1  ;;  %v5734_v31 = vpop.f32.mrb[99].mxu0 }
 0x45d   : > { %7242 = vst [vmem:[%s9934_s14 + $0xb8] sm:$0xff] %v7178_v26  }
 0x45e   : > { %v5904_v33 = vmul.f32 0.01, %v7380_v47  ;;  %v7382_v34 = vadd.f32 %v7381_v28, %v5732_v21  ;;  %vm5840_vm0 = vcmp.ge.f32.partialorder %v7380_v47, 0.0 }
 0x460   : > { %vm5841_vm1 = vcmp.ge.f32.partialorder %v7382_v34, 0.0  ;;  %v5905_v24 = vmul.f32 0.01, %v7382_v34  ;;  %v5968_v53 = vsel %vm5840_vm0, %v7380_v47, %v5904_v33 }
 0x461   : > { %v4870_v35 = vpop.f32.mrb[100].mxu1  ;;  %v5737_v39 = vpop.f32.mrb[100].mxu0 }
 0x462   : > { %v5969_v36 = vsel %vm5841_vm1, %v7382_v34, %v5905_v24  ;;  %v7383_v38 = vadd.f32 %v9918_v19, %v4870_v35  ;;  %v4872_v41 = vpop.f32.mrb[101].mxu1  ;;  %v5739_v57 = vpop.f32.mrb[101].mxu0 }
 0x463   : > { %v7183_v5 = vpack.c.bf16 %v5969_v36, %v5968_v53  ;;  %v4873_v8 = vpop.f32.mrb[102].mxu1  ;;  %v5740_v52 = vpop.f32.mrb[102].mxu0 }
 0x464   : > { %v7384_v42 = vadd.f32 %v7383_v38, %v5737_v39  ;;  %v7385_v43 = vadd.f32 %v9918_v19, %v4873_v8  ;;  %v4875_v55 = vpop.f32.mrb[103].mxu1  ;;  %v5742_v29 = vpop.f32.mrb[103].mxu0 }
 0x465   : > { %7243 = vst [vmem:[%s9934_s14 + $0xc0] sm:$0xff] %v7183_v5  }
 0x466   : > { %v5906_v44 = vmul.f32 0.01, %v7384_v42  ;;  %v7386_v46 = vadd.f32 %v7385_v43, %v5740_v52  ;;  %vm5842_vm2 = vcmp.ge.f32.partialorder %v7384_v42, 0.0 }
 0x468   : > { %vm5843_vm3 = vcmp.ge.f32.partialorder %v7386_v46, 0.0  ;;  %v5907_v1 = vmul.f32 0.01, %v7386_v46  ;;  %v5970_v48 = vsel %vm5842_vm2, %v7384_v42, %v5906_v44 }
 0x469   : > { %v4878_v0 = vpop.f32.mrb[104].mxu1  ;;  %v5745_v50 = vpop.f32.mrb[104].mxu0 }
 0x46a   : > { %v5971_v49 = vsel %vm5843_vm3, %v7386_v46, %v5907_v1  ;;  %v7387_v32 = vadd.f32 %v9918_v19, %v4878_v0  ;;  %v4880_v4 = vpop.f32.mrb[105].mxu1  ;;  %v5747_v51 = vpop.f32.mrb[105].mxu0 }
 0x46b   : > { %v7188_v54 = vpack.c.bf16 %v5971_v49, %v5970_v48  ;;  %v4881_v56 = vpop.f32.mrb[106].mxu1  ;;  %v5748_v59 = vpop.f32.mrb[106].mxu0 }
 0x46c   : > { %v7388_v58 = vadd.f32 %v7387_v32, %v5745_v50  ;;  %v7389_v61 = vadd.f32 %v9918_v19, %v4881_v56  ;;  %v4883_v62 = vpop.f32.mrb[107].mxu1  ;;  %v5750_v60 = vpop.f32.mrb[107].mxu0 }
 0x46d   : > { %7244 = vst [vmem:[%s9934_s14 + $0xc8] sm:$0xff] %v7188_v54  }
 0x46e   : > { %v5908_v37 = vmul.f32 0.01, %v7388_v58  ;;  %v7390_v11 = vadd.f32 %v7389_v61, %v5748_v59  ;;  %vm5844_vm4 = vcmp.ge.f32.partialorder %v7388_v58, 0.0 }
 0x470   : > { %vm5845_vm5 = vcmp.ge.f32.partialorder %v7390_v11, 0.0  ;;  %v5909_v2 = vmul.f32 0.01, %v7390_v11  ;;  %v5972_v16 = vsel %vm5844_vm4, %v7388_v58, %v5908_v37 }
 0x471   : > { %v4886_v13 = vpop.f32.mrb[108].mxu1  ;;  %v5753_v15 = vpop.f32.mrb[108].mxu0 }
 0x472   : > { %v5973_v3 = vsel %vm5845_vm5, %v7390_v11, %v5909_v2  ;;  %v7391_v19 = vadd.f32 %v10059_v6, %v4886_v13  ;;  %v4888_v40 = vpop.f32.mrb[109].mxu1  ;;  %v5755_v9 = vpop.f32.mrb[109].mxu0 }
 0x473   : > { %v7193_v7 = vpack.c.bf16 %v5973_v3, %v5972_v16  ;;  %v4889_v12 = vpop.f32.mrb[110].mxu1  ;;  %v5756_v14 = vpop.f32.mrb[110].mxu0 }
 0x474   : > { %v7392_v10 = vadd.f32 %v7391_v19, %v5753_v15  ;;  %v7393_v63 = vadd.f32 %v10059_v6, %v4889_v12  ;;  %v4891_v17 = vpop.f32.mrb[111].mxu1  ;;  %v5758_v22 = vpop.f32.mrb[111].mxu0 }
 0x475   : > { %7245 = vst [vmem:[%s9934_s14 + $0xd0] sm:$0xff] %v7193_v7  }
 0x476   : > { %v5910_v18 = vmul.f32 0.01, %v7392_v10  ;;  %v7394_v45 = vadd.f32 %v7393_v63, %v5756_v14  ;;  %vm5846_vm6 = vcmp.ge.f32.partialorder %v7392_v10, 0.0 }
 0x478   : > { %vm5847_vm7 = vcmp.ge.f32.partialorder %v7394_v45, 0.0  ;;  %v5911_v20 = vmul.f32 0.01, %v7394_v45  ;;  %v5974_v26 = vsel %vm5846_vm6, %v7392_v10, %v5910_v18 }
 0x479   : > { %v4894_v23 = vpop.f32.mrb[112].mxu1  ;;  %v5761_v47 = vpop.f32.mrb[112].mxu0 }
 0x47a   : > { %v5975_v25 = vsel %vm5847_vm7, %v7394_v45, %v5911_v20  ;;  %v7395_v27 = vadd.f32 %v10059_v6, %v4894_v23  ;;  %v4896_v28 = vpop.f32.mrb[113].mxu1  ;;  %v5763_v30 = vpop.f32.mrb[113].mxu0 }
 0x47b   : > { %v7198_v21 = vpack.c.bf16 %v5975_v25, %v5974_v26  ;;  %v4897_v31 = vpop.f32.mrb[114].mxu1  ;;  %v5764_v24 = vpop.f32.mrb[114].mxu0 }
 0x47c   : > { %v7396_v33 = vadd.f32 %v7395_v27, %v5761_v47  ;;  %v7397_v34 = vadd.f32 %v10059_v6, %v4897_v31  ;;  %v4899_v35 = vpop.f32.mrb[115].mxu1  ;;  %v5766_v53 = vpop.f32.mrb[115].mxu0 }
 0x47d   : > { %7246 = vst [vmem:[%s9934_s14 + $0xd8] sm:$0xff] %v7198_v21  }
 0x47e   : > { %v5912_v36 = vmul.f32 0.01, %v7396_v33  ;;  %v7398_v38 = vadd.f32 %v7397_v34, %v5764_v24  ;;  %vm5848_vm8 = vcmp.ge.f32.partialorder %v7396_v33, 0.0 }
 0x480   : > { %vm5849_vm9 = vcmp.ge.f32.partialorder %v7398_v38, 0.0  ;;  %v5913_v39 = vmul.f32 0.01, %v7398_v38  ;;  %v5976_v5 = vsel %vm5848_vm8, %v7396_v33, %v5912_v36 }
 0x481   : > { %v4902_v41 = vpop.f32.mrb[116].mxu1  ;;  %v5769_v42 = vpop.f32.mrb[116].mxu0 }
 0x482   : > { %v5977_v57 = vsel %vm5849_vm9, %v7398_v38, %v5913_v39  ;;  %v7399_v8 = vadd.f32 %v10059_v6, %v4902_v41  ;;  %v4904_v43 = vpop.f32.mrb[117].mxu1  ;;  %v5771_v55 = vpop.f32.mrb[117].mxu0 }
 0x483   : > { %v7203_v52 = vpack.c.bf16 %v5977_v57, %v5976_v5  ;;  %v4905_v29 = vpop.f32.mrb[118].mxu1  ;;  %v5772_v1 = vpop.f32.mrb[118].mxu0 }
 0x484   : > { %v7400_v44 = vadd.f32 %v7399_v8, %v5769_v42  ;;  %v7401_v46 = vadd.f32 %v10059_v6, %v4905_v29  ;;  %v4907_v0 = vpop.f32.mrb[119].mxu1  ;;  %v5774_v48 = vpop.f32.mrb[119].mxu0 }
 0x485   : > { %7247 = vst [vmem:[%s9934_s14 + $0xe0] sm:$0xff] %v7203_v52  }
 0x486   : > { %v5914_v49 = vmul.f32 0.01, %v7400_v44  ;;  %v7402_v32 = vadd.f32 %v7401_v46, %v5772_v1  ;;  %vm5850_vm10 = vcmp.ge.f32.partialorder %v7400_v44, 0.0 }
 0x488   : > { %vm5851_vm11 = vcmp.ge.f32.partialorder %v7402_v32, 0.0  ;;  %v5915_v50 = vmul.f32 0.01, %v7402_v32  ;;  %v5978_v54 = vsel %vm5850_vm10, %v7400_v44, %v5914_v49 }
 0x489   : > { %v4910_v4 = vpop.f32.mrb[120].mxu1  ;;  %v5777_v58 = vpop.f32.mrb[120].mxu0 }
 0x48a   : > { %v5979_v51 = vsel %vm5851_vm11, %v7402_v32, %v5915_v50  ;;  %v7403_v56 = vadd.f32 %v10059_v6, %v4910_v4  ;;  %v4912_v61 = vpop.f32.mrb[121].mxu1  ;;  %v5779_v62 = vpop.f32.mrb[121].mxu0 }
 0x48b   : > { %v7208_v59 = vpack.c.bf16 %v5979_v51, %v5978_v54  ;;  %v4913_v60 = vpop.f32.mrb[122].mxu1  ;;  %v5780_v2 = vpop.f32.mrb[122].mxu0 }
 0x48c   : > { %v7404_v37 = vadd.f32 %v7403_v56, %v5777_v58  ;;  %v7405_v11 = vadd.f32 %v10059_v6, %v4913_v60  ;;  %v4915_v13 = vpop.f32.mrb[123].mxu1  ;;  %v5782_v16 = vpop.f32.mrb[123].mxu0 }
 0x48d   : > { %7248 = vst [vmem:[%s9934_s14 + $0xe8] sm:$0xff] %v7208_v59  }
 0x48e   : > { %v5916_v3 = vmul.f32 0.01, %v7404_v37  ;;  %v7406_v19 = vadd.f32 %v7405_v11, %v5780_v2  ;;  %vm5852_vm12 = vcmp.ge.f32.partialorder %v7404_v37, 0.0 }
 0x490   : > { %vm5853_vm13 = vcmp.ge.f32.partialorder %v7406_v19, 0.0  ;;  %v5917_v15 = vmul.f32 0.01, %v7406_v19  ;;  %v5980_v7 = vsel %vm5852_vm12, %v7404_v37, %v5916_v3 }
 0x491   : > { %v4918_v40 = vpop.f32.mrb[124].mxu1  ;;  %v5785_v10 = vpop.f32.mrb[124].mxu0 }
 0x492   : > { %v5981_v9 = vsel %vm5853_vm13, %v7406_v19, %v5917_v15  ;;  %v7407_v12 = vadd.f32 %v10059_v6, %v4918_v40  ;;  %v4920_v63 = vpop.f32.mrb[125].mxu1  ;;  %v5787_v17 = vpop.f32.mrb[125].mxu0 }
 0x493   : > { %v7213_v14 = vpack.c.bf16 %v5981_v9, %v5980_v7  ;;  %v4921_v22 = vpop.f32.mrb[126].mxu1  ;;  %v5788_v20 = vpop.f32.mrb[126].mxu0 }
 0x494   : > { %v7408_v18 = vadd.f32 %v7407_v12, %v5785_v10  ;;  %v7409_v45 = vadd.f32 %v10059_v6, %v4921_v22  ;;  %v4923_v23 = vpop.f32.mrb[127].mxu1  ;;  %v5790_v26 = vpop.f32.mrb[127].mxu0 }
 0x495   : > { %7249 = vst [vmem:[%s9934_s14 + $0xf0] sm:$0xff] %v7213_v14  }
 0x496   : > { %v5918_v25 = vmul.f32 0.01, %v7408_v18  ;;  %v7410_v27 = vadd.f32 %v7409_v45, %v5788_v20  ;;  %vm5854_vm14 = vcmp.ge.f32.partialorder %v7408_v18, 0.0 }
 0x498   : > { %vm5855_vm15 = vcmp.ge.f32.partialorder %v7410_v27, 0.0  ;;  %v5919_v47 = vmul.f32 0.01, %v7410_v27  ;;  %v5982_v28 = vsel %vm5854_vm14, %v7408_v18, %v5918_v25 }
 0x49a   : > { %v5983_v21 = vsel %vm5855_vm15, %v7410_v27, %v5919_v47 }
 0x49b   : > { %v7218_v30 = vpack.c.bf16 %v5983_v21, %v5982_v28 }
 0x49d   : > { %7250 = vst [vmem:[%s9934_s14 + $0xf8] sm:$0xff] %v7218_v30  }
 0x49e PF: > { %s13_s12 = sadd.s32 1, %s8868_s12  }
 0x49f   : > { %p10_p4 = scmp.ge.s32.totalorder %s13_s12, 4  }
 0x4a1   :  { %12 = sbr.rel (!%p10_p4) target bundleno = 1 (0x1), region = 62 }

// kernel: encoder_forward.7
= control target key start
LH: loop header
LB: loop body
LE: loop exit
PB: predicated region body
PF: predicated region fallthrough
CT: control target
= control target key end

     0   :  { %s5424_s12 = smov 0   ;;  %s6572_s0 = inlined_call_operand.vmem [shape: bf16[512,1664], index: 0, kind: input, shape index: {}]   ;;  %s6573_s1 = inlined_call_operand.vmem [shape: bf16[1664,128], index: 1, kind: input, shape index: {}]   ;;  %s6574_s2 = inlined_call_operand.vmem [shape: f32[1,128], index: 2, kind: input, shape index: {}]   ;;  %s6575_s3 = inlined_call_operand.vmem [shape: bf16[512,128], index: 3, kind: output, shape index: {}]  }
   0x1 LB: > { %s3736_s13 = sadd.s32 4294967295, %s5402_s12   ;;  %p3740_p0 = scmp.ge.s32.totalorder %s5402_s12, 1  ;;  %s5402_s12 = sphi %s5424_s12, %s13_s12  }
   0x2   : > { %p139_p1 = scmp.lt.s32.totalorder %s5402_s12, 3 }
   0x4   : > { %p140_p2 = pnand %p3740_p0, %p139_p1 }
   0x5   : > { %v4988_v0 = vld [vmem:[%s6573_s1 + $0x40] sm:$0xff] (!%p140_p2)   ;;  %s3741_s16 = sshll.u32 (!%p140_p2), %s3736_s13, 5  ;;  %v4990_v2 = vld [vmem:[%s6573_s1 + $0x48] sm:$0xff] (!%p140_p2)   ;;  %v4992_v4 = vld [vmem:[%s6573_s1 + $0x50] sm:$0xff] (!%p140_p2)  }
   0x6   : > { %143 = sbr.rel (%p140_p2) target bundleno = 673 (0x2a1), region = 32  ;;  %v4989_v1 = vld [vmem:[%s6573_s1] sm:$0xff] (!%p140_p2)   ;;  %4219 = vmatprep.subr.bf16.mxu0 (!%p140_p2), %v4988_v0  ;;  %4963 = vmatprep.subr.bf16.mxu1 (!%p140_p2), %v4988_v0  ;;  %p165_p3 = scmp.lt.s32.totalorder (!%p140_p2), %s3741_s16, 63  ;;  %v4991_v3 = vld [vmem:[%s6573_s1 + $0x8] sm:$0xff] (!%p140_p2)   ;;  %v4993_v5 = vld [vmem:[%s6573_s1 + $0x10] sm:$0xff] (!%p140_p2)  }
   0x7   : > { %4220 = vmatpush3.bf16.msra.mxu0 (!%p140_p2), %v4989_v1  ;;  %4971 = vmatpush3.bf16.msra.mxu1 (!%p140_p2), %v4989_v1  ;;  %v4994_v6 = vld [vmem:[%s6573_s1 + $0x58] sm:$0xff] (!%p140_p2)   ;;  %v4996_v8 = vld [vmem:[%s6573_s1 + $0x60] sm:$0xff] (!%p140_p2)   ;;  %v4998_v10 = vld [vmem:[%s6573_s1 + $0x68] sm:$0xff] (!%p140_p2)  }
   0x8   : > { %4221 = vmatprep.subr.bf16.mxu0 (!%p140_p2), %v4990_v2  ;;  %4964 = vmatprep.subr.bf16.mxu1 (!%p140_p2), %v4990_v2  ;;  %v4995_v7 = vld [vmem:[%s6573_s1 + $0x18] sm:$0xff] (!%p140_p2)   ;;  %v4997_v9 = vld [vmem:[%s6573_s1 + $0x20] sm:$0xff] (!%p140_p2)   ;;  %v4999_v13 = vld [vmem:[%s6573_s1 + $0x28] sm:$0xff] (!%p140_p2)  }
   0x9   : > { %v5000_v14 = vld [vmem:[%s6573_s1 + $0x70] sm:$0xff] (!%p140_p2)   ;;  %v5002_v16 = vld [vmem:[%s6573_s1 + $0x78] sm:$0xff] (!%p140_p2)   ;;  %v5010_v18 = vld [vmem:[%s6573_s1 + $0xc0] sm:$0xff] (!%p140_p2)  }
   0xa   : > { %v5001_v15 = vld [vmem:[%s6573_s1 + $0x30] sm:$0xff] (!%p140_p2)   ;;  %v5003_v17 = vld [vmem:[%s6573_s1 + $0x38] sm:$0xff] (!%p140_p2)   ;;  %v5013_v21 = vld [vmem:[%s6573_s1 + $0x140] sm:$0xff] (!%p140_p2)  }
   0xb   : > { %4222 = vmatpush3.bf16.msra.mxu0 (!%p140_p2), %v4991_v3  ;;  %4972 = vmatpush3.bf16.msra.mxu1 (!%p140_p2), %v4991_v3  ;;  %v5011_v22 = vld [vmem:[%s6573_s1 + $0x80] sm:$0xff] (!%p140_p2)   ;;  %v5012_v23 = vld [vmem:[%s6573_s1 + $0xc8] sm:$0xff] (!%p140_p2)   ;;  %v5022_v31 = vld [vmem:[%s6573_s1 + $0xd0] sm:$0xff] (!%p140_p2)  }
   0xc   : > { %4223 = vmatprep.subr.bf16.mxu0 (!%p140_p2), %v4992_v4  ;;  %4965 = vmatprep.subr.bf16.mxu1 (!%p140_p2), %v4992_v4  ;;  %v5015_v24 = vld [vmem:[%s6573_s1 + $0x100] sm:$0xff] (!%p140_p2)   ;;  %v5014_v27 = vld [vmem:[%s6573_s1 + $0x88] sm:$0xff] (!%p140_p2)   ;;  %v5023_v32 = vld [vmem:[%s6573_s1 + $0x90] sm:$0xff] (!%p140_p2)  }
   0xd   : > { %s6577_s16 = smov (!%p165_p3, %s3741_s16), 63  ;;  %v5033_v28 = vld [vmem:[%s6573_s1 + $0x148] sm:$0xff]   ;;  %v5024_v34 = vld [vmem:[%s6573_s1 + $0xd8] sm:$0xff]   ;;  %v5032_v40 = vld [vmem:[%s6573_s1 + $0xe0] sm:$0xff]  }
   0xe   : > { %s4979_s29 = smul.u32 52, %s6577_s16  ;;  %v5035_v33 = vld [vmem:[%s6573_s1 + $0x108] sm:$0xff]   ;;  %v5025_v37 = vld [vmem:[%s6573_s1 + $0x98] sm:$0xff]   ;;  %v5034_v41 = vld [vmem:[%s6573_s1 + $0xa0] sm:$0xff]  }
   0xf   : > { %4224 = vmatpush3.bf16.msra.mxu0 %v4993_v5  ;;  %4973 = vmatpush3.bf16.msra.mxu1 %v4993_v5  ;;  %v5036_v42 = vld [vmem:[%s6573_s1 + $0xe8] sm:$0xff]   ;;  %v5047_v43 = vld [vmem:[%s6573_s1 + $0x150] sm:$0xff]   ;;  %v5046_v52 = vld [vmem:[%s6573_s1 + $0xf8] sm:$0xff]  }
  0x10   : > { %4225 = vmatprep.subr.bf16.mxu0 %v4994_v6  ;;  %4966 = vmatprep.subr.bf16.mxu1 %v4994_v6  ;;  %s5465_s9 = scalar_lea.vmem %s6572_s0, %s4979_s29  ;;  %v5049_v46 = vld [vmem:[%s6573_s1 + $0x110] sm:$0xff]   ;;  %v5037_v47 = vld [vmem:[%s6573_s1 + $0xa8] sm:$0xff]   ;;  %v5064_v55 = vld [vmem:[%s6573_s1 + $0x158] sm:$0xff]  }
  0x11   : > { %v5006_v11 = vld [vmem:[%s5465_s9 + $0x4] ss:$52 sps:$4 sm:$0xff]   ;;  %v5004_v19 = vld [vmem:[%s5465_s9] ss:$52 sps:$4 sm:$0xff]   ;;  %v5020_v29 = vld [vmem:[%s5465_s9 + $0x68] ss:$52 sps:$4 sm:$0xff]  }
  0x12   : > { %v5009_v12 = vld [vmem:[%s5465_s9 + $0x4e4] ss:$52 sps:$4 sm:$0xff]   ;;  %2329 = vmatprep.mubr.bf16.mxu0 %v5006_v11  ;;  %v5007_v20 = vld [vmem:[%s5465_s9 + $0x4e0] ss:$52 sps:$4 sm:$0xff]   ;;  %v5021_v30 = vld [vmem:[%s5465_s9 + $0x548] ss:$52 sps:$4 sm:$0xff]  }
  0x13   : > { %4226 = vmatpush3.bf16.msra.mxu0 %v4995_v7  ;;  %4974 = vmatpush3.bf16.msra.mxu1 %v4995_v7  ;;  %v5016_v25 = vld [vmem:[%s5465_s9 + $0x6c] ss:$52 sps:$4 sm:$0xff]   ;;  %v5026_v35 = vld [vmem:[%s5465_s9 + $0xd4] ss:$52 sps:$4 sm:$0xff]   ;;  %v5030_v38 = vld [vmem:[%s5465_s9 + $0xd0] ss:$52 sps:$4 sm:$0xff]  }
  0x14   : > { %4227 = vmatprep.subr.bf16.mxu0 %v4996_v8  ;;  %4967 = vmatprep.subr.bf16.mxu1 %v4996_v8  ;;  %v5018_v26 = vld [vmem:[%s5465_s9 + $0x54c] ss:$52 sps:$4 sm:$0xff]   ;;  %v5028_v36 = vld [vmem:[%s5465_s9 + $0x5b4] ss:$52 sps:$4 sm:$0xff]   ;;  %v5031_v39 = vld [vmem:[%s5465_s9 + $0x5b0] ss:$52 sps:$4 sm:$0xff]  }
  0x15   : > { %2425 = vmatprep.mubr.bf16.mxu1 %v5009_v12  ;;  %v5038_v44 = vld [vmem:[%s5465_s9 + $0x13c] ss:$52 sps:$4 sm:$0xff]   ;;  %v5042_v49 = vld [vmem:[%s5465_s9 + $0x138] ss:$52 sps:$4 sm:$0xff]   ;;  %v5055_v59 = vld [vmem:[%s5465_s9 + $0x1a0] ss:$52 sps:$4 sm:$0xff]  }
  0x16   : > { %v5040_v45 = vld [vmem:[%s5465_s9 + $0x61c] ss:$52 sps:$4 sm:$0xff]   ;;  %v5043_v50 = vld [vmem:[%s5465_s9 + $0x618] ss:$52 sps:$4 sm:$0xff]   ;;  %v5056_v60 = vld [vmem:[%s6573_s1 + $0x1c0] sm:$0xff]  }
  0x17   : > { %4228 = vmatpush3.bf16.msra.mxu0 %v4997_v9  ;;  %4975 = vmatpush3.bf16.msra.mxu1 %v4997_v9  ;;  %v5044_v48 = vld [vmem:[%s6573_s1 + $0xf0] sm:$0xff]   ;;  %v5050_v53 = vld [vmem:[%s5465_s9 + $0x1a4] ss:$52 sps:$4 sm:$0xff]   ;;  %v5054_v54 = vld [vmem:[%s5465_s9 + $0xc] ss:$52 sps:$4 sm:$0xff]  }
  0x18   : > { %4229 = vmatprep.subr.bf16.mxu0 %v4998_v10  ;;  %4968 = vmatprep.subr.bf16.mxu1 %v4998_v10  ;;  %v5045_v51 = vld [vmem:[%s6573_s1 + $0xb0] sm:$0xff]   ;;  %v5065_v56 = vld [vmem:[%s6573_s1 + $0x118] sm:$0xff]   ;;  %v5057_v61 = vld [vmem:[%s6573_s1 + $0x180] sm:$0xff]  }
  0x19   : > { %v5048_v57 = vld [vmem:[%s6573_s1 + $0xb8] sm:$0xff]   ;;  %v5058_v62 = vld [vmem:[%s5465_s9 + $0x20c] ss:$52 sps:$4 sm:$0xff]   ;;  %v5060_v63 = vld [vmem:[%s5465_s9 + $0x74] ss:$52 sps:$4 sm:$0xff]  }
  0x1a   : > { %v5052_v58 = vld [vmem:[%s5465_s9 + $0x8] ss:$52 sps:$4 sm:$0xff]   ;;  %v5074_v0 = vld [vmem:[%s6573_s1 + $0x160] sm:$0xff]   ;;  %v5089_v9 = vld [vmem:[%s6573_s1 + $0x1d0] sm:$0xff]  }
  0x1b   : > { %4230 = vmatpush3.bf16.msra.mxu0 %v4999_v13  ;;  %4976 = vmatpush3.bf16.msra.mxu1 %v4999_v13  ;;  %v5072_v1 = vld [vmem:[%s6573_s1 + $0x1c8] sm:$0xff]   ;;  %v5075_v2 = vld [vmem:[%s6573_s1 + $0x120] sm:$0xff]   ;;  %v5068_v7 = vld [vmem:[%s5465_s9 + $0xdc] ss:$52 sps:$4 sm:$0xff]  }
  0x1c   : > { %4231 = vmatprep.subr.bf16.mxu0 %v5000_v14  ;;  %4969 = vmatprep.subr.bf16.mxu1 %v5000_v14  ;;  %v5073_v3 = vld [vmem:[%s6573_s1 + $0x188] sm:$0xff]   ;;  %v5063_v5 = vld [vmem:[%s5465_s9 + $0x70] ss:$52 sps:$4 sm:$0xff]  }
  0x1d   : > { %v5062_v4 = vld [vmem:[%s5465_s9 + $0x208] ss:$52 sps:$4 sm:$0xff]   ;;  %v5091_v11 = vld [vmem:[%s6573_s1 + $0x190] sm:$0xff]   ;;  %v5071_v13 = vld [vmem:[%s5465_s9 + $0xd8] ss:$52 sps:$4 sm:$0xff]  }
  0x1e   : > { %v5066_v6 = vld [vmem:[%s5465_s9 + $0x274] ss:$52 sps:$4 sm:$0xff]   ;;  %v5070_v12 = vld [vmem:[%s5465_s9 + $0x270] ss:$52 sps:$4 sm:$0xff]  }
  0x1f   : > { %4232 = vmatpush3.bf16.msra.mxu0 %v5001_v15  ;;  %4977 = vmatpush3.bf16.msra.mxu1 %v5001_v15  ;;  %v5088_v8 = vld [vmem:[%s6573_s1 + $0x168] sm:$0xff]   ;;  %v5076_v14 = vld [vmem:[%s5465_s9 + $0x2dc] ss:$52 sps:$4 sm:$0xff]  }
  0x20   : > { %4233 = vmatprep.subr.bf16.mxu0 %v5002_v16  ;;  %4970 = vmatprep.subr.bf16.mxu1 %v5002_v16  ;;  %v5090_v10 = vld [vmem:[%s6573_s1 + $0x128] sm:$0xff]   ;;  %v5098_v15 = vld [vmem:[%s6573_s1 + $0x170] sm:$0xff]  }
  0x21   : > { %v5099_v16 = vld [vmem:[%s6573_s1 + $0x130] sm:$0xff]  }
  0x23   : > { %4234 = vmatpush3.bf16.msra.mxu0 %v5003_v17  ;;  %4978 = vmatpush3.bf16.msra.mxu1 %v5003_v17  ;;  %v5078_v17 = vld [vmem:[%s5465_s9 + $0x144] ss:$52 sps:$4 sm:$0xff]  }
  0x24   : > { %4331 = vmatprep.subr.bf16.mxu1 %v5010_v18  ;;  %4443 = vmatprep.subr.bf16.mxu0 %v5013_v21  ;;  %v5106_v18 = vld [vmem:[%s6573_s1 + $0x1d8] sm:$0xff]   ;;  %v5081_v21 = vld [vmem:[%s5465_s9 + $0x140] ss:$52 sps:$4 sm:$0xff]  }
  0x26   : > { %2330 = vmatmul.mubr.bf16.vlgmr.msra.gmra.mrb[0].mxu0 %v5004_v19  ;;  %2426 = vmatmul.mubr.bf16.vlgmr.msra.gmra.mrb[0].mxu1 %v5007_v20  ;;  %v5107_v19 = vld [vmem:[%s6573_s1 + $0x198] sm:$0xff]  }
  0x27   : > { %4332 = vmatpush3.bf16.msra.mxu1 %v5011_v22  ;;  %4444 = vmatpush3.bf16.msra.mxu0 %v5015_v24  ;;  %v5080_v20 = vld [vmem:[%s5465_s9 + $0x2d8] ss:$52 sps:$4 sm:$0xff]  }
  0x28   : > { %4333 = vmatprep.subr.bf16.mxu1 %v5012_v23  ;;  %2337 = vmatprep.mubr.bf16.mxu0 %v5016_v25  ;;  %v5082_v22 = vld [vmem:[%s5465_s9 + $0x344] ss:$52 sps:$4 sm:$0xff]   ;;  %v5084_v23 = vld [vmem:[%s5465_s9 + $0x1ac] ss:$52 sps:$4 sm:$0xff]  }
  0x29   : > { %2433 = vmatprep.mubr.bf16.mxu1 %v5018_v26  ;;  %4445 = vmatprep.subr.bf16.mxu0 %v5033_v28  ;;  %v5114_v24 = vld [vmem:[%s6573_s1 + $0x178] sm:$0xff]   ;;  %v5122_v26 = vld [vmem:[%s6573_s1 + $0x1e0] sm:$0xff]  }
  0x2a   : > { %v5115_v25 = vld [vmem:[%s6573_s1 + $0x138] sm:$0xff]  }
  0x2b   : > { %4334 = vmatpush3.bf16.msra.mxu1 %v5014_v27  ;;  %4446 = vmatpush3.bf16.msra.mxu0 %v5035_v33  ;;  %v5086_v27 = vld [vmem:[%s5465_s9 + $0x340] ss:$52 sps:$4 sm:$0xff]   ;;  %v5087_v28 = vld [vmem:[%s5465_s9 + $0x1a8] ss:$52 sps:$4 sm:$0xff]  }
  0x2c   : > { %4335 = vmatprep.subr.bf16.mxu1 %v5022_v31  ;;  %4447 = vmatprep.subr.bf16.mxu0 %v5047_v43  ;;  %v5092_v31 = vld [vmem:[%s5465_s9 + $0x3ac] ss:$52 sps:$4 sm:$0xff]   ;;  %v5096_v33 = vld [vmem:[%s5465_s9 + $0x3a8] ss:$52 sps:$4 sm:$0xff]   ;;  %v5154_v43 = vld [vmem:[%s6573_s1 + $0x1f0] sm:$0xff]  }
  0x2e   : > { %2338 = vmatmul.mubr.bf16.gmra.mrb[4].mxu0 %v5020_v29  ;;  %2434 = vmatmul.mubr.bf16.gmra.mrb[4].mxu1 %v5021_v30  ;;  %v5123_v29 = vld [vmem:[%s6573_s1 + $0x1a0] sm:$0xff]  }
  0x2f   : > { %4336 = vmatpush3.bf16.msra.mxu1 %v5023_v32  ;;  %2345 = vmatprep.mubr.bf16.mxu0 %v5026_v35  ;;  %v5124_v30 = vld [vmem:[%s6573_s1 + $0x240] sm:$0xff]   ;;  %v5094_v32 = vld [vmem:[%s5465_s9 + $0x214] ss:$52 sps:$4 sm:$0xff]  }
  0x30   : > { %4337 = vmatprep.subr.bf16.mxu1 %v5024_v34  ;;  %2441 = vmatprep.mubr.bf16.mxu1 %v5028_v36  ;;  %v5097_v34 = vld [vmem:[%s5465_s9 + $0x210] ss:$52 sps:$4 sm:$0xff]   ;;  %v5138_v35 = vld [vmem:[%s6573_s1 + $0x1e8] sm:$0xff]  }
  0x31   : > { %4448 = vmatpush3.bf16.msra.mxu0 %v5049_v46  ;;  %v5139_v36 = vld [vmem:[%s6573_s1 + $0x1a8] sm:$0xff]   ;;  %v5113_v46 = vld [vmem:[%s5465_s9 + $0x2e0] ss:$52 sps:$4 sm:$0xff]  }
  0x32   : > { %4449 = vmatprep.subr.bf16.mxu0 %v5064_v55  ;;  %v5128_v55 = vld [vmem:[%s5465_s9 + $0x7c] ss:$52 sps:$4 sm:$0xff]  }
  0x33   : > { %4338 = vmatpush3.bf16.msra.mxu1 %v5025_v37  ;;  %v5100_v37 = vld [vmem:[%s5465_s9 + $0x414] ss:$52 sps:$4 sm:$0xff]  }
  0x34   : > { %4339 = vmatprep.subr.bf16.mxu1 %v5032_v40  ;;  %v5105_v40 = vld [vmem:[%s5465_s9 + $0x278] ss:$52 sps:$4 sm:$0xff]  }
  0x35   : > { %4450 = vmatpush3.bf16.msra.mxu0 %v5065_v56  ;;  %v5140_v56 = vld [vmem:[%s6573_s1 + $0x248] sm:$0xff]  }
  0x36   : > { %2346 = vmatmul.mubr.bf16.gmra.mrb[8].mxu0 %v5030_v38  ;;  %2442 = vmatmul.mubr.bf16.gmra.mrb[8].mxu1 %v5031_v39  ;;  %v5102_v38 = vld [vmem:[%s5465_s9 + $0x27c] ss:$52 sps:$4 sm:$0xff]  }
  0x37   : > { %4340 = vmatpush3.bf16.msra.mxu1 %v5034_v41  ;;  %2353 = vmatprep.mubr.bf16.mxu0 %v5038_v44  ;;  %v5104_v39 = vld [vmem:[%s5465_s9 + $0x410] ss:$52 sps:$4 sm:$0xff]  }
  0x38   : > { %4341 = vmatprep.subr.bf16.mxu1 %v5036_v42  ;;  %2449 = vmatprep.mubr.bf16.mxu1 %v5040_v45  ;;  %v5108_v41 = vld [vmem:[%s5465_s9 + $0x47c] ss:$52 sps:$4 sm:$0xff]   ;;  %v5110_v42 = vld [vmem:[%s5465_s9 + $0x2e4] ss:$52 sps:$4 sm:$0xff]  }
  0x39   : > { %4451 = vmatprep.subr.bf16.mxu0 %v5074_v0  ;;  %v5155_v44 = vld [vmem:[%s6573_s1 + $0x1b0] sm:$0xff]   ;;  %v5112_v45 = vld [vmem:[%s5465_s9 + $0x478] ss:$52 sps:$4 sm:$0xff]  }
  0x3a   : > { %4452 = vmatpush3.bf16.msra.mxu0 %v5075_v2  ;;  %v5157_v0 = vld [vmem:[%s6573_s1 + $0x210] sm:$0xff]   ;;  %v5136_v2 = vld [vmem:[%s5465_s9 + $0x418] ss:$52 sps:$4 sm:$0xff]  }
  0x3b   : > { %4342 = vmatpush3.bf16.msra.mxu1 %v5037_v47  ;;  %4453 = vmatprep.subr.bf16.mxu0 %v5088_v8  ;;  %v5116_v47 = vld [vmem:[%s5465_s9 + $0x34c] ss:$52 sps:$4 sm:$0xff]  }
  0x3c   : > { %4343 = vmatprep.subr.bf16.mxu1 %v5044_v48  ;;  %v5120_v48 = vld [vmem:[%s5465_s9 + $0x14] ss:$52 sps:$4 sm:$0xff]   ;;  %v5189_v8 = vld [vmem:[%s6573_s1 + $0x220] sm:$0xff]  }
  0x3e   : > { %2354 = vmatmul.mubr.bf16.gmra.mrb[12].mxu0 %v5042_v49  ;;  %2450 = vmatmul.mubr.bf16.gmra.mrb[12].mxu1 %v5043_v50  ;;  %v5170_v49 = vld [vmem:[%s6573_s1 + $0x1f8] sm:$0xff]  }
  0x3f   : > { %4344 = vmatpush3.bf16.msra.mxu1 %v5045_v51  ;;  %2361 = vmatprep.mubr.bf16.mxu0 %v5050_v53  ;;  %v5171_v50 = vld [vmem:[%s6573_s1 + $0x1b8] sm:$0xff]   ;;  %v5118_v51 = vld [vmem:[%s5465_s9 + $0x10] ss:$52 sps:$4 sm:$0xff]  }
  0x40   : > { %4345 = vmatprep.subr.bf16.mxu1 %v5046_v52  ;;  %2490 = vmatprep.mubr.bf16.mxu1 %v5054_v54  ;;  %v5121_v52 = vld [vmem:[%s5465_s9 + $0x348] ss:$52 sps:$4 sm:$0xff]   ;;  %v5125_v53 = vld [vmem:[%s6573_s1 + $0x200] sm:$0xff]  }
  0x41   : > { %4454 = vmatpush3.bf16.msra.mxu0 %v5090_v10  ;;  %v5126_v54 = vld [vmem:[%s5465_s9 + $0x3b4] ss:$52 sps:$4 sm:$0xff]  }
  0x42   : > { %4455 = vmatprep.subr.bf16.mxu0 %v5098_v15  ;;  %v5146_v10 = vld [vmem:[%s5465_s9 + $0x480] ss:$52 sps:$4 sm:$0xff]  }
  0x43   : > { %4346 = vmatpush3.bf16.msra.mxu1 %v5048_v57  ;;  %v5186_v57 = vld [vmem:[%s6573_s1 + $0x2c0] sm:$0xff]   ;;  %v5150_v15 = vld [vmem:[%s5465_s9 + $0x1b4] ss:$52 sps:$4 sm:$0xff]  }
  0x44   : > { %4555 = vmatprep.subr.bf16.mxu1 %v5056_v60  ;;  %v5130_v60 = vld [vmem:[%s5465_s9 + $0x3b0] ss:$52 sps:$4 sm:$0xff]  }
  0x45   : > { %4456 = vmatpush3.bf16.msra.mxu0 %v5099_v16  ;;  %v5221_v16 = vld [vmem:[%s6573_s1 + $0x230] sm:$0xff]  }
  0x46   : > { %2362 = vmatmul.mubr.bf16.gmra.mrb[16].mxu0 %v5055_v59  ;;  %2491 = vmatmul.mubr.bf16.vlgmr.msra.gmra.mrb[16].mxu1 %v5052_v58  ;;  %v5141_v58 = vld [vmem:[%s6573_s1 + $0x208] sm:$0xff]   ;;  %v5156_v59 = vld [vmem:[%s6573_s1 + $0x250] sm:$0xff]  }
  0x47   : > { %4556 = vmatpush3.bf16.msra.mxu1 %v5057_v61  ;;  %2369 = vmatprep.mubr.bf16.mxu0 %v5058_v62  ;;  %v5131_v61 = vld [vmem:[%s5465_s9 + $0x78] ss:$52 sps:$4 sm:$0xff]   ;;  %v5132_v62 = vld [vmem:[%s5465_s9 + $0x41c] ss:$52 sps:$4 sm:$0xff]  }
  0x48   : > { %2498 = vmatprep.mubr.bf16.mxu1 %v5060_v63  ;;  %4557 = vmatprep.subr.bf16.mxu1 %v5072_v1  ;;  %v5134_v63 = vld [vmem:[%s5465_s9 + $0xe4] ss:$52 sps:$4 sm:$0xff]  }
  0x49   : > { %4457 = vmatprep.subr.bf16.mxu0 %v5114_v24  ;;  %v5172_v1 = vld [vmem:[%s6573_s1 + $0x258] sm:$0xff]  }
  0x4a   : > { %4458 = vmatpush3.bf16.msra.mxu0 %v5115_v25  ;;  %v5163_v24 = vld [vmem:[%s5465_s9 + $0x218] ss:$52 sps:$4 sm:$0xff]   ;;  %v5164_v25 = vld [vmem:[%s5465_s9 + $0x5bc] ss:$52 sps:$4 sm:$0xff]  }
  0x4b   : > { %4558 = vmatpush3.bf16.msra.mxu1 %v5073_v3  ;;  %4667 = vmatprep.subr.bf16.mxu0 %v5124_v30  ;;  %v5173_v3 = vld [vmem:[%s6573_s1 + $0x218] sm:$0xff]  }
  0x4c   : > { %4559 = vmatprep.subr.bf16.mxu1 %v5089_v9  ;;  %v5204_v9 = vld [vmem:[%s6573_s1 + $0x268] sm:$0xff]   ;;  %v5174_v30 = vld [vmem:[%s5465_s9 + $0x624] ss:$52 sps:$4 sm:$0xff]  }
  0x4e   : > { %2370 = vmatmul.mubr.bf16.gmra.mrb[20].mxu0 %v5062_v4  ;;  %2499 = vmatmul.mubr.bf16.gmra.mrb[20].mxu1 %v5063_v5  ;;  %v5188_v4 = vld [vmem:[%s6573_s1 + $0x260] sm:$0xff]  }
  0x4f   : > { %2377 = vmatprep.mubr.bf16.mxu0 %v5066_v6  ;;  %2506 = vmatprep.mubr.bf16.mxu1 %v5068_v7  ;;  %v5137_v5 = vld [vmem:[%s5465_s9 + $0xe0] ss:$52 sps:$4 sm:$0xff]   ;;  %v5142_v6 = vld [vmem:[%s5465_s9 + $0x484] ss:$52 sps:$4 sm:$0xff]  }
  0x50   : > { %4560 = vmatpush3.bf16.msra.mxu1 %v5091_v11  ;;  %v5144_v7 = vld [vmem:[%s5465_s9 + $0x14c] ss:$52 sps:$4 sm:$0xff]   ;;  %v5147_v11 = vld [vmem:[%s5465_s9 + $0x148] ss:$52 sps:$4 sm:$0xff]  }
  0x51   : > { %4561 = vmatprep.subr.bf16.mxu1 %v5106_v18  ;;  %v5153_v18 = vld [vmem:[%s5465_s9 + $0x1b0] ss:$52 sps:$4 sm:$0xff]  }
  0x54   : > { %4562 = vmatpush3.bf16.msra.mxu1 %v5107_v19  ;;  %v5158_v19 = vld [vmem:[%s5465_s9 + $0x554] ss:$52 sps:$4 sm:$0xff]  }
  0x55   : > { %4563 = vmatprep.subr.bf16.mxu1 %v5122_v26  ;;  %v5166_v26 = vld [vmem:[%s5465_s9 + $0x284] ss:$52 sps:$4 sm:$0xff]  }
  0x56   : > { %2378 = vmatmul.mubr.bf16.gmra.mrb[24].mxu0 %v5070_v12  ;;  %2507 = vmatmul.mubr.bf16.gmra.mrb[24].mxu1 %v5071_v13  ;;  %v5205_v12 = vld [vmem:[%s6573_s1 + $0x228] sm:$0xff]   ;;  %v5220_v13 = vld [vmem:[%s6573_s1 + $0x270] sm:$0xff]  }
  0x57   : > { %2385 = vmatprep.mubr.bf16.mxu0 %v5076_v14  ;;  %2514 = vmatprep.mubr.bf16.mxu1 %v5078_v17  ;;  %v5148_v14 = vld [vmem:[%s5465_s9 + $0x4ec] ss:$52 sps:$4 sm:$0xff]   ;;  %v5152_v17 = vld [vmem:[%s5465_s9 + $0x4e8] ss:$52 sps:$4 sm:$0xff]  }
  0x58   : > { %4564 = vmatpush3.bf16.msra.mxu1 %v5123_v29  ;;  %v5169_v29 = vld [vmem:[%s5465_s9 + $0x280] ss:$52 sps:$4 sm:$0xff]  }
  0x59   : > { %4565 = vmatprep.subr.bf16.mxu1 %v5138_v35  ;;  %v5184_v35 = vld [vmem:[%s5465_s9 + $0x1c] ss:$52 sps:$4 sm:$0xff]  }
  0x5c   : > { %4566 = vmatpush3.bf16.msra.mxu1 %v5139_v36  ;;  %v5182_v36 = vld [vmem:[%s5465_s9 + $0x18] ss:$52 sps:$4 sm:$0xff]  }
  0x5d   : > { %4567 = vmatprep.subr.bf16.mxu1 %v5154_v43  ;;  %v5218_v43 = vld [vmem:[%s6573_s1 + $0x2d0] sm:$0xff]  }
  0x5e   : > { %2386 = vmatmul.mubr.bf16.gmra.mrb[28].mxu0 %v5080_v20  ;;  %2515 = vmatmul.mubr.bf16.gmra.mrb[28].mxu1 %v5081_v21  ;;  %v5160_v20 = vld [vmem:[%s5465_s9 + $0x21c] ss:$52 sps:$4 sm:$0xff]  }
  0x5f   : > { %2393 = vmatprep.mubr.bf16.mxu0 %v5082_v22  ;;  %2522 = vmatprep.mubr.bf16.mxu1 %v5084_v23  ;;  %v5236_v21 = vld [vmem:[%s6573_s1 + $0x278] sm:$0xff]   ;;  %v5162_v23 = vld [vmem:[%s5465_s9 + $0x550] ss:$52 sps:$4 sm:$0xff]  }
  0x60   : > { %4568 = vmatpush3.bf16.msra.mxu1 %v5155_v44  ;;  %v5237_v22 = vld [vmem:[%s6573_s1 + $0x238] sm:$0xff]  }
  0x61   : > { %4569 = vmatprep.subr.bf16.mxu1 %v5170_v49  ;;  %v5194_v44 = vld [vmem:[%s5465_s9 + $0x3b8] ss:$52 sps:$4 sm:$0xff]  }
  0x62   : > { %v5234_v49 = vld [vmem:[%s6573_s1 + $0x2d8] sm:$0xff]  }
  0x64   : > { %4570 = vmatpush3.bf16.msra.mxu1 %v5171_v50  ;;  %v5235_v50 = vld [vmem:[%s6573_s1 + $0x298] sm:$0xff]  }
  0x65   : > { %4779 = vmatprep.subr.bf16.mxu1 %v5186_v57  ;;  %v5265_v57 = vld [vmem:[%s6573_s1 + $0x2e8] sm:$0xff]  }
  0x66   : > { %2394 = vmatmul.mubr.bf16.gmra.mrb[32].mxu0 %v5086_v27  ;;  %2523 = vmatmul.mubr.bf16.gmra.mrb[32].mxu1 %v5087_v28  ;;  %v5760_v27 = vld [vmem:[%s6573_s1 + $0x300] sm:$0xff]   ;;  %v5168_v28 = vld [vmem:[%s5465_s9 + $0x5b8] ss:$52 sps:$4 sm:$0xff]  }
  0x67   : > { %2401 = vmatprep.mubr.bf16.mxu0 %v5092_v31  ;;  %2530 = vmatprep.mubr.bf16.mxu1 %v5094_v32  ;;  %v5176_v31 = vld [vmem:[%s5465_s9 + $0x2ec] ss:$52 sps:$4 sm:$0xff]  }
  0x68   : > { %v5178_v32 = vld [vmem:[%s5465_s9 + $0x620] ss:$52 sps:$4 sm:$0xff]  }
  0x6e   : > { %2402 = vmatmul.mubr.bf16.gmra.mrb[36].mxu0 %v5096_v33  ;;  %2531 = vmatmul.mubr.bf16.gmra.mrb[36].mxu1 %v5097_v34  ;;  %v5179_v33 = vld [vmem:[%s5465_s9 + $0x2e8] ss:$52 sps:$4 sm:$0xff]  }
  0x6f   : > { %2409 = vmatprep.mubr.bf16.mxu0 %v5100_v37  ;;  %2538 = vmatprep.mubr.bf16.mxu1 %v5102_v38  ;;  %v5180_v34 = vld [vmem:[%s5465_s9 + $0x354] ss:$52 sps:$4 sm:$0xff]   ;;  %v5185_v37 = vld [vmem:[%s5465_s9 + $0x350] ss:$52 sps:$4 sm:$0xff]  }
  0x70   : > { %v5187_v38 = vld [vmem:[%s6573_s1 + $0x280] sm:$0xff]  }
  0x76   : > { %2410 = vmatmul.mubr.bf16.gmra.mrb[40].mxu0 %v5104_v39  ;;  %2539 = vmatmul.mubr.bf16.gmra.mrb[40].mxu1 %v5105_v40  ;;  %v5190_v39 = vld [vmem:[%s5465_s9 + $0x3bc] ss:$52 sps:$4 sm:$0xff]   ;;  %v5192_v40 = vld [vmem:[%s5465_s9 + $0x84] ss:$52 sps:$4 sm:$0xff]  }
  0x77   : > { %2417 = vmatprep.mubr.bf16.mxu0 %v5108_v41  ;;  %2546 = vmatprep.mubr.bf16.mxu1 %v5110_v42  ;;  %v5202_v41 = vld [vmem:[%s6573_s1 + $0x2c8] sm:$0xff]  }
  0x78   : > { %v5203_v42 = vld [vmem:[%s6573_s1 + $0x288] sm:$0xff]  }
  0x7e   : > { %2418 = vmatmul.mubr.bf16.gmra.mrb[44].mxu0 %v5112_v45  ;;  %2547 = vmatmul.mubr.bf16.gmra.mrb[44].mxu1 %v5113_v46  ;;  %v5195_v45 = vld [vmem:[%s5465_s9 + $0x80] ss:$52 sps:$4 sm:$0xff]   ;;  %v5196_v46 = vld [vmem:[%s5465_s9 + $0x424] ss:$52 sps:$4 sm:$0xff]  }
  0x7f   : > { %2554 = vmatprep.mubr.bf16.mxu1 %v5116_v47  ;;  %2651 = vmatprep.mubr.bf16.mxu0 %v5120_v48  ;;  %v5198_v47 = vld [vmem:[%s5465_s9 + $0xec] ss:$52 sps:$4 sm:$0xff]   ;;  %v5219_v48 = vld [vmem:[%s6573_s1 + $0x290] sm:$0xff]  }
  0x86   : > { %2555 = vmatmul.mubr.bf16.gmra.mrb[48].mxu1 %v5121_v52  ;;  %2652 = vmatmul.mubr.bf16.vlgmr.msra.gmra.mrb[48].mxu0 %v5118_v51  ;;  %v5250_v51 = vld [vmem:[%s6573_s1 + $0x2e0] sm:$0xff]  }
  0x87   : > { %4668 = vmatpush3.bf16.msra.mxu0 %v5125_v53  ;;  %2562 = vmatprep.mubr.bf16.mxu1 %v5126_v54  ;;  %v5200_v52 = vld [vmem:[%s5465_s9 + $0x420] ss:$52 sps:$4 sm:$0xff]   ;;  %v5201_v53 = vld [vmem:[%s5465_s9 + $0xe8] ss:$52 sps:$4 sm:$0xff]  }
  0x88   : > { %2659 = vmatprep.mubr.bf16.mxu0 %v5128_v55  ;;  %4669 = vmatprep.subr.bf16.mxu0 %v5140_v56  ;;  %v5206_v54 = vld [vmem:[%s5465_s9 + $0x48c] ss:$52 sps:$4 sm:$0xff]   ;;  %v5208_v55 = vld [vmem:[%s5465_s9 + $0x154] ss:$52 sps:$4 sm:$0xff]  }
  0x89   : > { %v5251_v56 = vld [vmem:[%s6573_s1 + $0x2a0] sm:$0xff]  }
  0x8b   : > { %4670 = vmatpush3.bf16.msra.mxu0 %v5141_v58  ;;  %v5266_v58 = vld [vmem:[%s6573_s1 + $0x2a8] sm:$0xff]  }
  0x8c   : > { %4671 = vmatprep.subr.bf16.mxu0 %v5156_v59  ;;  %v5280_v59 = vld [vmem:[%s6573_s1 + $0x2f0] sm:$0xff]  }
  0x8e   : > { %2563 = vmatmul.mubr.bf16.gmra.mrb[52].mxu1 %v5130_v60  ;;  %2660 = vmatmul.mubr.bf16.gmra.mrb[52].mxu0 %v5131_v61  ;;  %v5210_v60 = vld [vmem:[%s5465_s9 + $0x488] ss:$52 sps:$4 sm:$0xff]   ;;  %v5211_v61 = vld [vmem:[%s5465_s9 + $0x150] ss:$52 sps:$4 sm:$0xff]  }
  0x8f   : > { %2570 = vmatprep.mubr.bf16.mxu1 %v5132_v62  ;;  %2667 = vmatprep.mubr.bf16.mxu0 %v5134_v63  ;;  %v5212_v62 = vld [vmem:[%s5465_s9 + $0x4f4] ss:$52 sps:$4 sm:$0xff]   ;;  %v5214_v63 = vld [vmem:[%s5465_s9 + $0x1bc] ss:$52 sps:$4 sm:$0xff]  }
  0x90   : > { %4672 = vmatpush3.bf16.msra.mxu0 %v5157_v0  ;;  %v5281_v0 = vld [vmem:[%s6573_s1 + $0x2b0] sm:$0xff]  }
  0x91   : > { %4673 = vmatprep.subr.bf16.mxu0 %v5172_v1  ;;  %v5295_v1 = vld [vmem:[%s6573_s1 + $0x2f8] sm:$0xff]  }
  0x94   : > { %4674 = vmatpush3.bf16.msra.mxu0 %v5173_v3  ;;  %v5216_v3 = vld [vmem:[%s5465_s9 + $0x4f0] ss:$52 sps:$4 sm:$0xff]  }
  0x95   : > { %4675 = vmatprep.subr.bf16.mxu0 %v5188_v4  ;;  %v5217_v4 = vld [vmem:[%s5465_s9 + $0x1b8] ss:$52 sps:$4 sm:$0xff]  }
  0x96   : > { %2571 = vmatmul.mubr.bf16.gmra.mrb[56].mxu1 %v5136_v2  ;;  %2668 = vmatmul.mubr.bf16.gmra.mrb[56].mxu0 %v5137_v5  ;;  %v5296_v2 = vld [vmem:[%s6573_s1 + $0x2b8] sm:$0xff]  }
  0x97   : > { %2578 = vmatprep.mubr.bf16.mxu1 %v5142_v6  ;;  %2675 = vmatprep.mubr.bf16.mxu0 %v5144_v7  ;;  %v5222_v5 = vld [vmem:[%s5465_s9 + $0x55c] ss:$52 sps:$4 sm:$0xff]   ;;  %v5224_v6 = vld [vmem:[%s5465_s9 + $0x224] ss:$52 sps:$4 sm:$0xff]  }
  0x98   : > { %4676 = vmatpush3.bf16.msra.mxu0 %v5189_v8  ;;  %v5226_v7 = vld [vmem:[%s5465_s9 + $0x558] ss:$52 sps:$4 sm:$0xff]   ;;  %v5227_v8 = vld [vmem:[%s5465_s9 + $0x220] ss:$52 sps:$4 sm:$0xff]  }
  0x99   : > { %4677 = vmatprep.subr.bf16.mxu0 %v5204_v9  ;;  %v5228_v9 = vld [vmem:[%s5465_s9 + $0x5c4] ss:$52 sps:$4 sm:$0xff]  }
  0x9c   : > { %4678 = vmatpush3.bf16.msra.mxu0 %v5205_v12  ;;  %v5233_v12 = vld [vmem:[%s5465_s9 + $0x288] ss:$52 sps:$4 sm:$0xff]  }
  0x9d   : > { %4679 = vmatprep.subr.bf16.mxu0 %v5220_v13  ;;  %v5238_v13 = vld [vmem:[%s5465_s9 + $0x62c] ss:$52 sps:$4 sm:$0xff]  }
  0x9e   : > { %2579 = vmatmul.mubr.bf16.gmra.mrb[60].mxu1 %v5146_v10  ;;  %2676 = vmatmul.mubr.bf16.gmra.mrb[60].mxu0 %v5147_v11  ;;  %v5230_v10 = vld [vmem:[%s5465_s9 + $0x28c] ss:$52 sps:$4 sm:$0xff]  }
  0x9f   : > { %2586 = vmatprep.mubr.bf16.mxu1 %v5148_v14  ;;  %2683 = vmatprep.mubr.bf16.mxu0 %v5150_v15  ;;  %v5232_v11 = vld [vmem:[%s5465_s9 + $0x5c0] ss:$52 sps:$4 sm:$0xff]  }
  0xa0   : > { %4680 = vmatpush3.bf16.msra.mxu0 %v5221_v16  ;;  %v5240_v14 = vld [vmem:[%s5465_s9 + $0x2f4] ss:$52 sps:$4 sm:$0xff]  }
  0xa1   : > { %4681 = vmatprep.subr.bf16.mxu0 %v5236_v21 }
  0xa4   : > { %4682 = vmatpush3.bf16.msra.mxu0 %v5237_v22 }
  0xa5   : > { %4915 = vmatprep.subr.bf16.mxu0 %v5760_v27 }
  0xa6   : > { %2587 = vmatmul.mubr.bf16.gmra.mrb[64].mxu1 %v5152_v17  ;;  %2684 = vmatmul.mubr.bf16.gmra.mrb[64].mxu0 %v5153_v18 }
  0xa7   : > { %2594 = vmatprep.mubr.bf16.mxu1 %v5158_v19  ;;  %2691 = vmatprep.mubr.bf16.mxu0 %v5160_v20  ;;  %v5242_v19 = vld [vmem:[%s5465_s9 + $0x628] ss:$52 sps:$4 sm:$0xff]   ;;  %v5243_v20 = vld [vmem:[%s5465_s9 + $0x2f0] ss:$52 sps:$4 sm:$0xff]  }
  0xae   : > { %2595 = vmatmul.mubr.bf16.gmra.mrb[68].mxu1 %v5162_v23  ;;  %2692 = vmatmul.mubr.bf16.gmra.mrb[68].mxu0 %v5163_v24 }
  0xaf   : > { %2602 = vmatprep.mubr.bf16.mxu1 %v5164_v25  ;;  %2699 = vmatprep.mubr.bf16.mxu0 %v5166_v26  ;;  %v5244_v25 = vld [vmem:[%s5465_s9 + $0x35c] ss:$52 sps:$4 sm:$0xff]   ;;  %v5248_v26 = vld [vmem:[%s5465_s9 + $0x24] ss:$52 sps:$4 sm:$0xff]  }
  0xb6   : > { %2603 = vmatmul.mubr.bf16.gmra.mrb[72].mxu1 %v5168_v28  ;;  %2700 = vmatmul.mubr.bf16.gmra.mrb[72].mxu0 %v5169_v29 }
  0xb7   : > { %2610 = vmatprep.mubr.bf16.mxu1 %v5174_v30  ;;  %2707 = vmatprep.mubr.bf16.mxu0 %v5176_v31 }
  0xbe   : > { %2611 = vmatmul.mubr.bf16.gmra.mrb[76].mxu1 %v5178_v32  ;;  %2708 = vmatmul.mubr.bf16.gmra.mrb[76].mxu0 %v5179_v33 }
  0xbf   : > { %2715 = vmatprep.mubr.bf16.mxu0 %v5180_v34  ;;  %2812 = vmatprep.mubr.bf16.mxu1 %v5184_v35 }
  0xc6   : > { %2716 = vmatmul.mubr.bf16.gmra.mrb[80].mxu0 %v5185_v37  ;;  %2813 = vmatmul.mubr.bf16.vlgmr.msra.gmra.mrb[80].mxu1 %v5182_v36  ;;  %v5246_v36 = vld [vmem:[%s5465_s9 + $0x20] ss:$52 sps:$4 sm:$0xff]   ;;  %v5249_v37 = vld [vmem:[%s5465_s9 + $0x358] ss:$52 sps:$4 sm:$0xff]  }
  0xc7   : > { %4780 = vmatpush3.bf16.msra.mxu1 %v5187_v38  ;;  %2723 = vmatprep.mubr.bf16.mxu0 %v5190_v39 }
  0xc8   : > { %2820 = vmatprep.mubr.bf16.mxu1 %v5192_v40  ;;  %4781 = vmatprep.subr.bf16.mxu1 %v5202_v41 }
  0xcb   : > { %4782 = vmatpush3.bf16.msra.mxu1 %v5203_v42  ;;  %v5253_v42 = vld [vmem:[%s5465_s9 + $0x3c4] ss:$52 sps:$4 sm:$0xff]  }
  0xcc   : > { %4783 = vmatprep.subr.bf16.mxu1 %v5218_v43 }
  0xce   : > { %2724 = vmatmul.mubr.bf16.gmra.mrb[84].mxu0 %v5194_v44  ;;  %2821 = vmatmul.mubr.bf16.gmra.mrb[84].mxu1 %v5195_v45  ;;  %v5255_v45 = vld [vmem:[%s5465_s9 + $0x8c] ss:$52 sps:$4 sm:$0xff]  }
  0xcf   : > { %2731 = vmatprep.mubr.bf16.mxu0 %v5196_v46  ;;  %2828 = vmatprep.mubr.bf16.mxu1 %v5198_v47  ;;  %v5267_v46 = vld [vmem:[%s6573_s1 + $0x308] sm:$0xff]  }
  0xd0   : > { %4784 = vmatpush3.bf16.msra.mxu1 %v5219_v48 }
  0xd1   : > { %4785 = vmatprep.subr.bf16.mxu1 %v5234_v49  ;;  %v5282_v49 = vld [vmem:[%s6573_s1 + $0x310] sm:$0xff]  }
  0xd4   : > { %4786 = vmatpush3.bf16.msra.mxu1 %v5235_v50 }
  0xd5   : > { %4787 = vmatprep.subr.bf16.mxu1 %v5250_v51 }
  0xd6   : > { %2732 = vmatmul.mubr.bf16.gmra.mrb[88].mxu0 %v5200_v52  ;;  %2829 = vmatmul.mubr.bf16.gmra.mrb[88].mxu1 %v5201_v53 }
  0xd7   : > { %2739 = vmatprep.mubr.bf16.mxu0 %v5206_v54  ;;  %2836 = vmatprep.mubr.bf16.mxu1 %v5208_v55  ;;  %v5257_v54 = vld [vmem:[%s5465_s9 + $0x3c0] ss:$52 sps:$4 sm:$0xff]   ;;  %v5258_v55 = vld [vmem:[%s5465_s9 + $0x88] ss:$52 sps:$4 sm:$0xff]  }
  0xd8   : > { %4788 = vmatpush3.bf16.msra.mxu1 %v5251_v56 }
  0xd9   : > { %4789 = vmatprep.subr.bf16.mxu1 %v5265_v57 }
  0xdc   : > { %4790 = vmatpush3.bf16.msra.mxu1 %v5266_v58 }
  0xdd   : > { %4791 = vmatprep.subr.bf16.mxu1 %v5280_v59  ;;  %v5259_v59 = vld [vmem:[%s5465_s9 + $0x42c] ss:$52 sps:$4 sm:$0xff]  }
  0xde   : > { %2740 = vmatmul.mubr.bf16.gmra.mrb[92].mxu0 %v5210_v60  ;;  %2837 = vmatmul.mubr.bf16.gmra.mrb[92].mxu1 %v5211_v61  ;;  %v5261_v60 = vld [vmem:[%s5465_s9 + $0xf4] ss:$52 sps:$4 sm:$0xff]  }
  0xdf   : > { %2747 = vmatprep.mubr.bf16.mxu0 %v5212_v62  ;;  %2844 = vmatprep.mubr.bf16.mxu1 %v5214_v63 }
  0xe0   : > { %4792 = vmatpush3.bf16.msra.mxu1 %v5281_v0 }
  0xe1   : > { %4793 = vmatprep.subr.bf16.mxu1 %v5295_v1  ;;  %v5297_v1 = vld [vmem:[%s6573_s1 + $0x318] sm:$0xff]  }
  0xe4   : > { %4794 = vmatpush3.bf16.msra.mxu1 %v5296_v2 }
  0xe6   : > { %2748 = vmatmul.mubr.bf16.gmra.mrb[96].mxu0 %v5216_v3  ;;  %2845 = vmatmul.mubr.bf16.gmra.mrb[96].mxu1 %v5217_v4  ;;  %v5310_v4 = vld [vmem:[%s6573_s1 + $0x320] sm:$0xff]  }
  0xe7   : > { %2755 = vmatprep.mubr.bf16.mxu0 %v5222_v5  ;;  %2852 = vmatprep.mubr.bf16.mxu1 %v5224_v6 }
  0xee   : > { %2756 = vmatmul.mubr.bf16.gmra.mrb[100].mxu0 %v5226_v7  ;;  %2853 = vmatmul.mubr.bf16.gmra.mrb[100].mxu1 %v5227_v8  ;;  %v5263_v7 = vld [vmem:[%s5465_s9 + $0x428] ss:$52 sps:$4 sm:$0xff]   ;;  %v5264_v8 = vld [vmem:[%s5465_s9 + $0xf0] ss:$52 sps:$4 sm:$0xff]  }
  0xef   : > { %2763 = vmatprep.mubr.bf16.mxu0 %v5228_v9  ;;  %2860 = vmatprep.mubr.bf16.mxu1 %v5230_v10 }
  0xf6   : > { %2764 = vmatmul.mubr.bf16.gmra.mrb[104].mxu0 %v5232_v11  ;;  %2861 = vmatmul.mubr.bf16.gmra.mrb[104].mxu1 %v5233_v12 }
  0xf7   : > { %2771 = vmatprep.mubr.bf16.mxu0 %v5238_v13  ;;  %2868 = vmatprep.mubr.bf16.mxu1 %v5240_v14  ;;  %v5268_v13 = vld [vmem:[%s5465_s9 + $0x494] ss:$52 sps:$4 sm:$0xff]   ;;  %v5270_v14 = vld [vmem:[%s5465_s9 + $0x15c] ss:$52 sps:$4 sm:$0xff]  }
  0xf9   : > { %v4307_v15 = vpop.f32.mrb[0].mxu1  ;;  %v4235_v16 = vpop.f32.mrb[0].mxu0 }
  0xfa   : > { %v4308_v17 = vpop.f32.mrb[1].mxu1  ;;  %v4236_v18 = vpop.f32.mrb[1].mxu0 }
  0xfb   : > { %v5846_v21 = vadd.f32 %v4308_v17, %v4307_v15  ;;  %v4310_v22 = vpop.f32.mrb[2].mxu1  ;;  %v5848_v23 = vadd.f32 %v4236_v18, %v4235_v16  ;;  %v4238_v24 = vpop.f32.mrb[2].mxu0 }
  0xfc   : > { %v4311_v28 = vpop.f32.mrb[3].mxu1  ;;  %v4239_v29 = vpop.f32.mrb[3].mxu0 }
  0xfd   : > { %v5852_v30 = vadd.f32 %v4311_v28, %v4310_v22  ;;  %v5854_v31 = vadd.f32 %v4239_v29, %v4238_v24  ;;  %v5272_v29 = vld [vmem:[%s5465_s9 + $0x490] ss:$52 sps:$4 sm:$0xff]  }
  0xfe   : > { %2772 = vmatmul.mubr.bf16.gmra.mrb[108].mxu0 %v5242_v19  ;;  %2869 = vmatmul.mubr.bf16.gmra.mrb[108].mxu1 %v5243_v20  ;;  %v5323_v19 = vld [vmem:[%s6573_s1 + $0x328] sm:$0xff]   ;;  %v5911_v20 = vld [vmem:[%s6574_s2] ss:$0 sm:$0xff] }
  0xff   : > { %2876 = vmatprep.mubr.bf16.mxu1 %v5244_v25  ;;  %2973 = vmatprep.mubr.bf16.mxu0 %v5248_v26  ;;  %v5336_v25 = vld [vmem:[%s6573_s1 + $0x330] sm:$0xff]  }
 0x101   : > { %v4313_v32 = vpop.f32.mrb[4].mxu1  ;;  %v4241_v33 = vpop.f32.mrb[4].mxu0 }
 0x102   : > { %v4314_v34 = vpop.f32.mrb[5].mxu1  ;;  %v4242_v35 = vpop.f32.mrb[5].mxu0 }
 0x103   : > { %v5858_v38 = vadd.f32 %v4314_v34, %v4313_v32  ;;  %v4316_v39 = vpop.f32.mrb[6].mxu1  ;;  %v5860_v40 = vadd.f32 %v4242_v35, %v4241_v33  ;;  %v4244_v41 = vpop.f32.mrb[6].mxu0  ;;  %v5273_v32 = vld [vmem:[%s5465_s9 + $0x158] ss:$52 sps:$4 sm:$0xff]   ;;  %v2332_v33 = vadd.f32 %v5848_v23, %v5911_v20 }
 0x104   : > { %v4317_v43 = vpop.f32.mrb[7].mxu1  ;;  %v4245_v44 = vpop.f32.mrb[7].mxu0  ;;  %v5349_v23 = vld [vmem:[%s6573_s1 + $0x338] sm:$0xff]  }
 0x105   : > { %v5867_v47 = vadd.f32 %v4317_v43, %v4316_v39  ;;  %v5869_v48 = vadd.f32 %v4245_v44, %v4244_v41  ;;  %v5274_v39 = vld [vmem:[%s5465_s9 + $0x4fc] ss:$52 sps:$4 sm:$0xff]   ;;  %v5276_v41 = vld [vmem:[%s5465_s9 + $0x1c4] ss:$52 sps:$4 sm:$0xff]   ;;  %v2335_v44 = vadd.f32 %v5854_v31, %v5911_v20 }
 0x106   : > { %2877 = vmatmul.mubr.bf16.gmra.mrb[112].mxu1 %v5249_v37  ;;  %2974 = vmatmul.mubr.bf16.vlgmr.msra.gmra.mrb[112].mxu0 %v5246_v36 }
 0x107   : > { %4916 = vmatpush3.bf16.msra.mxu0 %v5760_v27  ;;  %2884 = vmatprep.mubr.bf16.mxu1 %v5253_v42 }
 0x108   : > { %2981 = vmatprep.mubr.bf16.mxu0 %v5255_v45  ;;  %4917 = vmatprep.subr.bf16.mxu0 %v5267_v46 }
 0x109   : > { %v4319_v50 = vpop.f32.mrb[8].mxu1  ;;  %v4247_v51 = vpop.f32.mrb[8].mxu0 }
 0x10a   : > { %v4320_v52 = vpop.f32.mrb[9].mxu1  ;;  %v4248_v53 = vpop.f32.mrb[9].mxu0 }
 0x10b   : > { %v5877_v56 = vadd.f32 %v4320_v52, %v4319_v50  ;;  %v4322_v57 = vpop.f32.mrb[10].mxu1  ;;  %v5879_v58 = vadd.f32 %v4248_v53, %v4247_v51  ;;  %v4250_v27 = vpop.f32.mrb[10].mxu0  ;;  %4918 = vmatpush3.bf16.msra.mxu0 %v5267_v46 }
 0x10c   : > { %v4323_v61 = vpop.f32.mrb[11].mxu1  ;;  %v4251_v62 = vpop.f32.mrb[11].mxu0  ;;  %4919 = vmatprep.subr.bf16.mxu0 %v5282_v49 }
 0x10d   : > { %v5883_v63 = vadd.f32 %v4323_v61, %v4322_v57  ;;  %v5885_v0 = vadd.f32 %v4251_v62, %v4250_v27  ;;  %v2340_v57 = vadd.f32 %v5860_v40, %v5911_v20  ;;  %v5283_v62 = vld [vmem:[%s5465_s9 + $0x564] ss:$52 sps:$4 sm:$0xff]  }
 0x10e   : > { %2885 = vmatmul.mubr.bf16.gmra.mrb[116].mxu1 %v5257_v54  ;;  %2982 = vmatmul.mubr.bf16.gmra.mrb[116].mxu0 %v5258_v55  ;;  %v5278_v54 = vld [vmem:[%s5465_s9 + $0x4f8] ss:$52 sps:$4 sm:$0xff]   ;;  %v5279_v55 = vld [vmem:[%s5465_s9 + $0x1c0] ss:$52 sps:$4 sm:$0xff]  }
 0x10f   : > { %2892 = vmatprep.mubr.bf16.mxu1 %v5259_v59  ;;  %2989 = vmatprep.mubr.bf16.mxu0 %v5261_v60 }
 0x110   : > { %4920 = vmatpush3.bf16.msra.mxu0 %v5282_v49 }
 0x111   : > { %v4325_v2 = vpop.f32.mrb[12].mxu1  ;;  %v4253_v3 = vpop.f32.mrb[12].mxu0  ;;  %4921 = vmatprep.subr.bf16.mxu0 %v5297_v1 }
 0x112   : > { %v4326_v5 = vpop.f32.mrb[13].mxu1  ;;  %v4254_v6 = vpop.f32.mrb[13].mxu0 }
 0x113   : > { %v5895_v9 = vadd.f32 %v4326_v5, %v4325_v2  ;;  %v4328_v10 = vpop.f32.mrb[14].mxu1  ;;  %v5897_v11 = vadd.f32 %v4254_v6, %v4253_v3  ;;  %v4256_v12 = vpop.f32.mrb[14].mxu0 }
 0x114   : > { %v4329_v15 = vpop.f32.mrb[15].mxu1  ;;  %v4257_v16 = vpop.f32.mrb[15].mxu0  ;;  %4922 = vmatpush3.bf16.msra.mxu0 %v5297_v1  ;;  %v5285_v1 = vld [vmem:[%s5465_s9 + $0x22c] ss:$52 sps:$4 sm:$0xff]  }
 0x115   : > { %v5901_v17 = vadd.f32 %v4329_v15, %v4328_v10  ;;  %v5903_v18 = vadd.f32 %v4257_v16, %v4256_v12  ;;  %4923 = vmatprep.subr.bf16.mxu0 %v5310_v4  ;;  %v5288_v15 = vld [vmem:[%s5465_s9 + $0x228] ss:$52 sps:$4 sm:$0xff]  }
 0x116   : > { %2893 = vmatmul.mubr.bf16.gmra.mrb[120].mxu1 %v5263_v7  ;;  %2990 = vmatmul.mubr.bf16.gmra.mrb[120].mxu0 %v5264_v8 }
 0x117   : > { %2900 = vmatprep.mubr.bf16.mxu1 %v5268_v13  ;;  %2997 = vmatprep.mubr.bf16.mxu0 %v5270_v14  ;;  %v5287_v14 = vld [vmem:[%s5465_s9 + $0x560] ss:$52 sps:$4 sm:$0xff]  }
 0x118   : > { %4924 = vmatpush3.bf16.msra.mxu0 %v5310_v4  ;;  %v2343_v4 = vadd.f32 %v5869_v48, %v5911_v20  ;;  %v2348_v48 = vadd.f32 %v5879_v58, %v5911_v20 }
 0x119   : > { %v4347_v22 = vpop.f32.mrb[16].mxu1  ;;  %v4259_v24 = vpop.f32.mrb[16].mxu0  ;;  %4925 = vmatprep.subr.bf16.mxu0 %v5323_v19 }
 0x11a   : > { %v4348_v26 = vpop.f32.mrb[17].mxu1  ;;  %v4260_v28 = vpop.f32.mrb[17].mxu0 }
 0x11b   : > { %v4349_v34 = vadd.f32 %v4348_v26, %v4347_v22  ;;  %v4350_v35 = vpop.f32.mrb[18].mxu1  ;;  %v5920_v36 = vadd.f32 %v4260_v28, %v4259_v24  ;;  %v4262_v37 = vpop.f32.mrb[18].mxu0  ;;  %v5291_v26 = vld [vmem:[%s5465_s9 + $0x294] ss:$52 sps:$4 sm:$0xff]  }
 0x11c   : > { %v4351_v42 = vpop.f32.mrb[19].mxu1  ;;  %v4263_v43 = vpop.f32.mrb[19].mxu0  ;;  %4926 = vmatpush3.bf16.msra.mxu0 %v5323_v19 }
 0x11d   : > { %v5926_v45 = vadd.f32 %v4349_v34, %v2332_v33  ;;  %v4352_v46 = vadd.f32 %v4351_v42, %v4350_v35  ;;  %v5928_v49 = vadd.f32 %v4263_v43, %v4262_v37  ;;  %4927 = vmatprep.subr.bf16.mxu0 %v5336_v25  ;;  %v5293_v43 = vld [vmem:[%s5465_s9 + $0x5c8] ss:$52 sps:$4 sm:$0xff]  }
 0x11e   : > { %2901 = vmatmul.mubr.bf16.gmra.mrb[124].mxu1 %v5272_v29  ;;  %2998 = vmatmul.mubr.bf16.gmra.mrb[124].mxu0 %v5273_v32  ;;  %v2351_v32 = vadd.f32 %v5885_v0, %v5911_v20  ;;  %v2356_v0 = vadd.f32 %v5897_v11, %v5911_v20 }
 0x11f   : > { %v5933_v50 = vadd.f32 %v4352_v46, %v2335_v44  ;;  %2908 = vmatprep.mubr.bf16.mxu1 %v5274_v39  ;;  %3005 = vmatprep.mubr.bf16.mxu0 %v5276_v41  ;;  %v5294_v44 = vld [vmem:[%s5465_s9 + $0x290] ss:$52 sps:$4 sm:$0xff]  }
 0x120   : > { %4928 = vmatpush3.bf16.msra.mxu0 %v5336_v25  ;;  %v5289_v25 = vld [vmem:[%s5465_s9 + $0x5cc] ss:$52 sps:$4 sm:$0xff]  }
 0x121   : > { %v4353_v31 = vpop.f32.mrb[20].mxu1  ;;  %v4265_v51 = vpop.f32.mrb[20].mxu0  ;;  %4929 = vmatprep.subr.bf16.mxu0 %v5349_v23 }
 0x122   : > { %v4354_v52 = vpop.f32.mrb[21].mxu1  ;;  %v4266_v53 = vpop.f32.mrb[21].mxu0 }
 0x123   : > { %v4355_v27 = vadd.f32 %v4354_v52, %v4353_v31  ;;  %v4356_v59 = vpop.f32.mrb[22].mxu1  ;;  %v5939_v60 = vadd.f32 %v4266_v53, %v4265_v51  ;;  %v4268_v61 = vpop.f32.mrb[22].mxu0  ;;  %v5298_v52 = vld [vmem:[%s5465_s9 + $0x634] ss:$52 sps:$4 sm:$0xff]   ;;  %v5300_v53 = vld [vmem:[%s5465_s9 + $0x2fc] ss:$52 sps:$4 sm:$0xff]  }
 0x124   : > { %v4357_v2 = vpop.f32.mrb[23].mxu1  ;;  %v4269_v3 = vpop.f32.mrb[23].mxu0  ;;  %4930 = vmatpush3.bf16.msra.mxu0 %v5349_v23 }
 0x125   : > { %v5945_v5 = vadd.f32 %v4355_v27, %v2340_v57  ;;  %v4358_v6 = vadd.f32 %v4357_v2, %v4356_v59  ;;  %v5947_v7 = vadd.f32 %v4269_v3, %v4268_v61  ;;  %v2359_v57 = vadd.f32 %v5903_v18, %v5911_v20 }
 0x126   : > { %2909 = vmatmul.mubr.bf16.gmra.mrb[128].mxu1 %v5278_v54  ;;  %3006 = vmatmul.mubr.bf16.gmra.mrb[128].mxu0 %v5279_v55  ;;  %v2364_v18 = vadd.f32 %v5920_v36, %v5911_v20 }
 0x127   : > { %v5949_v40 = vadd.f32 %v4358_v6, %v2343_v4  ;;  %2916 = vmatprep.mubr.bf16.mxu1 %v5283_v62  ;;  %3013 = vmatprep.mubr.bf16.mxu0 %v5285_v1  ;;  %v5302_v4 = vld [vmem:[%s5465_s9 + $0x630] ss:$52 sps:$4 sm:$0xff]   ;;  %v5303_v6 = vld [vmem:[%s5465_s9 + $0x2f8] ss:$52 sps:$4 sm:$0xff]  }
 0x129   : > { %v4359_v8 = vpop.f32.mrb[24].mxu1  ;;  %v4271_v10 = vpop.f32.mrb[24].mxu0 }
 0x12a   : > { %v4360_v12 = vpop.f32.mrb[25].mxu1  ;;  %v4272_v13 = vpop.f32.mrb[25].mxu0 }
 0x12b   : > { %v4361_v16 = vadd.f32 %v4360_v12, %v4359_v8  ;;  %v4362_v19 = vpop.f32.mrb[26].mxu1  ;;  %v5955_v22 = vadd.f32 %v4272_v13, %v4271_v10  ;;  %v4274_v24 = vpop.f32.mrb[26].mxu0 }
 0x12c   : > { %v4363_v28 = vpop.f32.mrb[27].mxu1  ;;  %v4275_v29 = vpop.f32.mrb[27].mxu0 }
 0x12d   : > { %v5961_v33 = vadd.f32 %v4361_v16, %v2348_v48  ;;  %v4364_v34 = vadd.f32 %v4363_v28, %v4362_v19  ;;  %v5963_v35 = vadd.f32 %v4275_v29, %v4274_v24  ;;  %v2367_v19 = vadd.f32 %v5928_v49, %v5911_v20 }
 0x12e   : > { %2917 = vmatmul.mubr.bf16.gmra.mrb[132].mxu1 %v5287_v14  ;;  %3014 = vmatmul.mubr.bf16.gmra.mrb[132].mxu0 %v5288_v15  ;;  %v5304_v14 = vld [vmem:[%s5465_s9 + $0x364] ss:$52 sps:$4 sm:$0xff]   ;;  %v5308_v15 = vld [vmem:[%s5465_s9 + $0x2c] ss:$52 sps:$4 sm:$0xff]   ;;  %v2372_v49 = vadd.f32 %v5939_v60, %v5911_v20 }
 0x12f   : > { %v5965_v58 = vadd.f32 %v4364_v34, %v2351_v32  ;;  %2924 = vmatprep.mubr.bf16.mxu1 %v5289_v25  ;;  %3021 = vmatprep.mubr.bf16.mxu0 %v5291_v26 }
 0x131   : > { %v4365_v37 = vpop.f32.mrb[28].mxu1  ;;  %v4277_v39 = vpop.f32.mrb[28].mxu0 }
 0x132   : > { %v4366_v41 = vpop.f32.mrb[29].mxu1  ;;  %v4278_v42 = vpop.f32.mrb[29].mxu0 }
 0x133   : > { %v4367_v46 = vadd.f32 %v4366_v41, %v4365_v37  ;;  %v4368_v23 = vpop.f32.mrb[30].mxu1  ;;  %v5971_v31 = vadd.f32 %v4278_v42, %v4277_v39  ;;  %v4280_v51 = vpop.f32.mrb[30].mxu0  ;;  %v5306_v37 = vld [vmem:[%s5465_s9 + $0x28] ss:$52 sps:$4 sm:$0xff]   ;;  %v5309_v39 = vld [vmem:[%s5465_s9 + $0x360] ss:$52 sps:$4 sm:$0xff]  }
 0x134   : > { %v4369_v54 = vpop.f32.mrb[31].mxu1  ;;  %v4281_v55 = vpop.f32.mrb[31].mxu0 }
 0x135   : > { %v5977_v27 = vadd.f32 %v4367_v46, %v2356_v0  ;;  %v4370_v59 = vadd.f32 %v4369_v54, %v4368_v23  ;;  %v5979_v61 = vadd.f32 %v4281_v55, %v4280_v51  ;;  %v5311_v0 = vld [vmem:[%s5465_s9 + $0x3cc] ss:$52 sps:$4 sm:$0xff]   ;;  %v5313_v46 = vld [vmem:[%s5465_s9 + $0x94] ss:$52 sps:$4 sm:$0xff]  }
 0x136   : > { %2925 = vmatmul.mubr.bf16.gmra.mrb[136].mxu1 %v5293_v43  ;;  %3022 = vmatmul.mubr.bf16.gmra.mrb[136].mxu0 %v5294_v44 }
 0x137   : > { %v5981_v11 = vadd.f32 %v4370_v59, %v2359_v57  ;;  %2932 = vmatprep.mubr.bf16.mxu1 %v5298_v52  ;;  %3029 = vmatprep.mubr.bf16.mxu0 %v5300_v53  ;;  %v2375_v52 = vadd.f32 %v5947_v7, %v5911_v20  ;;  %v2380_v7 = vadd.f32 %v5955_v22, %v5911_v20 }
 0x139   : > { %v4371_v62 = vpop.f32.mrb[32].mxu1  ;;  %v4283_v1 = vpop.f32.mrb[32].mxu0 }
 0x13a   : > { %v4372_v2 = vpop.f32.mrb[33].mxu1  ;;  %v4284_v3 = vpop.f32.mrb[33].mxu0 }
 0x13b   : > { %v4373_v8 = vadd.f32 %v4372_v2, %v4371_v62  ;;  %v4374_v10 = vpop.f32.mrb[34].mxu1  ;;  %v5987_v12 = vadd.f32 %v4284_v3, %v4283_v1  ;;  %v4286_v13 = vpop.f32.mrb[34].mxu0  ;;  %v5315_v2 = vld [vmem:[%s5465_s9 + $0x3c8] ss:$52 sps:$4 sm:$0xff]   ;;  %v5316_v3 = vld [vmem:[%s5465_s9 + $0x90] ss:$52 sps:$4 sm:$0xff]  }
 0x13c   : > { %v4375_v48 = vpop.f32.mrb[35].mxu1  ;;  %v4287_v16 = vpop.f32.mrb[35].mxu0 }
 0x13d   : > { %v5993_v24 = vadd.f32 %v4373_v8, %v2364_v18  ;;  %v4376_v25 = vadd.f32 %v4375_v48, %v4374_v10  ;;  %v5995_v26 = vadd.f32 %v4287_v16, %v4286_v13  ;;  %v5317_v10 = vld [vmem:[%s5465_s9 + $0x434] ss:$52 sps:$4 sm:$0xff]   ;;  %v5319_v13 = vld [vmem:[%s5465_s9 + $0xfc] ss:$52 sps:$4 sm:$0xff]   ;;  %v2383_v48 = vadd.f32 %v5963_v35, %v5911_v20 }
 0x13e   : > { %2933 = vmatmul.mubr.bf16.gmra.mrb[140].mxu1 %v5302_v4  ;;  %3030 = vmatmul.mubr.bf16.gmra.mrb[140].mxu0 %v5303_v6  ;;  %v2388_v35 = vadd.f32 %v5971_v31, %v5911_v20 }
 0x13f   : > { %v5997_v36 = vadd.f32 %v4376_v25, %v2367_v19  ;;  %3037 = vmatprep.mubr.bf16.mxu0 %v5304_v14  ;;  %3134 = vmatprep.mubr.bf16.mxu1 %v5308_v15 }
 0x141   : > { %v4377_v28 = vpop.f32.mrb[36].mxu1  ;;  %v4289_v29 = vpop.f32.mrb[36].mxu0 }
 0x142   : > { %v4378_v32 = vpop.f32.mrb[37].mxu1  ;;  %v4290_v34 = vpop.f32.mrb[37].mxu0 }
 0x143   : > { %v4379_v41 = vadd.f32 %v4378_v32, %v4377_v28  ;;  %v4380_v42 = vpop.f32.mrb[38].mxu1  ;;  %v6003_v43 = vadd.f32 %v4290_v34, %v4289_v29  ;;  %v4292_v44 = vpop.f32.mrb[38].mxu0 }
 0x144   : > { %v4381_v23 = vpop.f32.mrb[39].mxu1  ;;  %v4293_v51 = vpop.f32.mrb[39].mxu0 }
 0x145   : > { %v6009_v53 = vadd.f32 %v4379_v41, %v2372_v49  ;;  %v4382_v54 = vadd.f32 %v4381_v23, %v4380_v42  ;;  %v6011_v55 = vadd.f32 %v4293_v51, %v4292_v44 }
 0x146   : > { %3038 = vmatmul.mubr.bf16.gmra.mrb[144].mxu0 %v5309_v39  ;;  %3135 = vmatmul.mubr.bf16.vlgmr.msra.gmra.mrb[144].mxu1 %v5306_v37  ;;  %v5321_v37 = vld [vmem:[%s5465_s9 + $0x430] ss:$52 sps:$4 sm:$0xff]   ;;  %v5322_v39 = vld [vmem:[%s5465_s9 + $0xf8] ss:$52 sps:$4 sm:$0xff]  }
 0x147   : > { %v6013_v60 = vadd.f32 %v4382_v54, %v2375_v52  ;;  %3045 = vmatprep.mubr.bf16.mxu0 %v5311_v0  ;;  %3142 = vmatprep.mubr.bf16.mxu1 %v5313_v46  ;;  %v5324_v0 = vld [vmem:[%s5465_s9 + $0x49c] ss:$52 sps:$4 sm:$0xff]   ;;  %v5326_v46 = vld [vmem:[%s5465_s9 + $0x164] ss:$52 sps:$4 sm:$0xff]   ;;  %v2391_v52 = vadd.f32 %v5979_v61, %v5911_v20  ;;  %v2396_v61 = vadd.f32 %v5987_v12, %v5911_v20 }
 0x149   : > { %v4383_v57 = vpop.f32.mrb[40].mxu1  ;;  %v4295_v59 = vpop.f32.mrb[40].mxu0 }
 0x14a   : > { %v4384_v62 = vpop.f32.mrb[41].mxu1  ;;  %v4296_v1 = vpop.f32.mrb[41].mxu0 }
 0x14b   : > { %v4385_v4 = vadd.f32 %v4384_v62, %v4383_v57  ;;  %v4386_v6 = vpop.f32.mrb[42].mxu1  ;;  %v6019_v18 = vadd.f32 %v4296_v1, %v4295_v59  ;;  %v4298_v8 = vpop.f32.mrb[42].mxu0 }
 0x14c   : > { %v4387_v14 = vpop.f32.mrb[43].mxu1  ;;  %v4299_v15 = vpop.f32.mrb[43].mxu0 }
 0x14d   : > { %v6025_v16 = vadd.f32 %v4385_v4, %v2380_v7  ;;  %v4388_v19 = vadd.f32 %v4387_v14, %v4386_v6  ;;  %v6027_v25 = vadd.f32 %v4299_v15, %v4298_v8  ;;  %v5328_v7 = vld [vmem:[%s5465_s9 + $0x498] ss:$52 sps:$4 sm:$0xff]   ;;  %v5329_v4 = vld [vmem:[%s5465_s9 + $0x160] ss:$52 sps:$4 sm:$0xff]  }
 0x14e   : > { %3046 = vmatmul.mubr.bf16.gmra.mrb[148].mxu0 %v5315_v2  ;;  %3143 = vmatmul.mubr.bf16.gmra.mrb[148].mxu1 %v5316_v3  ;;  %v5330_v14 = vld [vmem:[%s5465_s9 + $0x504] ss:$52 sps:$4 sm:$0xff]   ;;  %v5332_v15 = vld [vmem:[%s5465_s9 + $0x1cc] ss:$52 sps:$4 sm:$0xff]  }
 0x14f   : > { %v6029_v22 = vadd.f32 %v4388_v19, %v2383_v48  ;;  %3053 = vmatprep.mubr.bf16.mxu0 %v5317_v10  ;;  %3150 = vmatprep.mubr.bf16.mxu1 %v5319_v13  ;;  %v2399_v48 = vadd.f32 %v5995_v26, %v5911_v20 }
 0x151   : > { %v4389_v28 = vpop.f32.mrb[44].mxu1  ;;  %v4301_v29 = vpop.f32.mrb[44].mxu0 }
 0x152   : > { %v4390_v32 = vpop.f32.mrb[45].mxu1  ;;  %v4302_v34 = vpop.f32.mrb[45].mxu0 }
 0x153   : > { %v4391_v49 = vadd.f32 %v4390_v32, %v4389_v28  ;;  %v4392_v41 = vpop.f32.mrb[46].mxu1  ;;  %v6035_v42 = vadd.f32 %v4302_v34, %v4301_v29  ;;  %v4304_v44 = vpop.f32.mrb[46].mxu0 }
 0x154   : > { %v4393_v23 = vpop.f32.mrb[47].mxu1  ;;  %v4305_v51 = vpop.f32.mrb[47].mxu0 }
 0x155   : > { %v6041_v54 = vadd.f32 %v4391_v49, %v2388_v35  ;;  %v4394_v57 = vadd.f32 %v4393_v23, %v4392_v41  ;;  %v6043_v59 = vadd.f32 %v4305_v51, %v4304_v44  ;;  %v5334_v44 = vld [vmem:[%s5465_s9 + $0x500] ss:$52 sps:$4 sm:$0xff]  }
 0x156   : > { %3054 = vmatmul.mubr.bf16.gmra.mrb[152].mxu0 %v5321_v37  ;;  %3151 = vmatmul.mubr.bf16.gmra.mrb[152].mxu1 %v5322_v39 }
 0x157   : > { %v6045_v31 = vadd.f32 %v4394_v57, %v2391_v52  ;;  %3061 = vmatprep.mubr.bf16.mxu0 %v5324_v0  ;;  %3158 = vmatprep.mubr.bf16.mxu1 %v5326_v46  ;;  %v2404_v0 = vadd.f32 %v6003_v43, %v5911_v20  ;;  %v5337_v57 = vld [vmem:[%s5465_s9 + $0x56c] ss:$52 sps:$4 sm:$0xff]  }
 0x159   : > { %v4395_v62 = vpop.f32.mrb[48].mxu1  ;;  %v4459_v1 = vpop.f32.mrb[48].mxu0 }
 0x15a   : > { %v4396_v2 = vpop.f32.mrb[49].mxu1  ;;  %v4460_v3 = vpop.f32.mrb[49].mxu0 }
 0x15b   : > { %v4397_v6 = vadd.f32 %v4396_v2, %v4395_v62  ;;  %v4461_v8 = vadd.f32 %v4460_v3, %v4459_v1  ;;  %v4398_v10 = vpop.f32.mrb[50].mxu1  ;;  %v4462_v13 = vpop.f32.mrb[50].mxu0  ;;  %v5339_v62 = vld [vmem:[%s5465_s9 + $0x234] ss:$52 sps:$4 sm:$0xff]  }
 0x15c   : > { %v4399_v19 = vpop.f32.mrb[51].mxu1  ;;  %v4463_v28 = vpop.f32.mrb[51].mxu0 }
 0x15d   : > { %v6055_v29 = vadd.f32 %v4397_v6, %v2396_v61  ;;  %v6058_v32 = vadd.f32 %v4461_v8, %v5926_v45  ;;  %v4400_v34 = vadd.f32 %v4399_v19, %v4398_v10  ;;  %v4464_v12 = vadd.f32 %v4463_v28, %v4462_v13  ;;  %v5335_v45 = vld [vmem:[%s5465_s9 + $0x1c8] ss:$52 sps:$4 sm:$0xff]  }
 0x15e   : > { %3062 = vmatmul.mubr.bf16.gmra.mrb[156].mxu0 %v5328_v7  ;;  %3159 = vmatmul.mubr.bf16.gmra.mrb[156].mxu1 %v5329_v4 }
 0x15f   : > { %v6060_v37 = vadd.f32 %v4400_v34, %v2399_v48  ;;  %v6063_v39 = vadd.f32 %v4464_v12, %v5933_v50  ;;  %3069 = vmatprep.mubr.bf16.mxu0 %v5330_v14  ;;  %3166 = vmatprep.mubr.bf16.mxu1 %v5332_v15  ;;  %v2407_v50 = vadd.f32 %v6011_v55, %v5911_v20  ;;  %v5341_v14 = vld [vmem:[%s5465_s9 + $0x568] ss:$52 sps:$4 sm:$0xff]  }
 0x160   : > { %v2412_v15 = vadd.f32 %v6019_v18, %v5911_v20  ;;  %v5343_v12 = vld [vmem:[%s5465_s9 + $0x5d4] ss:$52 sps:$4 sm:$0xff]  }
 0x161   : > { %v4401_v26 = vpop.f32.mrb[52].mxu1  ;;  %v4465_v35 = vpop.f32.mrb[52].mxu0 }
 0x162   : > { %v4402_v49 = vpop.f32.mrb[53].mxu1  ;;  %v4466_v41 = vpop.f32.mrb[53].mxu0 }
 0x163   : > { %v4403_v46 = vadd.f32 %v4402_v49, %v4401_v26  ;;  %v4467_v23 = vadd.f32 %v4466_v41, %v4465_v35  ;;  %v4404_v51 = vpop.f32.mrb[54].mxu1  ;;  %v4468_v52 = vpop.f32.mrb[54].mxu0  ;;  %v5345_v26 = vld [vmem:[%s5465_s9 + $0x29c] ss:$52 sps:$4 sm:$0xff]  }
 0x164   : > { %v4405_v1 = vpop.f32.mrb[55].mxu1  ;;  %v4469_v2 = vpop.f32.mrb[55].mxu0 }
 0x165   : > { %v6073_v3 = vadd.f32 %v4403_v46, %v2404_v0  ;;  %v6076_v7 = vadd.f32 %v4467_v23, %v5945_v5  ;;  %v4406_v4 = vadd.f32 %v4405_v1, %v4404_v51  ;;  %v4470_v43 = vadd.f32 %v4469_v2, %v4468_v52  ;;  %v5342_v5 = vld [vmem:[%s5465_s9 + $0x230] ss:$52 sps:$4 sm:$0xff]  }
 0x166   : > { %3070 = vmatmul.mubr.bf16.gmra.mrb[160].mxu0 %v5334_v44  ;;  %3167 = vmatmul.mubr.bf16.gmra.mrb[160].mxu1 %v5335_v45 }
 0x167   : > { %v6078_v61 = vadd.f32 %v4406_v4, %v2407_v50  ;;  %v6081_v6 = vadd.f32 %v4470_v43, %v5949_v40  ;;  %3077 = vmatprep.mubr.bf16.mxu0 %v5337_v57  ;;  %3174 = vmatprep.mubr.bf16.mxu1 %v5339_v62  ;;  %v2415_v40 = vadd.f32 %v6027_v25, %v5911_v20  ;;  %v5347_v57 = vld [vmem:[%s5465_s9 + $0x5d0] ss:$52 sps:$4 sm:$0xff]  }
 0x168   : > { %v2420_v62 = vadd.f32 %v6035_v42, %v5911_v20  ;;  %v5350_v43 = vld [vmem:[%s5465_s9 + $0x63c] ss:$52 sps:$4 sm:$0xff]  }
 0x169   : > { %v4407_v55 = vpop.f32.mrb[56].mxu1  ;;  %v4471_v8 = vpop.f32.mrb[56].mxu0 }
 0x16a   : > { %v4408_v10 = vpop.f32.mrb[57].mxu1  ;;  %v4472_v13 = vpop.f32.mrb[57].mxu0 }
 0x16b   : > { %v4409_v48 = vadd.f32 %v4408_v10, %v4407_v55  ;;  %v4473_v19 = vadd.f32 %v4472_v13, %v4471_v8  ;;  %v4410_v28 = vpop.f32.mrb[58].mxu1  ;;  %v4474_v34 = vpop.f32.mrb[58].mxu0  ;;  %v5352_v55 = vld [vmem:[%s5465_s9 + $0x304] ss:$52 sps:$4 sm:$0xff]  }
 0x16c   : > { %v4411_v35 = vpop.f32.mrb[59].mxu1  ;;  %v4475_v49 = vpop.f32.mrb[59].mxu0 }
 0x16d   : > { %v6091_v41 = vadd.f32 %v4409_v48, %v2412_v15  ;;  %v6094_v44 = vadd.f32 %v4473_v19, %v5961_v33  ;;  %v4412_v45 = vadd.f32 %v4411_v35, %v4410_v28  ;;  %v4476_v18 = vadd.f32 %v4475_v49, %v4474_v34  ;;  %v5348_v33 = vld [vmem:[%s5465_s9 + $0x298] ss:$52 sps:$4 sm:$0xff]  }
 0x16e   : > { %3078 = vmatmul.mubr.bf16.gmra.mrb[164].mxu0 %v5341_v14  ;;  %3175 = vmatmul.mubr.bf16.gmra.mrb[164].mxu1 %v5342_v5 }
 0x16f   : > { %v6096_v0 = vadd.f32 %v4412_v45, %v2415_v40  ;;  %v6099_v46 = vadd.f32 %v4476_v18, %v5965_v58  ;;  %3085 = vmatprep.mubr.bf16.mxu0 %v5343_v12  ;;  %3182 = vmatprep.mubr.bf16.mxu1 %v5345_v26  ;;  %v2423_v58 = vadd.f32 %v6043_v59, %v5911_v20  ;;  %v5354_v12 = vld [vmem:[%s5465_s9 + $0x638] ss:$52 sps:$4 sm:$0xff]  }
 0x170   : > { %v2428_v26 = vadd.f32 %v5846_v21, %v5911_v20  ;;  %v5356_v18 = vld [vmem:[%s5465_s9 + $0x36c] ss:$52 sps:$4 sm:$0xff]  }
 0x171   : > { %v4413_v25 = vpop.f32.mrb[60].mxu1  ;;  %v4477_v23 = vpop.f32.mrb[60].mxu0 }
 0x172   : > { %v4414_v51 = vpop.f32.mrb[61].mxu1  ;;  %v4478_v52 = vpop.f32.mrb[61].mxu0 }
 0x173   : > { %v4415_v50 = vadd.f32 %v4414_v51, %v4413_v25  ;;  %v4479_v1 = vadd.f32 %v4478_v52, %v4477_v23  ;;  %v4416_v2 = vpop.f32.mrb[62].mxu1  ;;  %v4480_v4 = vpop.f32.mrb[62].mxu0  ;;  %v5358_v25 = vld [vmem:[%s5465_s9 + $0x30] ss:$52 sps:$4 sm:$0xff]  }
 0x174   : > { %v4417_v8 = vpop.f32.mrb[63].mxu1  ;;  %v4481_v10 = vpop.f32.mrb[63].mxu0 }
 0x175   : > { %v6109_v13 = vadd.f32 %v4415_v50, %v2420_v62  ;;  %v6112_v14 = vadd.f32 %v4479_v1, %v5977_v27  ;;  %v4418_v5 = vadd.f32 %v4417_v8, %v4416_v2  ;;  %v4482_v42 = vadd.f32 %v4481_v10, %v4480_v4  ;;  %v5355_v27 = vld [vmem:[%s5465_s9 + $0x300] ss:$52 sps:$4 sm:$0xff]  }
 0x176   : > { %3086 = vmatmul.mubr.bf16.gmra.mrb[168].mxu0 %v5347_v57  ;;  %3183 = vmatmul.mubr.bf16.gmra.mrb[168].mxu1 %v5348_v33 }
 0x177   : > { %v6114_v15 = vadd.f32 %v4418_v5, %v2423_v58  ;;  %v6117_v48 = vadd.f32 %v4482_v42, %v5981_v11  ;;  %3093 = vmatprep.mubr.bf16.mxu0 %v5350_v43  ;;  %3190 = vmatprep.mubr.bf16.mxu1 %v5352_v55  ;;  %v2431_v11 = vadd.f32 %v5852_v30, %v5911_v20  ;;  %v5359_v43 = vld [vmem:[%s5465_s9 + $0x368] ss:$52 sps:$4 sm:$0xff]  }
 0x178   : > { %v2436_v55 = vadd.f32 %v5858_v38, %v5911_v20  ;;  %v5361_v42 = vld [vmem:[%s5465_s9 + $0x3d4] ss:$52 sps:$4 sm:$0xff]  }
 0x179   : > { %v4419_v59 = vpop.f32.mrb[64].mxu1  ;;  %v4483_v19 = vpop.f32.mrb[64].mxu0 }
 0x17a   : > { %v4420_v28 = vpop.f32.mrb[65].mxu1  ;;  %v4484_v34 = vpop.f32.mrb[65].mxu0 }
 0x17b   : > { %v4421_v40 = vadd.f32 %v4420_v28, %v4419_v59  ;;  %v4485_v35 = vadd.f32 %v4484_v34, %v4483_v19  ;;  %v4422_v49 = vpop.f32.mrb[66].mxu1  ;;  %v4486_v45 = vpop.f32.mrb[66].mxu0  ;;  %v5363_v59 = vld [vmem:[%s5465_s9 + $0x100] ss:$52 sps:$4 sm:$0xff]  }
 0x17c   : > { %v4423_v23 = vpop.f32.mrb[67].mxu1  ;;  %v4487_v51 = vpop.f32.mrb[67].mxu0 }
 0x17d   : > { %v6127_v52 = vadd.f32 %v4421_v40, %v2428_v26  ;;  %v6130_v57 = vadd.f32 %v4485_v35, %v5993_v24  ;;  %v4424_v33 = vadd.f32 %v4423_v23, %v4422_v49  ;;  %v4488_v21 = vadd.f32 %v4487_v51, %v4486_v45  ;;  %v5360_v24 = vld [vmem:[%s5465_s9 + $0x98] ss:$52 sps:$4 sm:$0xff]  }
 0x17e   : > { %3094 = vmatmul.mubr.bf16.gmra.mrb[172].mxu0 %v5354_v12  ;;  %3191 = vmatmul.mubr.bf16.gmra.mrb[172].mxu1 %v5355_v27 }
 0x17f   : > { %v6132_v62 = vadd.f32 %v4424_v33, %v2431_v11  ;;  %v6135_v50 = vadd.f32 %v4488_v21, %v5997_v36  ;;  %3198 = vmatprep.mubr.bf16.mxu1 %v5356_v18  ;;  %4931 = vmatprep.mubr.bf16.mxu0 %v5358_v25  ;;  %v2439_v36 = vadd.f32 %v5867_v47, %v5911_v20  ;;  %v5364_v18 = vld [vmem:[%s5465_s9 + $0x3d0] ss:$52 sps:$4 sm:$0xff]  }
 0x180   : > { %v2444_v25 = vadd.f32 %v5877_v56, %v5911_v20  ;;  %v5366_v21 = vld [vmem:[%s5465_s9 + $0x43c] ss:$52 sps:$4 sm:$0xff]  }
 0x181   : > { %v4425_v30 = vpop.f32.mrb[68].mxu1  ;;  %v4489_v1 = vpop.f32.mrb[68].mxu0 }
 0x182   : > { %v4426_v2 = vpop.f32.mrb[69].mxu1  ;;  %v4490_v4 = vpop.f32.mrb[69].mxu0 }
 0x183   : > { %v4427_v58 = vadd.f32 %v4426_v2, %v4425_v30  ;;  %v4491_v8 = vadd.f32 %v4490_v4, %v4489_v1  ;;  %v4428_v10 = vpop.f32.mrb[70].mxu1  ;;  %v4492_v5 = vpop.f32.mrb[70].mxu0  ;;  %v5368_v30 = vld [vmem:[%s5465_s9 + $0x1d0] ss:$52 sps:$4 sm:$0xff]  }
 0x184   : > { %v4429_v19 = vpop.f32.mrb[71].mxu1  ;;  %v4493_v28 = vpop.f32.mrb[71].mxu0 }
 0x185   : > { %v6145_v34 = vadd.f32 %v4427_v58, %v2436_v55  ;;  %v6148_v12 = vadd.f32 %v4491_v8, %v6009_v53  ;;  %v4430_v27 = vadd.f32 %v4429_v19, %v4428_v10  ;;  %v4494_v38 = vadd.f32 %v4493_v28, %v4492_v5  ;;  %v5365_v53 = vld [vmem:[%s5465_s9 + $0x168] ss:$52 sps:$4 sm:$0xff]  }
 0x186   : > { %3199 = vmatmul.mubr.bf16.gmra.mrb[176].mxu1 %v5359_v43  ;;  %4932 = vmatmul.mubr.bf16.vlgmr.msra.gmra.mrb[176].mxu0 %v5360_v24 }
 0x187   : > { %v6150_v26 = vadd.f32 %v4430_v27, %v2439_v36  ;;  %v6153_v40 = vadd.f32 %v4494_v38, %v6013_v60  ;;  %3206 = vmatprep.mubr.bf16.mxu1 %v5361_v42  ;;  %4935 = vmatprep.mubr.bf16.mxu0 %v5363_v59  ;;  %v2447_v60 = vadd.f32 %v5883_v63, %v5911_v20  ;;  %v5369_v42 = vld [vmem:[%s5465_s9 + $0x438] ss:$52 sps:$4 sm:$0xff]  }
 0x188   : > { %v2452_v59 = vadd.f32 %v5895_v9, %v5911_v20  ;;  %v5371_v38 = vld [vmem:[%s5465_s9 + $0x4a4] ss:$52 sps:$4 sm:$0xff]  }
 0x189   : > { %v4431_v47 = vpop.f32.mrb[72].mxu1  ;;  %v4495_v35 = vpop.f32.mrb[72].mxu0 }
 0x18a   : > { %v4432_v49 = vpop.f32.mrb[73].mxu1  ;;  %v4496_v45 = vpop.f32.mrb[73].mxu0 }
 0x18b   : > { %v4433_v11 = vadd.f32 %v4432_v49, %v4431_v47  ;;  %v4497_v23 = vadd.f32 %v4496_v45, %v4495_v35  ;;  %v4434_v51 = vpop.f32.mrb[74].mxu1  ;;  %v4498_v33 = vpop.f32.mrb[74].mxu0  ;;  %v5373_v47 = vld [vmem:[%s5465_s9 + $0x2a0] ss:$52 sps:$4 sm:$0xff]  }
 0x18c   : > { %v4435_v1 = vpop.f32.mrb[75].mxu1  ;;  %v4499_v2 = vpop.f32.mrb[75].mxu0 }
 0x18d   : > { %v6163_v4 = vadd.f32 %v4433_v11, %v2444_v25  ;;  %v6166_v43 = vadd.f32 %v4497_v23, %v6025_v16  ;;  %v4436_v24 = vadd.f32 %v4435_v1, %v4434_v51  ;;  %v4500_v56 = vadd.f32 %v4499_v2, %v4498_v33  ;;  %v5370_v16 = vld [vmem:[%s5465_s9 + $0x238] ss:$52 sps:$4 sm:$0xff]   ;;  %v5374_v33 = vld [vmem:[%s5465_s9 + $0x4a0] ss:$52 sps:$4 sm:$0xff]  }
 0x18e   : > { %3207 = vmatmul.mubr.bf16.gmra.mrb[180].mxu1 %v5364_v18  ;;  %4936 = vmatmul.mubr.bf16.gmra.mrb[180].mxu0 %v5365_v53  ;;  %v5376_v2 = vld [vmem:[%s5465_s9 + $0x50c] ss:$52 sps:$4 sm:$0xff]  }
 0x18f   : > { %v6168_v55 = vadd.f32 %v4436_v24, %v2447_v60  ;;  %v6171_v58 = vadd.f32 %v4500_v56, %v6029_v22  ;;  %3214 = vmatprep.mubr.bf16.mxu1 %v5366_v21  ;;  %4939 = vmatprep.mubr.bf16.mxu0 %v5368_v30  ;;  %v2455_v22 = vadd.f32 %v5901_v17, %v5911_v20  ;;  %v5378_v24 = vld [vmem:[%s5465_s9 + $0x370] ss:$52 sps:$4 sm:$0xff]  }
 0x191   : > { %v4437_v63 = vpop.f32.mrb[76].mxu1  ;;  %v4501_v8 = vpop.f32.mrb[76].mxu0 }
 0x192   : > { %v4438_v10 = vpop.f32.mrb[77].mxu1  ;;  %v4502_v5 = vpop.f32.mrb[77].mxu0 }
 0x193   : > { %v4439_v36 = vadd.f32 %v4438_v10, %v4437_v63  ;;  %v4503_v19 = vadd.f32 %v4502_v5, %v4501_v8  ;;  %v4440_v28 = vpop.f32.mrb[78].mxu1  ;;  %v4504_v27 = vpop.f32.mrb[78].mxu0 }
 0x194   : > { %v4441_v35 = vpop.f32.mrb[79].mxu1  ;;  %v4505_v49 = vpop.f32.mrb[79].mxu0 }
 0x195   : > { %v6181_v45 = vadd.f32 %v4439_v36, %v2452_v59  ;;  %v6184_v18 = vadd.f32 %v4503_v19, %v6041_v54  ;;  %v4442_v53 = vadd.f32 %v4441_v35, %v4440_v28  ;;  %v4506_v9 = vadd.f32 %v4505_v49, %v4504_v27  ;;  %v5375_v54 = vld [vmem:[%s5465_s9 + $0x308] ss:$52 sps:$4 sm:$0xff]   ;;  %v5380_v28 = vld [vmem:[%s5465_s9 + $0x3d8] ss:$52 sps:$4 sm:$0xff]   ;;  %v5383_v49 = vld [vmem:[%s5465_s9 + $0x440] ss:$52 sps:$4 sm:$0xff]  }
 0x196   : > { %3215 = vmatmul.mubr.bf16.gmra.mrb[184].mxu1 %v5369_v42  ;;  %4940 = vmatmul.mubr.bf16.gmra.mrb[184].mxu0 %v5370_v16  ;;  %v5381_v35 = vld [vmem:[%s5465_s9 + $0x574] ss:$52 sps:$4 sm:$0xff]  }
 0x197   : > { %v6186_v25 = vadd.f32 %v4442_v53, %v2455_v22  ;;  %v6189_v11 = vadd.f32 %v4506_v9, %v6045_v31  ;;  %3222 = vmatprep.mubr.bf16.mxu1 %v5371_v38  ;;  %4943 = vmatprep.mubr.bf16.mxu0 %v5373_v47 }
 0x199   : > { %v4507_v17 = vpop.f32.mrb[80].mxu0  ;;  %v4571_v20 = vpop.f32.mrb[80].mxu1 }
 0x19a   : > { %v4508_v23 = vpop.f32.mrb[81].mxu0  ;;  %v4572_v51 = vpop.f32.mrb[81].mxu1 }
 0x19b   : > { %v4509_v21 = vadd.f32 %v4508_v23, %v4507_v17  ;;  %v4573_v30 = vadd.f32 %v4572_v51, %v4571_v20  ;;  %v4510_v60 = vpop.f32.mrb[82].mxu0  ;;  %v4574_v1 = vpop.f32.mrb[82].mxu1 }
 0x19c   : > { %v4511_v56 = vpop.f32.mrb[83].mxu0  ;;  %v4575_v63 = vpop.f32.mrb[83].mxu1 }
 0x19d   : > { %v6196_v31 = vadd.f32 %v4509_v21, %v6055_v29  ;;  %v6199_v8 = vadd.f32 %v4573_v30, %v6058_v32  ;;  %v4512_v10 = vadd.f32 %v4511_v56, %v4510_v60  ;;  %v4576_v5 = vadd.f32 %v4575_v63, %v4574_v1  ;;  %v5379_v32 = vld [vmem:[%s5465_s9 + $0x508] ss:$52 sps:$4 sm:$0xff]   ;;  %v5388_v63 = vld [vmem:[%s5465_s9 + $0x510] ss:$52 sps:$4 sm:$0xff]  }
 0x19e   : > { %3223 = vmatmul.mubr.bf16.gmra.mrb[188].mxu1 %v5374_v33  ;;  %4944 = vmatmul.mubr.bf16.gmra.mrb[188].mxu0 %v5375_v54  ;;  %v5385_v30 = vld [vmem:[%s5465_s9 + $0x4a8] ss:$52 sps:$4 sm:$0xff]  }
 0x19f   : > { %v6202_v42 = vadd.f32 %v4512_v10, %v6060_v37  ;;  %v6205_v16 = vadd.f32 %v4576_v5, %v6063_v39  ;;  %3230 = vmatprep.mubr.bf16.mxu1 %v5376_v2  ;;  %4947 = vmatprep.mubr.bf16.mxu0 %v5378_v24  ;;  %v5386_v56 = vld [vmem:[%s5465_s9 + $0x5dc] ss:$52 sps:$4 sm:$0xff]  }
 0x1a1   : > { %v4513_v59 = vpop.f32.mrb[84].mxu0  ;;  %v4577_v29 = vpop.f32.mrb[84].mxu1 }
 0x1a2   : > { %v4514_v36 = vpop.f32.mrb[85].mxu0  ;;  %v4578_v19 = vpop.f32.mrb[85].mxu1 }
 0x1a3   : > { %v4515_v27 = vadd.f32 %v4514_v36, %v4513_v59  ;;  %v4579_v38 = vadd.f32 %v4578_v19, %v4577_v29  ;;  %v4516_v47 = vpop.f32.mrb[86].mxu0  ;;  %v4580_v22 = vpop.f32.mrb[86].mxu1 }
 0x1a4   : > { %v4517_v53 = vpop.f32.mrb[87].mxu0  ;;  %v4581_v37 = vpop.f32.mrb[87].mxu1 }
 0x1a5   : > { %v6212_v39 = vadd.f32 %v4515_v27, %v6073_v3  ;;  %v6215_v9 = vadd.f32 %v4579_v38, %v6076_v7  ;;  %v4518_v17 = vadd.f32 %v4517_v53, %v4516_v47  ;;  %v4582_v20 = vadd.f32 %v4581_v37, %v4580_v22  ;;  %v5384_v7 = vld [vmem:[%s5465_s9 + $0x570] ss:$52 sps:$4 sm:$0xff]   ;;  %v5390_v38 = vld [vmem:[%s5465_s9 + $0x578] ss:$52 sps:$4 sm:$0xff]   ;;  %v5393_v37 = vld [vmem:[%s5465_s9 + $0x5e0] ss:$52 sps:$4 sm:$0xff]  }
 0x1a6   : > { %3231 = vmatmul.mubr.bf16.gmra.mrb[192].mxu1 %v5379_v32  ;;  %4948 = vmatmul.mubr.bf16.gmra.mrb[192].mxu0 %v5380_v28  ;;  %v5391_v53 = vld [vmem:[%s5465_s9 + $0x644] ss:$52 sps:$4 sm:$0xff]  }
 0x1a7   : > { %v6218_v23 = vadd.f32 %v4518_v17, %v6078_v61  ;;  %v6221_v51 = vadd.f32 %v4582_v20, %v6081_v6  ;;  %3238 = vmatprep.mubr.bf16.mxu1 %v5381_v35  ;;  %4951 = vmatprep.mubr.bf16.mxu0 %v5383_v49 }
 0x1a9   : > { %v4519_v33 = vpop.f32.mrb[88].mxu0  ;;  %v4583_v3 = vpop.f32.mrb[88].mxu1 }
 0x1aa   : > { %v4520_v54 = vpop.f32.mrb[89].mxu0  ;;  %v4584_v21 = vpop.f32.mrb[89].mxu1 }
 0x1ab   : > { %v4521_v60 = vadd.f32 %v4520_v54, %v4519_v33  ;;  %v4585_v1 = vadd.f32 %v4584_v21, %v4583_v3  ;;  %v4522_v2 = vpop.f32.mrb[90].mxu0  ;;  %v4586_v24 = vpop.f32.mrb[90].mxu1 }
 0x1ac   : > { %v4523_v10 = vpop.f32.mrb[91].mxu0  ;;  %v4587_v61 = vpop.f32.mrb[91].mxu1 }
 0x1ad   : > { %v6228_v6 = vadd.f32 %v4521_v60, %v6091_v41  ;;  %v6231_v5 = vadd.f32 %v4585_v1, %v6094_v44  ;;  %v4524_v59 = vadd.f32 %v4523_v10, %v4522_v2  ;;  %v4588_v29 = vadd.f32 %v4587_v61, %v4586_v24  ;;  %v5389_v44 = vld [vmem:[%s5465_s9 + $0x5d8] ss:$52 sps:$4 sm:$0xff]   ;;  %v5394_v1 = vld [vmem:[%s5465_s9 + $0x640] ss:$52 sps:$4 sm:$0xff]   ;;  %v5395_v2 = vld [vmem:[%s5465_s9 + $0x648] ss:$52 sps:$4 sm:$0xff]  }
 0x1ae   : > { %3239 = vmatmul.mubr.bf16.gmra.mrb[196].mxu1 %v5384_v7  ;;  %4952 = vmatmul.mubr.bf16.gmra.mrb[196].mxu0 %v5385_v30  ;;  %s3744_s9 = sshll.u32 %s6577_s16, 2 }
 0x1af   : > { %v6234_v36 = vadd.f32 %v4524_v59, %v6096_v0  ;;  %v6237_v19 = vadd.f32 %v4588_v29, %v6099_v46  ;;  %3246 = vmatprep.mubr.bf16.mxu1 %v5386_v56  ;;  %4955 = vmatprep.mubr.bf16.mxu0 %v5388_v63  ;;  %s6511_s13 = scalar_lea.vmem %s6575_s3, %s3744_s9 }
 0x1b1   : > { %v4525_v32 = vpop.f32.mrb[92].mxu0  ;;  %v4589_v41 = vpop.f32.mrb[92].mxu1 }
 0x1b2   : > { %v4526_v28 = vpop.f32.mrb[93].mxu0  ;;  %v4590_v27 = vpop.f32.mrb[93].mxu1 }
 0x1b3   : > { %v4527_v47 = vadd.f32 %v4526_v28, %v4525_v32  ;;  %v4591_v22 = vadd.f32 %v4590_v27, %v4589_v41  ;;  %v4528_v35 = vpop.f32.mrb[94].mxu0  ;;  %v4592_v49 = vpop.f32.mrb[94].mxu1 }
 0x1b4   : > { %v4529_v17 = vpop.f32.mrb[95].mxu0  ;;  %v4593_v0 = vpop.f32.mrb[95].mxu1 }
 0x1b5   : > { %v6244_v46 = vadd.f32 %v4527_v47, %v6109_v13  ;;  %v6247_v20 = vadd.f32 %v4591_v22, %v6112_v14  ;;  %v4530_v33 = vadd.f32 %v4529_v17, %v4528_v35  ;;  %v4594_v3 = vadd.f32 %v4593_v0, %v4592_v49 }
 0x1b6   : > { %3247 = vmatmul.mubr.bf16.gmra.mrb[200].mxu1 %v5389_v44  ;;  %4956 = vmatmul.mubr.bf16.gmra.mrb[200].mxu0 %v5390_v38 }
 0x1b7   : > { %v6250_v54 = vadd.f32 %v4530_v33, %v6114_v15  ;;  %v6253_v21 = vadd.f32 %v4594_v3, %v6117_v48  ;;  %3254 = vmatprep.mubr.bf16.mxu1 %v5391_v53  ;;  %4959 = vmatprep.mubr.bf16.mxu0 %v5393_v37 }
 0x1b9   : > { %v4531_v7 = vpop.f32.mrb[96].mxu0  ;;  %v4595_v30 = vpop.f32.mrb[96].mxu1 }
 0x1ba   : > { %v4532_v60 = vpop.f32.mrb[97].mxu0  ;;  %v4596_v13 = vpop.f32.mrb[97].mxu1 }
 0x1bb   : > { %v4533_v14 = vadd.f32 %v4532_v60, %v4531_v7  ;;  %v4597_v24 = vadd.f32 %v4596_v13, %v4595_v30  ;;  %v4534_v56 = vpop.f32.mrb[98].mxu0  ;;  %v4598_v63 = vpop.f32.mrb[98].mxu1 }
 0x1bc   : > { %v4535_v10 = vpop.f32.mrb[99].mxu0  ;;  %v4599_v61 = vpop.f32.mrb[99].mxu1 }
 0x1bd   : > { %v6258_v15 = vadd.f32 %v4533_v14, %v6127_v52  ;;  %v6261_v48 = vadd.f32 %v4597_v24, %v6130_v57  ;;  %v4536_v59 = vadd.f32 %v4535_v10, %v4534_v56  ;;  %v4600_v29 = vadd.f32 %v4599_v61, %v4598_v63 }
 0x1be   : > { %3255 = vmatmul.mubr.bf16.gmra.mrb[204].mxu1 %v5394_v1  ;;  %4960 = vmatmul.mubr.bf16.gmra.mrb[204].mxu0 %v5395_v2 }
 0x1bf   : > { %v6264_v32 = vadd.f32 %v4536_v59, %v6132_v62  ;;  %v6267_v41 = vadd.f32 %v4600_v29, %v6135_v50 }
 0x1c1   : > { %v4537_v28 = vpop.f32.mrb[100].mxu0  ;;  %v4601_v27 = vpop.f32.mrb[100].mxu1 }
 0x1c2   : > { %v4538_v44 = vpop.f32.mrb[101].mxu0  ;;  %v4602_v38 = vpop.f32.mrb[101].mxu1 }
 0x1c3   : > { %v4539_v47 = vadd.f32 %v4538_v44, %v4537_v28  ;;  %v4603_v52 = vadd.f32 %v4602_v38, %v4601_v27  ;;  %v4540_v22 = vpop.f32.mrb[102].mxu0  ;;  %v4604_v35 = vpop.f32.mrb[102].mxu1 }
 0x1c4   : > { %v4541_v57 = vpop.f32.mrb[103].mxu0  ;;  %v4605_v49 = vpop.f32.mrb[103].mxu1 }
 0x1c5   : > { %v6270_v53 = vadd.f32 %v4539_v47, %v6145_v34  ;;  %v6273_v37 = vadd.f32 %v4603_v52, %v6148_v12  ;;  %v4542_v62 = vadd.f32 %v4541_v57, %v4540_v22  ;;  %v4606_v17 = vadd.f32 %v4605_v49, %v4604_v35 }
 0x1c7   : > { %v6276_v50 = vadd.f32 %v4542_v62, %v6150_v26  ;;  %v6279_v0 = vadd.f32 %v4606_v17, %v6153_v40 }
 0x1c9   : > { %v4543_v33 = vpop.f32.mrb[104].mxu0  ;;  %v4607_v3 = vpop.f32.mrb[104].mxu1 }
 0x1ca   : > { %v4544_v7 = vpop.f32.mrb[105].mxu0  ;;  %v4608_v30 = vpop.f32.mrb[105].mxu1 }
 0x1cb   : > { %v4545_v60 = vadd.f32 %v4544_v7, %v4543_v33  ;;  %v4609_v13 = vadd.f32 %v4608_v30, %v4607_v3  ;;  %v4546_v1 = vpop.f32.mrb[106].mxu0  ;;  %v4610_v34 = vpop.f32.mrb[106].mxu1 }
 0x1cc   : > { %v4547_v2 = vpop.f32.mrb[107].mxu0  ;;  %v4611_v14 = vpop.f32.mrb[107].mxu1 }
 0x1cd   : > { %v6282_v12 = vadd.f32 %v4545_v60, %v6163_v4  ;;  %v6285_v24 = vadd.f32 %v4609_v13, %v6166_v43  ;;  %v4548_v26 = vadd.f32 %v4547_v2, %v4546_v1  ;;  %v4612_v56 = vadd.f32 %v4611_v14, %v4610_v34 }
 0x1cf   : > { %v6288_v40 = vadd.f32 %v4548_v26, %v6168_v55  ;;  %v6291_v63 = vadd.f32 %v4612_v56, %v6171_v58 }
 0x1d1   : > { %v4549_v10 = vpop.f32.mrb[108].mxu0  ;;  %v4613_v61 = vpop.f32.mrb[108].mxu1 }
 0x1d2   : > { %v4550_v59 = vpop.f32.mrb[109].mxu0  ;;  %v4614_v29 = vpop.f32.mrb[109].mxu1 }
 0x1d3   : > { %v4551_v28 = vadd.f32 %v4550_v59, %v4549_v10  ;;  %v4615_v27 = vadd.f32 %v4614_v29, %v4613_v61  ;;  %v4552_v44 = vpop.f32.mrb[110].mxu0  ;;  %v4616_v4 = vpop.f32.mrb[110].mxu1 }
 0x1d4   : > { %v4553_v38 = vpop.f32.mrb[111].mxu0  ;;  %v4617_v47 = vpop.f32.mrb[111].mxu1 }
 0x1d5   : > { %v6294_v43 = vadd.f32 %v4551_v28, %v6181_v45  ;;  %v6297_v52 = vadd.f32 %v4615_v27, %v6184_v18  ;;  %v4554_v55 = vadd.f32 %v4553_v38, %v4552_v44  ;;  %v4618_v22 = vadd.f32 %v4617_v47, %v4616_v4 }
 0x1d7   : > { %v6300_v58 = vadd.f32 %v4554_v55, %v6186_v25  ;;  %v6303_v35 = vadd.f32 %v4618_v22, %v6189_v11 }
 0x1d9   : > { %v4619_v57 = vpop.f32.mrb[112].mxu1  ;;  %v4683_v49 = vpop.f32.mrb[112].mxu0 }
 0x1da   : > { %v4620_v62 = vpop.f32.mrb[113].mxu1  ;;  %v4684_v17 = vpop.f32.mrb[113].mxu0 }
 0x1db   : > { %v4621_v33 = vadd.f32 %v4620_v62, %v4619_v57  ;;  %v4685_v3 = vadd.f32 %v4684_v17, %v4683_v49  ;;  %v4622_v7 = vpop.f32.mrb[114].mxu1  ;;  %v4686_v45 = vpop.f32.mrb[114].mxu0 }
 0x1dc   : > { %v4623_v30 = vpop.f32.mrb[115].mxu1  ;;  %v4687_v60 = vpop.f32.mrb[115].mxu0 }
 0x1dd   : > { %v6306_v18 = vadd.f32 %v4621_v33, %v6196_v31  ;;  %v6309_v13 = vadd.f32 %v4685_v3, %v6199_v8  ;;  %v4624_v25 = vadd.f32 %v4623_v30, %v4622_v7  ;;  %v4688_v1 = vadd.f32 %v4687_v60, %v4686_v45 }
 0x1df   : > { %v6312_v11 = vadd.f32 %v4624_v25, %v6202_v42  ;;  %v6315_v34 = vadd.f32 %v4688_v1, %v6205_v16 }
 0x1e1   : > { %v4625_v2 = vpop.f32.mrb[116].mxu1  ;;  %v4689_v14 = vpop.f32.mrb[116].mxu0 }
 0x1e2   : > { %v4626_v26 = vpop.f32.mrb[117].mxu1  ;;  %v4690_v56 = vpop.f32.mrb[117].mxu0 }
 0x1e3   : > { %v4627_v10 = vadd.f32 %v4626_v26, %v4625_v2  ;;  %v4691_v61 = vadd.f32 %v4690_v56, %v4689_v14  ;;  %v4628_v59 = vpop.f32.mrb[118].mxu1  ;;  %v4692_v31 = vpop.f32.mrb[118].mxu0 }
 0x1e4   : > { %v4629_v29 = vpop.f32.mrb[119].mxu1  ;;  %v4693_v28 = vpop.f32.mrb[119].mxu0 }
 0x1e5   : > { %v6318_v8 = vadd.f32 %v4627_v10, %v6212_v39  ;;  %v6321_v27 = vadd.f32 %v4691_v61, %v6215_v9  ;;  %v4630_v42 = vadd.f32 %v4629_v29, %v4628_v59  ;;  %v4694_v44 = vadd.f32 %v4693_v28, %v4692_v31 }
 0x1e7   : > { %v6324_v16 = vadd.f32 %v4630_v42, %v6218_v23  ;;  %v6327_v4 = vadd.f32 %v4694_v44, %v6221_v51 }
 0x1e9   : > { %v4631_v38 = vpop.f32.mrb[120].mxu1  ;;  %v4695_v47 = vpop.f32.mrb[120].mxu0 }
 0x1ea   : > { %v4632_v55 = vpop.f32.mrb[121].mxu1  ;;  %v4696_v22 = vpop.f32.mrb[121].mxu0 }
 0x1eb   : > { %v4633_v57 = vadd.f32 %v4632_v55, %v4631_v38  ;;  %v4697_v49 = vadd.f32 %v4696_v22, %v4695_v47  ;;  %v4634_v62 = vpop.f32.mrb[122].mxu1  ;;  %v4698_v39 = vpop.f32.mrb[122].mxu0 }
 0x1ec   : > { %v4635_v17 = vpop.f32.mrb[123].mxu1  ;;  %v4699_v33 = vpop.f32.mrb[123].mxu0 }
 0x1ed   : > { %v6330_v9 = vadd.f32 %v4633_v57, %v6228_v6  ;;  %v6333_v3 = vadd.f32 %v4697_v49, %v6231_v5  ;;  %v4636_v23 = vadd.f32 %v4635_v17, %v4634_v62  ;;  %v4700_v7 = vadd.f32 %v4699_v33, %v4698_v39 }
 0x1ef   : > { %v6336_v51 = vadd.f32 %v4636_v23, %v6234_v36  ;;  %v6339_v45 = vadd.f32 %v4700_v7, %v6237_v19 }
 0x1f1   : > { %v4637_v30 = vpop.f32.mrb[124].mxu1  ;;  %v4701_v60 = vpop.f32.mrb[124].mxu0 }
 0x1f2   : > { %v4638_v25 = vpop.f32.mrb[125].mxu1  ;;  %v4702_v1 = vpop.f32.mrb[125].mxu0 }
 0x1f3   : > { %v4639_v2 = vadd.f32 %v4638_v25, %v4637_v30  ;;  %v4703_v14 = vadd.f32 %v4702_v1, %v4701_v60  ;;  %v4640_v26 = vpop.f32.mrb[126].mxu1  ;;  %v4704_v6 = vpop.f32.mrb[126].mxu0 }
 0x1f4   : > { %v4641_v56 = vpop.f32.mrb[127].mxu1  ;;  %v4705_v10 = vpop.f32.mrb[127].mxu0 }
 0x1f5   : > { %v6342_v5 = vadd.f32 %v4639_v2, %v6244_v46  ;;  %v6345_v61 = vadd.f32 %v4703_v14, %v6247_v20  ;;  %v4642_v36 = vadd.f32 %v4641_v56, %v4640_v26  ;;  %v4706_v59 = vadd.f32 %v4705_v10, %v4704_v6 }
 0x1f7   : > { %v6348_v19 = vadd.f32 %v4642_v36, %v6250_v54  ;;  %v6351_v31 = vadd.f32 %v4706_v59, %v6253_v21 }
 0x1f9   : > { %v4643_v29 = vpop.f32.mrb[128].mxu1  ;;  %v4707_v28 = vpop.f32.mrb[128].mxu0 }
 0x1fa   : > { %v4644_v42 = vpop.f32.mrb[129].mxu1  ;;  %v4708_v44 = vpop.f32.mrb[129].mxu0 }
 0x1fb   : > { %v4645_v38 = vadd.f32 %v4644_v42, %v4643_v29  ;;  %v4709_v47 = vadd.f32 %v4708_v44, %v4707_v28  ;;  %v4646_v55 = vpop.f32.mrb[130].mxu1  ;;  %v4710_v46 = vpop.f32.mrb[130].mxu0 }
 0x1fc   : > { %v4647_v22 = vpop.f32.mrb[131].mxu1  ;;  %v4711_v57 = vpop.f32.mrb[131].mxu0 }
 0x1fd   : > { %v6354_v20 = vadd.f32 %v4645_v38, %v6258_v15  ;;  %v6357_v49 = vadd.f32 %v4709_v47, %v6261_v48  ;;  %v4648_v54 = vadd.f32 %v4647_v22, %v4646_v55  ;;  %v4712_v62 = vadd.f32 %v4711_v57, %v4710_v46 }
 0x1ff   : > { %v6360_v21 = vadd.f32 %v4648_v54, %v6264_v32  ;;  %v6363_v39 = vadd.f32 %v4712_v62, %v6267_v41 }
 0x201   : > { %v4649_v17 = vpop.f32.mrb[132].mxu1  ;;  %v4713_v33 = vpop.f32.mrb[132].mxu0 }
 0x202   : > { %v4650_v23 = vpop.f32.mrb[133].mxu1  ;;  %v4714_v7 = vpop.f32.mrb[133].mxu0 }
 0x203   : > { %v4651_v30 = vadd.f32 %v4650_v23, %v4649_v17  ;;  %v4715_v60 = vadd.f32 %v4714_v7, %v4713_v33  ;;  %v4652_v25 = vpop.f32.mrb[134].mxu1  ;;  %v4716_v15 = vpop.f32.mrb[134].mxu0 }
 0x204   : > { %v4653_v1 = vpop.f32.mrb[135].mxu1  ;;  %v4717_v2 = vpop.f32.mrb[135].mxu0 }
 0x205   : > { %v6366_v48 = vadd.f32 %v4651_v30, %v6270_v53  ;;  %v6369_v14 = vadd.f32 %v4715_v60, %v6273_v37  ;;  %v4654_v32 = vadd.f32 %v4653_v1, %v4652_v25  ;;  %v4718_v26 = vadd.f32 %v4717_v2, %v4716_v15 }
 0x207   : > { %v6372_v41 = vadd.f32 %v4654_v32, %v6276_v50  ;;  %v6375_v6 = vadd.f32 %v4718_v26, %v6279_v0 }
 0x209   : > { %v4655_v56 = vpop.f32.mrb[136].mxu1  ;;  %v4719_v10 = vpop.f32.mrb[136].mxu0 }
 0x20a   : > { %v4656_v36 = vpop.f32.mrb[137].mxu1  ;;  %v4720_v59 = vpop.f32.mrb[137].mxu0 }
 0x20b   : > { %v4657_v29 = vadd.f32 %v4656_v36, %v4655_v56  ;;  %v4721_v28 = vadd.f32 %v4720_v59, %v4719_v10  ;;  %v4658_v42 = vpop.f32.mrb[138].mxu1  ;;  %v4722_v53 = vpop.f32.mrb[138].mxu0 }
 0x20c   : > { %v4659_v44 = vpop.f32.mrb[139].mxu1  ;;  %v4723_v38 = vpop.f32.mrb[139].mxu0 }
 0x20d   : > { %v6378_v37 = vadd.f32 %v4657_v29, %v6282_v12  ;;  %v6381_v47 = vadd.f32 %v4721_v28, %v6285_v24  ;;  %v4660_v50 = vadd.f32 %v4659_v44, %v4658_v42  ;;  %v4724_v55 = vadd.f32 %v4723_v38, %v4722_v53 }
 0x20f   : > { %v6384_v0 = vadd.f32 %v4660_v50, %v6288_v40  ;;  %v6387_v46 = vadd.f32 %v4724_v55, %v6291_v63 }
 0x211   : > { %v4661_v22 = vpop.f32.mrb[140].mxu1  ;;  %v4725_v57 = vpop.f32.mrb[140].mxu0 }
 0x212   : > { %v4662_v54 = vpop.f32.mrb[141].mxu1  ;;  %v4726_v62 = vpop.f32.mrb[141].mxu0 }
 0x213   : > { %v4663_v17 = vadd.f32 %v4662_v54, %v4661_v22  ;;  %v4727_v33 = vadd.f32 %v4726_v62, %v4725_v57  ;;  %v4664_v23 = vpop.f32.mrb[142].mxu1  ;;  %v4728_v12 = vpop.f32.mrb[142].mxu0 }
 0x214   : > { %v4665_v7 = vpop.f32.mrb[143].mxu1  ;;  %v4729_v30 = vpop.f32.mrb[143].mxu0 }
 0x215   : > { %v6390_v24 = vadd.f32 %v4663_v17, %v6294_v43  ;;  %v6393_v60 = vadd.f32 %v4727_v33, %v6297_v52  ;;  %v4666_v40 = vadd.f32 %v4665_v7, %v4664_v23  ;;  %v4730_v25 = vadd.f32 %v4729_v30, %v4728_v12 }
 0x217   : > { %v6396_v63 = vadd.f32 %v4666_v40, %v6300_v58  ;;  %v6399_v15 = vadd.f32 %v4730_v25, %v6303_v35 }
 0x219   : > { %v4731_v1 = vpop.f32.mrb[144].mxu0  ;;  %v4795_v2 = vpop.f32.mrb[144].mxu1 }
 0x21a   : > { %v4732_v32 = vpop.f32.mrb[145].mxu0  ;;  %v4796_v26 = vpop.f32.mrb[145].mxu1 }
 0x21b   : > { %v4733_v56 = vadd.f32 %v4732_v32, %v4731_v1  ;;  %v4797_v10 = vadd.f32 %v4796_v26, %v4795_v2  ;;  %v4734_v36 = vpop.f32.mrb[146].mxu0  ;;  %v4798_v43 = vpop.f32.mrb[146].mxu1 }
 0x21c   : > { %v4735_v59 = vpop.f32.mrb[147].mxu0  ;;  %v4799_v29 = vpop.f32.mrb[147].mxu1 }
 0x21d   : > { %v6402_v52 = vadd.f32 %v4733_v56, %v6306_v18  ;;  %v4736_v28 = vadd.f32 %v4735_v59, %v4734_v36  ;;  %v4800_v42 = vadd.f32 %v4799_v29, %v4798_v43  ;;  %v6405_v58 = vadd.f32 %v4797_v10, %v6309_v13 }
 0x21f   : > { %v6408_v35 = vadd.f32 %v4736_v28, %v6312_v11  ;;  %v6411_v53 = vadd.f32 %v4800_v42, %v6315_v34 }
 0x221   : > { %v4737_v44 = vpop.f32.mrb[148].mxu0  ;;  %v4801_v38 = vpop.f32.mrb[148].mxu1 }
 0x222   : > { %v4738_v50 = vpop.f32.mrb[149].mxu0  ;;  %v4802_v55 = vpop.f32.mrb[149].mxu1 }
 0x223   : > { %v4739_v22 = vadd.f32 %v4738_v50, %v4737_v44  ;;  %v4803_v57 = vadd.f32 %v4802_v55, %v4801_v38  ;;  %v4740_v54 = vpop.f32.mrb[150].mxu0  ;;  %v4804_v18 = vpop.f32.mrb[150].mxu1 }
 0x224   : > { %v4741_v62 = vpop.f32.mrb[151].mxu0  ;;  %v4805_v17 = vpop.f32.mrb[151].mxu1 }
 0x225   : > { %v6414_v33 = vadd.f32 %v4739_v22, %v6318_v8  ;;  %v4742_v13 = vadd.f32 %v4741_v62, %v4740_v54  ;;  %v4806_v23 = vadd.f32 %v4805_v17, %v4804_v18  ;;  %v6417_v11 = vadd.f32 %v4803_v57, %v6321_v27 }
 0x227   : > { %v6420_v34 = vadd.f32 %v4742_v13, %v6324_v16  ;;  %v6423_v12 = vadd.f32 %v4806_v23, %v6327_v4 }
 0x229   : > { %v4743_v7 = vpop.f32.mrb[152].mxu0  ;;  %v4807_v30 = vpop.f32.mrb[152].mxu1 }
 0x22a   : > { %v4744_v40 = vpop.f32.mrb[153].mxu0  ;;  %v4808_v25 = vpop.f32.mrb[153].mxu1 }
 0x22b   : > { %v4745_v1 = vadd.f32 %v4744_v40, %v4743_v7  ;;  %v4809_v2 = vadd.f32 %v4808_v25, %v4807_v30  ;;  %v4746_v32 = vpop.f32.mrb[154].mxu0  ;;  %v4810_v8 = vpop.f32.mrb[154].mxu1 }
 0x22c   : > { %v4747_v26 = vpop.f32.mrb[155].mxu0  ;;  %v4811_v56 = vpop.f32.mrb[155].mxu1 }
 0x22d   : > { %v6426_v10 = vadd.f32 %v4745_v1, %v6330_v9  ;;  %v4748_v27 = vadd.f32 %v4747_v26, %v4746_v32  ;;  %v4812_v36 = vadd.f32 %v4811_v56, %v4810_v8  ;;  %v6429_v16 = vadd.f32 %v4809_v2, %v6333_v3 }
 0x22f   : > { %v6432_v4 = vadd.f32 %v4748_v27, %v6336_v51  ;;  %v6435_v43 = vadd.f32 %v4812_v36, %v6339_v45 }
 0x231   : > { %v4749_v59 = vpop.f32.mrb[156].mxu0  ;;  %v4813_v29 = vpop.f32.mrb[156].mxu1 }
 0x232   : > { %v4750_v28 = vpop.f32.mrb[157].mxu0  ;;  %v4814_v42 = vpop.f32.mrb[157].mxu1 }
 0x233   : > { %v4751_v44 = vadd.f32 %v4750_v28, %v4749_v59  ;;  %v4815_v38 = vadd.f32 %v4814_v42, %v4813_v29  ;;  %v4752_v50 = vpop.f32.mrb[158].mxu0  ;;  %v4816_v9 = vpop.f32.mrb[158].mxu1 }
 0x234   : > { %v4753_v55 = vpop.f32.mrb[159].mxu0  ;;  %v4817_v22 = vpop.f32.mrb[159].mxu1 }
 0x235   : > { %v6438_v57 = vadd.f32 %v4751_v44, %v6342_v5  ;;  %v4754_v3 = vadd.f32 %v4753_v55, %v4752_v50  ;;  %v4818_v54 = vadd.f32 %v4817_v22, %v4816_v9  ;;  %v6441_v51 = vadd.f32 %v4815_v38, %v6345_v61 }
 0x237   : > { %v6444_v45 = vadd.f32 %v4754_v3, %v6348_v19  ;;  %v6447_v18 = vadd.f32 %v4818_v54, %v6351_v31 }
 0x239   : > { %v4755_v62 = vpop.f32.mrb[160].mxu0  ;;  %v4819_v17 = vpop.f32.mrb[160].mxu1 }
 0x23a   : > { %v4756_v13 = vpop.f32.mrb[161].mxu0  ;;  %v4820_v23 = vpop.f32.mrb[161].mxu1 }
 0x23b   : > { %v4757_v7 = vadd.f32 %v4756_v13, %v4755_v62  ;;  %v4821_v30 = vadd.f32 %v4820_v23, %v4819_v17  ;;  %v4758_v40 = vpop.f32.mrb[162].mxu0  ;;  %v4822_v5 = vpop.f32.mrb[162].mxu1 }
 0x23c   : > { %v4759_v25 = vpop.f32.mrb[163].mxu0  ;;  %v4823_v1 = vpop.f32.mrb[163].mxu1 }
 0x23d   : > { %v6450_v2 = vadd.f32 %v4757_v7, %v6354_v20  ;;  %v4760_v61 = vadd.f32 %v4759_v25, %v4758_v40  ;;  %v4824_v32 = vadd.f32 %v4823_v1, %v4822_v5  ;;  %v6453_v19 = vadd.f32 %v4821_v30, %v6357_v49 }
 0x23f   : > { %v6456_v31 = vadd.f32 %v4760_v61, %v6360_v21  ;;  %v6459_v8 = vadd.f32 %v4824_v32, %v6363_v39 }
 0x241   : > { %v4761_v26 = vpop.f32.mrb[164].mxu0  ;;  %v4825_v56 = vpop.f32.mrb[164].mxu1 }
 0x242   : > { %v4762_v27 = vpop.f32.mrb[165].mxu0  ;;  %v4826_v36 = vpop.f32.mrb[165].mxu1 }
 0x243   : > { %v4763_v59 = vadd.f32 %v4762_v27, %v4761_v26  ;;  %v4827_v29 = vadd.f32 %v4826_v36, %v4825_v56  ;;  %v4764_v28 = vpop.f32.mrb[166].mxu0  ;;  %v4828_v20 = vpop.f32.mrb[166].mxu1 }
 0x244   : > { %v4765_v42 = vpop.f32.mrb[167].mxu0  ;;  %v4829_v44 = vpop.f32.mrb[167].mxu1 }
 0x245   : > { %v6462_v38 = vadd.f32 %v4763_v59, %v6366_v48  ;;  %v4766_v49 = vadd.f32 %v4765_v42, %v4764_v28  ;;  %v4830_v50 = vadd.f32 %v4829_v44, %v4828_v20  ;;  %v6465_v21 = vadd.f32 %v4827_v29, %v6369_v14 }
 0x247   : > { %v6468_v39 = vadd.f32 %v4766_v49, %v6372_v41  ;;  %v6471_v9 = vadd.f32 %v4830_v50, %v6375_v6 }
 0x249   : > { %v4767_v55 = vpop.f32.mrb[168].mxu0  ;;  %v4831_v22 = vpop.f32.mrb[168].mxu1 }
 0x24a   : > { %v4768_v3 = vpop.f32.mrb[169].mxu0  ;;  %v4832_v54 = vpop.f32.mrb[169].mxu1 }
 0x24b   : > { %v4769_v62 = vadd.f32 %v4768_v3, %v4767_v55  ;;  %v4833_v17 = vadd.f32 %v4832_v54, %v4831_v22  ;;  %v4770_v13 = vpop.f32.mrb[170].mxu0  ;;  %v4834_v48 = vpop.f32.mrb[170].mxu1 }
 0x24c   : > { %v4771_v23 = vpop.f32.mrb[171].mxu0  ;;  %v4835_v7 = vpop.f32.mrb[171].mxu1 }
 0x24d   : > { %v6474_v30 = vadd.f32 %v4769_v62, %v6378_v37  ;;  %v4772_v14 = vadd.f32 %v4771_v23, %v4770_v13  ;;  %v4836_v40 = vadd.f32 %v4835_v7, %v4834_v48  ;;  %v6477_v41 = vadd.f32 %v4833_v17, %v6381_v47 }
 0x24f   : > { %v6480_v6 = vadd.f32 %v4772_v14, %v6384_v0  ;;  %v6483_v5 = vadd.f32 %v4836_v40, %v6387_v46 }
 0x251   : > { %v4773_v25 = vpop.f32.mrb[172].mxu0  ;;  %v4837_v1 = vpop.f32.mrb[172].mxu1 }
 0x252   : > { %v4774_v61 = vpop.f32.mrb[173].mxu0  ;;  %v4838_v32 = vpop.f32.mrb[173].mxu1 }
 0x253   : > { %v4775_v26 = vadd.f32 %v4774_v61, %v4773_v25  ;;  %v4839_v56 = vadd.f32 %v4838_v32, %v4837_v1  ;;  %v4776_v27 = vpop.f32.mrb[174].mxu0  ;;  %v4840_v37 = vpop.f32.mrb[174].mxu1 }
 0x254   : > { %v4777_v36 = vpop.f32.mrb[175].mxu0  ;;  %v4841_v59 = vpop.f32.mrb[175].mxu1 }
 0x255   : > { %v6486_v29 = vadd.f32 %v4775_v26, %v6390_v24  ;;  %v4778_v47 = vadd.f32 %v4777_v36, %v4776_v27  ;;  %v4842_v28 = vadd.f32 %v4841_v59, %v4840_v37  ;;  %v6489_v0 = vadd.f32 %v4839_v56, %v6393_v60 }
 0x257   : > { %v6492_v46 = vadd.f32 %v4778_v47, %v6396_v63  ;;  %v6495_v20 = vadd.f32 %v4842_v28, %v6399_v15 }
 0x259   : > { %v4843_v42 = vpop.f32.mrb[176].mxu1  ;;  %v4933_v44 = vpop.f32.mrb[176].mxu0 }
 0x25a   : > { %v3306_v49 = vadd.f32 %v4933_v44, %v6417_v11  ;;  %v4844_v50 = vpop.f32.mrb[177].mxu1  ;;  %v3297_v55 = vpop.f32.mrb[177].mxu0 }
 0x25b   : > { %v4845_v24 = vadd.f32 %v4844_v50, %v4843_v42  ;;  %v3298_v22 = vadd.f32 %v3297_v55, %v6405_v58  ;;  %v4846_v3 = vpop.f32.mrb[178].mxu1  ;;  %v4934_v54 = vpop.f32.mrb[178].mxu0 }
 0x25c   : > { %v3458_v60 = vmul.f32 0.01, %v3306_v49  ;;  %v3309_v62 = vadd.f32 %v4934_v54, %v6423_v12  ;;  %v4847_v63 = vpop.f32.mrb[179].mxu1  ;;  %v3300_v17 = vpop.f32.mrb[179].mxu0  ;;  %vm3426_vm0 = vcmp.ge.f32.partialorder %v3306_v49, 0.0 }
 0x25d   : > { %v3456_v15 = vmul.f32 0.01, %v3298_v22  ;;  %v4848_v13 = vadd.f32 %v4847_v63, %v4846_v3  ;;  %v3301_v48 = vadd.f32 %v3300_v17, %v6411_v53  ;;  %vm3424_vm1 = vcmp.ge.f32.partialorder %v3298_v22, 0.0 }
 0x25e   : > { %vm3427_vm2 = vcmp.ge.f32.partialorder %v3309_v62, 0.0  ;;  %v3459_v11 = vmul.f32 0.01, %v3309_v62  ;;  %v6503_v23 = vadd.f32 %v4845_v24, %v6402_v52  ;;  %v3490_v12 = vsel %vm3426_vm0, %v3306_v49, %v3458_v60 }
 0x25f   : > { %vm3425_vm3 = vcmp.ge.f32.partialorder %v3301_v48, 0.0  ;;  %v3457_v58 = vmul.f32 0.01, %v3301_v48  ;;  %v6506_v7 = vadd.f32 %v4848_v13, %v6408_v35  ;;  %v3488_v14 = vsel %vm3424_vm1, %v3298_v22, %v3456_v15 }
 0x260   : > { %v3491_v53 = vsel %vm3427_vm2, %v3309_v62, %v3459_v11 }
 0x261   : > { %v4132_v40 = vpack.c.bf16 %v3491_v53, %v3490_v12  ;;  %v3489_v25 = vsel %vm3425_vm3, %v3301_v48, %v3457_v58  ;;  %v4849_v1 = vpop.f32.mrb[180].mxu1  ;;  %v4937_v52 = vpop.f32.mrb[180].mxu0 }
 0x262   : > { %v4127_v61 = vpack.c.bf16 %v3489_v25, %v3488_v14  ;;  %v3322_v32 = vadd.f32 %v4937_v52, %v6441_v51  ;;  %v4850_v26 = vpop.f32.mrb[181].mxu1  ;;  %v3313_v35 = vpop.f32.mrb[181].mxu0 }
 0x263   : > { %4204 = vst [vmem:[%s6511_s13 + $0x8] sm:$0xff] %v4132_v40   ;;  %v4851_v56 = vadd.f32 %v4850_v26, %v4849_v1  ;;  %v3314_v27 = vadd.f32 %v3313_v35, %v6429_v16  ;;  %v4852_v37 = vpop.f32.mrb[182].mxu1  ;;  %v4938_v36 = vpop.f32.mrb[182].mxu0 }
 0x264   : > { %4128 = vst [vmem:[%s6511_s13] sm:$0xff] %v4127_v61   ;;  %v3462_v59 = vmul.f32 0.01, %v3322_v32  ;;  %v3325_v47 = vadd.f32 %v4938_v36, %v6447_v18  ;;  %v4853_v28 = vpop.f32.mrb[183].mxu1  ;;  %v3316_v42 = vpop.f32.mrb[183].mxu0  ;;  %vm3430_vm4 = vcmp.ge.f32.partialorder %v3322_v32, 0.0 }
 0x265   : > { %v3460_v44 = vmul.f32 0.01, %v3314_v27  ;;  %v4854_v49 = vadd.f32 %v4853_v28, %v4852_v37  ;;  %v3317_v50 = vadd.f32 %v3316_v42, %v6435_v43  ;;  %vm3428_vm5 = vcmp.ge.f32.partialorder %v3314_v27, 0.0 }
 0x266   : > { %vm3431_vm6 = vcmp.ge.f32.partialorder %v3325_v47, 0.0  ;;  %v3463_v51 = vmul.f32 0.01, %v3325_v47  ;;  %v6520_v55 = vadd.f32 %v4851_v56, %v6414_v33  ;;  %v3494_v18 = vsel %vm3430_vm4, %v3322_v32, %v3462_v59 }
 0x267   : > { %vm3429_vm7 = vcmp.ge.f32.partialorder %v3317_v50, 0.0  ;;  %v3461_v16 = vmul.f32 0.01, %v3317_v50  ;;  %v6523_v24 = vadd.f32 %v4854_v49, %v6420_v34  ;;  %v3492_v3 = vsel %vm3428_vm5, %v3314_v27, %v3460_v44 }
 0x268   : > { %v3495_v22 = vsel %vm3431_vm6, %v3325_v47, %v3463_v51 }
 0x269   : > { %v4142_v54 = vpack.c.bf16 %v3495_v22, %v3494_v18  ;;  %v3493_v60 = vsel %vm3429_vm7, %v3317_v50, %v3461_v16  ;;  %v4855_v62 = vpop.f32.mrb[184].mxu1  ;;  %v4941_v43 = vpop.f32.mrb[184].mxu0 }
 0x26a   : > { %v4137_v63 = vpack.c.bf16 %v3493_v60, %v3492_v3  ;;  %v3338_v17 = vadd.f32 %v4941_v43, %v6465_v21  ;;  %v4856_v15 = vpop.f32.mrb[185].mxu1  ;;  %v3329_v13 = vpop.f32.mrb[185].mxu0 }
 0x26b   : > { %4206 = vst [vmem:[%s6511_s13 + $0x18] sm:$0xff] %v4142_v54   ;;  %v4857_v33 = vadd.f32 %v4856_v15, %v4855_v62  ;;  %v3330_v48 = vadd.f32 %v3329_v13, %v6453_v19  ;;  %v4858_v11 = vpop.f32.mrb[186].mxu1  ;;  %v4942_v34 = vpop.f32.mrb[186].mxu0 }
 0x26c   : > { %4205 = vst [vmem:[%s6511_s13 + $0x10] sm:$0xff] %v4137_v63   ;;  %v3466_v58 = vmul.f32 0.01, %v3338_v17  ;;  %v3341_v12 = vadd.f32 %v4942_v34, %v6471_v9  ;;  %v4859_v53 = vpop.f32.mrb[187].mxu1  ;;  %v3332_v14 = vpop.f32.mrb[187].mxu0  ;;  %vm3434_vm8 = vcmp.ge.f32.partialorder %v3338_v17, 0.0 }
 0x26d   : > { %v3464_v40 = vmul.f32 0.01, %v3330_v48  ;;  %v4860_v25 = vadd.f32 %v4859_v53, %v4858_v11  ;;  %v3333_v1 = vadd.f32 %v3332_v14, %v6459_v8  ;;  %vm3432_vm9 = vcmp.ge.f32.partialorder %v3330_v48, 0.0 }
 0x26e   : > { %vm3435_vm10 = vcmp.ge.f32.partialorder %v3341_v12, 0.0  ;;  %v3467_v21 = vmul.f32 0.01, %v3341_v12  ;;  %v6532_v52 = vadd.f32 %v4857_v33, %v6426_v10  ;;  %v3498_v9 = vsel %vm3434_vm8, %v3338_v17, %v3466_v58 }
 0x26f   : > { %vm3433_vm11 = vcmp.ge.f32.partialorder %v3333_v1, 0.0  ;;  %v3465_v19 = vmul.f32 0.01, %v3333_v1  ;;  %v6535_v61 = vadd.f32 %v4860_v25, %v6432_v4  ;;  %v3496_v26 = vsel %vm3432_vm9, %v3330_v48, %v3464_v40 }
 0x270   : > { %v3499_v32 = vsel %vm3435_vm10, %v3341_v12, %v3467_v21 }
 0x271   : > { %v4152_v35 = vpack.c.bf16 %v3499_v32, %v3498_v9  ;;  %v3497_v56 = vsel %vm3433_vm11, %v3333_v1, %v3465_v19  ;;  %v4861_v27 = vpop.f32.mrb[188].mxu1  ;;  %v4945_v8 = vpop.f32.mrb[188].mxu0 }
 0x272   : > { %v4147_v37 = vpack.c.bf16 %v3497_v56, %v3496_v26  ;;  %v3354_v36 = vadd.f32 %v4945_v8, %v6489_v0  ;;  %v4862_v59 = vpop.f32.mrb[189].mxu1  ;;  %v3345_v47 = vpop.f32.mrb[189].mxu0 }
 0x273   : > { %4208 = vst [vmem:[%s6511_s13 + $0x28] sm:$0xff] %v4152_v35   ;;  %v4863_v10 = vadd.f32 %v4862_v59, %v4861_v27  ;;  %v3346_v28 = vadd.f32 %v3345_v47, %v6477_v41  ;;  %v4864_v42 = vpop.f32.mrb[190].mxu1  ;;  %v4946_v4 = vpop.f32.mrb[190].mxu0 }
 0x274   : > { %4207 = vst [vmem:[%s6511_s13 + $0x20] sm:$0xff] %v4147_v37   ;;  %v3470_v44 = vmul.f32 0.01, %v3354_v36  ;;  %v3357_v49 = vadd.f32 %v4946_v4, %v6495_v20  ;;  %v4865_v50 = vpop.f32.mrb[191].mxu1  ;;  %v3348_v51 = vpop.f32.mrb[191].mxu0  ;;  %vm3438_vm12 = vcmp.ge.f32.partialorder %v3354_v36, 0.0 }
 0x275   : > { %v3468_v16 = vmul.f32 0.01, %v3346_v28  ;;  %v4866_v18 = vadd.f32 %v4865_v50, %v4864_v42  ;;  %v3349_v22 = vadd.f32 %v3348_v51, %v6483_v5  ;;  %vm3436_vm13 = vcmp.ge.f32.partialorder %v3346_v28, 0.0 }
 0x276   : > { %vm3439_vm14 = vcmp.ge.f32.partialorder %v3357_v49, 0.0  ;;  %v3471_v0 = vmul.f32 0.01, %v3357_v49  ;;  %v3225_v3 = vadd.f32 %v4863_v10, %v6438_v57  ;;  %v3502_v60 = vsel %vm3438_vm12, %v3354_v36, %v3470_v44 }
 0x277   : > { %vm3437_vm15 = vcmp.ge.f32.partialorder %v3349_v22, 0.0  ;;  %v3469_v41 = vmul.f32 0.01, %v3349_v22  ;;  %v3228_v54 = vadd.f32 %v4866_v18, %v6444_v45  ;;  %v3500_v62 = vsel %vm3436_vm13, %v3346_v28, %v3468_v16 }
 0x278   : > { %v3503_v20 = vsel %vm3439_vm14, %v3357_v49, %v3471_v0 }
 0x279   : > { %v4162_v43 = vpack.c.bf16 %v3503_v20, %v3502_v60  ;;  %v3501_v63 = vsel %vm3437_vm15, %v3349_v22, %v3469_v41  ;;  %v4867_v17 = vpop.f32.mrb[192].mxu1  ;;  %v4949_v15 = vpop.f32.mrb[192].mxu0 }
 0x27a   : > { %v4157_v13 = vpack.c.bf16 %v3501_v63, %v3500_v62  ;;  %v3370_v5 = vadd.f32 %v4949_v15, %v6520_v55  ;;  %v4868_v33 = vpop.f32.mrb[193].mxu1  ;;  %v3361_v48 = vpop.f32.mrb[193].mxu0 }
 0x27b   : > { %4210 = vst [vmem:[%s6511_s13 + $0x38] sm:$0xff] %v4162_v43   ;;  %v4869_v11 = vadd.f32 %v4868_v33, %v4867_v17  ;;  %v3362_v57 = vadd.f32 %v3361_v48, %v6503_v23  ;;  %v4870_v34 = vpop.f32.mrb[194].mxu1  ;;  %v4950_v58 = vpop.f32.mrb[194].mxu0 }
 0x27c   : > { %4209 = vst [vmem:[%s6511_s13 + $0x30] sm:$0xff] %v4157_v13   ;;  %v3474_v45 = vmul.f32 0.01, %v3370_v5  ;;  %v3373_v12 = vadd.f32 %v4950_v58, %v6523_v24  ;;  %v4871_v53 = vpop.f32.mrb[195].mxu1  ;;  %v3364_v14 = vpop.f32.mrb[195].mxu0  ;;  %vm3442_vm0 = vcmp.ge.f32.partialorder %v3370_v5, 0.0 }
 0x27d   : > { %v3472_v40 = vmul.f32 0.01, %v3362_v57  ;;  %v4872_v25 = vadd.f32 %v4871_v53, %v4870_v34  ;;  %v3365_v1 = vadd.f32 %v3364_v14, %v6506_v7  ;;  %vm3440_vm1 = vcmp.ge.f32.partialorder %v3362_v57, 0.0 }
 0x27e   : > { %vm3443_vm2 = vcmp.ge.f32.partialorder %v3373_v12, 0.0  ;;  %v3475_v55 = vmul.f32 0.01, %v3373_v12  ;;  %v3233_v21 = vadd.f32 %v4869_v11, %v6450_v2  ;;  %v3506_v9 = vsel %vm3442_vm0, %v3370_v5, %v3474_v45 }
 0x27f   : > { %vm3441_vm3 = vcmp.ge.f32.partialorder %v3365_v1, 0.0  ;;  %v3473_v23 = vmul.f32 0.01, %v3365_v1  ;;  %v3236_v19 = vadd.f32 %v4872_v25, %v6456_v31  ;;  %v3504_v32 = vsel %vm3440_vm1, %v3362_v57, %v3472_v40 }
 0x280   : > { %v3507_v24 = vsel %vm3443_vm2, %v3373_v12, %v3475_v55 }
 0x281   : > { %v4172_v26 = vpack.c.bf16 %v3507_v24, %v3506_v9  ;;  %v3505_v35 = vsel %vm3441_vm3, %v3365_v1, %v3473_v23  ;;  %v4873_v56 = vpop.f32.mrb[196].mxu1  ;;  %v4953_v27 = vpop.f32.mrb[196].mxu0 }
 0x282   : > { %v4167_v8 = vpack.c.bf16 %v3505_v35, %v3504_v32  ;;  %v3386_v7 = vadd.f32 %v4953_v27, %v3225_v3  ;;  %v4874_v37 = vpop.f32.mrb[197].mxu1  ;;  %v3377_v36 = vpop.f32.mrb[197].mxu0 }
 0x283   : > { %4212 = vst [vmem:[%s6511_s13 + $0x48] sm:$0xff] %v4172_v26   ;;  %v4875_v59 = vadd.f32 %v4874_v37, %v4873_v56  ;;  %v3378_v2 = vadd.f32 %v3377_v36, %v6532_v52  ;;  %v4876_v47 = vpop.f32.mrb[198].mxu1  ;;  %v4954_v10 = vpop.f32.mrb[198].mxu0 }
 0x284   : > { %4211 = vst [vmem:[%s6511_s13 + $0x40] sm:$0xff] %v4167_v8   ;;  %v3478_v31 = vmul.f32 0.01, %v3386_v7  ;;  %v3389_v28 = vadd.f32 %v4954_v10, %v3228_v54  ;;  %v4877_v42 = vpop.f32.mrb[199].mxu1  ;;  %v3380_v4 = vpop.f32.mrb[199].mxu0  ;;  %vm3446_vm4 = vcmp.ge.f32.partialorder %v3386_v7, 0.0 }
 0x285   : > { %v3476_v44 = vmul.f32 0.01, %v3378_v2  ;;  %v4878_v49 = vadd.f32 %v4877_v42, %v4876_v47  ;;  %v3381_v50 = vadd.f32 %v3380_v4, %v6535_v61  ;;  %vm3444_vm5 = vcmp.ge.f32.partialorder %v3378_v2, 0.0 }
 0x286   : > { %vm3447_vm6 = vcmp.ge.f32.partialorder %v3389_v28, 0.0  ;;  %v3479_v51 = vmul.f32 0.01, %v3389_v28  ;;  %v3241_v16 = vadd.f32 %v4875_v59, %v6462_v38  ;;  %v3510_v22 = vsel %vm3446_vm4, %v3386_v7, %v3478_v31 }
 0x287   : > { %vm3445_vm7 = vcmp.ge.f32.partialorder %v3381_v50, 0.0  ;;  %v3477_v52 = vmul.f32 0.01, %v3381_v50  ;;  %v3244_v18 = vadd.f32 %v4878_v49, %v6468_v39  ;;  %v3508_v3 = vsel %vm3444_vm5, %v3378_v2, %v3476_v44 }
 0x288   : > { %v3511_v0 = vsel %vm3447_vm6, %v3389_v28, %v3479_v51 }
 0x289   : > { %v4182_v41 = vpack.c.bf16 %v3511_v0, %v3510_v22  ;;  %v3509_v54 = vsel %vm3445_vm7, %v3381_v50, %v3477_v52  ;;  %v4879_v60 = vpop.f32.mrb[200].mxu1  ;;  %v4957_v20 = vpop.f32.mrb[200].mxu0 }
 0x28a   : > { %v4177_v62 = vpack.c.bf16 %v3509_v54, %v3508_v3  ;;  %v3402_v61 = vadd.f32 %v4957_v20, %v3241_v16  ;;  %v4880_v43 = vpop.f32.mrb[201].mxu1  ;;  %v3393_v63 = vpop.f32.mrb[201].mxu0 }
 0x28b   : > { %4214 = vst [vmem:[%s6511_s13 + $0x58] sm:$0xff] %v4182_v41   ;;  %v4881_v17 = vadd.f32 %v4880_v43, %v4879_v60  ;;  %v3394_v15 = vadd.f32 %v3393_v63, %v3233_v21  ;;  %v4882_v38 = vpop.f32.mrb[202].mxu1  ;;  %v4958_v13 = vpop.f32.mrb[202].mxu0 }
 0x28c   : > { %4213 = vst [vmem:[%s6511_s13 + $0x50] sm:$0xff] %v4177_v62   ;;  %v3482_v5 = vmul.f32 0.01, %v3402_v61  ;;  %v3405_v39 = vadd.f32 %v4958_v13, %v3244_v18  ;;  %v4883_v33 = vpop.f32.mrb[203].mxu1  ;;  %v3396_v48 = vpop.f32.mrb[203].mxu0  ;;  %vm3450_vm8 = vcmp.ge.f32.partialorder %v3402_v61, 0.0 }
 0x28d   : > { %v3480_v11 = vmul.f32 0.01, %v3394_v15  ;;  %v4884_v57 = vadd.f32 %v4883_v33, %v4882_v38  ;;  %v3397_v34 = vadd.f32 %v3396_v48, %v3236_v19  ;;  %vm3448_vm9 = vcmp.ge.f32.partialorder %v3394_v15, 0.0 }
 0x28e   : > { %vm3451_vm10 = vcmp.ge.f32.partialorder %v3405_v39, 0.0  ;;  %v3483_v58 = vmul.f32 0.01, %v3405_v39  ;;  %v3249_v45 = vadd.f32 %v4881_v17, %v6474_v30  ;;  %v3514_v14 = vsel %vm3450_vm8, %v3402_v61, %v3482_v5 }
 0x28f   : > { %vm3449_vm11 = vcmp.ge.f32.partialorder %v3397_v34, 0.0  ;;  %v3481_v12 = vmul.f32 0.01, %v3397_v34  ;;  %v3252_v53 = vadd.f32 %v4884_v57, %v6480_v6  ;;  %v3512_v25 = vsel %vm3448_vm9, %v3394_v15, %v3480_v11 }
 0x290   : > { %v3515_v40 = vsel %vm3451_vm10, %v3405_v39, %v3483_v58 }
 0x291   : > { %v4192_v1 = vpack.c.bf16 %v3515_v40, %v3514_v14  ;;  %v3513_v55 = vsel %vm3449_vm11, %v3397_v34, %v3481_v12  ;;  %v4885_v21 = vpop.f32.mrb[204].mxu1  ;;  %v4961_v23 = vpop.f32.mrb[204].mxu0 }
 0x292   : > { %v4187_v9 = vpack.c.bf16 %v3513_v55, %v3512_v25  ;;  %v4886_v19 = vpop.f32.mrb[205].mxu1  ;;  %v3409_v24 = vpop.f32.mrb[205].mxu0 }
 0x293   : > { %4216 = vst [vmem:[%s6511_s13 + $0x68] sm:$0xff] %v4192_v1   ;;  %v4887_v32 = vadd.f32 %v4886_v19, %v4885_v21  ;;  %v3410_v26 = vadd.f32 %v3409_v24, %v3249_v45  ;;  %v4888_v35 = vpop.f32.mrb[206].mxu1  ;;  %v4962_v30 = vpop.f32.mrb[206].mxu0 }
 0x294   : > { %4215 = vst [vmem:[%s6511_s13 + $0x60] sm:$0xff] %v4187_v9   ;;  %v4889_v56 = vpop.f32.mrb[207].mxu1  ;;  %v3412_v27 = vpop.f32.mrb[207].mxu0 }
 0x295   : > { %v3257_v6 = vadd.f32 %v4887_v32, %v6486_v29  ;;  %v4890_v8 = vadd.f32 %v4889_v56, %v4888_v35  ;;  %v3484_v7 = vmul.f32 0.01, %v3410_v26  ;;  %v3413_v37 = vadd.f32 %v3412_v27, %v3252_v53 }
 0x296   : > { %vm3452_vm12 = vcmp.ge.f32.partialorder %v3410_v26, 0.0 }
 0x297   : > { %v3418_v36 = vadd.f32 %v4961_v23, %v3257_v6  ;;  %v3260_v59 = vadd.f32 %v4890_v8, %v6492_v46  ;;  %vm3453_vm13 = vcmp.ge.f32.partialorder %v3413_v37, 0.0  ;;  %v3485_v2 = vmul.f32 0.01, %v3413_v37 }
 0x298   : > { %v3516_v31 = vsel %vm3452_vm12, %v3410_v26, %v3484_v7 }
 0x299   : > { %v3486_v47 = vmul.f32 0.01, %v3418_v36  ;;  %v3421_v10 = vadd.f32 %v4962_v30, %v3260_v59  ;;  %vm3454_vm14 = vcmp.ge.f32.partialorder %v3418_v36, 0.0  ;;  %v3517_v28 = vsel %vm3453_vm13, %v3413_v37, %v3485_v2 }
 0x29a   : > { %v4197_v4 = vpack.c.bf16 %v3517_v28, %v3516_v31 }
 0x29b   : > { %vm3455_vm15 = vcmp.ge.f32.partialorder %v3421_v10, 0.0  ;;  %v3487_v42 = vmul.f32 0.01, %v3421_v10  ;;  %v3518_v29 = vsel %vm3454_vm14, %v3418_v36, %v3486_v47 }
 0x29c   : > { %4217 = vst [vmem:[%s6511_s13 + $0x70] sm:$0xff] %v4197_v4  }
 0x29d   : > { %v3519_v44 = vsel %vm3455_vm15, %v3421_v10, %v3487_v42 }
 0x29e   : > { %v4202_v49 = vpack.c.bf16 %v3519_v44, %v3518_v29 }
 0x2a0   : > { %4218 = vst [vmem:[%s6511_s13 + $0x78] sm:$0xff] %v4202_v49  }
 0x2a1 PF: > { %s13_s12 = sadd.s32 1, %s5402_s12  }
 0x2a2   : > { %p10_p4 = scmp.ge.s32.totalorder %s13_s12, 4  }
 0x2a4   :  { %12 = sbr.rel (!%p10_p4) target bundleno = 1 (0x1), region = 62 }

// kernel: encoder_forward.9
= control target key start
LH: loop header
LB: loop body
LE: loop exit
PB: predicated region body
PF: predicated region fallthrough
CT: control target
= control target key end

     0   :  { %12 = vsyncpa [#allocation3], 0  ;;  %v153_v36 = vlaneseq  ;;  %v1485_v37 = vmov 1966171168   ;;  %s1978_s0 = inlined_call_operand.vmem [shape: bf16[2,1024], index: 0, kind: input, shape index: {}]   ;;  %s1979_s1 = inlined_call_operand.vmem [shape: bf16[1024,256], index: 1, kind: input, shape index: {}]   ;;  %s1980_s2 = inlined_call_operand.vmem [shape: f32[1,256], index: 2, kind: input, shape index: {}]   ;;  %s1981_s3 = inlined_call_operand.vmem [shape: f32[2,32], index: 3, kind: input, shape index: {}]   ;;  %s1982_s4 = inlined_call_operand.hbm [shape: f32[2,32], index: 4, kind: output, shape index: {0}]   ;;  %s1983_s5 = inlined_call_operand.hbm [shape: f32[2,32], index: 5, kind: output, shape index: {1}]   ;;  %s1984_s6 = inlined_call_operand.hbm [shape: f32[2,32], index: 6, kind: output, shape index: {2}]  }
   0x1   :  { %v1220_v0 = vld [vmem:[%s1979_s1 + $0x4] ss:$8 sps:$4 sm:$0xff]   ;;  %v1224_v2 = vld [vmem:[%s1979_s1] ss:$8 sps:$4 sm:$0xff]   ;;  %v1226_v4 = vld [vmem:[%s1979_s1 + $0x14] ss:$8 sps:$4 sm:$0xff]   ;;  %v166_v38 = vunpack.c.l.s4 %v1485_v37 }
   0x2   :  { %v1222_v1 = vld [vmem:[%s1979_s1 + $0x204] ss:$8 sps:$4 sm:$0xff]   ;;  %861 = vmatprep.subr.bf16.mxu1 %v1220_v0  ;;  %v1225_v3 = vld [vmem:[%s1979_s1 + $0x200] ss:$8 sps:$4 sm:$0xff]   ;;  %v1228_v5 = vld [vmem:[%s1979_s1 + $0x214] ss:$8 sps:$4 sm:$0xff]  }
   0x3   :  { %943 = vmatprep.subr.bf16.mxu0 %v1222_v1  ;;  %862 = vmatpush1.bf16.msra.mxu1 %v1224_v2  ;;  %v1230_v6 = vld [vmem:[%s1979_s1 + $0x10] ss:$8 sps:$4 sm:$0xff]   ;;  %v1232_v8 = vld [vmem:[%s1979_s1 + $0x24] ss:$8 sps:$4 sm:$0xff]   ;;  %v1236_v10 = vld [vmem:[%s1979_s1 + $0x20] ss:$8 sps:$4 sm:$0xff]   ;;  %v167_v43 = vunpack.c.0.s8 %v166_v38 }
   0x4   :  { %944 = vmatpush1.bf16.msra.mxu0 %v1225_v3  ;;  %863 = vmatprep.subr.bf16.mxu1 %v1226_v4  ;;  %v1231_v7 = vld [vmem:[%s1979_s1 + $0x210] ss:$8 sps:$4 sm:$0xff]   ;;  %v1234_v9 = vld [vmem:[%s1979_s1 + $0x224] ss:$8 sps:$4 sm:$0xff]   ;;  %v1237_v11 = vld [vmem:[%s1979_s1 + $0x220] ss:$8 sps:$4 sm:$0xff]  }
   0x5   :  { %945 = vmatprep.subr.bf16.mxu0 %v1228_v5  ;;  %v1238_v12 = vld [vmem:[%s1979_s1 + $0x34] ss:$8 sps:$4 sm:$0xff]   ;;  %v1242_v14 = vld [vmem:[%s1979_s1 + $0x30] ss:$8 sps:$4 sm:$0xff]   ;;  %v1244_v16 = vld [vmem:[%s1979_s1 + $0x44] ss:$8 sps:$4 sm:$0xff]  }
   0x6   :  { %v1240_v13 = vld [vmem:[%s1979_s1 + $0x234] ss:$8 sps:$4 sm:$0xff]   ;;  %v1243_v15 = vld [vmem:[%s1979_s1 + $0x230] ss:$8 sps:$4 sm:$0xff]   ;;  %v1246_v17 = vld [vmem:[%s1979_s1 + $0x244] ss:$8 sps:$4 sm:$0xff]  }
   0x7   :  { %864 = vmatpush1.bf16.msra.mxu1 %v1230_v6  ;;  %v1248_v18 = vld [vmem:[%s1979_s1 + $0x40] ss:$8 sps:$4 sm:$0xff]   ;;  %v1250_v20 = vld [vmem:[%s1979_s1 + $0x54] ss:$8 sps:$4 sm:$0xff]   ;;  %v1254_v22 = vld [vmem:[%s1979_s1 + $0x50] ss:$8 sps:$4 sm:$0xff]  }
   0x8   :  { %946 = vmatpush1.bf16.msra.mxu0 %v1231_v7  ;;  %865 = vmatprep.subr.bf16.mxu1 %v1232_v8  ;;  %v1249_v19 = vld [vmem:[%s1979_s1 + $0x240] ss:$8 sps:$4 sm:$0xff]   ;;  %v1252_v21 = vld [vmem:[%s1979_s1 + $0x254] ss:$8 sps:$4 sm:$0xff]   ;;  %v1255_v23 = vld [vmem:[%s1979_s1 + $0x250] ss:$8 sps:$4 sm:$0xff]  }
   0x9   :  { %947 = vmatprep.subr.bf16.mxu0 %v1234_v9  ;;  %v1256_v24 = vld [vmem:[%s1979_s1 + $0x64] ss:$8 sps:$4 sm:$0xff]   ;;  %v1260_v26 = vld [vmem:[%s1979_s1 + $0x60] ss:$8 sps:$4 sm:$0xff]   ;;  %v1262_v28 = vld [vmem:[%s1979_s1 + $0x74] ss:$8 sps:$4 sm:$0xff]  }
   0xa   :  { %v1258_v25 = vld [vmem:[%s1979_s1 + $0x264] ss:$8 sps:$4 sm:$0xff]   ;;  %v1261_v27 = vld [vmem:[%s1979_s1 + $0x260] ss:$8 sps:$4 sm:$0xff]   ;;  %v1264_v29 = vld [vmem:[%s1979_s1 + $0x274] ss:$8 sps:$4 sm:$0xff]  }
   0xb   :  { %866 = vmatpush1.bf16.msra.mxu1 %v1236_v10  ;;  %v1266_v30 = vld [vmem:[%s1979_s1 + $0x70] ss:$8 sps:$4 sm:$0xff]   ;;  %v1268_v32 = vld [vmem:[%s1979_s1 + $0x84] ss:$8 sps:$4 sm:$0xff]   ;;  %v1272_v34 = vld [vmem:[%s1979_s1 + $0x80] ss:$8 sps:$4 sm:$0xff]  }
   0xc   :  { %948 = vmatpush1.bf16.msra.mxu0 %v1237_v11  ;;  %867 = vmatprep.subr.bf16.mxu1 %v1238_v12  ;;  %v1267_v31 = vld [vmem:[%s1979_s1 + $0x270] ss:$8 sps:$4 sm:$0xff]   ;;  %v1270_v33 = vld [vmem:[%s1979_s1 + $0x284] ss:$8 sps:$4 sm:$0xff]   ;;  %v1273_v35 = vld [vmem:[%s1979_s1 + $0x280] ss:$8 sps:$4 sm:$0xff]  }
   0xd   :  { %949 = vmatprep.subr.bf16.mxu0 %v1240_v13  ;;  %v1274_v39 = vld [vmem:[%s1979_s1 + $0x94] ss:$8 sps:$4 sm:$0xff]   ;;  %v1278_v41 = vld [vmem:[%s1979_s1 + $0x90] ss:$8 sps:$4 sm:$0xff]   ;;  %v1641_v42 = vshrl.u32 %v153_v36, 7  ;;  %v22_v52 = vld [vmem:[%s1978_s0] sm:$0xff] }
   0xe   :  { %v1276_v40 = vld [vmem:[%s1979_s1 + $0x294] ss:$8 sps:$4 sm:$0xff]   ;;  %v1279_v44 = vld [vmem:[%s1979_s1 + $0x290] ss:$8 sps:$4 sm:$0xff]   ;;  %v1280_v45 = vld [vmem:[%s1979_s1 + $0xa4] ss:$8 sps:$4 sm:$0xff]   ;;  %v164_v55 = vcombine.high %v22_v52, %v22_v52 }
   0xf   :  { %868 = vmatpush1.bf16.msra.mxu1 %v1242_v14  ;;  %v1282_v46 = vld [vmem:[%s1979_s1 + $0x2a4] ss:$8 sps:$4 sm:$0xff]   ;;  %v1284_v47 = vld [vmem:[%s1979_s1 + $0xa0] ss:$8 sps:$4 sm:$0xff]   ;;  %v170_v49 = vsub.s32 %v167_v43, %v1641_v42  ;;  %v1286_v50 = vld [vmem:[%s1979_s1 + $0xb4] ss:$8 sps:$4 sm:$0xff]  }
  0x10   :  { %950 = vmatpush1.bf16.msra.mxu0 %v1243_v15  ;;  %869 = vmatprep.subr.bf16.mxu1 %v1244_v16  ;;  %v1285_v48 = vld [vmem:[%s1979_s1 + $0x2a0] ss:$8 sps:$4 sm:$0xff]   ;;  %v1288_v51 = vld [vmem:[%s1979_s1 + $0x2b4] ss:$8 sps:$4 sm:$0xff]   ;;  %v1290_v53 = vld [vmem:[%s1979_s1 + $0xb0] ss:$8 sps:$4 sm:$0xff]  }
  0x11   :  { %951 = vmatprep.subr.bf16.mxu0 %v1246_v17  ;;  %v171_v54 = vrot.slane %v22_v52, %v170_v49  ;;  %v1291_v56 = vld [vmem:[%s1979_s1 + $0x2b0] ss:$8 sps:$4 sm:$0xff]   ;;  %v1292_v57 = vld [vmem:[%s1979_s1 + $0xc4] ss:$8 sps:$4 sm:$0xff]   ;;  %v178_v60 = vrot.slane %v164_v55, %v170_v49  ;;  %v1296_v61 = vld [vmem:[%s1979_s1 + $0xc0] ss:$8 sps:$4 sm:$0xff]  }
  0x12   :  { %v1294_v58 = vld [vmem:[%s1979_s1 + $0x2c4] ss:$8 sps:$4 sm:$0xff]   ;;  %v1297_v0 = vld [vmem:[%s1979_s1 + $0x2c0] ss:$8 sps:$4 sm:$0xff]   ;;  %v1298_v1 = vld [vmem:[%s1979_s1 + $0xd4] ss:$8 sps:$4 sm:$0xff]  }
  0x13   :  { %870 = vmatpush1.bf16.msra.mxu1 %v1248_v18  ;;  %v179_v59 = vcombine.high %v171_v54, %v171_v54  ;;  %v180_v63 = vcombine.high %v178_v60, %v178_v60  ;;  %v1300_v2 = vld [vmem:[%s1979_s1 + $0x2d4] ss:$8 sps:$4 sm:$0xff]   ;;  %v1302_v4 = vld [vmem:[%s1979_s1 + $0xd0] ss:$8 sps:$4 sm:$0xff]   ;;  %v1304_v6 = vld [vmem:[%s1979_s1 + $0xe4] ss:$8 sps:$4 sm:$0xff]   ;;  %v1731_v17 = vrot.slane %v171_v54, %v170_v49  ;;  %v1733_v18 = vrot.slane %v178_v60, %v170_v49 }
  0x14   :  { %952 = vmatpush1.bf16.msra.mxu0 %v1249_v19  ;;  %871 = vmatprep.subr.bf16.mxu1 %v1250_v20  ;;  %v1303_v5 = vld [vmem:[%s1979_s1 + $0x2d0] ss:$8 sps:$4 sm:$0xff]   ;;  %v1306_v7 = vld [vmem:[%s1979_s1 + $0x2e4] ss:$8 sps:$4 sm:$0xff]   ;;  %v1308_v8 = vld [vmem:[%s1979_s1 + $0xe0] ss:$8 sps:$4 sm:$0xff]  }
  0x15   :  { %953 = vmatprep.subr.bf16.mxu0 %v1252_v21  ;;  %v201_v62 = vrot.slane %v179_v59, %v170_v49  ;;  %v208_v3 = vrot.slane %v180_v63, %v170_v49  ;;  %v1309_v9 = vld [vmem:[%s1979_s1 + $0x2e0] ss:$8 sps:$4 sm:$0xff]   ;;  %v1310_v10 = vld [vmem:[%s1979_s1 + $0xf4] ss:$8 sps:$4 sm:$0xff]   ;;  %v1314_v12 = vld [vmem:[%s1979_s1 + $0xf0] ss:$8 sps:$4 sm:$0xff]  }
  0x16   :  { %v1312_v11 = vld [vmem:[%s1979_s1 + $0x2f4] ss:$8 sps:$4 sm:$0xff]   ;;  %v1315_v13 = vld [vmem:[%s1979_s1 + $0x2f0] ss:$8 sps:$4 sm:$0xff]   ;;  %v1318_v14 = vld [vmem:[%s1979_s1 + $0x104] ss:$8 sps:$4 sm:$0xff]  }
  0x17   :  { %872 = vmatpush1.bf16.msra.mxu1 %v1254_v22  ;;  %893 = vmatprep.mubr.bf16.mxu1 %v201_v62  ;;  %v1322_v15 = vld [vmem:[%s1979_s1 + $0x304] ss:$8 sps:$4 sm:$0xff]   ;;  %v1316_v16 = vld [vmem:[%s1979_s1 + $0x100] ss:$8 sps:$4 sm:$0xff]   ;;  %v1325_v20 = vld [vmem:[%s1979_s1 + $0x114] ss:$8 sps:$4 sm:$0xff]   ;;  %v211_v22 = vcombine.high %v201_v62, %v201_v62 }
  0x18   :  { %954 = vmatpush1.bf16.msra.mxu0 %v1255_v23  ;;  %873 = vmatprep.subr.bf16.mxu1 %v1256_v24  ;;  %v1320_v19 = vld [vmem:[%s1979_s1 + $0x300] ss:$8 sps:$4 sm:$0xff]   ;;  %v1328_v21 = vld [vmem:[%s1979_s1 + $0x314] ss:$8 sps:$4 sm:$0xff]   ;;  %v212_v23 = vcombine.high %v208_v3, %v208_v3  ;;  %v1323_v24 = vld [vmem:[%s1979_s1 + $0x110] ss:$8 sps:$4 sm:$0xff]  }
  0x19   :  { %955 = vmatprep.subr.bf16.mxu0 %v1258_v25  ;;  %975 = vmatprep.mubr.bf16.mxu0 %v208_v3  ;;  %v1326_v25 = vld [vmem:[%s1979_s1 + $0x310] ss:$8 sps:$4 sm:$0xff]   ;;  %v1341_v36 = vld [vmem:[%s1979_s1 + $0x140] ss:$8 sps:$4 sm:$0xff]   ;;  %v1349_v38 = vld [vmem:[%s1979_s1 + $0x154] ss:$8 sps:$4 sm:$0xff]  }
  0x1a   :  { %v1344_v37 = vld [vmem:[%s1979_s1 + $0x340] ss:$8 sps:$4 sm:$0xff]   ;;  %v1355_v43 = vld [vmem:[%s1979_s1 + $0x164] ss:$8 sps:$4 sm:$0xff]  }
  0x1b   :  { %874 = vmatpush1.bf16.msra.mxu1 %v1260_v26  ;;  %v1331_v26 = vld [vmem:[%s1979_s1 + $0x124] ss:$8 sps:$4 sm:$0xff]  }
  0x1c   :  { %956 = vmatpush1.bf16.msra.mxu0 %v1261_v27  ;;  %875 = vmatprep.subr.bf16.mxu1 %v1262_v28  ;;  %v1334_v27 = vld [vmem:[%s1979_s1 + $0x324] ss:$8 sps:$4 sm:$0xff]   ;;  %v1329_v28 = vld [vmem:[%s1979_s1 + $0x120] ss:$8 sps:$4 sm:$0xff]  }
  0x1d   :  { %957 = vmatprep.subr.bf16.mxu0 %v1264_v29  ;;  %v1332_v29 = vld [vmem:[%s1979_s1 + $0x320] ss:$8 sps:$4 sm:$0xff]  }
  0x1f   :  { %876 = vmatpush1.bf16.msra.mxu1 %v1266_v30  ;;  %v1337_v30 = vld [vmem:[%s1979_s1 + $0x134] ss:$8 sps:$4 sm:$0xff]  }
  0x20   :  { %958 = vmatpush1.bf16.msra.mxu0 %v1267_v31  ;;  %877 = vmatprep.subr.bf16.mxu1 %v1268_v32  ;;  %v1340_v31 = vld [vmem:[%s1979_s1 + $0x334] ss:$8 sps:$4 sm:$0xff]   ;;  %v1335_v32 = vld [vmem:[%s1979_s1 + $0x130] ss:$8 sps:$4 sm:$0xff]  }
  0x21   :  { %959 = vmatprep.subr.bf16.mxu0 %v1270_v33  ;;  %v1338_v33 = vld [vmem:[%s1979_s1 + $0x330] ss:$8 sps:$4 sm:$0xff]  }
  0x23   :  { %878 = vmatpush1.bf16.msra.mxu1 %v1272_v34  ;;  %v1343_v34 = vld [vmem:[%s1979_s1 + $0x144] ss:$8 sps:$4 sm:$0xff]  }
  0x24   :  { %960 = vmatpush1.bf16.msra.mxu0 %v1273_v35  ;;  %879 = vmatprep.subr.bf16.mxu1 %v1274_v39  ;;  %v1346_v35 = vld [vmem:[%s1979_s1 + $0x344] ss:$8 sps:$4 sm:$0xff]   ;;  %v1352_v39 = vld [vmem:[%s1979_s1 + $0x354] ss:$8 sps:$4 sm:$0xff]  }
  0x25   :  { %961 = vmatprep.subr.bf16.mxu0 %v1276_v40  ;;  %v1347_v40 = vld [vmem:[%s1979_s1 + $0x150] ss:$8 sps:$4 sm:$0xff]  }
  0x27   :  { %880 = vmatpush1.bf16.msra.mxu1 %v1278_v41  ;;  %v1350_v41 = vld [vmem:[%s1979_s1 + $0x350] ss:$8 sps:$4 sm:$0xff]  }
  0x28   :  { %962 = vmatpush1.bf16.msra.mxu0 %v1279_v44  ;;  %881 = vmatprep.subr.bf16.mxu1 %v1280_v45  ;;  %v1358_v44 = vld [vmem:[%s1979_s1 + $0x364] ss:$8 sps:$4 sm:$0xff]  }
  0x29   :  { %963 = vmatprep.subr.bf16.mxu0 %v1282_v46 }
  0x2b   :  { %882 = vmatpush1.bf16.msra.mxu1 %v1284_v47 }
  0x2c   :  { %964 = vmatpush1.bf16.msra.mxu0 %v1285_v48  ;;  %883 = vmatprep.subr.bf16.mxu1 %v1286_v50 }
  0x2d   :  { %965 = vmatprep.subr.bf16.mxu0 %v1288_v51 }
  0x2f   :  { %884 = vmatpush1.bf16.msra.mxu1 %v1290_v53 }
  0x30   :  { %966 = vmatpush1.bf16.msra.mxu0 %v1291_v56  ;;  %885 = vmatprep.subr.bf16.mxu1 %v1292_v57 }
  0x31   :  { %967 = vmatprep.subr.bf16.mxu0 %v1294_v58 }
  0x33   :  { %886 = vmatpush1.bf16.msra.mxu1 %v1296_v61 }
  0x34   :  { %968 = vmatpush1.bf16.msra.mxu0 %v1297_v0  ;;  %887 = vmatprep.subr.bf16.mxu1 %v1298_v1 }
  0x35   :  { %969 = vmatprep.subr.bf16.mxu0 %v1300_v2 }
  0x37   :  { %888 = vmatpush1.bf16.msra.mxu1 %v1302_v4 }
  0x38   :  { %970 = vmatpush1.bf16.msra.mxu0 %v1303_v5  ;;  %889 = vmatprep.subr.bf16.mxu1 %v1304_v6 }
  0x39   :  { %971 = vmatprep.subr.bf16.mxu0 %v1306_v7 }
  0x3b   :  { %890 = vmatpush1.bf16.msra.mxu1 %v1308_v8 }
  0x3c   :  { %972 = vmatpush1.bf16.msra.mxu0 %v1309_v9  ;;  %891 = vmatprep.subr.bf16.mxu1 %v1310_v10 }
  0x3d   :  { %973 = vmatprep.subr.bf16.mxu0 %v1312_v11 }
  0x3f   :  { %892 = vmatpush1.bf16.msra.mxu1 %v1314_v12 }
  0x40   :  { %974 = vmatpush1.bf16.msra.mxu0 %v1315_v13  ;;  %902 = vmatprep.subr.bf16.mxu1 %v1318_v14 }
  0x41   :  { %984 = vmatprep.subr.bf16.mxu0 %v1322_v15 }
  0x42   :  { %894 = vmatmul.mubr.bf16.vlgmr.msra.gmra.mrb[0].mxu1 %v1731_v17 }
  0x43   :  { %976 = vmatmul.mubr.bf16.vlgmr.msra.gmra.mrb[0].mxu0 %v1733_v18  ;;  %903 = vmatpush1.bf16.msra.mxu1 %v1316_v16 }
  0x44   :  { %985 = vmatpush1.bf16.msra.mxu0 %v1320_v19  ;;  %904 = vmatprep.subr.bf16.mxu1 %v1325_v20 }
  0x45   :  { %986 = vmatprep.subr.bf16.mxu0 %v1328_v21  ;;  %934 = vmatprep.mubr.bf16.mxu1 %v211_v22 }
  0x46   :  { %1016 = vmatprep.mubr.bf16.mxu0 %v212_v23 }
  0x47   :  { %905 = vmatpush1.bf16.msra.mxu1 %v1323_v24 }
  0x48   :  { %987 = vmatpush1.bf16.msra.mxu0 %v1326_v25  ;;  %906 = vmatprep.subr.bf16.mxu1 %v1331_v26 }
  0x49   :  { %988 = vmatprep.subr.bf16.mxu0 %v1334_v27 }
  0x4b   :  { %907 = vmatpush1.bf16.msra.mxu1 %v1329_v28 }
  0x4c   :  { %989 = vmatpush1.bf16.msra.mxu0 %v1332_v29  ;;  %908 = vmatprep.subr.bf16.mxu1 %v1337_v30 }
  0x4d   :  { %990 = vmatprep.subr.bf16.mxu0 %v1340_v31 }
  0x4f   :  { %909 = vmatpush1.bf16.msra.mxu1 %v1335_v32 }
  0x50   :  { %991 = vmatpush1.bf16.msra.mxu0 %v1338_v33  ;;  %910 = vmatprep.subr.bf16.mxu1 %v1343_v34 }
  0x51   :  { %992 = vmatprep.subr.bf16.mxu0 %v1346_v35 }
  0x53   :  { %911 = vmatpush1.bf16.msra.mxu1 %v1341_v36 }
  0x54   :  { %993 = vmatpush1.bf16.msra.mxu0 %v1344_v37  ;;  %912 = vmatprep.subr.bf16.mxu1 %v1349_v38 }
  0x55   :  { %994 = vmatprep.subr.bf16.mxu0 %v1352_v39 }
  0x56   :  { %13 = vsyncpa [#allocation5], 0  ;;  %v1353_v45 = vld [vmem:[%s1979_s1 + $0x160] ss:$8 sps:$4 sm:$0xff]   ;;  %v1361_v47 = vld [vmem:[%s1979_s1 + $0x174] ss:$8 sps:$4 sm:$0xff]   ;;  %v209_v21 = vcombine.high %v1731_v17, %v1731_v17  ;;  %v210_v22 = vcombine.high %v1733_v18, %v1733_v18 }
  0x57   :  { %913 = vmatpush1.bf16.msra.mxu1 %v1347_v40  ;;  %v1356_v46 = vld [vmem:[%s1979_s1 + $0x360] ss:$8 sps:$4 sm:$0xff]   ;;  %v1364_v48 = vld [vmem:[%s1979_s1 + $0x374] ss:$8 sps:$4 sm:$0xff]   ;;  %v1359_v49 = vld [vmem:[%s1979_s1 + $0x170] ss:$8 sps:$4 sm:$0xff]  }
  0x58   :  { %995 = vmatpush1.bf16.msra.mxu0 %v1350_v41  ;;  %914 = vmatprep.subr.bf16.mxu1 %v1355_v43  ;;  %v1362_v50 = vld [vmem:[%s1979_s1 + $0x370] ss:$8 sps:$4 sm:$0xff]   ;;  %v1367_v51 = vld [vmem:[%s1979_s1 + $0x184] ss:$8 sps:$4 sm:$0xff]   ;;  %v1365_v53 = vld [vmem:[%s1979_s1 + $0x180] ss:$8 sps:$4 sm:$0xff]  }
  0x59   :  { %996 = vmatprep.subr.bf16.mxu0 %v1358_v44  ;;  %v1370_v52 = vld [vmem:[%s1979_s1 + $0x384] ss:$8 sps:$4 sm:$0xff]   ;;  %v1368_v54 = vld [vmem:[%s1979_s1 + $0x380] ss:$8 sps:$4 sm:$0xff]   ;;  %v1373_v55 = vld [vmem:[%s1979_s1 + $0x194] ss:$8 sps:$4 sm:$0xff]  }
  0x5a   :  { %v1376_v56 = vld [vmem:[%s1979_s1 + $0x394] ss:$8 sps:$4 sm:$0xff]   ;;  %v1371_v57 = vld [vmem:[%s1979_s1 + $0x190] ss:$8 sps:$4 sm:$0xff]   ;;  %v1379_v59 = vld [vmem:[%s1979_s1 + $0x1a4] ss:$8 sps:$4 sm:$0xff]  }
  0x5b   :  { %915 = vmatpush1.bf16.msra.mxu1 %v1353_v45  ;;  %v1374_v58 = vld [vmem:[%s1979_s1 + $0x390] ss:$8 sps:$4 sm:$0xff]   ;;  %v1382_v60 = vld [vmem:[%s1979_s1 + $0x3a4] ss:$8 sps:$4 sm:$0xff]   ;;  %v1377_v61 = vld [vmem:[%s1979_s1 + $0x1a0] ss:$8 sps:$4 sm:$0xff]  }
  0x5c   :  { %997 = vmatpush1.bf16.msra.mxu0 %v1356_v46  ;;  %916 = vmatprep.subr.bf16.mxu1 %v1361_v47  ;;  %v1380_v62 = vld [vmem:[%s1979_s1 + $0x3a0] ss:$8 sps:$4 sm:$0xff]   ;;  %v1385_v63 = vld [vmem:[%s1979_s1 + $0x1b4] ss:$8 sps:$4 sm:$0xff]   ;;  %v1383_v1 = vld [vmem:[%s1979_s1 + $0x1b0] ss:$8 sps:$4 sm:$0xff]  }
  0x5d   :  { %998 = vmatprep.subr.bf16.mxu0 %v1364_v48  ;;  %v1388_v0 = vld [vmem:[%s1979_s1 + $0x3b4] ss:$8 sps:$4 sm:$0xff]   ;;  %v1386_v2 = vld [vmem:[%s1979_s1 + $0x3b0] ss:$8 sps:$4 sm:$0xff]   ;;  %v1391_v3 = vld [vmem:[%s1979_s1 + $0x1c4] ss:$8 sps:$4 sm:$0xff]  }
  0x5e   :  { %v1394_v4 = vld [vmem:[%s1979_s1 + $0x3c4] ss:$8 sps:$4 sm:$0xff]   ;;  %v1389_v5 = vld [vmem:[%s1979_s1 + $0x1c0] ss:$8 sps:$4 sm:$0xff]   ;;  %v1397_v7 = vld [vmem:[%s1979_s1 + $0x1d4] ss:$8 sps:$4 sm:$0xff]  }
  0x5f   :  { %917 = vmatpush1.bf16.msra.mxu1 %v1359_v49  ;;  %v1392_v6 = vld [vmem:[%s1979_s1 + $0x3c0] ss:$8 sps:$4 sm:$0xff]   ;;  %v1400_v8 = vld [vmem:[%s1979_s1 + $0x3d4] ss:$8 sps:$4 sm:$0xff]   ;;  %v1395_v9 = vld [vmem:[%s1979_s1 + $0x1d0] ss:$8 sps:$4 sm:$0xff]  }
  0x60   :  { %999 = vmatpush1.bf16.msra.mxu0 %v1362_v50  ;;  %918 = vmatprep.subr.bf16.mxu1 %v1367_v51  ;;  %v1398_v10 = vld [vmem:[%s1979_s1 + $0x3d0] ss:$8 sps:$4 sm:$0xff]   ;;  %v1403_v11 = vld [vmem:[%s1979_s1 + $0x1e4] ss:$8 sps:$4 sm:$0xff]   ;;  %v1401_v13 = vld [vmem:[%s1979_s1 + $0x1e0] ss:$8 sps:$4 sm:$0xff]  }
  0x61   :  { %1000 = vmatprep.subr.bf16.mxu0 %v1370_v52  ;;  %v1406_v12 = vld [vmem:[%s1979_s1 + $0x3e4] ss:$8 sps:$4 sm:$0xff]   ;;  %v1404_v14 = vld [vmem:[%s1979_s1 + $0x3e0] ss:$8 sps:$4 sm:$0xff]   ;;  %v1409_v15 = vld [vmem:[%s1979_s1 + $0x1f4] ss:$8 sps:$4 sm:$0xff]  }
  0x62   :  { %v1412_v16 = vld [vmem:[%s1979_s1 + $0x3f4] ss:$8 sps:$4 sm:$0xff]   ;;  %v1407_v19 = vld [vmem:[%s1979_s1 + $0x1f0] ss:$8 sps:$4 sm:$0xff]   ;;  %v155_v23 = vsub.s32 0, %v1641_v42  ;;  %v159_v25 = vsub.s32 1, %v1641_v42 }
  0x63   :  { %919 = vmatpush1.bf16.msra.mxu1 %v1365_v53  ;;  %v1410_v20 = vld [vmem:[%s1979_s1 + $0x3f0] ss:$8 sps:$4 sm:$0xff]   ;;  %v151_v24 = vld [vmem:[%s1980_s2] sm:$0x3]  ;;  %s1486_s1 = smov [#allocation4]   ;;  %s1487_s11 = smov [#allocation6]  }
  0x64   :  { %1001 = vmatpush1.bf16.msra.mxu0 %v1368_v54  ;;  %920 = vmatprep.subr.bf16.mxu1 %v1373_v55  ;;  %v156_v26 = vrot.slane %v151_v24, %v155_v23  ;;  %v160_v27 = vrot.slane %v151_v24, %v159_v25  ;;  %s1051_s10 = sshll.u32 %s1486_s1, 4  ;;  %s1061_s12 = sshll.u32 %s1487_s11, 4  ;;  %vm1025_vm0 = vcmask 254976   ;;  %s1052_s10 = int_to_ptr.vmem [resolvable:$true] %s1051_s10  ;;  %s1929_s12 = int_to_ptr.vmem [resolvable:$true] %s1061_s12 }
  0x65   :  { %1002 = vmatprep.subr.bf16.mxu0 %v1376_v56  ;;  %s1415_s2 = scalar_lea.vmem %s1052_s10, 32  ;;  %p1420_p1 = scmp.lt.s32.totalorder %s1052_s10, %s1052_s10 }
  0x66   :  { %p1416_p0 = scmp.ne.s32.totalorder %s1052_s10, %s1415_s2  ;;  %p1421_p2 = scmp.lt.s32.totalorder %s1415_s2, %s1415_s2 }
  0x67   :  { %921 = vmatpush1.bf16.msra.mxu1 %v1371_v57 }
  0x68   :  { %1003 = vmatpush1.bf16.msra.mxu0 %v1374_v58  ;;  %922 = vmatprep.subr.bf16.mxu1 %v1379_v59  ;;  %p1422_p3 = por %p1421_p2, %p1420_p1 }
  0x69   :  { %1004 = vmatprep.subr.bf16.mxu0 %v1382_v60 }
  0x6a   :  { %p1423_p4 = pnand %p1422_p3, %p1416_p0 }
  0x6b   :  { %923 = vmatpush1.bf16.msra.mxu1 %v1377_v61 }
  0x6c   :  { %1005 = vmatpush1.bf16.msra.mxu0 %v1380_v62  ;;  %924 = vmatprep.subr.bf16.mxu1 %v1385_v63 }
  0x6d   :  { %1006 = vmatprep.subr.bf16.mxu0 %v1388_v0 }
  0x6f   :  { %925 = vmatpush1.bf16.msra.mxu1 %v1383_v1 }
  0x70   :  { %1007 = vmatpush1.bf16.msra.mxu0 %v1386_v2  ;;  %926 = vmatprep.subr.bf16.mxu1 %v1391_v3 }
  0x71   :  { %1008 = vmatprep.subr.bf16.mxu0 %v1394_v4 }
  0x73   :  { %927 = vmatpush1.bf16.msra.mxu1 %v1389_v5 }
  0x74   :  { %1009 = vmatpush1.bf16.msra.mxu0 %v1392_v6  ;;  %928 = vmatprep.subr.bf16.mxu1 %v1397_v7 }
  0x75   :  { %1010 = vmatprep.subr.bf16.mxu0 %v1400_v8 }
  0x77   :  { %929 = vmatpush1.bf16.msra.mxu1 %v1395_v9 }
  0x78   :  { %1011 = vmatpush1.bf16.msra.mxu0 %v1398_v10  ;;  %930 = vmatprep.subr.bf16.mxu1 %v1403_v11 }
  0x79   :  { %1012 = vmatprep.subr.bf16.mxu0 %v1406_v12 }
  0x7b   :  { %931 = vmatpush1.bf16.msra.mxu1 %v1401_v13 }
  0x7c   :  { %1013 = vmatpush1.bf16.msra.mxu0 %v1404_v14  ;;  %932 = vmatprep.subr.bf16.mxu1 %v1409_v15 }
  0x7d   :  { %1014 = vmatprep.subr.bf16.mxu0 %v1412_v16 }
  0x7f   :  { %933 = vmatpush1.bf16.msra.mxu1 %v1407_v19 }
  0x80   :  { %1015 = vmatpush1.bf16.msra.mxu0 %v1410_v20 }
  0x82   :  { %935 = vmatmul.mubr.bf16.vlgmr.msra.gmra.mrb[0].mxu1 %v209_v21 }
  0x83   :  { %1017 = vmatmul.mubr.bf16.vlgmr.msra.gmra.mrb[0].mxu0 %v210_v22 }
 0x155   :  { %v936_v28 = vpop.f32.mrb[0].mxu1 }
 0x156   :  { %v1018_v29 = vpop.f32.mrb[0].mxu0  ;;  %v1204_v17 = vadd.f32 %v936_v28, %v156_v26  ;;  %v938_v18 = vpop.f32.mrb[1].mxu1 }
 0x157   :  { %v1020_v30 = vpop.f32.mrb[1].mxu0  ;;  %v1206_v31 = vadd.f32 %v938_v18, %v160_v27  ;;  %v940_v32 = vpop.f32.mrb[2].mxu1 }
 0x158   :  { %v1022_v33 = vpop.f32.mrb[2].mxu0  ;;  %v1205_v34 = vadd.f32 %v1204_v17, %v1018_v29  ;;  %v941_v35 = vpop.f32.mrb[3].mxu1 }
 0x159   :  { %v1023_v36 = vpop.f32.mrb[3].mxu0  ;;  %v1207_v42 = vadd.f32 %v1206_v31, %v1020_v30 }
 0x15a   :  { %1026 = vst.msk [vmem:[#allocation4] sm:$0x3] %vm1025_vm0, %v1205_v34 }
 0x15b   :  { %v1028_v37 = vmul.f32 0.5, %v1207_v42 }
 0x15c   :  { %1426 = shalt.err (!%p1423_p4)
}
 0x15d   :  { %s1427_s15 = scalar_lea.hbm %s1983_s5, 32 }
 0x15e   :  { %p1428_p5 = scmp.ne.s32.totalorder %s1983_s5, %s1427_s15  ;;  %p1431_p6 = scmp.lt.u32.totalorder %s1427_s15, %s1983_s5 }
 0x160   :  { %p1433_p7 = pnand %p1431_p6, %p1428_p5 }
 0x162   :  { %1436 = shalt.err (!%p1433_p7)
}
 0x163   :  { %1054 = dma.vmem_to_hbm [thread:$0]  %s1052_s10, 32, %s1983_s5, [#allocation5]   ;;  %1027 = vst.msk [vmem:[#allocation6] sm:$0x3] %vm1025_vm0, %v1207_v42 }
 0x164   :  { %s1437_s22 = scalar_lea.vmem %s1929_s12, 32  ;;  %p1442_p9 = scmp.lt.s32.totalorder %s1929_s12, %s1929_s12 }
 0x165   :  { %p1438_p8 = scmp.ne.s32.totalorder %s1929_s12, %s1437_s22  ;;  %p1443_p10 = scmp.lt.s32.totalorder %s1437_s22, %s1437_s22 }
 0x167   :  { %p1444_p11 = por %p1443_p10, %p1442_p9 }
 0x169   :  { %p1445_p12 = pnand %p1444_p11, %p1438_p8 }
 0x16b   :  { %1448 = shalt.err (!%p1445_p12)
}
 0x16c   :  { %s1449_s25 = scalar_lea.hbm %s1984_s6, 32 }
 0x16d   :  { %p1450_p13 = scmp.ne.s32.totalorder %s1984_s6, %s1449_s25  ;;  %p1453_p0 = scmp.lt.u32.totalorder %s1449_s25, %s1984_s6 }
 0x16f   :  { %p1455_p1 = pnand %p1453_p0, %p1450_p13 }
 0x171   :  { %1458 = shalt.err (!%p1455_p1)
}
 0x172   :  { %1064 = dma.vmem_to_hbm [thread:$0]  %s1929_s12, 32, %s1984_s6, [#allocation5]   ;;  %v1029_v38 = vmul.f32 1.442695, %v1028_v37  ;;  %v1031_v39 = vld [vmem:[%s1981_s3] sm:$0x3] }
 0x173   :  { %s1488_s8 = smov [#allocation2]  }
 0x174   :  { %1413 = vpow2.f32 %v1029_v38  ;;  %s1041_s9 = sshll.u32 %s1488_s8, 4  ;;  %s1042_s9 = int_to_ptr.vmem [resolvable:$true] %s1041_s9 }
 0x175   :  { %s1459_s1 = scalar_lea.vmem %s1042_s9, 32  ;;  %p1464_p3 = scmp.lt.s32.totalorder %s1042_s9, %s1042_s9 }
 0x176   :  { %p1460_p2 = scmp.ne.s32.totalorder %s1042_s9, %s1459_s1  ;;  %p1465_p4 = scmp.lt.s32.totalorder %s1459_s1, %s1459_s1 }
 0x178   :  { %p1466_p5 = por %p1465_p4, %p1464_p3 }
 0x17a   :  { %p1467_p6 = pnand %p1466_p5, %p1460_p2 }
 0x17e   :  { %v1414_v40 = vpop.eup %1413 }
 0x17f   :  { %v1032_v41 = vmul.f32 %v1414_v40, %v1031_v39 }
 0x181   :  { %v1033_v43 = vadd.f32 %v1205_v34, %v1032_v41 }
 0x183   :  { %1034 = vst.msk [vmem:[#allocation2] sm:$0x3] %vm1025_vm0, %v1033_v43 }
 0x184   :  { %1470 = shalt.err (!%p1467_p6)
}
 0x185   :  { %s1471_s11 = scalar_lea.hbm %s1982_s4, 32 }
 0x186   :  { %p1472_p7 = scmp.ne.s32.totalorder %s1982_s4, %s1471_s11  ;;  %p1475_p8 = scmp.lt.u32.totalorder %s1471_s11, %s1982_s4 }
 0x188   :  { %p1477_p9 = pnand %p1475_p8, %p1472_p7 }
 0x18a   :  { %1480 = shalt.err (!%p1477_p9)
}
 0x18b   :  { %1044 = dma.vmem_to_hbm [thread:$0]  %s1042_s9, 32, %s1982_s4, [#allocation3]  }
 0x18c   :  { %1481 = dma.done.wait [#allocation3], 32  }
 0x18d   :  { %1482 = vsyncadd [#allocation3], 4294967264 }
 0x18e   :  { %1483 = dma.done.wait [#allocation5], 64  }
 0x18f   :  { %1484 = vsyncadd [#allocation5], 4294967232 }
 0x190   :  { %1074 = vsyncpa [#allocation3], 1 }
 0x191   :  { %1075 = vsyncpa [#allocation5], 1 }

// kernel: encoder_forward.8
= control target key start
LH: loop header
LB: loop body
LE: loop exit
PB: predicated region body
PF: predicated region fallthrough
CT: control target
= control target key end

     0   :  { %s4869_s18 = smov 0   ;;  %s5693_s0 = inlined_call_operand.vmem [shape: bf16[128,3200], index: 0, kind: input, shape index: {}]   ;;  %s5694_s1 = inlined_call_operand.vmem [shape: bf16[3200,128], index: 1, kind: input, shape index: {}]   ;;  %s5695_s2 = inlined_call_operand.vmem [shape: f32[1,128], index: 2, kind: input, shape index: {}]   ;;  %s5696_s3 = inlined_call_operand.vmem [shape: bf16[128,16], index: 3, kind: input, shape index: {}]   ;;  %s5697_s4 = inlined_call_operand.vmem [shape: f32[1,16], index: 4, kind: input, shape index: {}]   ;;  %s5698_s5 = inlined_call_operand.vmem [shape: bf16[128,16], index: 5, kind: output, shape index: {}]  }
   0x1 LB: > { %s3577_s19 = sadd.s32 4294967295, %s4837_s18   ;;  %p3581_p0 = scmp.ge.s32.totalorder %s4837_s18, 1  ;;  %s4837_s18 = sphi %s4869_s18, %s15_s18  }
   0x2   : > { %p189_p1 = scmp.lt.s32.totalorder %s4837_s18, 3 }
   0x4   : > { %p190_p2 = pnand %p3581_p0, %p189_p1 }
   0x5   : > { %v4475_v0 = vld [vmem:[%s5694_s1 + $0x40] sm:$0xff] (!%p190_p2)   ;;  %v4479_v4 = vld [vmem:[%s5694_s1 + $0x48] sm:$0xff] (!%p190_p2)   ;;  %v4483_v8 = vld [vmem:[%s5694_s1 + $0x50] sm:$0xff] (!%p190_p2)   ;;  %s3582_s25 = sshll.u32 (!%p190_p2), %s3577_s19, 3  ;;  %vm3512_vm10 = vcmask (!%p190_p2), 125952  }
   0x6   : > { %193 = sbr.rel (%p190_p2) target bundleno = 708 (0x2c4), region = 40  ;;  %v4476_v1 = vld [vmem:[%s5694_s1] sm:$0xff] (!%p190_p2)   ;;  %3914 = vmatprep.subr.bf16.mxu0 (!%p190_p2), %v4475_v0  ;;  %v4480_v5 = vld [vmem:[%s5694_s1 + $0x8] sm:$0xff] (!%p190_p2)   ;;  %v4484_v9 = vld [vmem:[%s5694_s1 + $0x10] sm:$0xff] (!%p190_p2)   ;;  %p219_p3 = scmp.lt.s32.totalorder (!%p190_p2), %s3582_s25, 15 }
   0x7   : > { %v4477_v2 = vld [vmem:[%s5694_s1 + $0xc0] sm:$0xff] (!%p190_p2)   ;;  %3915 = vmatpush3.bf16.msra.mxu0 (!%p190_p2), %v4476_v1  ;;  %v4481_v6 = vld [vmem:[%s5694_s1 + $0xc8] sm:$0xff] (!%p190_p2)   ;;  %v4485_v10 = vld [vmem:[%s5694_s1 + $0xd0] sm:$0xff] (!%p190_p2)  }
   0x8   : > { %v4478_v3 = vld [vmem:[%s5694_s1 + $0x80] sm:$0xff] (!%p190_p2)   ;;  %3954 = vmatprep.subr.bf16.mxu1 (!%p190_p2), %v4477_v2  ;;  %3916 = vmatprep.subr.bf16.mxu0 (!%p190_p2), %v4479_v4  ;;  %v4482_v7 = vld [vmem:[%s5694_s1 + $0x88] sm:$0xff] (!%p190_p2)   ;;  %v4486_v11 = vld [vmem:[%s5694_s1 + $0x90] sm:$0xff] (!%p190_p2)  }
   0x9   : > { %3955 = vmatpush3.bf16.msra.mxu1 (!%p190_p2), %v4478_v3  ;;  %v4487_v12 = vld [vmem:[%s5694_s1 + $0x58] sm:$0xff] (!%p190_p2)   ;;  %v4491_v16 = vld [vmem:[%s5694_s1 + $0x60] sm:$0xff] (!%p190_p2)   ;;  %v4495_v20 = vld [vmem:[%s5694_s1 + $0x68] sm:$0xff] (!%p190_p2)  }
   0xa   : > { %3956 = vmatprep.subr.bf16.mxu1 (!%p190_p2), %v4481_v6  ;;  %v4488_v13 = vld [vmem:[%s5694_s1 + $0x18] sm:$0xff] (!%p190_p2)   ;;  %v4492_v17 = vld [vmem:[%s5694_s1 + $0x20] sm:$0xff] (!%p190_p2)   ;;  %v4496_v21 = vld [vmem:[%s5694_s1 + $0x28] sm:$0xff] (!%p190_p2)  }
   0xb   : > { %3917 = vmatpush3.bf16.msra.mxu0 (!%p190_p2), %v4480_v5  ;;  %v4489_v14 = vld [vmem:[%s5694_s1 + $0xd8] sm:$0xff] (!%p190_p2)   ;;  %v4493_v18 = vld [vmem:[%s5694_s1 + $0xe0] sm:$0xff] (!%p190_p2)   ;;  %v4497_v22 = vld [vmem:[%s5694_s1 + $0xe8] sm:$0xff] (!%p190_p2)  }
   0xc   : > { %3918 = vmatprep.subr.bf16.mxu0 (!%p190_p2), %v4483_v8  ;;  %v4490_v15 = vld [vmem:[%s5694_s1 + $0x98] sm:$0xff] (!%p190_p2)   ;;  %v4494_v19 = vld [vmem:[%s5694_s1 + $0xa0] sm:$0xff] (!%p190_p2)   ;;  %v4498_v23 = vld [vmem:[%s5694_s1 + $0xa8] sm:$0xff] (!%p190_p2)  }
   0xd   : > { %3957 = vmatpush3.bf16.msra.mxu1 %v4482_v7  ;;  %s5700_s25 = smov (!%p219_p3, %s3582_s25), 15  ;;  %v4499_v24 = vld [vmem:[%s5694_s1 + $0x70] sm:$0xff]   ;;  %v4503_v28 = vld [vmem:[%s5694_s1 + $0x78] sm:$0xff]   ;;  %v4510_v34 = vld [vmem:[%s5694_s1 + $0x140] sm:$0xff]  }
   0xe   : > { %3958 = vmatprep.subr.bf16.mxu1 %v4485_v10  ;;  %s4466_s24 = smul.u32 100, %s5700_s25  ;;  %v4500_v25 = vld [vmem:[%s5694_s1 + $0x30] sm:$0xff]   ;;  %v4504_v29 = vld [vmem:[%s5694_s1 + $0x38] sm:$0xff]   ;;  %v4514_v37 = vld [vmem:[%s5694_s1 + $0x100] sm:$0xff]   ;;  %s3585_s22 = sshll.u32 %s5700_s25, 2 }
   0xf   : > { %3919 = vmatpush3.bf16.msra.mxu0 %v4484_v9  ;;  %v4501_v26 = vld [vmem:[%s5694_s1 + $0xf0] sm:$0xff]   ;;  %v4505_v30 = vld [vmem:[%s5694_s1 + $0xf8] sm:$0xff]   ;;  %v4515_v38 = vld [vmem:[%s5694_s1 + $0x1c0] sm:$0xff]   ;;  %s5672_s26 = scalar_lea.vmem %s5698_s5, %s3585_s22 }
  0x10   : > { %3920 = vmatprep.subr.bf16.mxu0 %v4487_v12  ;;  %v4502_v27 = vld [vmem:[%s5694_s1 + $0xb0] sm:$0xff]   ;;  %s4972_s10 = scalar_lea.vmem %s5693_s0, %s4466_s24  ;;  %v4509_v33 = vld [vmem:[%s5694_s1 + $0xb8] sm:$0xff]   ;;  %v4516_v39 = vld [vmem:[%s5694_s1 + $0x180] sm:$0xff]  }
  0x11   : > { %3959 = vmatpush3.bf16.msra.mxu1 %v4486_v11  ;;  %v4506_v31 = vld [vmem:[%s4972_s10] ss:$100 sps:$4 sm:$0xff]   ;;  %v4511_v35 = vld [vmem:[%s4972_s10 + $0x8] ss:$100 sps:$4 sm:$0xff]   ;;  %v4524_v46 = vld [vmem:[%s5694_s1 + $0x150] sm:$0xff]  }
  0x12   : > { %3960 = vmatprep.subr.bf16.mxu1 %v4489_v14  ;;  %v4508_v32 = vld [vmem:[%s4972_s10 + $0x4] ss:$100 sps:$4 sm:$0xff]   ;;  %v4513_v36 = vld [vmem:[%s4972_s10 + $0xc] ss:$100 sps:$4 sm:$0xff]   ;;  %v4525_v47 = vld [vmem:[%s4972_s10 + $0xd4] ss:$100 sps:$4 sm:$0xff]  }
  0x13   : > { %3921 = vmatpush3.bf16.msra.mxu0 %v4488_v13  ;;  %2479 = vmatprep.mubr.bf16.mxu0 %v4508_v32  ;;  %v4517_v40 = vld [vmem:[%s5694_s1 + $0x148] sm:$0xff]   ;;  %v4527_v48 = vld [vmem:[%s5694_s1 + $0x110] sm:$0xff]   ;;  %v4531_v52 = vld [vmem:[%s5694_s1 + $0x158] sm:$0xff]  }
  0x14   : > { %3922 = vmatprep.subr.bf16.mxu0 %v4491_v16  ;;  %2544 = vmatprep.mubr.bf16.mxu1 %v4513_v36  ;;  %v4518_v41 = vld [vmem:[%s5694_s1 + $0x108] sm:$0xff]   ;;  %v4528_v49 = vld [vmem:[%s4972_s10 + $0xd0] ss:$100 sps:$4 sm:$0xff]   ;;  %v4532_v53 = vld [vmem:[%s5694_s1 + $0x118] sm:$0xff]  }
  0x15   : > { %3961 = vmatpush3.bf16.msra.mxu1 %v4490_v15  ;;  %v4519_v42 = vld [vmem:[%s5694_s1 + $0x1c8] sm:$0xff]   ;;  %v4529_v50 = vld [vmem:[%s5694_s1 + $0x1d0] sm:$0xff]   ;;  %v4533_v54 = vld [vmem:[%s5694_s1 + $0x1d8] sm:$0xff]  }
  0x16   : > { %3962 = vmatprep.subr.bf16.mxu1 %v4493_v18  ;;  %v4520_v43 = vld [vmem:[%s4972_s10 + $0xcc] ss:$100 sps:$4 sm:$0xff]   ;;  %v4534_v55 = vld [vmem:[%s4972_s10 + $0x194] ss:$100 sps:$4 sm:$0xff]   ;;  %v4538_v58 = vld [vmem:[%s5694_s1 + $0x160] sm:$0xff]  }
  0x17   : > { %3923 = vmatpush3.bf16.msra.mxu0 %v4492_v17  ;;  %v4522_v44 = vld [vmem:[%s5694_s1 + $0x188] sm:$0xff]   ;;  %v4530_v51 = vld [vmem:[%s5694_s1 + $0x190] sm:$0xff]   ;;  %v4536_v56 = vld [vmem:[%s5694_s1 + $0x198] sm:$0xff]  }
  0x18   : > { %3924 = vmatprep.subr.bf16.mxu0 %v4495_v20  ;;  %v4523_v45 = vld [vmem:[%s4972_s10 + $0xc8] ss:$100 sps:$4 sm:$0xff]   ;;  %v4537_v57 = vld [vmem:[%s4972_s10 + $0x190] ss:$100 sps:$4 sm:$0xff]   ;;  %v4539_v59 = vld [vmem:[%s4972_s10 + $0x19c] ss:$100 sps:$4 sm:$0xff]  }
  0x19   : > { %3963 = vmatpush3.bf16.msra.mxu1 %v4494_v19  ;;  %v4541_v60 = vld [vmem:[%s5694_s1 + $0x120] sm:$0xff]   ;;  %v4542_v61 = vld [vmem:[%s4972_s10 + $0x198] ss:$100 sps:$4 sm:$0xff]   ;;  %v4545_v0 = vld [vmem:[%s5694_s1 + $0x168] sm:$0xff]  }
  0x1a   : > { %3964 = vmatprep.subr.bf16.mxu1 %v4497_v22  ;;  %v4543_v62 = vld [vmem:[%s5694_s1 + $0x1e0] sm:$0xff]   ;;  %v4546_v1 = vld [vmem:[%s5694_s1 + $0x128] sm:$0xff]   ;;  %v4551_v5 = vld [vmem:[%s4972_s10 + $0x258] ss:$100 sps:$4 sm:$0xff]  }
  0x1b   : > { %3925 = vmatpush3.bf16.msra.mxu0 %v4496_v21  ;;  %v4544_v63 = vld [vmem:[%s5694_s1 + $0x1a0] sm:$0xff]   ;;  %v4547_v2 = vld [vmem:[%s5694_s1 + $0x1e8] sm:$0xff]   ;;  %v4552_v6 = vld [vmem:[%s5694_s1 + $0x170] sm:$0xff]  }
  0x1c   : > { %3926 = vmatprep.subr.bf16.mxu0 %v4499_v24  ;;  %v4548_v3 = vld [vmem:[%s4972_s10 + $0x25c] ss:$100 sps:$4 sm:$0xff]   ;;  %v4550_v4 = vld [vmem:[%s5694_s1 + $0x1a8] sm:$0xff]   ;;  %v4555_v8 = vld [vmem:[%s5694_s1 + $0x130] sm:$0xff]  }
  0x1d   : > { %3965 = vmatpush3.bf16.msra.mxu1 %v4498_v23  ;;  %v4553_v7 = vld [vmem:[%s4972_s10 + $0x264] ss:$100 sps:$4 sm:$0xff]   ;;  %v4557_v10 = vld [vmem:[%s5694_s1 + $0x1f0] sm:$0xff]   ;;  %v4559_v12 = vld [vmem:[%s5694_s1 + $0x178] sm:$0xff]  }
  0x1e   : > { %3966 = vmatprep.subr.bf16.mxu1 %v4501_v26  ;;  %v4556_v9 = vld [vmem:[%s4972_s10 + $0x260] ss:$100 sps:$4 sm:$0xff]   ;;  %v4558_v11 = vld [vmem:[%s5694_s1 + $0x1b0] sm:$0xff]   ;;  %v4560_v13 = vld [vmem:[%s5694_s1 + $0x138] sm:$0xff]  }
  0x1f   : > { %3927 = vmatpush3.bf16.msra.mxu0 %v4500_v25  ;;  %v4561_v14 = vld [vmem:[%s5694_s1 + $0x1f8] sm:$0xff]   ;;  %v4562_v15 = vld [vmem:[%s4972_s10 + $0x10] ss:$100 sps:$4 sm:$0xff]   ;;  %v4566_v18 = vld [vmem:[%s5694_s1 + $0x240] sm:$0xff]  }
  0x20   : > { %3928 = vmatprep.subr.bf16.mxu0 %v4503_v28  ;;  %v4564_v16 = vld [vmem:[%s4972_s10 + $0x14] ss:$100 sps:$4 sm:$0xff]   ;;  %v4569_v20 = vld [vmem:[%s4972_s10 + $0x1c] ss:$100 sps:$4 sm:$0xff]   ;;  %v4573_v24 = vld [vmem:[%s5694_s1 + $0x248] sm:$0xff]  }
  0x21   : > { %3967 = vmatpush3.bf16.msra.mxu1 %v4502_v27  ;;  %v4565_v17 = vld [vmem:[%s5694_s1 + $0x1b8] sm:$0xff]   ;;  %v4570_v21 = vld [vmem:[%s5694_s1 + $0x200] sm:$0xff]   ;;  %v4574_v25 = vld [vmem:[%s5694_s1 + $0x208] sm:$0xff]  }
  0x22   : > { %3968 = vmatprep.subr.bf16.mxu1 %v4505_v30  ;;  %v4567_v19 = vld [vmem:[%s4972_s10 + $0x18] ss:$100 sps:$4 sm:$0xff]   ;;  %v4571_v22 = vld [vmem:[%s5694_s1 + $0x2c0] sm:$0xff]   ;;  %v4575_v26 = vld [vmem:[%s5694_s1 + $0x2c8] sm:$0xff]  }
  0x23   : > { %3929 = vmatpush3.bf16.msra.mxu0 %v4504_v29  ;;  %v4572_v23 = vld [vmem:[%s5694_s1 + $0x280] sm:$0xff]   ;;  %v4578_v28 = vld [vmem:[%s5694_s1 + $0x288] sm:$0xff]   ;;  %v4579_v29 = vld [vmem:[%s4972_s10 + $0xd8] ss:$100 sps:$4 sm:$0xff]  }
  0x24   : > { %3994 = vmatprep.subr.bf16.mxu0 %v4510_v34  ;;  %v4576_v27 = vld [vmem:[%s4972_s10 + $0xdc] ss:$100 sps:$4 sm:$0xff]   ;;  %v4580_v30 = vld [vmem:[%s5694_s1 + $0x250] sm:$0xff]  }
  0x25   : > { %3969 = vmatpush3.bf16.msra.mxu1 %v4509_v33  ;;  %v4583_v32 = vld [vmem:[%s5694_s1 + $0x210] sm:$0xff]   ;;  %v4584_v33 = vld [vmem:[%s4972_s10 + $0xe0] ss:$100 sps:$4 sm:$0xff]   ;;  %v4587_v36 = vld [vmem:[%s5694_s1 + $0x258] sm:$0xff]  }
  0x26   : > { %2480 = vmatmul.mubr.bf16.vlgmr.msra.gmra.mrb[0].mxu0 %v4506_v31  ;;  %4034 = vmatprep.subr.bf16.mxu1 %v4515_v38  ;;  %v4581_v31 = vld [vmem:[%s4972_s10 + $0xe4] ss:$100 sps:$4 sm:$0xff]   ;;  %v4585_v34 = vld [vmem:[%s5694_s1 + $0x2d0] sm:$0xff]   ;;  %v4589_v38 = vld [vmem:[%s5694_s1 + $0x2d8] sm:$0xff]  }
  0x27   : > { %3995 = vmatpush3.bf16.msra.mxu0 %v4514_v37  ;;  %2487 = vmatprep.mubr.bf16.mxu0 %v4520_v43  ;;  %v4588_v37 = vld [vmem:[%s5694_s1 + $0x218] sm:$0xff]   ;;  %v4595_v43 = vld [vmem:[%s4972_s10 + $0x1ac] ss:$100 sps:$4 sm:$0xff]  }
  0x28   : > { %2545 = vmatmul.mubr.bf16.vlgmr.msra.gmra.mrb[0].mxu1 %v4511_v35  ;;  %3996 = vmatprep.subr.bf16.mxu0 %v4517_v40  ;;  %v4586_v35 = vld [vmem:[%s5694_s1 + $0x290] sm:$0xff]   ;;  %v4592_v40 = vld [vmem:[%s5694_s1 + $0x298] sm:$0xff]  }
  0x29   : > { %4035 = vmatpush3.bf16.msra.mxu1 %v4516_v39  ;;  %2552 = vmatprep.mubr.bf16.mxu1 %v4525_v47  ;;  %v4590_v39 = vld [vmem:[%s4972_s10 + $0x1a4] ss:$100 sps:$4 sm:$0xff]  }
  0x2a   : > { %4036 = vmatprep.subr.bf16.mxu1 %v4519_v42  ;;  %v4594_v42 = vld [vmem:[%s5694_s1 + $0x260] sm:$0xff]  }
  0x2b   : > { %3997 = vmatpush3.bf16.msra.mxu0 %v4518_v41  ;;  %v4593_v41 = vld [vmem:[%s4972_s10 + $0x1a0] ss:$100 sps:$4 sm:$0xff]  }
  0x2c   : > { %3998 = vmatprep.subr.bf16.mxu0 %v4524_v46  ;;  %v4599_v46 = vld [vmem:[%s5694_s1 + $0x2e0] sm:$0xff]  }
  0x2d   : > { %4037 = vmatpush3.bf16.msra.mxu1 %v4522_v44  ;;  %v4597_v44 = vld [vmem:[%s5694_s1 + $0x220] sm:$0xff]  }
  0x2e   : > { %2488 = vmatmul.mubr.bf16.gmra.mrb[4].mxu0 %v4523_v45  ;;  %4038 = vmatprep.subr.bf16.mxu1 %v4529_v50  ;;  %v4598_v45 = vld [vmem:[%s4972_s10 + $0x1a8] ss:$100 sps:$4 sm:$0xff]   ;;  %v4600_v47 = vld [vmem:[%s5694_s1 + $0x2a0] sm:$0xff]  }
  0x2f   : > { %3999 = vmatpush3.bf16.msra.mxu0 %v4527_v48  ;;  %2495 = vmatprep.mubr.bf16.mxu0 %v4534_v55  ;;  %v4601_v48 = vld [vmem:[%s5694_s1 + $0x268] sm:$0xff]   ;;  %v4609_v55 = vld [vmem:[%s4972_s10 + $0x274] ss:$100 sps:$4 sm:$0xff]  }
  0x30   : > { %2553 = vmatmul.mubr.bf16.gmra.mrb[4].mxu1 %v4528_v49  ;;  %4000 = vmatprep.subr.bf16.mxu0 %v4531_v52  ;;  %v4602_v49 = vld [vmem:[%s5694_s1 + $0x228] sm:$0xff]  }
  0x31   : > { %4039 = vmatpush3.bf16.msra.mxu1 %v4530_v51  ;;  %2560 = vmatprep.mubr.bf16.mxu1 %v4539_v59  ;;  %v4603_v50 = vld [vmem:[%s5694_s1 + $0x2e8] sm:$0xff]   ;;  %v4614_v59 = vld [vmem:[%s5694_s1 + $0x2b0] sm:$0xff]  }
  0x32   : > { %4040 = vmatprep.subr.bf16.mxu1 %v4533_v54  ;;  %v4604_v51 = vld [vmem:[%s4972_s10 + $0x26c] ss:$100 sps:$4 sm:$0xff]  }
  0x33   : > { %4001 = vmatpush3.bf16.msra.mxu0 %v4532_v53  ;;  %v4606_v52 = vld [vmem:[%s5694_s1 + $0x2a8] sm:$0xff]   ;;  %v4608_v54 = vld [vmem:[%s5694_s1 + $0x270] sm:$0xff]  }
  0x34   : > { %4002 = vmatprep.subr.bf16.mxu0 %v4538_v58  ;;  %v4607_v53 = vld [vmem:[%s4972_s10 + $0x268] ss:$100 sps:$4 sm:$0xff]   ;;  %v4613_v58 = vld [vmem:[%s5694_s1 + $0x2f0] sm:$0xff]  }
  0x35   : > { %4041 = vmatpush3.bf16.msra.mxu1 %v4536_v56  ;;  %v4611_v56 = vld [vmem:[%s5694_s1 + $0x230] sm:$0xff]  }
  0x36   : > { %2496 = vmatmul.mubr.bf16.gmra.mrb[8].mxu0 %v4537_v57  ;;  %4042 = vmatprep.subr.bf16.mxu1 %v4543_v62  ;;  %v4612_v57 = vld [vmem:[%s4972_s10 + $0x270] ss:$100 sps:$4 sm:$0xff]   ;;  %v4617_v62 = vld [vmem:[%s5694_s1 + $0x2f8] sm:$0xff]  }
  0x37   : > { %4003 = vmatpush3.bf16.msra.mxu0 %v4541_v60  ;;  %2503 = vmatprep.mubr.bf16.mxu0 %v4548_v3  ;;  %v4615_v60 = vld [vmem:[%s5694_s1 + $0x278] sm:$0xff]   ;;  %v4623_v3 = vld [vmem:[%s4972_s10 + $0x28] ss:$100 sps:$4 sm:$0xff]  }
  0x38   : > { %2561 = vmatmul.mubr.bf16.gmra.mrb[8].mxu1 %v4542_v61  ;;  %4004 = vmatprep.subr.bf16.mxu0 %v4545_v0  ;;  %v4616_v61 = vld [vmem:[%s5694_s1 + $0x238] sm:$0xff]   ;;  %v4620_v0 = vld [vmem:[%s4972_s10 + $0x24] ss:$100 sps:$4 sm:$0xff]  }
  0x39   : > { %4043 = vmatpush3.bf16.msra.mxu1 %v4544_v63  ;;  %2568 = vmatprep.mubr.bf16.mxu1 %v4553_v7  ;;  %v4618_v63 = vld [vmem:[%s4972_s10 + $0x20] ss:$100 sps:$4 sm:$0xff]  }
  0x3a   : > { %4044 = vmatprep.subr.bf16.mxu1 %v4547_v2  ;;  %v4622_v2 = vld [vmem:[%s5694_s1 + $0x340] sm:$0xff]  }
  0x3b   : > { %4005 = vmatpush3.bf16.msra.mxu0 %v4546_v1  ;;  %v4621_v1 = vld [vmem:[%s5694_s1 + $0x2b8] sm:$0xff]   ;;  %v4628_v7 = vld [vmem:[%s5694_s1 + $0x380] sm:$0xff]  }
  0x3c   : > { %4006 = vmatprep.subr.bf16.mxu0 %v4552_v6  ;;  %v4627_v6 = vld [vmem:[%s5694_s1 + $0x3c0] sm:$0xff]  }
  0x3d   : > { %4045 = vmatpush3.bf16.msra.mxu1 %v4550_v4  ;;  %v4625_v4 = vld [vmem:[%s4972_s10 + $0x2c] ss:$100 sps:$4 sm:$0xff]  }
  0x3e   : > { %2504 = vmatmul.mubr.bf16.gmra.mrb[12].mxu0 %v4551_v5  ;;  %4046 = vmatprep.subr.bf16.mxu1 %v4557_v10  ;;  %v4626_v5 = vld [vmem:[%s5694_s1 + $0x300] sm:$0xff]   ;;  %v4631_v10 = vld [vmem:[%s5694_s1 + $0x3c8] sm:$0xff]  }
  0x3f   : > { %4007 = vmatpush3.bf16.msra.mxu0 %v4555_v8  ;;  %2609 = vmatprep.mubr.bf16.mxu0 %v4564_v16  ;;  %v4629_v8 = vld [vmem:[%s5694_s1 + $0x348] sm:$0xff]   ;;  %v4639_v16 = vld [vmem:[%s5694_s1 + $0x310] sm:$0xff]  }
  0x40   : > { %2569 = vmatmul.mubr.bf16.gmra.mrb[12].mxu1 %v4556_v9  ;;  %4008 = vmatprep.subr.bf16.mxu0 %v4559_v12  ;;  %v4630_v9 = vld [vmem:[%s5694_s1 + $0x308] sm:$0xff]  }
  0x41   : > { %4047 = vmatpush3.bf16.msra.mxu1 %v4558_v11  ;;  %2674 = vmatprep.mubr.bf16.mxu1 %v4569_v20  ;;  %v4632_v11 = vld [vmem:[%s4972_s10 + $0xec] ss:$100 sps:$4 sm:$0xff]   ;;  %v4643_v20 = vld [vmem:[%s5694_s1 + $0x358] sm:$0xff]  }
  0x42   : > { %4048 = vmatprep.subr.bf16.mxu1 %v4561_v14  ;;  %v4634_v12 = vld [vmem:[%s5694_s1 + $0x388] sm:$0xff]   ;;  %v4636_v14 = vld [vmem:[%s5694_s1 + $0x350] sm:$0xff]  }
  0x43   : > { %4009 = vmatpush3.bf16.msra.mxu0 %v4560_v13  ;;  %v4635_v13 = vld [vmem:[%s4972_s10 + $0xe8] ss:$100 sps:$4 sm:$0xff]  }
  0x44   : > { %4074 = vmatprep.subr.bf16.mxu0 %v4566_v18  ;;  %v4641_v18 = vld [vmem:[%s5694_s1 + $0x3d0] sm:$0xff]  }
  0x45   : > { %4049 = vmatpush3.bf16.msra.mxu1 %v4565_v17  ;;  %v4640_v17 = vld [vmem:[%s4972_s10 + $0xf0] ss:$100 sps:$4 sm:$0xff]  }
  0x46   : > { %2610 = vmatmul.mubr.bf16.vlgmr.msra.gmra.mrb[16].mxu0 %v4562_v15  ;;  %4114 = vmatprep.subr.bf16.mxu1 %v4571_v22  ;;  %v4637_v15 = vld [vmem:[%s4972_s10 + $0xf4] ss:$100 sps:$4 sm:$0xff]  }
  0x47   : > { %4075 = vmatpush3.bf16.msra.mxu0 %v4570_v21  ;;  %2617 = vmatprep.mubr.bf16.mxu0 %v4576_v27  ;;  %v4644_v21 = vld [vmem:[%s5694_s1 + $0x318] sm:$0xff]  }
  0x48   : > { %2675 = vmatmul.mubr.bf16.vlgmr.msra.gmra.mrb[16].mxu1 %v4567_v19  ;;  %4076 = vmatprep.subr.bf16.mxu0 %v4573_v24  ;;  %v4642_v19 = vld [vmem:[%s5694_s1 + $0x390] sm:$0xff]   ;;  %v4645_v22 = vld [vmem:[%s5694_s1 + $0x3d8] sm:$0xff]  }
  0x49   : > { %4115 = vmatpush3.bf16.msra.mxu1 %v4572_v23  ;;  %2682 = vmatprep.mubr.bf16.mxu1 %v4581_v31  ;;  %v4646_v23 = vld [vmem:[%s4972_s10 + $0x1b4] ss:$100 sps:$4 sm:$0xff]   ;;  %v4651_v27 = vld [vmem:[%s4972_s10 + $0x1bc] ss:$100 sps:$4 sm:$0xff]  }
  0x4a   : > { %4116 = vmatprep.subr.bf16.mxu1 %v4575_v26  ;;  %v4648_v24 = vld [vmem:[%s5694_s1 + $0x398] sm:$0xff]   ;;  %v4650_v26 = vld [vmem:[%s5694_s1 + $0x360] sm:$0xff]  }
  0x4b   : > { %4077 = vmatpush3.bf16.msra.mxu0 %v4574_v25  ;;  %v4649_v25 = vld [vmem:[%s4972_s10 + $0x1b0] ss:$100 sps:$4 sm:$0xff]   ;;  %v4656_v31 = vld [vmem:[%s5694_s1 + $0x3a0] sm:$0xff]  }
  0x4c   : > { %4078 = vmatprep.subr.bf16.mxu0 %v4580_v30  ;;  %v4655_v30 = vld [vmem:[%s5694_s1 + $0x3e0] sm:$0xff]  }
  0x4d   : > { %4117 = vmatpush3.bf16.msra.mxu1 %v4578_v28  ;;  %v4653_v28 = vld [vmem:[%s5694_s1 + $0x320] sm:$0xff]  }
  0x4e   : > { %2618 = vmatmul.mubr.bf16.gmra.mrb[20].mxu0 %v4579_v29  ;;  %4118 = vmatprep.subr.bf16.mxu1 %v4585_v34  ;;  %v4654_v29 = vld [vmem:[%s4972_s10 + $0x1b8] ss:$100 sps:$4 sm:$0xff]   ;;  %v4659_v34 = vld [vmem:[%s5694_s1 + $0x3e8] sm:$0xff]  }
  0x4f   : > { %4079 = vmatpush3.bf16.msra.mxu0 %v4583_v32  ;;  %2625 = vmatprep.mubr.bf16.mxu0 %v4590_v39  ;;  %v4657_v32 = vld [vmem:[%s5694_s1 + $0x368] sm:$0xff]  }
  0x50   : > { %2683 = vmatmul.mubr.bf16.gmra.mrb[20].mxu1 %v4584_v33  ;;  %4080 = vmatprep.subr.bf16.mxu0 %v4587_v36  ;;  %v4658_v33 = vld [vmem:[%s5694_s1 + $0x328] sm:$0xff]  }
  0x51   : > { %4119 = vmatpush3.bf16.msra.mxu1 %v4586_v35  ;;  %2690 = vmatprep.mubr.bf16.mxu1 %v4595_v43  ;;  %v4660_v35 = vld [vmem:[%s4972_s10 + $0x27c] ss:$100 sps:$4 sm:$0xff]   ;;  %v4662_v36 = vld [vmem:[%s5694_s1 + $0x3a8] sm:$0xff]   ;;  %v4670_v43 = vld [vmem:[%s5694_s1 + $0x3b0] sm:$0xff]  }
  0x52   : > { %4120 = vmatprep.subr.bf16.mxu1 %v4589_v38  ;;  %v4664_v38 = vld [vmem:[%s5694_s1 + $0x370] sm:$0xff]   ;;  %v4665_v39 = vld [vmem:[%s4972_s10 + $0x284] ss:$100 sps:$4 sm:$0xff]  }
  0x53   : > { %4081 = vmatpush3.bf16.msra.mxu0 %v4588_v37  ;;  %v4663_v37 = vld [vmem:[%s4972_s10 + $0x278] ss:$100 sps:$4 sm:$0xff]  }
  0x54   : > { %4082 = vmatprep.subr.bf16.mxu0 %v4594_v42  ;;  %v4669_v42 = vld [vmem:[%s5694_s1 + $0x3f0] sm:$0xff]  }
  0x55   : > { %4121 = vmatpush3.bf16.msra.mxu1 %v4592_v40  ;;  %v4667_v40 = vld [vmem:[%s5694_s1 + $0x330] sm:$0xff]  }
  0x56   : > { %2626 = vmatmul.mubr.bf16.gmra.mrb[24].mxu0 %v4593_v41  ;;  %4122 = vmatprep.subr.bf16.mxu1 %v4599_v46  ;;  %v4668_v41 = vld [vmem:[%s4972_s10 + $0x280] ss:$100 sps:$4 sm:$0xff]   ;;  %v4673_v46 = vld [vmem:[%s5694_s1 + $0x3f8] sm:$0xff]  }
  0x57   : > { %4083 = vmatpush3.bf16.msra.mxu0 %v4597_v44  ;;  %2633 = vmatprep.mubr.bf16.mxu0 %v4604_v51  ;;  %v4671_v44 = vld [vmem:[%s5694_s1 + $0x378] sm:$0xff]  }
  0x58   : > { %2691 = vmatmul.mubr.bf16.gmra.mrb[24].mxu1 %v4598_v45  ;;  %4084 = vmatprep.subr.bf16.mxu0 %v4601_v48  ;;  %v4672_v45 = vld [vmem:[%s5694_s1 + $0x338] sm:$0xff]  }
  0x59   : > { %4123 = vmatpush3.bf16.msra.mxu1 %v4600_v47  ;;  %2698 = vmatprep.mubr.bf16.mxu1 %v4609_v55  ;;  %v4674_v47 = vld [vmem:[%s4972_s10 + $0x30] ss:$100 sps:$4 sm:$0xff]   ;;  %v4679_v51 = vld [vmem:[%s4972_s10 + $0x38] ss:$100 sps:$4 sm:$0xff]   ;;  %v4684_v55 = vld [vmem:[%s5694_s1 + $0x480] sm:$0xff]  }
  0x5a   : > { %4124 = vmatprep.subr.bf16.mxu1 %v4603_v50  ;;  %v4676_v48 = vld [vmem:[%s4972_s10 + $0x34] ss:$100 sps:$4 sm:$0xff]   ;;  %v4678_v50 = vld [vmem:[%s5694_s1 + $0x440] sm:$0xff]  }
  0x5b   : > { %4085 = vmatpush3.bf16.msra.mxu0 %v4602_v49  ;;  %v4677_v49 = vld [vmem:[%s5694_s1 + $0x3b8] sm:$0xff]  }
  0x5c   : > { %4086 = vmatprep.subr.bf16.mxu0 %v4608_v54  ;;  %v4683_v54 = vld [vmem:[%s5694_s1 + $0x4c0] sm:$0xff]  }
  0x5d   : > { %4125 = vmatpush3.bf16.msra.mxu1 %v4606_v52  ;;  %v4681_v52 = vld [vmem:[%s4972_s10 + $0x3c] ss:$100 sps:$4 sm:$0xff]  }
  0x5e   : > { %2634 = vmatmul.mubr.bf16.gmra.mrb[28].mxu0 %v4607_v53  ;;  %4126 = vmatprep.subr.bf16.mxu1 %v4613_v58  ;;  %v4682_v53 = vld [vmem:[%s5694_s1 + $0x400] sm:$0xff]   ;;  %v4687_v58 = vld [vmem:[%s5694_s1 + $0x4c8] sm:$0xff]  }
  0x5f   : > { %4087 = vmatpush3.bf16.msra.mxu0 %v4611_v56  ;;  %2739 = vmatprep.mubr.bf16.mxu0 %v4620_v0  ;;  %v4685_v56 = vld [vmem:[%s5694_s1 + $0x448] sm:$0xff]   ;;  %v4695_v0 = vld [vmem:[%s5694_s1 + $0x410] sm:$0xff]  }
  0x60   : > { %2699 = vmatmul.mubr.bf16.gmra.mrb[28].mxu1 %v4612_v57  ;;  %4088 = vmatprep.subr.bf16.mxu0 %v4615_v60  ;;  %v4686_v57 = vld [vmem:[%s5694_s1 + $0x408] sm:$0xff]  }
  0x61   : > { %4127 = vmatpush3.bf16.msra.mxu1 %v4614_v59  ;;  %2804 = vmatprep.mubr.bf16.mxu1 %v4625_v4  ;;  %v4688_v59 = vld [vmem:[%s4972_s10 + $0xfc] ss:$100 sps:$4 sm:$0xff]   ;;  %v4690_v60 = vld [vmem:[%s5694_s1 + $0x488] sm:$0xff]  }
  0x62   : > { %4128 = vmatprep.subr.bf16.mxu1 %v4617_v62  ;;  %v4692_v62 = vld [vmem:[%s5694_s1 + $0x450] sm:$0xff]   ;;  %v4699_v4 = vld [vmem:[%s5694_s1 + $0x458] sm:$0xff]  }
  0x63   : > { %4089 = vmatpush3.bf16.msra.mxu0 %v4616_v61  ;;  %v4691_v61 = vld [vmem:[%s4972_s10 + $0xf8] ss:$100 sps:$4 sm:$0xff]  }
  0x64   : > { %4154 = vmatprep.subr.bf16.mxu0 %v4622_v2  ;;  %v4697_v2 = vld [vmem:[%s5694_s1 + $0x4d0] sm:$0xff]  }
  0x65   : > { %4129 = vmatpush3.bf16.msra.mxu1 %v4621_v1  ;;  %v4696_v1 = vld [vmem:[%s4972_s10 + $0x100] ss:$100 sps:$4 sm:$0xff]  }
  0x66   : > { %2740 = vmatmul.mubr.bf16.vlgmr.msra.gmra.mrb[32].mxu0 %v4618_v63  ;;  %4194 = vmatprep.subr.bf16.mxu1 %v4627_v6  ;;  %v4693_v63 = vld [vmem:[%s4972_s10 + $0x104] ss:$100 sps:$4 sm:$0xff]   ;;  %v4701_v6 = vld [vmem:[%s5694_s1 + $0x4d8] sm:$0xff]  }
  0x67   : > { %4155 = vmatpush3.bf16.msra.mxu0 %v4626_v5  ;;  %2747 = vmatprep.mubr.bf16.mxu0 %v4632_v11  ;;  %v4700_v5 = vld [vmem:[%s5694_s1 + $0x418] sm:$0xff]   ;;  %v4707_v11 = vld [vmem:[%s4972_s10 + $0x1cc] ss:$100 sps:$4 sm:$0xff]  }
  0x68   : > { %2805 = vmatmul.mubr.bf16.vlgmr.msra.gmra.mrb[32].mxu1 %v4623_v3  ;;  %4156 = vmatprep.subr.bf16.mxu0 %v4629_v8  ;;  %v4698_v3 = vld [vmem:[%s5694_s1 + $0x490] sm:$0xff]   ;;  %v4704_v8 = vld [vmem:[%s5694_s1 + $0x498] sm:$0xff]  }
  0x69   : > { %4195 = vmatpush3.bf16.msra.mxu1 %v4628_v7  ;;  %2812 = vmatprep.mubr.bf16.mxu1 %v4637_v15  ;;  %v4702_v7 = vld [vmem:[%s4972_s10 + $0x1c4] ss:$100 sps:$4 sm:$0xff]  }
  0x6a   : > { %4196 = vmatprep.subr.bf16.mxu1 %v4631_v10  ;;  %v4706_v10 = vld [vmem:[%s5694_s1 + $0x460] sm:$0xff]  }
  0x6b   : > { %4157 = vmatpush3.bf16.msra.mxu0 %v4630_v9  ;;  %v4705_v9 = vld [vmem:[%s4972_s10 + $0x1c0] ss:$100 sps:$4 sm:$0xff]  }
  0x6c   : > { %4158 = vmatprep.subr.bf16.mxu0 %v4636_v14  ;;  %v4711_v14 = vld [vmem:[%s5694_s1 + $0x4e0] sm:$0xff]  }
  0x6d   : > { %4197 = vmatpush3.bf16.msra.mxu1 %v4634_v12  ;;  %v4709_v12 = vld [vmem:[%s5694_s1 + $0x420] sm:$0xff]  }
  0x6e   : > { %2748 = vmatmul.mubr.bf16.gmra.mrb[36].mxu0 %v4635_v13  ;;  %4198 = vmatprep.subr.bf16.mxu1 %v4641_v18  ;;  %v4710_v13 = vld [vmem:[%s4972_s10 + $0x1c8] ss:$100 sps:$4 sm:$0xff]   ;;  %v4712_v15 = vld [vmem:[%s5694_s1 + $0x4a0] sm:$0xff]  }
  0x6f   : > { %4159 = vmatpush3.bf16.msra.mxu0 %v4639_v16  ;;  %2755 = vmatprep.mubr.bf16.mxu0 %v4646_v23  ;;  %v4713_v16 = vld [vmem:[%s5694_s1 + $0x468] sm:$0xff]   ;;  %v4721_v23 = vld [vmem:[%s4972_s10 + $0x294] ss:$100 sps:$4 sm:$0xff]  }
  0x70   : > { %2813 = vmatmul.mubr.bf16.gmra.mrb[36].mxu1 %v4640_v17  ;;  %4160 = vmatprep.subr.bf16.mxu0 %v4643_v20  ;;  %v4714_v17 = vld [vmem:[%s5694_s1 + $0x428] sm:$0xff]  }
  0x71   : > { %4199 = vmatpush3.bf16.msra.mxu1 %v4642_v19  ;;  %2820 = vmatprep.mubr.bf16.mxu1 %v4651_v27  ;;  %v4715_v18 = vld [vmem:[%s5694_s1 + $0x4e8] sm:$0xff]   ;;  %v4726_v27 = vld [vmem:[%s5694_s1 + $0x4b0] sm:$0xff]  }
  0x72   : > { %4200 = vmatprep.subr.bf16.mxu1 %v4645_v22  ;;  %v4716_v19 = vld [vmem:[%s4972_s10 + $0x28c] ss:$100 sps:$4 sm:$0xff]  }
  0x73   : > { %4161 = vmatpush3.bf16.msra.mxu0 %v4644_v21  ;;  %v4718_v20 = vld [vmem:[%s5694_s1 + $0x4a8] sm:$0xff]   ;;  %v4720_v22 = vld [vmem:[%s5694_s1 + $0x470] sm:$0xff]  }
  0x74   : > { %4162 = vmatprep.subr.bf16.mxu0 %v4650_v26  ;;  %v4719_v21 = vld [vmem:[%s4972_s10 + $0x288] ss:$100 sps:$4 sm:$0xff]   ;;  %v4725_v26 = vld [vmem:[%s5694_s1 + $0x4f0] sm:$0xff]  }
  0x75   : > { %4201 = vmatpush3.bf16.msra.mxu1 %v4648_v24  ;;  %v4723_v24 = vld [vmem:[%s5694_s1 + $0x430] sm:$0xff]  }
  0x76   : > { %2756 = vmatmul.mubr.bf16.gmra.mrb[40].mxu0 %v4649_v25  ;;  %4202 = vmatprep.subr.bf16.mxu1 %v4655_v30  ;;  %v4724_v25 = vld [vmem:[%s4972_s10 + $0x290] ss:$100 sps:$4 sm:$0xff]   ;;  %v4729_v30 = vld [vmem:[%s5694_s1 + $0x4f8] sm:$0xff]  }
  0x77   : > { %4163 = vmatpush3.bf16.msra.mxu0 %v4653_v28  ;;  %2763 = vmatprep.mubr.bf16.mxu0 %v4660_v35  ;;  %v4727_v28 = vld [vmem:[%s5694_s1 + $0x478] sm:$0xff]   ;;  %v4735_v35 = vld [vmem:[%s4972_s10 + $0x48] ss:$100 sps:$4 sm:$0xff]  }
  0x78   : > { %2821 = vmatmul.mubr.bf16.gmra.mrb[40].mxu1 %v4654_v29  ;;  %4164 = vmatprep.subr.bf16.mxu0 %v4657_v32  ;;  %v4728_v29 = vld [vmem:[%s5694_s1 + $0x438] sm:$0xff]   ;;  %v4732_v32 = vld [vmem:[%s4972_s10 + $0x44] ss:$100 sps:$4 sm:$0xff]  }
  0x79   : > { %4203 = vmatpush3.bf16.msra.mxu1 %v4656_v31  ;;  %2828 = vmatprep.mubr.bf16.mxu1 %v4665_v39  ;;  %v4730_v31 = vld [vmem:[%s4972_s10 + $0x40] ss:$100 sps:$4 sm:$0xff]  }
  0x7a   : > { %4204 = vmatprep.subr.bf16.mxu1 %v4659_v34  ;;  %v4734_v34 = vld [vmem:[%s5694_s1 + $0x540] sm:$0xff]  }
  0x7b   : > { %4165 = vmatpush3.bf16.msra.mxu0 %v4658_v33  ;;  %v4733_v33 = vld [vmem:[%s5694_s1 + $0x4b8] sm:$0xff]   ;;  %v4740_v39 = vld [vmem:[%s5694_s1 + $0x580] sm:$0xff]  }
  0x7c   : > { %4166 = vmatprep.subr.bf16.mxu0 %v4664_v38  ;;  %v4739_v38 = vld [vmem:[%s5694_s1 + $0x5c0] sm:$0xff]  }
  0x7d   : > { %4205 = vmatpush3.bf16.msra.mxu1 %v4662_v36  ;;  %v4737_v36 = vld [vmem:[%s4972_s10 + $0x4c] ss:$100 sps:$4 sm:$0xff]  }
  0x7e   : > { %2764 = vmatmul.mubr.bf16.gmra.mrb[44].mxu0 %v4663_v37  ;;  %4206 = vmatprep.subr.bf16.mxu1 %v4669_v42  ;;  %v4738_v37 = vld [vmem:[%s5694_s1 + $0x500] sm:$0xff]   ;;  %v4743_v42 = vld [vmem:[%s5694_s1 + $0x5c8] sm:$0xff]  }
  0x7f   : > { %4167 = vmatpush3.bf16.msra.mxu0 %v4667_v40  ;;  %2869 = vmatprep.mubr.bf16.mxu0 %v4676_v48  ;;  %v4741_v40 = vld [vmem:[%s5694_s1 + $0x548] sm:$0xff]   ;;  %v4751_v48 = vld [vmem:[%s5694_s1 + $0x510] sm:$0xff]  }
  0x80   : > { %2829 = vmatmul.mubr.bf16.gmra.mrb[44].mxu1 %v4668_v41  ;;  %4168 = vmatprep.subr.bf16.mxu0 %v4671_v44  ;;  %v4742_v41 = vld [vmem:[%s5694_s1 + $0x508] sm:$0xff]  }
  0x81   : > { %4207 = vmatpush3.bf16.msra.mxu1 %v4670_v43  ;;  %2934 = vmatprep.mubr.bf16.mxu1 %v4681_v52  ;;  %v4744_v43 = vld [vmem:[%s4972_s10 + $0x10c] ss:$100 sps:$4 sm:$0xff]   ;;  %v4755_v52 = vld [vmem:[%s5694_s1 + $0x558] sm:$0xff]  }
  0x82   : > { %4208 = vmatprep.subr.bf16.mxu1 %v4673_v46  ;;  %v4746_v44 = vld [vmem:[%s5694_s1 + $0x588] sm:$0xff]   ;;  %v4748_v46 = vld [vmem:[%s5694_s1 + $0x550] sm:$0xff]  }
  0x83   : > { %4169 = vmatpush3.bf16.msra.mxu0 %v4672_v45  ;;  %v4747_v45 = vld [vmem:[%s4972_s10 + $0x108] ss:$100 sps:$4 sm:$0xff]  }
  0x84   : > { %4234 = vmatprep.subr.bf16.mxu0 %v4678_v50  ;;  %v4753_v50 = vld [vmem:[%s5694_s1 + $0x5d0] sm:$0xff]  }
  0x85   : > { %4209 = vmatpush3.bf16.msra.mxu1 %v4677_v49  ;;  %v4752_v49 = vld [vmem:[%s4972_s10 + $0x110] ss:$100 sps:$4 sm:$0xff]  }
  0x86   : > { %2870 = vmatmul.mubr.bf16.vlgmr.msra.gmra.mrb[48].mxu0 %v4674_v47  ;;  %4274 = vmatprep.subr.bf16.mxu1 %v4683_v54  ;;  %v4749_v47 = vld [vmem:[%s4972_s10 + $0x114] ss:$100 sps:$4 sm:$0xff]  }
  0x87   : > { %4235 = vmatpush3.bf16.msra.mxu0 %v4682_v53  ;;  %2877 = vmatprep.mubr.bf16.mxu0 %v4688_v59  ;;  %v4756_v53 = vld [vmem:[%s5694_s1 + $0x518] sm:$0xff]  }
  0x88   : > { %2935 = vmatmul.mubr.bf16.vlgmr.msra.gmra.mrb[48].mxu1 %v4679_v51  ;;  %4236 = vmatprep.subr.bf16.mxu0 %v4685_v56  ;;  %v4754_v51 = vld [vmem:[%s5694_s1 + $0x590] sm:$0xff]   ;;  %v4757_v54 = vld [vmem:[%s5694_s1 + $0x5d8] sm:$0xff]  }
  0x89   : > { %4275 = vmatpush3.bf16.msra.mxu1 %v4684_v55  ;;  %2942 = vmatprep.mubr.bf16.mxu1 %v4693_v63  ;;  %v4758_v55 = vld [vmem:[%s4972_s10 + $0x1d4] ss:$100 sps:$4 sm:$0xff]   ;;  %v4763_v59 = vld [vmem:[%s4972_s10 + $0x1dc] ss:$100 sps:$4 sm:$0xff]  }
  0x8a   : > { %4276 = vmatprep.subr.bf16.mxu1 %v4687_v58  ;;  %v4760_v56 = vld [vmem:[%s5694_s1 + $0x598] sm:$0xff]   ;;  %v4762_v58 = vld [vmem:[%s5694_s1 + $0x560] sm:$0xff]  }
  0x8b   : > { %4237 = vmatpush3.bf16.msra.mxu0 %v4686_v57  ;;  %v4761_v57 = vld [vmem:[%s4972_s10 + $0x1d0] ss:$100 sps:$4 sm:$0xff]   ;;  %v4768_v63 = vld [vmem:[%s5694_s1 + $0x5a0] sm:$0xff]  }
  0x8c   : > { %4238 = vmatprep.subr.bf16.mxu0 %v4692_v62  ;;  %v4767_v62 = vld [vmem:[%s5694_s1 + $0x5e0] sm:$0xff]  }
  0x8d   : > { %4277 = vmatpush3.bf16.msra.mxu1 %v4690_v60  ;;  %v4765_v60 = vld [vmem:[%s5694_s1 + $0x520] sm:$0xff]  }
  0x8e   : > { %2878 = vmatmul.mubr.bf16.gmra.mrb[52].mxu0 %v4691_v61  ;;  %4278 = vmatprep.subr.bf16.mxu1 %v4697_v2  ;;  %v4766_v61 = vld [vmem:[%s4972_s10 + $0x1d8] ss:$100 sps:$4 sm:$0xff]   ;;  %v4771_v2 = vld [vmem:[%s5694_s1 + $0x5e8] sm:$0xff]  }
  0x8f   : > { %4239 = vmatpush3.bf16.msra.mxu0 %v4695_v0  ;;  %2885 = vmatprep.mubr.bf16.mxu0 %v4702_v7  ;;  %v4769_v0 = vld [vmem:[%s5694_s1 + $0x568] sm:$0xff]  }
  0x90   : > { %2943 = vmatmul.mubr.bf16.gmra.mrb[52].mxu1 %v4696_v1  ;;  %4240 = vmatprep.subr.bf16.mxu0 %v4699_v4  ;;  %v4770_v1 = vld [vmem:[%s5694_s1 + $0x528] sm:$0xff]  }
  0x91   : > { %4279 = vmatpush3.bf16.msra.mxu1 %v4698_v3  ;;  %2950 = vmatprep.mubr.bf16.mxu1 %v4707_v11  ;;  %v4772_v3 = vld [vmem:[%s4972_s10 + $0x29c] ss:$100 sps:$4 sm:$0xff]   ;;  %v4774_v4 = vld [vmem:[%s5694_s1 + $0x5a8] sm:$0xff]   ;;  %v4782_v11 = vld [vmem:[%s5694_s1 + $0x5b0] sm:$0xff]  }
  0x92   : > { %4280 = vmatprep.subr.bf16.mxu1 %v4701_v6  ;;  %v4776_v6 = vld [vmem:[%s5694_s1 + $0x570] sm:$0xff]   ;;  %v4777_v7 = vld [vmem:[%s4972_s10 + $0x2a4] ss:$100 sps:$4 sm:$0xff]  }
  0x93   : > { %4241 = vmatpush3.bf16.msra.mxu0 %v4700_v5  ;;  %v4775_v5 = vld [vmem:[%s4972_s10 + $0x298] ss:$100 sps:$4 sm:$0xff]  }
  0x94   : > { %4242 = vmatprep.subr.bf16.mxu0 %v4706_v10  ;;  %v4781_v10 = vld [vmem:[%s5694_s1 + $0x5f0] sm:$0xff]  }
  0x95   : > { %4281 = vmatpush3.bf16.msra.mxu1 %v4704_v8  ;;  %v4779_v8 = vld [vmem:[%s5694_s1 + $0x530] sm:$0xff]  }
  0x96   : > { %2886 = vmatmul.mubr.bf16.gmra.mrb[56].mxu0 %v4705_v9  ;;  %4282 = vmatprep.subr.bf16.mxu1 %v4711_v14  ;;  %v4780_v9 = vld [vmem:[%s4972_s10 + $0x2a0] ss:$100 sps:$4 sm:$0xff]   ;;  %v4785_v14 = vld [vmem:[%s5694_s1 + $0x5f8] sm:$0xff]  }
  0x97   : > { %4243 = vmatpush3.bf16.msra.mxu0 %v4709_v12  ;;  %2893 = vmatprep.mubr.bf16.mxu0 %v4716_v19  ;;  %v4783_v12 = vld [vmem:[%s5694_s1 + $0x578] sm:$0xff]   ;;  %v4790_v19 = vld [vmem:[%s5694_s1 + $0x600] sm:$0xff]  }
  0x98   : > { %2951 = vmatmul.mubr.bf16.gmra.mrb[56].mxu1 %v4710_v13  ;;  %4244 = vmatprep.subr.bf16.mxu0 %v4713_v16  ;;  %v4784_v13 = vld [vmem:[%s5694_s1 + $0x538] sm:$0xff]  }
  0x99   : > { %4283 = vmatpush3.bf16.msra.mxu1 %v4712_v15  ;;  %2958 = vmatprep.mubr.bf16.mxu1 %v4721_v23  ;;  %v4786_v15 = vld [vmem:[%s4972_s10 + $0x50] ss:$100 sps:$4 sm:$0xff]  }
  0x9a   : > { %4284 = vmatprep.subr.bf16.mxu1 %v4715_v18  ;;  %v4788_v16 = vld [vmem:[%s4972_s10 + $0x54] ss:$100 sps:$4 sm:$0xff]  }
  0x9b   : > { %4245 = vmatpush3.bf16.msra.mxu0 %v4714_v17  ;;  %v4789_v17 = vld [vmem:[%s5694_s1 + $0x5b8] sm:$0xff]  }
  0x9c   : > { %4246 = vmatprep.subr.bf16.mxu0 %v4720_v22  ;;  %v4793_v22 = vld [vmem:[%s4972_s10 + $0x5c] ss:$100 sps:$4 sm:$0xff]  }
  0x9d   : > { %4285 = vmatpush3.bf16.msra.mxu1 %v4718_v20 }
  0x9e   : > { %2894 = vmatmul.mubr.bf16.gmra.mrb[60].mxu0 %v4719_v21  ;;  %4286 = vmatprep.subr.bf16.mxu1 %v4725_v26  ;;  %v4791_v21 = vld [vmem:[%s4972_s10 + $0x58] ss:$100 sps:$4 sm:$0xff]  }
  0x9f   : > { %4247 = vmatpush3.bf16.msra.mxu0 %v4723_v24  ;;  %2999 = vmatprep.mubr.bf16.mxu0 %v4732_v32 }
  0xa0   : > { %2959 = vmatmul.mubr.bf16.gmra.mrb[60].mxu1 %v4724_v25  ;;  %4248 = vmatprep.subr.bf16.mxu0 %v4727_v28  ;;  %v4794_v25 = vld [vmem:[%s5694_s1 + $0x608] sm:$0xff]  }
  0xa1   : > { %4287 = vmatpush3.bf16.msra.mxu1 %v4726_v27  ;;  %3064 = vmatprep.mubr.bf16.mxu1 %v4737_v36  ;;  %v4795_v27 = vld [vmem:[%s4972_s10 + $0x11c] ss:$100 sps:$4 sm:$0xff]  }
  0xa2   : > { %4288 = vmatprep.subr.bf16.mxu1 %v4729_v30  ;;  %v4797_v30 = vld [vmem:[%s4972_s10 + $0x118] ss:$100 sps:$4 sm:$0xff]   ;;  %v4801_v36 = vld [vmem:[%s4972_s10 + $0x120] ss:$100 sps:$4 sm:$0xff]  }
  0xa3   : > { %4249 = vmatpush3.bf16.msra.mxu0 %v4728_v29 }
  0xa4   : > { %4314 = vmatprep.subr.bf16.mxu0 %v4734_v34 }
  0xa5   : > { %4289 = vmatpush3.bf16.msra.mxu1 %v4733_v33  ;;  %v4798_v33 = vld [vmem:[%s5694_s1 + $0x610] sm:$0xff]  }
  0xa6   : > { %3000 = vmatmul.mubr.bf16.vlgmr.msra.gmra.mrb[64].mxu0 %v4730_v31  ;;  %4354 = vmatprep.subr.bf16.mxu1 %v4739_v38  ;;  %v4802_v38 = vld [vmem:[%s5694_s1 + $0x618] sm:$0xff]  }
  0xa7   : > { %4315 = vmatpush3.bf16.msra.mxu0 %v4738_v37  ;;  %3007 = vmatprep.mubr.bf16.mxu0 %v4744_v43 }
  0xa8   : > { %3065 = vmatmul.mubr.bf16.vlgmr.msra.gmra.mrb[64].mxu1 %v4735_v35  ;;  %4316 = vmatprep.subr.bf16.mxu0 %v4741_v40  ;;  %v4799_v35 = vld [vmem:[%s4972_s10 + $0x124] ss:$100 sps:$4 sm:$0xff]  }
  0xa9   : > { %4355 = vmatpush3.bf16.msra.mxu1 %v4740_v39  ;;  %3072 = vmatprep.mubr.bf16.mxu1 %v4749_v47  ;;  %v4803_v39 = vld [vmem:[%s4972_s10 + $0x1e4] ss:$100 sps:$4 sm:$0xff]  }
  0xaa   : > { %4356 = vmatprep.subr.bf16.mxu1 %v4743_v42  ;;  %v4807_v42 = vld [vmem:[%s4972_s10 + $0x1ec] ss:$100 sps:$4 sm:$0xff]   ;;  %v4805_v47 = vld [vmem:[%s4972_s10 + $0x1e0] ss:$100 sps:$4 sm:$0xff]  }
  0xab   : > { %4317 = vmatpush3.bf16.msra.mxu0 %v4742_v41 }
  0xac   : > { %4318 = vmatprep.subr.bf16.mxu0 %v4748_v46 }
  0xad   : > { %4357 = vmatpush3.bf16.msra.mxu1 %v4746_v44 }
  0xae   : > { %3008 = vmatmul.mubr.bf16.gmra.mrb[68].mxu0 %v4747_v45  ;;  %4358 = vmatprep.subr.bf16.mxu1 %v4753_v50  ;;  %v4806_v45 = vld [vmem:[%s5694_s1 + $0x620] sm:$0xff]  }
  0xaf   : > { %4319 = vmatpush3.bf16.msra.mxu0 %v4751_v48  ;;  %3015 = vmatprep.mubr.bf16.mxu0 %v4758_v55  ;;  %v4811_v48 = vld [vmem:[%s4972_s10 + $0x2ac] ss:$100 sps:$4 sm:$0xff]  }
  0xb0   : > { %3073 = vmatmul.mubr.bf16.gmra.mrb[68].mxu1 %v4752_v49  ;;  %4320 = vmatprep.subr.bf16.mxu0 %v4755_v52 }
  0xb1   : > { %4359 = vmatpush3.bf16.msra.mxu1 %v4754_v51  ;;  %3080 = vmatprep.mubr.bf16.mxu1 %v4763_v59  ;;  %v4809_v51 = vld [vmem:[%s4972_s10 + $0x1e8] ss:$100 sps:$4 sm:$0xff]   ;;  %v4814_v59 = vld [vmem:[%s5694_s1 + $0x630] sm:$0xff]  }
  0xb2   : > { %4360 = vmatprep.subr.bf16.mxu1 %v4757_v54  ;;  %v4810_v54 = vld [vmem:[%s5694_s1 + $0x628] sm:$0xff]  }
  0xb3   : > { %4321 = vmatpush3.bf16.msra.mxu0 %v4756_v53 }
  0xb4   : > { %4322 = vmatprep.subr.bf16.mxu0 %v4762_v58  ;;  %v4813_v58 = vld [vmem:[%s4972_s10 + $0x2a8] ss:$100 sps:$4 sm:$0xff]  }
  0xb5   : > { %4361 = vmatpush3.bf16.msra.mxu1 %v4760_v56 }
  0xb6   : > { %3016 = vmatmul.mubr.bf16.gmra.mrb[72].mxu0 %v4761_v57  ;;  %4362 = vmatprep.subr.bf16.mxu1 %v4767_v62  ;;  %v4815_v57 = vld [vmem:[%s4972_s10 + $0x2b4] ss:$100 sps:$4 sm:$0xff]  }
  0xb7   : > { %4323 = vmatpush3.bf16.msra.mxu0 %v4765_v60  ;;  %3023 = vmatprep.mubr.bf16.mxu0 %v4772_v3  ;;  %v4819_v60 = vld [vmem:[%s4972_s10 + $0x60] ss:$100 sps:$4 sm:$0xff]  }
  0xb8   : > { %3081 = vmatmul.mubr.bf16.gmra.mrb[72].mxu1 %v4766_v61  ;;  %4324 = vmatprep.subr.bf16.mxu0 %v4769_v0  ;;  %v3586_v61 = vld [vmem:[%s5695_s2] ss:$0 sm:$0xff]  ;;  %v4817_v0 = vld [vmem:[%s4972_s10 + $0x2b0] ss:$100 sps:$4 sm:$0xff]  }
  0xb9   : > { %4363 = vmatpush3.bf16.msra.mxu1 %v4768_v63  ;;  %3088 = vmatprep.mubr.bf16.mxu1 %v4777_v7 }
  0xba   : > { %4364 = vmatprep.subr.bf16.mxu1 %v4771_v2 }
  0xbb   : > { %4325 = vmatpush3.bf16.msra.mxu0 %v4770_v1  ;;  %v4818_v1 = vld [vmem:[%s5694_s1 + $0x638] sm:$0xff]  }
  0xbc   : > { %4326 = vmatprep.subr.bf16.mxu0 %v4776_v6 }
  0xbd   : > { %4365 = vmatpush3.bf16.msra.mxu1 %v4774_v4 }
  0xbe   : > { %3024 = vmatmul.mubr.bf16.gmra.mrb[76].mxu0 %v4775_v5  ;;  %4366 = vmatprep.subr.bf16.mxu1 %v4781_v10 }
  0xbf   : > { %4327 = vmatpush3.bf16.msra.mxu0 %v4779_v8  ;;  %3129 = vmatprep.mubr.bf16.mxu0 %v4788_v16 }
  0xc0   : > { %3089 = vmatmul.mubr.bf16.gmra.mrb[76].mxu1 %v4780_v9  ;;  %4328 = vmatprep.subr.bf16.mxu0 %v4783_v12 }
  0xc1   : > { %4367 = vmatpush3.bf16.msra.mxu1 %v4782_v11  ;;  %3194 = vmatprep.mubr.bf16.mxu1 %v4793_v22 }
  0xc2   : > { %4368 = vmatprep.subr.bf16.mxu1 %v4785_v14 }
  0xc3   : > { %4329 = vmatpush3.bf16.msra.mxu0 %v4784_v13 }
  0xc4   : > { %4418 = vmatprep.subr.bf16.mxu0 %v4790_v19 }
  0xc5   : > { %4369 = vmatpush3.bf16.msra.mxu1 %v4789_v17 }
  0xc6   : > { %3130 = vmatmul.mubr.bf16.vlgmr.msra.gmra.mrb[80].mxu0 %v4786_v15 }
  0xc7   : > { %4419 = vmatpush3.bf16.msra.mxu0 %v4790_v19  ;;  %3137 = vmatprep.mubr.bf16.mxu0 %v4795_v27  ;;  %v4821_v27 = vld [vmem:[%s4972_s10 + $0x1f0] ss:$100 sps:$4 sm:$0xff]  }
  0xc8   : > { %3195 = vmatmul.mubr.bf16.vlgmr.msra.gmra.mrb[80].mxu1 %v4791_v21  ;;  %4420 = vmatprep.subr.bf16.mxu0 %v4794_v25 }
  0xc9   : > { %3202 = vmatprep.mubr.bf16.mxu1 %v4799_v35 }
  0xcb   : > { %4421 = vmatpush3.bf16.msra.mxu0 %v4794_v25 }
  0xcc   : > { %4422 = vmatprep.subr.bf16.mxu0 %v4798_v33 }
  0xce   : > { %3138 = vmatmul.mubr.bf16.gmra.mrb[84].mxu0 %v4797_v30 }
  0xcf   : > { %3145 = vmatprep.mubr.bf16.mxu0 %v4803_v39  ;;  %4423 = vmatpush3.bf16.msra.mxu0 %v4798_v33 }
  0xd0   : > { %3203 = vmatmul.mubr.bf16.gmra.mrb[84].mxu1 %v4801_v36  ;;  %4424 = vmatprep.subr.bf16.mxu0 %v4802_v38 }
  0xd1   : > { %3210 = vmatprep.mubr.bf16.mxu1 %v4807_v42 }
  0xd3   : > { %4425 = vmatpush3.bf16.msra.mxu0 %v4802_v38 }
  0xd4   : > { %4426 = vmatprep.subr.bf16.mxu0 %v4806_v45 }
  0xd6   : > { %3146 = vmatmul.mubr.bf16.gmra.mrb[88].mxu0 %v4805_v47 }
  0xd7   : > { %3153 = vmatprep.mubr.bf16.mxu0 %v4811_v48  ;;  %4427 = vmatpush3.bf16.msra.mxu0 %v4806_v45 }
  0xd8   : > { %3211 = vmatmul.mubr.bf16.gmra.mrb[88].mxu1 %v4809_v51  ;;  %4428 = vmatprep.subr.bf16.mxu0 %v4810_v54 }
  0xd9   : > { %3218 = vmatprep.mubr.bf16.mxu1 %v4815_v57 }
  0xdb   : > { %4429 = vmatpush3.bf16.msra.mxu0 %v4810_v54 }
  0xdc   : > { %4430 = vmatprep.subr.bf16.mxu0 %v4814_v59 }
  0xde   : > { %3154 = vmatmul.mubr.bf16.gmra.mrb[92].mxu0 %v4813_v58 }
  0xdf   : > { %4434 = vmatprep.mubr.bf16.mxu0 %v4819_v60  ;;  %4431 = vmatpush3.bf16.msra.mxu0 %v4814_v59 }
  0xe0   : > { %3219 = vmatmul.mubr.bf16.gmra.mrb[92].mxu1 %v4817_v0  ;;  %4432 = vmatprep.subr.bf16.mxu0 %v4818_v1 }
  0xe3   : > { %4433 = vmatpush3.bf16.msra.mxu0 %v4818_v1 }
  0xf9   : > { %v3930_v18 = vpop.f32.mrb[0].mxu0 }
  0xfa   : > { %v3931_v20 = vpop.f32.mrb[1].mxu0 }
  0xfb   : > { %v5550_v23 = vadd.f32 %v3931_v20, %v3930_v18  ;;  %v3933_v24 = vpop.f32.mrb[2].mxu0  ;;  %v3970_v26 = vpop.f32.mrb[0].mxu1 }
  0xfc   : > { %v3934_v28 = vpop.f32.mrb[3].mxu0  ;;  %v3971_v29 = vpop.f32.mrb[1].mxu1 }
  0xfd   : > { %v3935_v31 = vadd.f32 %v3934_v28, %v3933_v24  ;;  %v5557_v32 = vadd.f32 %v3971_v29, %v3970_v26  ;;  %v3973_v34 = vpop.f32.mrb[2].mxu1  ;;  %v2482_v2 = vadd.f32 %v5550_v23, %v3586_v61  ;;  %v4820_v26 = vld [vmem:[%s4972_s10 + $0x128] ss:$100 sps:$4 sm:$0xff]  }
  0xfe   : > { %v3974_v37 = vpop.f32.mrb[3].mxu1  ;;  %4435 = vmatmul.mubr.bf16.vlgmr.msra.gmra.mrb[96].mxu0 %v4820_v26 }
  0xff   : > { %v3975_v40 = vadd.f32 %v3974_v37, %v3973_v34  ;;  %v2485_v3 = vadd.f32 %v3935_v31, %v3586_v61  ;;  %v2547_v11 = vadd.f32 %v5557_v32, %v2482_v2  ;;  %4438 = vmatprep.mubr.bf16.mxu0 %v4821_v27 }
 0x101   : > { %v3936_v41 = vpop.f32.mrb[4].mxu0  ;;  %v2550_v12 = vadd.f32 %v3975_v40, %v2485_v3 }
 0x102   : > { %v3937_v43 = vpop.f32.mrb[5].mxu0 }
 0x103   : > { %v3938_v44 = vadd.f32 %v3937_v43, %v3936_v41  ;;  %v3939_v46 = vpop.f32.mrb[6].mxu0  ;;  %v3976_v49 = vpop.f32.mrb[4].mxu1  ;;  %v4822_v41 = vld [vmem:[%s4972_s10 + $0x2b8] ss:$100 sps:$4 sm:$0xff]  }
 0x104   : > { %v3940_v50 = vpop.f32.mrb[7].mxu0  ;;  %v3977_v53 = vpop.f32.mrb[5].mxu1 }
 0x105   : > { %v3941_v52 = vadd.f32 %v3940_v50, %v3939_v46  ;;  %v3978_v55 = vadd.f32 %v3977_v53, %v3976_v49  ;;  %v3979_v56 = vpop.f32.mrb[6].mxu1  ;;  %v2490_v4 = vadd.f32 %v3938_v44, %v3586_v61 }
 0x106   : > { %v3980_v62 = vpop.f32.mrb[7].mxu1  ;;  %4439 = vmatmul.mubr.bf16.gmra.mrb[100].mxu0 %v4822_v41 }
 0x107   : > { %v2493_v5 = vadd.f32 %v3941_v52, %v3586_v61  ;;  %v3981_v7 = vadd.f32 %v3980_v62, %v3979_v56  ;;  %v5593_v13 = vadd.f32 %v3978_v55, %v2490_v4 }
 0x109   : > { %v3942_v63 = vpop.f32.mrb[8].mxu0  ;;  %v5595_v16 = vadd.f32 %v3981_v7, %v2493_v5 }
 0x10a   : > { %v3943_v6 = vpop.f32.mrb[9].mxu0 }
 0x10b   : > { %v3944_v8 = vadd.f32 %v3943_v6, %v3942_v63  ;;  %v3945_v9 = vpop.f32.mrb[10].mxu0  ;;  %v3982_v10 = vpop.f32.mrb[8].mxu1 }
 0x10c   : > { %v3946_v14 = vpop.f32.mrb[11].mxu0  ;;  %v3983_v15 = vpop.f32.mrb[9].mxu1 }
 0x10d   : > { %v2498_v17 = vadd.f32 %v3944_v8, %v3586_v61  ;;  %v3947_v18 = vadd.f32 %v3946_v14, %v3945_v9  ;;  %v3984_v19 = vadd.f32 %v3983_v15, %v3982_v10  ;;  %v3985_v20 = vpop.f32.mrb[10].mxu1 }
 0x10e   : > { %v3986_v21 = vpop.f32.mrb[11].mxu1 }
 0x10f   : > { %v2501_v22 = vadd.f32 %v3947_v18, %v3586_v61  ;;  %v5597_v23 = vadd.f32 %v3984_v19, %v2498_v17  ;;  %v3987_v24 = vadd.f32 %v3986_v21, %v3985_v20 }
 0x111   : > { %v5599_v25 = vadd.f32 %v3987_v24, %v2501_v22  ;;  %v3948_v28 = vpop.f32.mrb[12].mxu0 }
 0x112   : > { %v3949_v29 = vpop.f32.mrb[13].mxu0 }
 0x113   : > { %v3950_v30 = vadd.f32 %v3949_v29, %v3948_v28  ;;  %v3951_v31 = vpop.f32.mrb[14].mxu0  ;;  %v3988_v32 = vpop.f32.mrb[12].mxu1 }
 0x114   : > { %v3952_v33 = vpop.f32.mrb[15].mxu0  ;;  %v3989_v36 = vpop.f32.mrb[13].mxu1 }
 0x115   : > { %v2506_v34 = vadd.f32 %v3950_v30, %v3586_v61  ;;  %v3953_v35 = vadd.f32 %v3952_v33, %v3951_v31  ;;  %v3990_v37 = vadd.f32 %v3989_v36, %v3988_v32  ;;  %v3991_v38 = vpop.f32.mrb[14].mxu1 }
 0x116   : > { %v3992_v40 = vpop.f32.mrb[15].mxu1 }
 0x117   : > { %v2509_v39 = vadd.f32 %v3953_v35, %v3586_v61  ;;  %v2571_v42 = vadd.f32 %v3990_v37, %v2506_v34  ;;  %v3993_v43 = vadd.f32 %v3992_v40, %v3991_v38 }
 0x119   : > { %v2574_v44 = vadd.f32 %v3993_v43, %v2509_v39  ;;  %v4010_v45 = vpop.f32.mrb[16].mxu0 }
 0x11a   : > { %v4011_v46 = vpop.f32.mrb[17].mxu0 }
 0x11b   : > { %v4012_v47 = vadd.f32 %v4011_v46, %v4010_v45  ;;  %v4013_v48 = vpop.f32.mrb[18].mxu0  ;;  %v4050_v51 = vpop.f32.mrb[16].mxu1 }
 0x11c   : > { %v4014_v49 = vpop.f32.mrb[19].mxu0  ;;  %v4051_v53 = vpop.f32.mrb[17].mxu1 }
 0x11d   : > { %v2612_v50 = vadd.f32 %v4012_v47, %v2547_v11  ;;  %v4015_v52 = vadd.f32 %v4014_v49, %v4013_v48  ;;  %v4052_v55 = vadd.f32 %v4051_v53, %v4050_v51  ;;  %v4053_v56 = vpop.f32.mrb[18].mxu1 }
 0x11e   : > { %v4054_v57 = vpop.f32.mrb[19].mxu1 }
 0x11f   : > { %v2615_v54 = vadd.f32 %v4015_v52, %v2550_v12  ;;  %v2677_v58 = vadd.f32 %v4052_v55, %v2612_v50  ;;  %v4055_v59 = vadd.f32 %v4054_v57, %v4053_v56 }
 0x121   : > { %v2680_v60 = vadd.f32 %v4055_v59, %v2615_v54  ;;  %v4016_v61 = vpop.f32.mrb[20].mxu0 }
 0x122   : > { %v4017_v62 = vpop.f32.mrb[21].mxu0 }
 0x123   : > { %v4018_v63 = vadd.f32 %v4017_v62, %v4016_v61  ;;  %v4019_v0 = vpop.f32.mrb[22].mxu0  ;;  %v4056_v1 = vpop.f32.mrb[20].mxu1 }
 0x124   : > { %v4020_v2 = vpop.f32.mrb[23].mxu0  ;;  %v4057_v5 = vpop.f32.mrb[21].mxu1 }
 0x125   : > { %v2620_v3 = vadd.f32 %v4018_v63, %v5593_v13  ;;  %v4021_v4 = vadd.f32 %v4020_v2, %v4019_v0  ;;  %v4058_v6 = vadd.f32 %v4057_v5, %v4056_v1  ;;  %v4059_v7 = vpop.f32.mrb[22].mxu1  ;;  %v4823_v0 = vld [vmem:[%s5696_s3] sm:$0xff]  }
 0x126   : > { %v4060_v9 = vpop.f32.mrb[23].mxu1  ;;  %4442 = vmatprep.subr.bf16.mxu1 %v4823_v0 }
 0x127   : > { %v2623_v8 = vadd.f32 %v4021_v4, %v5595_v16  ;;  %v2685_v10 = vadd.f32 %v4058_v6, %v2620_v3  ;;  %v4061_v11 = vadd.f32 %v4060_v9, %v4059_v7  ;;  %4443 = vmatpush3.bf16.msra.mxu1 %v4823_v0  ;;  %v4824_v7 = vld [vmem:[%s5696_s3 + $0x8] sm:$0xff]  }
 0x128   : > { %4444 = vmatprep.subr.bf16.mxu1 %v4824_v7 }
 0x129   : > { %v5606_v12 = vadd.f32 %v4061_v11, %v2623_v8  ;;  %v4022_v14 = vpop.f32.mrb[24].mxu0 }
 0x12a   : > { %v4023_v15 = vpop.f32.mrb[25].mxu0 }
 0x12b   : > { %v4024_v17 = vadd.f32 %v4023_v15, %v4022_v14  ;;  %v4025_v18 = vpop.f32.mrb[26].mxu0  ;;  %v4062_v19 = vpop.f32.mrb[24].mxu1  ;;  %4445 = vmatpush3.bf16.msra.mxu1 %v4824_v7 }
 0x12c   : > { %v4026_v20 = vpop.f32.mrb[27].mxu0  ;;  %v4063_v22 = vpop.f32.mrb[25].mxu1 }
 0x12d   : > { %v2628_v21 = vadd.f32 %v4024_v17, %v5597_v23  ;;  %v4027_v13 = vadd.f32 %v4026_v20, %v4025_v18  ;;  %v4064_v24 = vadd.f32 %v4063_v22, %v4062_v19  ;;  %v4065_v26 = vpop.f32.mrb[26].mxu1 }
 0x12e   : > { %v4066_v16 = vpop.f32.mrb[27].mxu1 }
 0x12f   : > { %v2631_v27 = vadd.f32 %v4027_v13, %v5599_v25  ;;  %v5610_v28 = vadd.f32 %v4064_v24, %v2628_v21  ;;  %v4067_v29 = vadd.f32 %v4066_v16, %v4065_v26 }
 0x131   : > { %v5612_v30 = vadd.f32 %v4067_v29, %v2631_v27  ;;  %v4028_v31 = vpop.f32.mrb[28].mxu0 }
 0x132   : > { %v4029_v32 = vpop.f32.mrb[29].mxu0 }
 0x133   : > { %v4030_v33 = vadd.f32 %v4029_v32, %v4028_v31  ;;  %v4031_v34 = vpop.f32.mrb[30].mxu0  ;;  %v4068_v37 = vpop.f32.mrb[28].mxu1 }
 0x134   : > { %v4032_v35 = vpop.f32.mrb[31].mxu0  ;;  %v4069_v38 = vpop.f32.mrb[29].mxu1 }
 0x135   : > { %v2636_v36 = vadd.f32 %v4030_v33, %v2571_v42  ;;  %v4033_v23 = vadd.f32 %v4032_v35, %v4031_v34  ;;  %v4070_v40 = vadd.f32 %v4069_v38, %v4068_v37  ;;  %v4071_v41 = vpop.f32.mrb[30].mxu1  ;;  %v4827_v33 = vld [vmem:[%s5696_s3 + $0x20] sm:$0xff]   ;;  %v4828_v37 = vld [vmem:[%s5696_s3 + $0x28] sm:$0xff]  }
 0x136   : > { %v4072_v43 = vpop.f32.mrb[31].mxu1 }
 0x137   : > { %v2639_v39 = vadd.f32 %v4033_v23, %v2574_v44  ;;  %v5614_v25 = vadd.f32 %v4070_v40, %v2636_v36  ;;  %v4073_v45 = vadd.f32 %v4072_v43, %v4071_v41  ;;  %v4829_v43 = vld [vmem:[%s5696_s3 + $0x30] sm:$0xff]  }
 0x139   : > { %v5616_v46 = vadd.f32 %v4073_v45, %v2639_v39  ;;  %v4090_v47 = vpop.f32.mrb[32].mxu0 }
 0x13a   : > { %v4091_v48 = vpop.f32.mrb[33].mxu0 }
 0x13b   : > { %v4092_v49 = vadd.f32 %v4091_v48, %v4090_v47  ;;  %v4093_v50 = vpop.f32.mrb[34].mxu0  ;;  %v4130_v51 = vpop.f32.mrb[32].mxu1 }
 0x13c   : > { %v4094_v52 = vpop.f32.mrb[35].mxu0  ;;  %v4131_v54 = vpop.f32.mrb[33].mxu1 }
 0x13d   : > { %v2742_v53 = vadd.f32 %v4092_v49, %v2677_v58  ;;  %v4095_v42 = vadd.f32 %v4094_v52, %v4093_v50  ;;  %v4132_v55 = vadd.f32 %v4131_v54, %v4130_v51  ;;  %v4133_v56 = vpop.f32.mrb[34].mxu1  ;;  %v4830_v54 = vld [vmem:[%s5696_s3 + $0x38] sm:$0xff]  }
 0x13e   : > { %v4134_v57 = vpop.f32.mrb[35].mxu1 }
 0x13f   : > { %v2745_v44 = vadd.f32 %v4095_v42, %v2680_v60  ;;  %v5618_v59 = vadd.f32 %v4132_v55, %v2742_v53  ;;  %v4135_v61 = vadd.f32 %v4134_v57, %v4133_v56 }
 0x141   : > { %v5620_v62 = vadd.f32 %v4135_v61, %v2745_v44  ;;  %v4096_v63 = vpop.f32.mrb[36].mxu0 }
 0x142   : > { %v4097_v1 = vpop.f32.mrb[37].mxu0 }
 0x143   : > { %v4098_v2 = vadd.f32 %v4097_v1, %v4096_v63  ;;  %v4099_v3 = vpop.f32.mrb[38].mxu0  ;;  %v4136_v58 = vpop.f32.mrb[36].mxu1 }
 0x144   : > { %v4100_v4 = vpop.f32.mrb[39].mxu0  ;;  %v4137_v6 = vpop.f32.mrb[37].mxu1 }
 0x145   : > { %v2750_v5 = vadd.f32 %v4098_v2, %v2685_v10  ;;  %v4101_v60 = vadd.f32 %v4100_v4, %v4099_v3  ;;  %v4138_v8 = vadd.f32 %v4137_v6, %v4136_v58  ;;  %v4139_v9 = vpop.f32.mrb[38].mxu1  ;;  %v4825_v10 = vld [vmem:[%s5696_s3 + $0x10] sm:$0xff]  }
 0x146   : > { %v4140_v14 = vpop.f32.mrb[39].mxu1  ;;  %4446 = vmatprep.subr.bf16.mxu1 %v4825_v10 }
 0x147   : > { %v2753_v11 = vadd.f32 %v4101_v60, %v5606_v12  ;;  %v5629_v15 = vadd.f32 %v4138_v8, %v2750_v5  ;;  %v4141_v17 = vadd.f32 %v4140_v14, %v4139_v9  ;;  %4447 = vmatpush3.bf16.msra.mxu1 %v4825_v10  ;;  %v4826_v12 = vld [vmem:[%s5696_s3 + $0x18] sm:$0xff]  }
 0x148   : > { %4448 = vmatprep.subr.bf16.mxu1 %v4826_v12 }
 0x149   : > { %v5634_v18 = vadd.f32 %v4141_v17, %v2753_v11  ;;  %v4102_v19 = vpop.f32.mrb[40].mxu0 }
 0x14a   : > { %v4103_v20 = vpop.f32.mrb[41].mxu0 }
 0x14b   : > { %v4104_v21 = vadd.f32 %v4103_v20, %v4102_v19  ;;  %v4105_v13 = vpop.f32.mrb[42].mxu0  ;;  %v4142_v26 = vpop.f32.mrb[40].mxu1  ;;  %4449 = vmatpush3.bf16.msra.mxu1 %v4826_v12 }
 0x14c   : > { %v4106_v22 = vpop.f32.mrb[43].mxu0  ;;  %v4143_v16 = vpop.f32.mrb[41].mxu1  ;;  %4450 = vmatprep.subr.bf16.mxu1 %v4827_v33 }
 0x14d   : > { %v2758_v24 = vadd.f32 %v4104_v21, %v5610_v28  ;;  %v4107_v27 = vadd.f32 %v4106_v22, %v4105_v13  ;;  %v4144_v31 = vadd.f32 %v4143_v16, %v4142_v26  ;;  %v4145_v32 = vpop.f32.mrb[42].mxu1 }
 0x14e   : > { %v4146_v34 = vpop.f32.mrb[43].mxu1 }
 0x14f   : > { %v2761_v29 = vadd.f32 %v4107_v27, %v5612_v30  ;;  %v5644_v35 = vadd.f32 %v4144_v31, %v2758_v24  ;;  %v4147_v36 = vadd.f32 %v4146_v34, %v4145_v32  ;;  %4451 = vmatpush3.bf16.msra.mxu1 %v4827_v33 }
 0x150   : > { %4452 = vmatprep.subr.bf16.mxu1 %v4828_v37 }
 0x151   : > { %v5646_v28 = vadd.f32 %v4147_v36, %v2761_v29  ;;  %v4108_v23 = vpop.f32.mrb[44].mxu0 }
 0x152   : > { %v4109_v30 = vpop.f32.mrb[45].mxu0 }
 0x153   : > { %v4110_v38 = vadd.f32 %v4109_v30, %v4108_v23  ;;  %v4111_v39 = vpop.f32.mrb[46].mxu0  ;;  %4453 = vmatpush3.bf16.msra.mxu1 %v4828_v37  ;;  %v4148_v40 = vpop.f32.mrb[44].mxu1 }
 0x154   : > { %v4112_v41 = vpop.f32.mrb[47].mxu0  ;;  %v4149_v48 = vpop.f32.mrb[45].mxu1  ;;  %4454 = vmatprep.subr.bf16.mxu1 %v4829_v43 }
 0x155   : > { %v2766_v45 = vadd.f32 %v4110_v38, %v5614_v25  ;;  %v4113_v47 = vadd.f32 %v4112_v41, %v4111_v39  ;;  %v4150_v49 = vadd.f32 %v4149_v48, %v4148_v40  ;;  %v4151_v50 = vpop.f32.mrb[46].mxu1 }
 0x156   : > { %v4152_v52 = vpop.f32.mrb[47].mxu1 }
 0x157   : > { %v2769_v51 = vadd.f32 %v4113_v47, %v5616_v46  ;;  %4455 = vmatpush3.bf16.msra.mxu1 %v4829_v43  ;;  %v2831_v53 = vadd.f32 %v4150_v49, %v2766_v45  ;;  %v4153_v42 = vadd.f32 %v4152_v52, %v4151_v50 }
 0x158   : > { %4456 = vmatprep.subr.bf16.mxu1 %v4830_v54 }
 0x159   : > { %v2834_v55 = vadd.f32 %v4153_v42, %v2769_v51  ;;  %v4170_v56 = vpop.f32.mrb[48].mxu0 }
 0x15a   : > { %v4171_v25 = vpop.f32.mrb[49].mxu0 }
 0x15b   : > { %4457 = vmatpush3.bf16.msra.mxu1 %v4830_v54  ;;  %v4172_v44 = vadd.f32 %v4171_v25, %v4170_v56  ;;  %v4173_v57 = vpop.f32.mrb[50].mxu0  ;;  %v4210_v61 = vpop.f32.mrb[48].mxu1 }
 0x15c   : > { %v4174_v63 = vpop.f32.mrb[51].mxu0  ;;  %v4211_v1 = vpop.f32.mrb[49].mxu1 }
 0x15d   : > { %v2872_v0 = vadd.f32 %v4172_v44, %v5618_v59  ;;  %v4175_v46 = vadd.f32 %v4174_v63, %v4173_v57  ;;  %v4212_v2 = vadd.f32 %v4211_v1, %v4210_v61  ;;  %v4213_v3 = vpop.f32.mrb[50].mxu1 }
 0x15e   : > { %v4214_v4 = vpop.f32.mrb[51].mxu1 }
 0x15f   : > { %v2875_v58 = vadd.f32 %v4175_v46, %v5620_v62  ;;  %v2937_v5 = vadd.f32 %v4212_v2, %v2872_v0  ;;  %v4215_v60 = vadd.f32 %v4214_v4, %v4213_v3 }
 0x161   : > { %v2940_v6 = vadd.f32 %v4215_v60, %v2875_v58  ;;  %v4176_v7 = vpop.f32.mrb[52].mxu0 }
 0x162   : > { %v4177_v8 = vpop.f32.mrb[53].mxu0 }
 0x163   : > { %v4178_v9 = vadd.f32 %v4177_v8, %v4176_v7  ;;  %v4179_v11 = vpop.f32.mrb[54].mxu0  ;;  %v4216_v10 = vpop.f32.mrb[52].mxu1 }
 0x164   : > { %v4180_v14 = vpop.f32.mrb[55].mxu0  ;;  %v4217_v59 = vpop.f32.mrb[53].mxu1 }
 0x165   : > { %v2880_v17 = vadd.f32 %v4178_v9, %v5629_v15  ;;  %v4181_v19 = vadd.f32 %v4180_v14, %v4179_v11  ;;  %v4218_v21 = vadd.f32 %v4217_v59, %v4216_v10  ;;  %v4219_v13 = vpop.f32.mrb[54].mxu1 }
 0x166   : > { %v4220_v12 = vpop.f32.mrb[55].mxu1 }
 0x167   : > { %v2883_v20 = vadd.f32 %v4181_v19, %v5634_v18  ;;  %v2945_v62 = vadd.f32 %v4218_v21, %v2880_v17  ;;  %v4221_v22 = vadd.f32 %v4220_v12, %v4219_v13 }
 0x169   : > { %v2948_v24 = vadd.f32 %v4221_v22, %v2883_v20  ;;  %v4182_v26 = vpop.f32.mrb[56].mxu0 }
 0x16a   : > { %v4183_v27 = vpop.f32.mrb[57].mxu0 }
 0x16b   : > { %v4184_v16 = vadd.f32 %v4183_v27, %v4182_v26  ;;  %v4185_v29 = vpop.f32.mrb[58].mxu0  ;;  %v4222_v31 = vpop.f32.mrb[56].mxu1 }
 0x16c   : > { %v4186_v32 = vpop.f32.mrb[59].mxu0  ;;  %v4223_v34 = vpop.f32.mrb[57].mxu1 }
 0x16d   : > { %v2888_v33 = vadd.f32 %v4184_v16, %v5644_v35  ;;  %v4187_v15 = vadd.f32 %v4186_v32, %v4185_v29  ;;  %v4224_v36 = vadd.f32 %v4223_v34, %v4222_v31  ;;  %v4225_v37 = vpop.f32.mrb[58].mxu1 }
 0x16e   : > { %v4226_v23 = vpop.f32.mrb[59].mxu1 }
 0x16f   : > { %v2891_v18 = vadd.f32 %v4187_v15, %v5646_v28  ;;  %v2953_v30 = vadd.f32 %v4224_v36, %v2888_v33  ;;  %v4227_v38 = vadd.f32 %v4226_v23, %v4225_v37 }
 0x171   : > { %v2956_v39 = vadd.f32 %v4227_v38, %v2891_v18  ;;  %v4188_v40 = vpop.f32.mrb[60].mxu0 }
 0x172   : > { %v4189_v41 = vpop.f32.mrb[61].mxu0 }
 0x173   : > { %v4190_v43 = vadd.f32 %v4189_v41, %v4188_v40  ;;  %v4191_v45 = vpop.f32.mrb[62].mxu0  ;;  %v4228_v47 = vpop.f32.mrb[60].mxu1 }
 0x174   : > { %v4192_v48 = vpop.f32.mrb[63].mxu0  ;;  %v4229_v51 = vpop.f32.mrb[61].mxu1 }
 0x175   : > { %v2896_v49 = vadd.f32 %v4190_v43, %v2831_v53  ;;  %v4193_v50 = vadd.f32 %v4192_v48, %v4191_v45  ;;  %v4230_v35 = vadd.f32 %v4229_v51, %v4228_v47  ;;  %v4231_v52 = vpop.f32.mrb[62].mxu1 }
 0x176   : > { %v4232_v54 = vpop.f32.mrb[63].mxu1 }
 0x177   : > { %v2899_v42 = vadd.f32 %v4193_v50, %v2834_v55  ;;  %v2961_v56 = vadd.f32 %v4230_v35, %v2896_v49  ;;  %v4233_v25 = vadd.f32 %v4232_v54, %v4231_v52 }
 0x179   : > { %v2964_v28 = vadd.f32 %v4233_v25, %v2899_v42  ;;  %v4250_v44 = vpop.f32.mrb[64].mxu0 }
 0x17a   : > { %v4251_v57 = vpop.f32.mrb[65].mxu0 }
 0x17b   : > { %v4252_v61 = vadd.f32 %v4251_v57, %v4250_v44  ;;  %v4253_v63 = vpop.f32.mrb[66].mxu0  ;;  %v4290_v1 = vpop.f32.mrb[64].mxu1 }
 0x17c   : > { %v4254_v0 = vpop.f32.mrb[67].mxu0  ;;  %v4291_v3 = vpop.f32.mrb[65].mxu1 }
 0x17d   : > { %v3002_v46 = vadd.f32 %v4252_v61, %v2937_v5  ;;  %v4255_v2 = vadd.f32 %v4254_v0, %v4253_v63  ;;  %v4292_v53 = vadd.f32 %v4291_v3, %v4290_v1  ;;  %v4293_v4 = vpop.f32.mrb[66].mxu1 }
 0x17e   : > { %v4294_v60 = vpop.f32.mrb[67].mxu1 }
 0x17f   : > { %v3005_v58 = vadd.f32 %v4255_v2, %v2940_v6  ;;  %v3067_v7 = vadd.f32 %v4292_v53, %v3002_v46  ;;  %v4295_v8 = vadd.f32 %v4294_v60, %v4293_v4 }
 0x181   : > { %v3070_v55 = vadd.f32 %v4295_v8, %v3005_v58  ;;  %v4256_v9 = vpop.f32.mrb[68].mxu0 }
 0x182   : > { %v4257_v11 = vpop.f32.mrb[69].mxu0 }
 0x183   : > { %v4258_v14 = vadd.f32 %v4257_v11, %v4256_v9  ;;  %v4259_v17 = vpop.f32.mrb[70].mxu0  ;;  %v4296_v10 = vpop.f32.mrb[68].mxu1 }
 0x184   : > { %v4260_v19 = vpop.f32.mrb[71].mxu0  ;;  %v4297_v21 = vpop.f32.mrb[69].mxu1 }
 0x185   : > { %v3010_v59 = vadd.f32 %v4258_v14, %v2945_v62  ;;  %v4261_v20 = vadd.f32 %v4260_v19, %v4259_v17  ;;  %v4298_v5 = vadd.f32 %v4297_v21, %v4296_v10  ;;  %v4299_v13 = vpop.f32.mrb[70].mxu1 }
 0x186   : > { %v4300_v22 = vpop.f32.mrb[71].mxu1 }
 0x187   : > { %v3013_v12 = vadd.f32 %v4261_v20, %v2948_v24  ;;  %v3075_v6 = vadd.f32 %v4298_v5, %v3010_v59  ;;  %v4301_v26 = vadd.f32 %v4300_v22, %v4299_v13 }
 0x189   : > { %v3078_v27 = vadd.f32 %v4301_v26, %v3013_v12  ;;  %v4262_v16 = vpop.f32.mrb[72].mxu0 }
 0x18a   : > { %v4263_v29 = vpop.f32.mrb[73].mxu0 }
 0x18b   : > { %v4264_v31 = vadd.f32 %v4263_v29, %v4262_v16  ;;  %v4265_v32 = vpop.f32.mrb[74].mxu0  ;;  %v4302_v33 = vpop.f32.mrb[72].mxu1 }
 0x18c   : > { %v4266_v15 = vpop.f32.mrb[75].mxu0  ;;  %v4303_v37 = vpop.f32.mrb[73].mxu1 }
 0x18d   : > { %v3018_v34 = vadd.f32 %v4264_v31, %v2953_v30  ;;  %v4267_v36 = vadd.f32 %v4266_v15, %v4265_v32  ;;  %v4304_v18 = vadd.f32 %v4303_v37, %v4302_v33  ;;  %v4305_v62 = vpop.f32.mrb[74].mxu1 }
 0x18e   : > { %v4306_v38 = vpop.f32.mrb[75].mxu1 }
 0x18f   : > { %v3021_v23 = vadd.f32 %v4267_v36, %v2956_v39  ;;  %v3083_v40 = vadd.f32 %v4304_v18, %v3018_v34  ;;  %v4307_v41 = vadd.f32 %v4306_v38, %v4305_v62 }
 0x191   : > { %v3086_v24 = vadd.f32 %v4307_v41, %v3021_v23  ;;  %v4268_v43 = vpop.f32.mrb[76].mxu0 }
 0x192   : > { %v4269_v45 = vpop.f32.mrb[77].mxu0 }
 0x193   : > { %v4270_v47 = vadd.f32 %v4269_v45, %v4268_v43  ;;  %v4271_v48 = vpop.f32.mrb[78].mxu0  ;;  %v4308_v51 = vpop.f32.mrb[76].mxu1 }
 0x194   : > { %v4272_v49 = vpop.f32.mrb[79].mxu0  ;;  %v4309_v52 = vpop.f32.mrb[77].mxu1 }
 0x195   : > { %v3026_v50 = vadd.f32 %v4270_v47, %v2961_v56  ;;  %v4273_v35 = vadd.f32 %v4272_v49, %v4271_v48  ;;  %v4310_v30 = vadd.f32 %v4309_v52, %v4308_v51  ;;  %v4311_v54 = vpop.f32.mrb[78].mxu1 }
 0x196   : > { %v4312_v25 = vpop.f32.mrb[79].mxu1 }
 0x197   : > { %v3029_v42 = vadd.f32 %v4273_v35, %v2964_v28  ;;  %v3091_v44 = vadd.f32 %v4310_v30, %v3026_v50  ;;  %v4313_v57 = vadd.f32 %v4312_v25, %v4311_v54 }
 0x199   : > { %v3094_v39 = vadd.f32 %v4313_v57, %v3029_v42  ;;  %v4330_v61 = vpop.f32.mrb[80].mxu0 }
 0x19a   : > { %v4331_v63 = vpop.f32.mrb[81].mxu0 }
 0x19b   : > { %v4332_v0 = vadd.f32 %v4331_v63, %v4330_v61  ;;  %v4333_v46 = vpop.f32.mrb[82].mxu0  ;;  %v4370_v1 = vpop.f32.mrb[80].mxu1 }
 0x19c   : > { %v4334_v2 = vpop.f32.mrb[83].mxu0  ;;  %v4371_v53 = vpop.f32.mrb[81].mxu1 }
 0x19d   : > { %v3132_v3 = vadd.f32 %v4332_v0, %v3067_v7  ;;  %v4335_v58 = vadd.f32 %v4334_v2, %v4333_v46  ;;  %v4372_v56 = vadd.f32 %v4371_v53, %v4370_v1  ;;  %v4373_v4 = vpop.f32.mrb[82].mxu1 }
 0x19e   : > { %v4374_v8 = vpop.f32.mrb[83].mxu1 }
 0x19f   : > { %v3135_v60 = vadd.f32 %v4335_v58, %v3070_v55  ;;  %v4375_v28 = vadd.f32 %v4374_v8, %v4373_v4  ;;  %v3197_v9 = vadd.f32 %v4372_v56, %v3132_v3 }
 0x1a1   : > { %v4336_v11 = vpop.f32.mrb[84].mxu0  ;;  %v3200_v17 = vadd.f32 %v4375_v28, %v3135_v60 }
 0x1a2   : > { %v4337_v14 = vpop.f32.mrb[85].mxu0 }
 0x1a3   : > { %v4338_v10 = vadd.f32 %v4337_v14, %v4336_v11  ;;  %v4339_v19 = vpop.f32.mrb[86].mxu0  ;;  %v4376_v59 = vpop.f32.mrb[84].mxu1 }
 0x1a4   : > { %v4340_v20 = vpop.f32.mrb[87].mxu0  ;;  %v4377_v13 = vpop.f32.mrb[85].mxu1 }
 0x1a5   : > { %v3140_v21 = vadd.f32 %v4338_v10, %v3075_v6  ;;  %v4341_v5 = vadd.f32 %v4340_v20, %v4339_v19  ;;  %v4378_v12 = vadd.f32 %v4377_v13, %v4376_v59  ;;  %v4379_v7 = vpop.f32.mrb[86].mxu1 }
 0x1a6   : > { %v4380_v26 = vpop.f32.mrb[87].mxu1 }
 0x1a7   : > { %v3143_v22 = vadd.f32 %v4341_v5, %v3078_v27  ;;  %v4381_v16 = vadd.f32 %v4380_v26, %v4379_v7  ;;  %v3205_v29 = vadd.f32 %v4378_v12, %v3140_v21 }
 0x1a9   : > { %v4342_v55 = vpop.f32.mrb[88].mxu0  ;;  %v3208_v32 = vadd.f32 %v4381_v16, %v3143_v22 }
 0x1aa   : > { %v4343_v31 = vpop.f32.mrb[89].mxu0 }
 0x1ab   : > { %v4344_v33 = vadd.f32 %v4343_v31, %v4342_v55  ;;  %v4345_v15 = vpop.f32.mrb[90].mxu0  ;;  %v4382_v34 = vpop.f32.mrb[88].mxu1 }
 0x1ac   : > { %v4346_v36 = vpop.f32.mrb[91].mxu0  ;;  %v4383_v62 = vpop.f32.mrb[89].mxu1 }
 0x1ad   : > { %v3148_v37 = vadd.f32 %v4344_v33, %v3083_v40  ;;  %v4347_v18 = vadd.f32 %v4346_v36, %v4345_v15  ;;  %v4384_v23 = vadd.f32 %v4383_v62, %v4382_v34  ;;  %v4385_v6 = vpop.f32.mrb[90].mxu1  ;;  %v3887_v34 = vld [vmem:[%s5697_s4] ss:$0 sm:$0xff] }
 0x1ae   : > { %v4386_v41 = vpop.f32.mrb[91].mxu1 }
 0x1af   : > { %v3151_v38 = vadd.f32 %v4347_v18, %v3086_v24  ;;  %v4387_v43 = vadd.f32 %v4386_v41, %v4385_v6  ;;  %v3213_v45 = vadd.f32 %v4384_v23, %v3148_v37 }
 0x1b1   : > { %v4348_v27 = vpop.f32.mrb[92].mxu0  ;;  %v3216_v48 = vadd.f32 %v4387_v43, %v3151_v38 }
 0x1b2   : > { %v4349_v47 = vpop.f32.mrb[93].mxu0 }
 0x1b3   : > { %v4350_v49 = vadd.f32 %v4349_v47, %v4348_v27  ;;  %v4351_v50 = vpop.f32.mrb[94].mxu0  ;;  %v4388_v51 = vpop.f32.mrb[92].mxu1 }
 0x1b4   : > { %v4352_v35 = vpop.f32.mrb[95].mxu0  ;;  %v4389_v30 = vpop.f32.mrb[93].mxu1 }
 0x1b5   : > { %v3156_v52 = vadd.f32 %v4350_v49, %v3091_v44  ;;  %v4353_v42 = vadd.f32 %v4352_v35, %v4351_v50  ;;  %v4390_v54 = vadd.f32 %v4389_v30, %v4388_v51  ;;  %v4391_v40 = vpop.f32.mrb[94].mxu1 }
 0x1b6   : > { %v4392_v57 = vpop.f32.mrb[95].mxu1 }
 0x1b7   : > { %v3159_v25 = vadd.f32 %v4353_v42, %v3094_v39  ;;  %v4393_v61 = vadd.f32 %v4392_v57, %v4391_v40  ;;  %v3221_v63 = vadd.f32 %v4390_v54, %v3156_v52 }
 0x1b9   : > { %v3224_v0 = vadd.f32 %v4393_v61, %v3159_v25 }
 0x1d1   : > { %v4436_v24 = vpop.f32.mrb[96].mxu0 }
 0x1d2   : > { %v3270_v46 = vadd.f32 %v4436_v24, %v3205_v29  ;;  %v3261_v1 = vpop.f32.mrb[97].mxu0 }
 0x1d3   : > { %v3262_v2 = vadd.f32 %v3261_v1, %v3197_v9  ;;  %v4437_v3 = vpop.f32.mrb[98].mxu0 }
 0x1d4   : > { %v3302_v58 = vmul.f32 0.01, %v3270_v46  ;;  %v3273_v53 = vadd.f32 %v4437_v3, %v3208_v32  ;;  %v3264_v56 = vpop.f32.mrb[99].mxu0  ;;  %vm3294_vm0 = vcmp.ge.f32.partialorder %v3270_v46, 0.0 }
 0x1d5   : > { %v3300_v4 = vmul.f32 0.01, %v3262_v2  ;;  %v3265_v44 = vadd.f32 %v3264_v56, %v3200_v17  ;;  %vm3292_vm1 = vcmp.ge.f32.partialorder %v3262_v2, 0.0 }
 0x1d6   : > { %vm3295_vm2 = vcmp.ge.f32.partialorder %v3273_v53, 0.0  ;;  %v3303_v60 = vmul.f32 0.01, %v3273_v53  ;;  %v3310_v8 = vsel %vm3294_vm0, %v3270_v46, %v3302_v58 }
 0x1d7   : > { %vm3293_vm3 = vcmp.ge.f32.partialorder %v3265_v44, 0.0  ;;  %v3301_v39 = vmul.f32 0.01, %v3265_v44  ;;  %v3308_v10 = vsel %vm3292_vm1, %v3262_v2, %v3300_v4 }
 0x1d8   : > { %v3311_v28 = vsel %vm3295_vm2, %v3273_v53, %v3303_v60 }
 0x1d9   : > { %v3317_v11 = vpack.c.bf16 %v3311_v28, %v3310_v8  ;;  %v4440_v14 = vpop.f32.mrb[100].mxu0  ;;  %v3309_v19 = vsel %vm3293_vm3, %v3265_v44, %v3301_v39 }
 0x1da   : > { %v3286_v59 = vadd.f32 %v4440_v14, %v3221_v63  ;;  %v3277_v9 = vpop.f32.mrb[101].mxu0  ;;  %v3316_v20 = vpack.c.bf16 %v3309_v19, %v3308_v10 }
 0x1db   : > { %v3278_v21 = vadd.f32 %v3277_v9, %v3213_v45  ;;  %v4441_v5 = vpop.f32.mrb[102].mxu0 }
 0x1dc   : > { %v3306_v13 = vmul.f32 0.01, %v3286_v59  ;;  %v3289_v12 = vadd.f32 %v4441_v5, %v3224_v0  ;;  %v3280_v7 = vpop.f32.mrb[103].mxu0  ;;  %4458 = vmatprep.mubr.bf16.mxu1 %v3316_v20  ;;  %vm3298_vm4 = vcmp.ge.f32.partialorder %v3286_v59, 0.0 }
 0x1dd   : > { %v3304_v17 = vmul.f32 0.01, %v3278_v21  ;;  %v3281_v22 = vadd.f32 %v3280_v7, %v3216_v48  ;;  %4459 = vmatmul.mubr.bf16.vlgmr.msra.gmra.mrb[96].mxu1 %v3317_v11  ;;  %vm3296_vm5 = vcmp.ge.f32.partialorder %v3278_v21, 0.0 }
 0x1de   : > { %vm3299_vm6 = vcmp.ge.f32.partialorder %v3289_v12, 0.0  ;;  %v3307_v26 = vmul.f32 0.01, %v3289_v12  ;;  %v3314_v29 = vsel %vm3298_vm4, %v3286_v59, %v3306_v13 }
 0x1df   : > { %vm3297_vm7 = vcmp.ge.f32.partialorder %v3281_v22, 0.0  ;;  %v3305_v16 = vmul.f32 0.01, %v3281_v22  ;;  %v3312_v31 = vsel %vm3296_vm5, %v3278_v21, %v3304_v17 }
 0x1e0   : > { %v3315_v55 = vsel %vm3299_vm6, %v3289_v12, %v3307_v26 }
 0x1e1   : > { %v3313_v32 = vsel %vm3297_vm7, %v3281_v22, %v3305_v16  ;;  %v3319_v33 = vpack.c.bf16 %v3315_v55, %v3314_v29 }
 0x1e2   : > { %v3318_v15 = vpack.c.bf16 %v3313_v32, %v3312_v31 }
 0x1e4   : > { %4462 = vmatprep.mubr.bf16.mxu1 %v3318_v15 }
 0x1e5   : > { %4463 = vmatmul.mubr.bf16.gmra.mrb[100].mxu1 %v3319_v33 }
 0x2b0   : > { %v4460_v36 = vpop.f32.mrb[96].mxu1 }
 0x2b1   : > { %v3434_v37 = vadd.f32 %v4460_v36, %v3887_v34  ;;  %v3425_v18 = vpop.f32.mrb[97].mxu1 }
 0x2b2   : > { %v3426_v62 = vadd.f32 %v3887_v34, %v3425_v18  ;;  %v4461_v23 = vpop.f32.mrb[98].mxu1 }
 0x2b3   : > { %vm3458_vm8 = vcmp.ge.f32.partialorder %v3434_v37, 0.0  ;;  %v3466_v6 = vmul.f32 0.01, %v3434_v37  ;;  %v3437_v38 = vadd.f32 %v4461_v23, %v3887_v34  ;;  %v3428_v41 = vpop.f32.mrb[99].mxu1 }
 0x2b4   : > { %vm3456_vm9 = vcmp.ge.f32.partialorder %v3426_v62, 0.0  ;;  %v3464_v43 = vmul.f32 0.01, %v3426_v62  ;;  %v3429_v45 = vadd.f32 %v3887_v34, %v3428_v41 }
 0x2b5   : > { %v3474_v27 = vsel %vm3458_vm8, %v3434_v37, %v3466_v6  ;;  %vm3459_vm11 = vcmp.ge.f32.partialorder %v3437_v38, 0.0  ;;  %v3467_v47 = vmul.f32 0.01, %v3437_v38 }
 0x2b6   : > { %v3908_v48 = vpack.c.bf16 %v3474_v27, %v3474_v27  ;;  %v3472_v49 = vsel %vm3456_vm9, %v3426_v62, %v3464_v43  ;;  %vm3457_vm12 = vcmp.ge.f32.partialorder %v3429_v45, 0.0  ;;  %v3465_v50 = vmul.f32 0.01, %v3429_v45 }
 0x2b7   : > { %v3906_v51 = vpack.c.bf16 %v3472_v49, %v3472_v49  ;;  %v3475_v35 = vsel %vm3459_vm11, %v3437_v38, %v3467_v47 }
 0x2b8   : > { %3515 = vst.msk [vmem:[%s5672_s26 + $0x8] sm:$0xf] %vm3512_vm10, %v3908_v48  ;;  %v3909_v52 = vpack.c.bf16 %v3475_v35, %v3475_v35  ;;  %v3473_v42 = vsel %vm3457_vm12, %v3429_v45, %v3465_v50  ;;  %v4464_v30 = vpop.f32.mrb[100].mxu1 }
 0x2b9   : > { %3513 = vst.msk [vmem:[%s5672_s26] sm:$0xf] %vm3512_vm10, %v3906_v51  ;;  %v3907_v54 = vpack.c.bf16 %v3473_v42, %v3473_v42  ;;  %v3450_v40 = vadd.f32 %v4464_v30, %v3887_v34  ;;  %v3441_v25 = vpop.f32.mrb[101].mxu1 }
 0x2ba   : > { %3516 = vst.msk [vmem:[%s5672_s26 + $0xc] sm:$0xf] %vm3512_vm10, %v3909_v52  ;;  %v3442_v57 = vadd.f32 %v3887_v34, %v3441_v25  ;;  %v4465_v61 = vpop.f32.mrb[102].mxu1 }
 0x2bb   : > { %3514 = vst.msk [vmem:[%s5672_s26 + $0x4] sm:$0xf] %vm3512_vm10, %v3907_v54  ;;  %vm3462_vm13 = vcmp.ge.f32.partialorder %v3450_v40, 0.0  ;;  %v3470_v63 = vmul.f32 0.01, %v3450_v40  ;;  %v3453_v24 = vadd.f32 %v4465_v61, %v3887_v34  ;;  %v3444_v0 = vpop.f32.mrb[103].mxu1 }
 0x2bc   : > { %vm3460_vm14 = vcmp.ge.f32.partialorder %v3442_v57, 0.0  ;;  %v3468_v46 = vmul.f32 0.01, %v3442_v57  ;;  %v3445_v1 = vadd.f32 %v3887_v34, %v3444_v0 }
 0x2bd   : > { %v3478_v2 = vsel %vm3462_vm13, %v3450_v40, %v3470_v63  ;;  %vm3463_vm15 = vcmp.ge.f32.partialorder %v3453_v24, 0.0  ;;  %v3471_v3 = vmul.f32 0.01, %v3453_v24 }
 0x2be   : > { %v3912_v58 = vpack.c.bf16 %v3478_v2, %v3478_v2  ;;  %v3476_v53 = vsel %vm3460_vm14, %v3442_v57, %v3468_v46  ;;  %vm3461_vm0 = vcmp.ge.f32.partialorder %v3445_v1, 0.0  ;;  %v3469_v56 = vmul.f32 0.01, %v3445_v1 }
 0x2bf   : > { %v3910_v4 = vpack.c.bf16 %v3476_v53, %v3476_v53  ;;  %v3479_v44 = vsel %vm3463_vm15, %v3453_v24, %v3471_v3 }
 0x2c0   : > { %3519 = vst.msk [vmem:[%s5672_s26 + $0x18] sm:$0xf] %vm3512_vm10, %v3912_v58  ;;  %v3913_v60 = vpack.c.bf16 %v3479_v44, %v3479_v44  ;;  %v3477_v39 = vsel %vm3461_vm0, %v3445_v1, %v3469_v56 }
 0x2c1   : > { %3517 = vst.msk [vmem:[%s5672_s26 + $0x10] sm:$0xf] %vm3512_vm10, %v3910_v4  ;;  %v3911_v8 = vpack.c.bf16 %v3477_v39, %v3477_v39 }
 0x2c2   : > { %3520 = vst.msk [vmem:[%s5672_s26 + $0x1c] sm:$0xf] %vm3512_vm10, %v3913_v60 }
 0x2c3   : > { %3518 = vst.msk [vmem:[%s5672_s26 + $0x14] sm:$0xf] %vm3512_vm10, %v3911_v8 }
 0x2c4 PF: > { %s15_s18 = sadd.s32 1, %s4837_s18  }
 0x2c5   : > { %p12_p4 = scmp.ge.s32.totalorder %s15_s18, 4  }
 0x2c7   :  { %14 = sbr.rel (!%p12_p4) target bundleno = 1 (0x1), region = 70 }

</bundles_post_ra>
